<compile_context>
chip_gen: v6e
topology: v6e:2x2x1
jax: 0.10.0
libtpu: 0.0.40
codegen_flags: <defaults>
</compile_context>

<pallas_src>
import functools

import jax
import jax.numpy as jnp
from jax import lax
from jax.experimental import pallas as pl
from jax.experimental.pallas import tpu as pltpu


# ----------------------------- kernel helpers ------------------------------

def _leaky(x, slope):
    return jnp.where(x > 0, x, slope * x)


def _im2col_3x3(xpad, H, W):
    """xpad: (H+2, W+2, C) value -> (H*W, 9*C) patch matrix (tap-major)."""
    C = xpad.shape[-1]
    cols = [xpad[dh:dh + H, dw:dw + W, :] for dh in range(3) for dw in range(3)]
    return jnp.concatenate(cols, axis=-1).reshape(H * W, 9 * C)


# --------------------------------- kernel -----------------------------------

def hi_conv_fused_kernel(*args, H, W, Hd, Wd, use_hin, half, slope, eps,
                         downsample):
    if downsample:
        (x_ref, w1_ref, b1_ref, g_ref, bt_ref, w2_ref, b2_ref, wi_ref, bi_ref,
         wd_ref, o_ref, od_ref, xpad_ref, ypad_ref) = args
    else:
        (x_ref, w1_ref, b1_ref, g_ref, bt_ref, w2_ref, b2_ref, wi_ref, bi_ref,
         o_ref, xpad_ref, ypad_ref) = args
        wd_ref = od_ref = None

    Cin = x_ref.shape[-1]
    Co = o_ref.shape[-1]

    # Build the zero halo in VMEM (the wrapper no longer pads in HBM).
    # Re-zeroed every grid step so batch-axis core sharding stays correct.
    xpad_ref[...] = jnp.zeros_like(xpad_ref)
    ypad_ref[...] = jnp.zeros_like(ypad_ref)
    xpad_ref[1:H + 1, 1:W + 1, :] = x_ref[0].astype(jnp.float32)

    # ---- conv_1 (3x3, bias): one im2col bf16 MXU matmul, f32 accumulation ----
    p1 = _im2col_3x3(xpad_ref[...], H, W).astype(jnp.bfloat16)       # (HW, 9*Cin)
    acc = jnp.dot(p1, w1_ref[...], preferred_element_type=jnp.float32)
    acc = acc + b1_ref[...]                                          # (HW, Co) f32

    # ---- HIN on the first half of the channels (single-pass statistics) ----
    if use_hin:
        npix = float(H * W)
        s1 = jnp.sum(acc, axis=0, keepdims=True)
        s2 = jnp.sum(acc * acc, axis=0, keepdims=True)
        mean = s1 / npix
        var = jnp.maximum(s2 / npix - mean * mean, 0.0)              # biased var
        normed = (acc - mean) * lax.rsqrt(var + eps) * g_ref[...] + bt_ref[...]
        ch = lax.broadcasted_iota(jnp.int32, acc.shape, 1)
        acc = jnp.where(ch < half, normed, acc)                      # cat([norm(o1), o2])

    acc = _leaky(acc, slope)

    # ---- conv_2 (3x3, bias) + LeakyReLU; conv_1 result stays in VMEM ----
    ypad_ref[1:H + 1, 1:W + 1, :] = acc.reshape(H, W, Co)
    p2 = _im2col_3x3(ypad_ref[...], H, W).astype(jnp.bfloat16)       # (HW, 9*Co)
    acc2 = jnp.dot(p2, w2_ref[...], preferred_element_type=jnp.float32)
    acc2 = _leaky(acc2 + b2_ref[...], slope)

    # ---- identity 1x1 conv on the block input, added to conv_2 output ----
    xv = xpad_ref[1:H + 1, 1:W + 1, :].reshape(H * W, Cin).astype(jnp.bfloat16)
    idt = jnp.dot(xv, wi_ref[...], preferred_element_type=jnp.float32) + bi_ref[...]
    out = acc2 + idt
    o_ref[...] = out.reshape(1, H, W, Co).astype(o_ref.dtype)

    # ---- downsample conv (3x3, stride 2, pad 1, no bias): only even taps ----
    if downsample:
        # Reuse ypad scratch: it now holds the padded block output.
        ypad_ref[1:H + 1, 1:W + 1, :] = out.reshape(H, W, Co)
        taps = [None] * 9
        for dw in range(3):
            # columns dw, dw+2, ... : one sublane-strided load per dw
            csub = ypad_ref[:, pl.ds(dw, Wd, stride=2), :]           # (H+2, Wd, Co)
            csub = csub.reshape(Hd + 1, 2, Wd, Co)                   # row-parity split
            for dh in range(3):
                a0, pa = dh // 2, dh % 2                             # rows dh, dh+2, ...
                taps[dh * 3 + dw] = csub[a0:a0 + Hd, pa, :, :]       # (Hd, Wd, Co)
        pd = jnp.concatenate(taps, axis=-1).reshape(Hd * Wd, 9 * Co)
        down = jnp.dot(pd.astype(jnp.bfloat16), wd_ref[...],
                       preferred_element_type=jnp.float32)
        od_ref[...] = down.reshape(1, Hd, Wd, Co).astype(od_ref.dtype)


# --------------------------------- wrapper -----------------------------------

def hi_conv_block(x_nchw, params, *, relu_slope, use_hin, downsample, eps=1e-5):
    N, Cin, H, W = x_nchw.shape
    ouc = params["w1"].shape[0]
    half = ouc // 2
    if downsample:
        assert H % 2 == 0 and W % 2 == 0, "downsample path assumes even H, W"
    Hd, Wd = (H + 1) // 2, (W + 1) // 2

    x = jnp.transpose(x_nchw, (0, 2, 3, 1)).astype(jnp.bfloat16)      # NHWC bf16

    def cvt3x3(w):   # torch (O, I, 3, 3) -> (9*I, O), tap-major, bf16
        O, I = w.shape[0], w.shape[1]
        return jnp.transpose(w, (2, 3, 1, 0)).reshape(9 * I, O).astype(jnp.bfloat16)

    w1 = cvt3x3(params["w1"])
    w2 = cvt3x3(params["w2"])
    wi = jnp.transpose(params["wi"][:, :, 0, 0], (1, 0)).astype(jnp.bfloat16)
    b1 = params["b1"].reshape(1, ouc).astype(jnp.float32)
    b2 = params["b2"].reshape(1, ouc).astype(jnp.float32)
    bi = params["bi"].reshape(1, ouc).astype(jnp.float32)
    gamma = jnp.concatenate([params["gamma"].astype(jnp.float32),
                             jnp.ones((ouc - half,), jnp.float32)]).reshape(1, ouc)
    beta = jnp.concatenate([params["beta"].astype(jnp.float32),
                            jnp.zeros((ouc - half,), jnp.float32)]).reshape(1, ouc)

    def full_spec(shape):
        nd = len(shape)
        return pl.BlockSpec(shape, lambda n, _nd=nd: (0,) * _nd)

    in_arrays = [x, w1, b1, gamma, beta, w2, b2, wi, bi]
    in_specs = [pl.BlockSpec((1, H, W, Cin), lambda n: (n, 0, 0, 0)),
                full_spec(w1.shape), full_spec(b1.shape),
                full_spec(gamma.shape), full_spec(beta.shape),
                full_spec(w2.shape), full_spec(b2.shape),
                full_spec(wi.shape), full_spec(bi.shape)]

    if downsample:
        wd = cvt3x3(params["wd"])
        in_arrays.append(wd)
        in_specs.append(full_spec(wd.shape))
        out_shape = (jax.ShapeDtypeStruct((N, H, W, ouc), jnp.float32),
                     jax.ShapeDtypeStruct((N, Hd, Wd, ouc), jnp.float32))
        out_specs = (pl.BlockSpec((1, H, W, ouc), lambda n: (n, 0, 0, 0)),
                     pl.BlockSpec((1, Hd, Wd, ouc), lambda n: (n, 0, 0, 0)))
    else:
        out_shape = jax.ShapeDtypeStruct((N, H, W, ouc), jnp.float32)
        out_specs = pl.BlockSpec((1, H, W, ouc), lambda n: (n, 0, 0, 0))

    kernel = functools.partial(
        hi_conv_fused_kernel, H=H, W=W, Hd=Hd, Wd=Wd, use_hin=use_hin,
        half=half, slope=relu_slope, eps=eps, downsample=downsample)

    res = pl.pallas_call(
        kernel,
        out_shape=out_shape,
        grid=(N,),
        in_specs=in_specs,
        out_specs=out_specs,
        scratch_shapes=[pltpu.VMEM((H + 2, W + 2, Cin), jnp.float32),
                        pltpu.VMEM((H + 2, W + 2, ouc), jnp.float32)],
        compiler_params=pltpu.CompilerParams(
            dimension_semantics=("parallel",),
            vmem_limit_bytes=32 * 1024 * 1024),
    )(*in_arrays)

    if downsample:
        out, out_down = res
        return (jnp.transpose(out_down, (0, 3, 1, 2)),
                jnp.transpose(out, (0, 3, 1, 2)))
    return jnp.transpose(res, (0, 3, 1, 2))


# ---------------------------- pure-JAX reference ----------------------------

def reference(x_nchw, p, *, relu_slope, use_hin, downsample, eps=1e-5):
    dn = ("NCHW", "OIHW", "NCHW")
    conv = lambda x, w, s, pad: lax.conv_general_dilated(
        x, w, (s, s), ((pad, pad), (pad, pad)), dimension_numbers=dn,
        precision=lax.Precision.HIGHEST)
    ouc = p["w1"].shape[0]
    out = conv(x_nchw, p["w1"], 1, 1) + p["b1"][None, :, None, None]
    if use_hin:
        half = ouc // 2
        o1, o2 = out[:, :half], out[:, half:]
        m = o1.mean(axis=(2, 3), keepdims=True)
        v = ((o1 - m) ** 2).mean(axis=(2, 3), keepdims=True)
        o1 = (o1 - m) / jnp.sqrt(v + eps) * p["gamma"][None, :, None, None] \
             + p["beta"][None, :, None, None]
        out = jnp.concatenate([o1, o2], axis=1)
    out = jnp.where(out > 0, out, relu_slope * out)
    out = conv(out, p["w2"], 1, 1) + p["b2"][None, :, None, None]
    out = jnp.where(out > 0, out, relu_slope * out)
    out = out + conv(x_nchw, p["wi"], 1, 0) + p["bi"][None, :, None, None]
    if downsample:
        return conv(out, p["wd"], 2, 1), out
    return out


# ----------------------------------- main -----------------------------------

if __name__ == "__main__":
    inc, ouc = 4, 8
    N, H, W = 2, 16, 16
    relu_slope = 0.2

    key = jax.random.PRNGKey(0)
    ks = jax.random.split(key, 10)
    params = {
        "w1": 0.2 * jax.random.normal(ks[0], (ouc, inc, 3, 3), jnp.float32),
        "b1": 0.1 * jax.random.normal(ks[1], (ouc,), jnp.float32),
        "w2": 0.2 * jax.random.normal(ks[2], (ouc, ouc, 3, 3), jnp.float32),
        "b2": 0.1 * jax.random.normal(ks[3], (ouc,), jnp.float32),
        "wi": 0.2 * jax.random.normal(ks[4], (ouc, inc, 1, 1), jnp.float32),
        "bi": 0.1 * jax.random.normal(ks[5], (ouc,), jnp.float32),
        "gamma": 1.0 + 0.1 * jax.random.normal(ks[6], (ouc // 2,), jnp.float32),
        "beta": 0.1 * jax.random.normal(ks[7], (ouc // 2,), jnp.float32),
        "wd": 0.2 * jax.random.normal(ks[8], (ouc, ouc, 3, 3), jnp.float32),
    }
    x = jax.random.normal(ks[9], (N, inc, H, W), jnp.float32)

    # Path 1: use_HIN=True, downsample=True -> (out_down, out)
    out_down, out = hi_conv_block(x, params, relu_slope=relu_slope,
                                  use_hin=True, downsample=True)
    jax.block_until_ready((out_down, out))
    ref_down, ref_out = reference(x, params, relu_slope=relu_slope,
                                  use_hin=True, downsample=True)
    assert out.shape == (N, ouc, H, W)
    assert out_down.shape == (N, ouc, H // 2, W // 2)
    # bf16 MXU inputs (f32 accumulation) -> slightly looser tolerance than pure f32
    assert jnp.allclose(out, ref_out, rtol=5e-2, atol=5e-2)
    assert jnp.allclose(out_down, ref_down, rtol=5e-2, atol=5e-2)

    # Path 2: use_HIN=False, downsample=False -> out only
    out2 = hi_conv_block(x, params, relu_slope=relu_slope,
                         use_hin=False, downsample=False)
    jax.block_until_ready(out2)
    ref2 = reference(x, params, relu_slope=relu_slope,
                     use_hin=False, downsample=False)
    assert out2.shape == (N, ouc, H, W)
    assert jnp.allclose(out2, ref2, rtol=5e-2, atol=5e-2)

    print("KERNEL_OK")
</pallas_src>

<mosaic_0001>
module attributes {stable_mosaic.version = 11 : i64} {
  func.func @hi_conv_fused_kernel(%arg0: i32, %arg1: memref<1x16x16x4xbf16, #tpu.memory_space<vmem>>, %arg2: memref<36x8xbf16, #tpu.memory_space<vmem>>, %arg3: memref<1x8xf32, #tpu.memory_space<vmem>>, %arg4: memref<1x8xf32, #tpu.memory_space<vmem>>, %arg5: memref<1x8xf32, #tpu.memory_space<vmem>>, %arg6: memref<72x8xbf16, #tpu.memory_space<vmem>>, %arg7: memref<1x8xf32, #tpu.memory_space<vmem>>, %arg8: memref<4x8xbf16, #tpu.memory_space<vmem>>, %arg9: memref<1x8xf32, #tpu.memory_space<vmem>>, %arg10: memref<72x8xbf16, #tpu.memory_space<vmem>>, %arg11: memref<1x16x16x8xf32, #tpu.memory_space<vmem>>, %arg12: memref<1x8x8x8xf32, #tpu.memory_space<vmem>>, %arg13: memref<18x18x4xf32, #tpu.memory_space<vmem>>, %arg14: memref<18x18x8xf32, #tpu.memory_space<vmem>>) attributes {dimension_semantics = [#tpu.dimension_semantics<parallel>], iteration_bounds = array<i64: 2>, scalar_prefetch = 0 : i64, scratch_operands = 2 : i64, tpu.core_type = #tpu.core_type<tc>, window_params = [{transform_indices = @transform_0, window_bounds = array<i64: 1, 16, 16, 4>}, {pipeline_mode = #tpu.pipeline_mode<synchronous>, transform_indices = @transform_1, window_bounds = array<i64: 36, 8>}, {pipeline_mode = #tpu.pipeline_mode<synchronous>, transform_indices = @transform_2, window_bounds = array<i64: 1, 8>}, {pipeline_mode = #tpu.pipeline_mode<synchronous>, transform_indices = @transform_3, window_bounds = array<i64: 1, 8>}, {pipeline_mode = #tpu.pipeline_mode<synchronous>, transform_indices = @transform_4, window_bounds = array<i64: 1, 8>}, {pipeline_mode = #tpu.pipeline_mode<synchronous>, transform_indices = @transform_5, window_bounds = array<i64: 72, 8>}, {pipeline_mode = #tpu.pipeline_mode<synchronous>, transform_indices = @transform_6, window_bounds = array<i64: 1, 8>}, {pipeline_mode = #tpu.pipeline_mode<synchronous>, transform_indices = @transform_7, window_bounds = array<i64: 4, 8>}, {pipeline_mode = #tpu.pipeline_mode<synchronous>, transform_indices = @transform_8, window_bounds = array<i64: 1, 8>}, {pipeline_mode = #tpu.pipeline_mode<synchronous>, transform_indices = @transform_9, window_bounds = array<i64: 72, 8>}, {transform_indices = @transform_10, window_bounds = array<i64: 1, 16, 16, 8>}, {transform_indices = @transform_11, window_bounds = array<i64: 1, 8, 8, 8>}]} {
    %cst = arith.constant 0.000000e+00 : f32
    %0 = vector.broadcast %cst : f32 to vector<18x18x4xf32>
    %c0 = arith.constant 0 : index
    %c0_0 = arith.constant 0 : index
    %c0_1 = arith.constant 0 : index
    %1 = vector.load %arg13[%c0, %c0_0, %c0_1] : memref<18x18x4xf32, #tpu.memory_space<vmem>>, vector<18x18x4xf32>
    tpu.vector_store %arg13[%c0, %c0_0, %c0_1], %0 {strides = array<i32>} : memref<18x18x4xf32, #tpu.memory_space<vmem>>, vector<18x18x4xf32>,
    %cst_2 = arith.constant 0.000000e+00 : f32
    %2 = vector.broadcast %cst_2 : f32 to vector<18x18x8xf32>
    %c0_3 = arith.constant 0 : index
    %c0_4 = arith.constant 0 : index
    %c0_5 = arith.constant 0 : index
    %3 = vector.load %arg14[%c0_3, %c0_4, %c0_5] : memref<18x18x8xf32, #tpu.memory_space<vmem>>, vector<18x18x8xf32>
    tpu.vector_store %arg14[%c0_3, %c0_4, %c0_5], %2 {strides = array<i32>} : memref<18x18x8xf32, #tpu.memory_space<vmem>>, vector<18x18x8xf32>,
    %c0_6 = arith.constant 0 : index
    %c0_7 = arith.constant 0 : index
    %c0_8 = arith.constant 0 : index
    %c0_9 = arith.constant 0 : index
    %4 = vector.load %arg1[%c0_6, %c0_7, %c0_8, %c0_9] : memref<1x16x16x4xbf16, #tpu.memory_space<vmem>>, vector<1x16x16x4xbf16>
    %5 = vector.shape_cast %4 : vector<1x16x16x4xbf16> to vector<16x16x4xbf16>
    %6 = arith.extf %5 : vector<16x16x4xbf16> to vector<16x16x4xf32>
    %c1 = arith.constant 1 : index
    %c1_10 = arith.constant 1 : index
    %c0_11 = arith.constant 0 : index
    %7 = vector.load %arg13[%c1, %c1_10, %c0_11] : memref<18x18x4xf32, #tpu.memory_space<vmem>>, vector<16x16x4xf32>
    tpu.vector_store %arg13[%c1, %c1_10, %c0_11], %6 {strides = array<i32>} : memref<18x18x4xf32, #tpu.memory_space<vmem>>, vector<16x16x4xf32>,
    %c0_12 = arith.constant 0 : index
    %c0_13 = arith.constant 0 : index
    %c0_14 = arith.constant 0 : index
    %8 = vector.load %arg13[%c0_12, %c0_13, %c0_14] : memref<18x18x4xf32, #tpu.memory_space<vmem>>, vector<18x18x4xf32>
    %9 = vector.extract_strided_slice %8 {offsets = [0, 0, 0], sizes = [16, 16, 4], strides = [1, 1, 1]} : vector<18x18x4xf32> to vector<16x16x4xf32>
    %10 = vector.extract_strided_slice %8 {offsets = [0, 1, 0], sizes = [16, 16, 4], strides = [1, 1, 1]} : vector<18x18x4xf32> to vector<16x16x4xf32>
    %11 = vector.extract_strided_slice %8 {offsets = [0, 2, 0], sizes = [16, 16, 4], strides = [1, 1, 1]} : vector<18x18x4xf32> to vector<16x16x4xf32>
    %12 = vector.extract_strided_slice %8 {offsets = [1, 0, 0], sizes = [16, 16, 4], strides = [1, 1, 1]} : vector<18x18x4xf32> to vector<16x16x4xf32>
    %13 = vector.extract_strided_slice %8 {offsets = [1, 1, 0], sizes = [16, 16, 4], strides = [1, 1, 1]} : vector<18x18x4xf32> to vector<16x16x4xf32>
    %14 = vector.extract_strided_slice %8 {offsets = [1, 2, 0], sizes = [16, 16, 4], strides = [1, 1, 1]} : vector<18x18x4xf32> to vector<16x16x4xf32>
    %15 = vector.extract_strided_slice %8 {offsets = [2, 0, 0], sizes = [16, 16, 4], strides = [1, 1, 1]} : vector<18x18x4xf32> to vector<16x16x4xf32>
    %16 = vector.extract_strided_slice %8 {offsets = [2, 1, 0], sizes = [16, 16, 4], strides = [1, 1, 1]} : vector<18x18x4xf32> to vector<16x16x4xf32>
    %17 = vector.extract_strided_slice %8 {offsets = [2, 2, 0], sizes = [16, 16, 4], strides = [1, 1, 1]} : vector<18x18x4xf32> to vector<16x16x4xf32>
    %18 = tpu.concatenate %9, %10, %11, %12, %13, %14, %15, %16, %17 in 2 : vector<16x16x4xf32>, vector<16x16x4xf32>, vector<16x16x4xf32>, vector<16x16x4xf32>, vector<16x16x4xf32>, vector<16x16x4xf32>, vector<16x16x4xf32>, vector<16x16x4xf32>, vector<16x16x4xf32> -> vector<16x16x36xf32>
    %19 = vector.shape_cast %18 : vector<16x16x36xf32> to vector<256x36xf32>
    %20 = arith.truncf %19 : vector<256x36xf32> to vector<256x36xbf16>
    %c0_15 = arith.constant 0 : index
    %c0_16 = arith.constant 0 : index
    %21 = vector.load %arg2[%c0_15, %c0_16] : memref<36x8xbf16, #tpu.memory_space<vmem>>, vector<36x8xbf16>
    %cst_17 = arith.constant dense<0.000000e+00> : vector<256x8xf32>
    %22 = tpu.matmul %20, %21, %cst_17 {dimension_numbers = #tpu.dot_dimension_numbers<[1], [0], [0], [1], [0, 0, 1, 1], [], []>} : vector<256x36xbf16>, vector<36x8xbf16>, vector<256x8xf32> -> vector<256x8xf32>
    %c0_18 = arith.constant 0 : index
    %c0_19 = arith.constant 0 : index
    %23 = vector.load %arg3[%c0_18, %c0_19] : memref<1x8xf32, #tpu.memory_space<vmem>>, vector<1x8xf32>
    %24 = vector.broadcast %23 : vector<1x8xf32> to vector<256x8xf32>
    %25 = arith.addf %22, %24 : vector<256x8xf32>
    %cst_20 = arith.constant dense<0.000000e+00> : vector<8xf32>
    %26 = vector.multi_reduction <add>, %25, %cst_20 [0] : vector<256x8xf32> to vector<8xf32>
    %27 = vector.shape_cast %26 : vector<8xf32> to vector<1x8xf32>
    %28 = arith.mulf %25, %25 : vector<256x8xf32>
    %cst_21 = arith.constant dense<0.000000e+00> : vector<8xf32>
    %29 = vector.multi_reduction <add>, %28, %cst_21 [0] : vector<256x8xf32> to vector<8xf32>
    %30 = vector.shape_cast %29 : vector<8xf32> to vector<1x8xf32>
    %cst_22 = arith.constant 2.560000e+02 : f32
    %31 = vector.broadcast %cst_22 : f32 to vector<1x8xf32>
    %32 = arith.divf %27, %31 : vector<1x8xf32>
    %cst_23 = arith.constant 2.560000e+02 : f32
    %33 = vector.broadcast %cst_23 : f32 to vector<1x8xf32>
    %34 = arith.divf %30, %33 : vector<1x8xf32>
    %35 = arith.mulf %32, %32 : vector<1x8xf32>
    %36 = arith.subf %34, %35 : vector<1x8xf32>
    %cst_24 = arith.constant 0.000000e+00 : f32
    %37 = vector.broadcast %cst_24 : f32 to vector<1x8xf32>
    %38 = arith.maximumf %36, %37 : vector<1x8xf32>
    %39 = vector.broadcast %32 : vector<1x8xf32> to vector<256x8xf32>
    %40 = arith.subf %25, %39 : vector<256x8xf32>
    %cst_25 = arith.constant 9.99999974E-6 : f32
    %41 = vector.broadcast %cst_25 : f32 to vector<1x8xf32>
    %42 = arith.addf %38, %41 : vector<1x8xf32>
    %43 = math.rsqrt %42 : vector<1x8xf32>
    %44 = vector.broadcast %43 : vector<1x8xf32> to vector<256x8xf32>
    %45 = arith.mulf %40, %44 : vector<256x8xf32>
    %c0_26 = arith.constant 0 : index
    %c0_27 = arith.constant 0 : index
    %46 = vector.load %arg4[%c0_26, %c0_27] : memref<1x8xf32, #tpu.memory_space<vmem>>, vector<1x8xf32>
    %47 = vector.broadcast %46 : vector<1x8xf32> to vector<256x8xf32>
    %48 = arith.mulf %45, %47 : vector<256x8xf32>
    %c0_28 = arith.constant 0 : index
    %c0_29 = arith.constant 0 : index
    %49 = vector.load %arg5[%c0_28, %c0_29] : memref<1x8xf32, #tpu.memory_space<vmem>>, vector<1x8xf32>
    %50 = vector.broadcast %49 : vector<1x8xf32> to vector<256x8xf32>
    %51 = arith.addf %48, %50 : vector<256x8xf32>
    %52 = tpu.iota {dimensions = array<i32: 1>} : vector<256x8xi32>
    %c4_i32 = arith.constant 4 : i32
    %53 = vector.broadcast %c4_i32 : i32 to vector<256x8xi32>
    %54 = arith.cmpi slt, %52, %53 : vector<256x8xi32>
    %55 = arith.select %54, %51, %25 : vector<256x8xi1>, vector<256x8xf32>
    %cst_30 = arith.constant 0.000000e+00 : f32
    %56 = vector.broadcast %cst_30 : f32 to vector<256x8xf32>
    %57 = arith.cmpf ogt, %55, %56 : vector<256x8xf32>
    %cst_31 = arith.constant 2.000000e-01 : f32
    %58 = vector.broadcast %cst_31 : f32 to vector<256x8xf32>
    %59 = arith.mulf %58, %55 : vector<256x8xf32>
    %60 = arith.select %57, %55, %59 : vector<256x8xi1>, vector<256x8xf32>
    %61 = vector.shape_cast %60 : vector<256x8xf32> to vector<16x16x8xf32>
    %c1_32 = arith.constant 1 : index
    %c1_33 = arith.constant 1 : index
    %c0_34 = arith.constant 0 : index
    %62 = vector.load %arg14[%c1_32, %c1_33, %c0_34] : memref<18x18x8xf32, #tpu.memory_space<vmem>>, vector<16x16x8xf32>
    tpu.vector_store %arg14[%c1_32, %c1_33, %c0_34], %61 {strides = array<i32>} : memref<18x18x8xf32, #tpu.memory_space<vmem>>, vector<16x16x8xf32>,
    %c0_35 = arith.constant 0 : index
    %c0_36 = arith.constant 0 : index
    %c0_37 = arith.constant 0 : index
    %63 = vector.load %arg14[%c0_35, %c0_36, %c0_37] : memref<18x18x8xf32, #tpu.memory_space<vmem>>, vector<18x18x8xf32>
    %64 = vector.extract_strided_slice %63 {offsets = [0, 0, 0], sizes = [16, 16, 8], strides = [1, 1, 1]} : vector<18x18x8xf32> to vector<16x16x8xf32>
    %65 = vector.extract_strided_slice %63 {offsets = [0, 1, 0], sizes = [16, 16, 8], strides = [1, 1, 1]} : vector<18x18x8xf32> to vector<16x16x8xf32>
    %66 = vector.extract_strided_slice %63 {offsets = [0, 2, 0], sizes = [16, 16, 8], strides = [1, 1, 1]} : vector<18x18x8xf32> to vector<16x16x8xf32>
    %67 = vector.extract_strided_slice %63 {offsets = [1, 0, 0], sizes = [16, 16, 8], strides = [1, 1, 1]} : vector<18x18x8xf32> to vector<16x16x8xf32>
    %68 = vector.extract_strided_slice %63 {offsets = [1, 1, 0], sizes = [16, 16, 8], strides = [1, 1, 1]} : vector<18x18x8xf32> to vector<16x16x8xf32>
    %69 = vector.extract_strided_slice %63 {offsets = [1, 2, 0], sizes = [16, 16, 8], strides = [1, 1, 1]} : vector<18x18x8xf32> to vector<16x16x8xf32>
    %70 = vector.extract_strided_slice %63 {offsets = [2, 0, 0], sizes = [16, 16, 8], strides = [1, 1, 1]} : vector<18x18x8xf32> to vector<16x16x8xf32>
    %71 = vector.extract_strided_slice %63 {offsets = [2, 1, 0], sizes = [16, 16, 8], strides = [1, 1, 1]} : vector<18x18x8xf32> to vector<16x16x8xf32>
    %72 = vector.extract_strided_slice %63 {offsets = [2, 2, 0], sizes = [16, 16, 8], strides = [1, 1, 1]} : vector<18x18x8xf32> to vector<16x16x8xf32>
    %73 = tpu.concatenate %64, %65, %66, %67, %68, %69, %70, %71, %72 in 2 : vector<16x16x8xf32>, vector<16x16x8xf32>, vector<16x16x8xf32>, vector<16x16x8xf32>, vector<16x16x8xf32>, vector<16x16x8xf32>, vector<16x16x8xf32>, vector<16x16x8xf32>, vector<16x16x8xf32> -> vector<16x16x72xf32>
    %74 = vector.shape_cast %73 : vector<16x16x72xf32> to vector<256x72xf32>
    %75 = arith.truncf %74 : vector<256x72xf32> to vector<256x72xbf16>
    %c0_38 = arith.constant 0 : index
    %c0_39 = arith.constant 0 : index
    %76 = vector.load %arg6[%c0_38, %c0_39] : memref<72x8xbf16, #tpu.memory_space<vmem>>, vector<72x8xbf16>
    %cst_40 = arith.constant dense<0.000000e+00> : vector<256x8xf32>
    %77 = tpu.matmul %75, %76, %cst_40 {dimension_numbers = #tpu.dot_dimension_numbers<[1], [0], [0], [1], [0, 0, 1, 1], [], []>} : vector<256x72xbf16>, vector<72x8xbf16>, vector<256x8xf32> -> vector<256x8xf32>
    %c0_41 = arith.constant 0 : index
    %c0_42 = arith.constant 0 : index
    %78 = vector.load %arg7[%c0_41, %c0_42] : memref<1x8xf32, #tpu.memory_space<vmem>>, vector<1x8xf32>
    %79 = vector.broadcast %78 : vector<1x8xf32> to vector<256x8xf32>
    %80 = arith.addf %77, %79 : vector<256x8xf32>
    %cst_43 = arith.constant 0.000000e+00 : f32
    %81 = vector.broadcast %cst_43 : f32 to vector<256x8xf32>
    %82 = arith.cmpf ogt, %80, %81 : vector<256x8xf32>
    %cst_44 = arith.constant 2.000000e-01 : f32
    %83 = vector.broadcast %cst_44 : f32 to vector<256x8xf32>
    %84 = arith.mulf %83, %80 : vector<256x8xf32>
    %85 = arith.select %82, %80, %84 : vector<256x8xi1>, vector<256x8xf32>
    %c1_45 = arith.constant 1 : index
    %c1_46 = arith.constant 1 : index
    %c0_47 = arith.constant 0 : index
    %86 = vector.load %arg13[%c1_45, %c1_46, %c0_47] : memref<18x18x4xf32, #tpu.memory_space<vmem>>, vector<16x16x4xf32>
    %87 = vector.shape_cast %86 : vector<16x16x4xf32> to vector<256x4xf32>
    %88 = arith.truncf %87 : vector<256x4xf32> to vector<256x4xbf16>
    %c0_48 = arith.constant 0 : index
    %c0_49 = arith.constant 0 : index
    %89 = vector.load %arg8[%c0_48, %c0_49] : memref<4x8xbf16, #tpu.memory_space<vmem>>, vector<4x8xbf16>
    %cst_50 = arith.constant dense<0.000000e+00> : vector<256x8xf32>
    %90 = tpu.matmul %88, %89, %cst_50 {dimension_numbers = #tpu.dot_dimension_numbers<[1], [0], [0], [1], [0, 0, 1, 1], [], []>} : vector<256x4xbf16>, vector<4x8xbf16>, vector<256x8xf32> -> vector<256x8xf32>
    %c0_51 = arith.constant 0 : index
    %c0_52 = arith.constant 0 : index
    %91 = vector.load %arg9[%c0_51, %c0_52] : memref<1x8xf32, #tpu.memory_space<vmem>>, vector<1x8xf32>
    %92 = vector.broadcast %91 : vector<1x8xf32> to vector<256x8xf32>
    %93 = arith.addf %90, %92 : vector<256x8xf32>
    %94 = arith.addf %85, %93 : vector<256x8xf32>
    %95 = vector.shape_cast %94 : vector<256x8xf32> to vector<1x16x16x8xf32>
    %c0_53 = arith.constant 0 : index
    %c0_54 = arith.constant 0 : index
    %c0_55 = arith.constant 0 : index
    %c0_56 = arith.constant 0 : index
    %96 = vector.load %arg11[%c0_53, %c0_54, %c0_55, %c0_56] : memref<1x16x16x8xf32, #tpu.memory_space<vmem>>, vector<1x16x16x8xf32>
    tpu.vector_store %arg11[%c0_53, %c0_54, %c0_55, %c0_56], %95 {strides = array<i32>} : memref<1x16x16x8xf32, #tpu.memory_space<vmem>>, vector<1x16x16x8xf32>,
    %97 = vector.shape_cast %94 : vector<256x8xf32> to vector<16x16x8xf32>
    %c1_57 = arith.constant 1 : index
    %c1_58 = arith.constant 1 : index
    %c0_59 = arith.constant 0 : index
    %98 = vector.load %arg14[%c1_57, %c1_58, %c0_59] : memref<18x18x8xf32, #tpu.memory_space<vmem>>, vector<16x16x8xf32>
    tpu.vector_store %arg14[%c1_57, %c1_58, %c0_59], %97 {strides = array<i32>} : memref<18x18x8xf32, #tpu.memory_space<vmem>>, vector<16x16x8xf32>,
    %c0_60 = arith.constant 0 : index
    %c0_61 = arith.constant 0 : index
    %c0_62 = arith.constant 0 : index
    %99 = tpu.strided_load %arg14[%c0_60, %c0_61, %c0_62] {strides = array<i32: 1, 2, 1>} : memref<18x18x8xf32, #tpu.memory_space<vmem>>, vector<18x8x8xf32>
    %100 = vector.shape_cast %99 : vector<18x8x8xf32> to vector<9x2x8x8xf32>
    %101 = vector.extract_strided_slice %100 {offsets = [0, 0, 0, 0], sizes = [8, 1, 8, 8], strides = [1, 1, 1, 1]} : vector<9x2x8x8xf32> to vector<8x1x8x8xf32>
    %102 = vector.shape_cast %101 : vector<8x1x8x8xf32> to vector<8x8x8xf32>
    %103 = vector.extract_strided_slice %100 {offsets = [0, 1, 0, 0], sizes = [8, 1, 8, 8], strides = [1, 1, 1, 1]} : vector<9x2x8x8xf32> to vector<8x1x8x8xf32>
    %104 = vector.shape_cast %103 : vector<8x1x8x8xf32> to vector<8x8x8xf32>
    %105 = vector.extract_strided_slice %100 {offsets = [1, 0, 0, 0], sizes = [8, 1, 8, 8], strides = [1, 1, 1, 1]} : vector<9x2x8x8xf32> to vector<8x1x8x8xf32>
    %106 = vector.shape_cast %105 : vector<8x1x8x8xf32> to vector<8x8x8xf32>
    %c0_63 = arith.constant 0 : index
    %c1_64 = arith.constant 1 : index
    %c0_65 = arith.constant 0 : index
    %107 = tpu.strided_load %arg14[%c0_63, %c1_64, %c0_65] {strides = array<i32: 1, 2, 1>} : memref<18x18x8xf32, #tpu.memory_space<vmem>>, vector<18x8x8xf32>
    %108 = vector.shape_cast %107 : vector<18x8x8xf32> to vector<9x2x8x8xf32>
    %109 = vector.extract_strided_slice %108 {offsets = [0, 0, 0, 0], sizes = [8, 1, 8, 8], strides = [1, 1, 1, 1]} : vector<9x2x8x8xf32> to vector<8x1x8x8xf32>
    %110 = vector.shape_cast %109 : vector<8x1x8x8xf32> to vector<8x8x8xf32>
    %111 = vector.extract_strided_slice %108 {offsets = [0, 1, 0, 0], sizes = [8, 1, 8, 8], strides = [1, 1, 1, 1]} : vector<9x2x8x8xf32> to vector<8x1x8x8xf32>
    %112 = vector.shape_cast %111 : vector<8x1x8x8xf32> to vector<8x8x8xf32>
    %113 = vector.extract_strided_slice %108 {offsets = [1, 0, 0, 0], sizes = [8, 1, 8, 8], strides = [1, 1, 1, 1]} : vector<9x2x8x8xf32> to vector<8x1x8x8xf32>
    %114 = vector.shape_cast %113 : vector<8x1x8x8xf32> to vector<8x8x8xf32>
    %c0_66 = arith.constant 0 : index
    %c2 = arith.constant 2 : index
    %c0_67 = arith.constant 0 : index
    %115 = tpu.strided_load %arg14[%c0_66, %c2, %c0_67] {strides = array<i32: 1, 2, 1>} : memref<18x18x8xf32, #tpu.memory_space<vmem>>, vector<18x8x8xf32>
    %116 = vector.shape_cast %115 : vector<18x8x8xf32> to vector<9x2x8x8xf32>
    %117 = vector.extract_strided_slice %116 {offsets = [0, 0, 0, 0], sizes = [8, 1, 8, 8], strides = [1, 1, 1, 1]} : vector<9x2x8x8xf32> to vector<8x1x8x8xf32>
    %118 = vector.shape_cast %117 : vector<8x1x8x8xf32> to vector<8x8x8xf32>
    %119 = vector.extract_strided_slice %116 {offsets = [0, 1, 0, 0], sizes = [8, 1, 8, 8], strides = [1, 1, 1, 1]} : vector<9x2x8x8xf32> to vector<8x1x8x8xf32>
    %120 = vector.shape_cast %119 : vector<8x1x8x8xf32> to vector<8x8x8xf32>
    %121 = vector.extract_strided_slice %116 {offsets = [1, 0, 0, 0], sizes = [8, 1, 8, 8], strides = [1, 1, 1, 1]} : vector<9x2x8x8xf32> to vector<8x1x8x8xf32>
    %122 = vector.shape_cast %121 : vector<8x1x8x8xf32> to vector<8x8x8xf32>
    %123 = tpu.concatenate %102, %110, %118, %104, %112, %120, %106, %114, %122 in 2 : vector<8x8x8xf32>, vector<8x8x8xf32>, vector<8x8x8xf32>, vector<8x8x8xf32>, vector<8x8x8xf32>, vector<8x8x8xf32>, vector<8x8x8xf32>, vector<8x8x8xf32>, vector<8x8x8xf32> -> vector<8x8x72xf32>
    %124 = vector.shape_cast %123 : vector<8x8x72xf32> to vector<64x72xf32>
    %125 = arith.truncf %124 : vector<64x72xf32> to vector<64x72xbf16>
    %c0_68 = arith.constant 0 : index
    %c0_69 = arith.constant 0 : index
    %126 = vector.load %arg10[%c0_68, %c0_69] : memref<72x8xbf16, #tpu.memory_space<vmem>>, vector<72x8xbf16>
    %cst_70 = arith.constant dense<0.000000e+00> : vector<64x8xf32>
    %127 = tpu.matmul %125, %126, %cst_70 {dimension_numbers = #tpu.dot_dimension_numbers<[1], [0], [0], [1], [0, 0, 1, 1], [], []>} : vector<64x72xbf16>, vector<72x8xbf16>, vector<64x8xf32> -> vector<64x8xf32>
    %128 = vector.shape_cast %127 : vector<64x8xf32> to vector<1x8x8x8xf32>
    %c0_71 = arith.constant 0 : index
    %c0_72 = arith.constant 0 : index
    %c0_73 = arith.constant 0 : index
    %c0_74 = arith.constant 0 : index
    %129 = vector.load %arg12[%c0_71, %c0_72, %c0_73, %c0_74] : memref<1x8x8x8xf32, #tpu.memory_space<vmem>>, vector<1x8x8x8xf32>
    tpu.vector_store %arg12[%c0_71, %c0_72, %c0_73, %c0_74], %128 {strides = array<i32>} : memref<1x8x8x8xf32, #tpu.memory_space<vmem>>, vector<1x8x8x8xf32>,
    return
  }
  func.func @transform_0(%arg0: i32) -> (i32, i32, i32, i32) {
    %c0_i32 = arith.constant 0 : i32
    %c0_i32_0 = arith.constant 0 : i32
    %c0_i32_1 = arith.constant 0 : i32
    %c0_i32_2 = arith.constant 0 : i32
    return %arg0, %c0_i32, %c0_i32_0, %c0_i32_1 : i32, i32, i32, i32
  }
  func.func @transform_1(%arg0: i32) -> (i32, i32) {
    %c0_i32 = arith.constant 0 : i32
    %c0_i32_0 = arith.constant 0 : i32
    %c0_i32_1 = arith.constant 0 : i32
    return %c0_i32, %c0_i32_0 : i32, i32
  }
  func.func @transform_2(%arg0: i32) -> (i32, i32) {
    %c0_i32 = arith.constant 0 : i32
    %c0_i32_0 = arith.constant 0 : i32
    %c0_i32_1 = arith.constant 0 : i32
    return %c0_i32, %c0_i32_0 : i32, i32
  }
  func.func @transform_3(%arg0: i32) -> (i32, i32) {
    %c0_i32 = arith.constant 0 : i32
    %c0_i32_0 = arith.constant 0 : i32
    %c0_i32_1 = arith.constant 0 : i32
    return %c0_i32, %c0_i32_0 : i32, i32
  }
  func.func @transform_4(%arg0: i32) -> (i32, i32) {
    %c0_i32 = arith.constant 0 : i32
    %c0_i32_0 = arith.constant 0 : i32
    %c0_i32_1 = arith.constant 0 : i32
    return %c0_i32, %c0_i32_0 : i32, i32
  }
  func.func @transform_5(%arg0: i32) -> (i32, i32) {
    %c0_i32 = arith.constant 0 : i32
    %c0_i32_0 = arith.constant 0 : i32
    %c0_i32_1 = arith.constant 0 : i32
    return %c0_i32, %c0_i32_0 : i32, i32
  }
  func.func @transform_6(%arg0: i32) -> (i32, i32) {
    %c0_i32 = arith.constant 0 : i32
    %c0_i32_0 = arith.constant 0 : i32
    %c0_i32_1 = arith.constant 0 : i32
    return %c0_i32, %c0_i32_0 : i32, i32
  }
  func.func @transform_7(%arg0: i32) -> (i32, i32) {
    %c0_i32 = arith.constant 0 : i32
    %c0_i32_0 = arith.constant 0 : i32
    %c0_i32_1 = arith.constant 0 : i32
    return %c0_i32, %c0_i32_0 : i32, i32
  }
  func.func @transform_8(%arg0: i32) -> (i32, i32) {
    %c0_i32 = arith.constant 0 : i32
    %c0_i32_0 = arith.constant 0 : i32
    %c0_i32_1 = arith.constant 0 : i32
    return %c0_i32, %c0_i32_0 : i32, i32
  }
  func.func @transform_9(%arg0: i32) -> (i32, i32) {
    %c0_i32 = arith.constant 0 : i32
    %c0_i32_0 = arith.constant 0 : i32
    %c0_i32_1 = arith.constant 0 : i32
    return %c0_i32, %c0_i32_0 : i32, i32
  }
  func.func @transform_10(%arg0: i32) -> (i32, i32, i32, i32) {
    %c0_i32 = arith.constant 0 : i32
    %c0_i32_0 = arith.constant 0 : i32
    %c0_i32_1 = arith.constant 0 : i32
    %c0_i32_2 = arith.constant 0 : i32
    return %arg0, %c0_i32, %c0_i32_0, %c0_i32_1 : i32, i32, i32, i32
  }
  func.func @transform_11(%arg0: i32) -> (i32, i32, i32, i32) {
    %c0_i32 = arith.constant 0 : i32
    %c0_i32_0 = arith.constant 0 : i32
    %c0_i32_1 = arith.constant 0 : i32
    %c0_i32_2 = arith.constant 0 : i32
    return %arg0, %c0_i32, %c0_i32_0, %c0_i32_1 : i32, i32, i32, i32
  }
}

</mosaic_0001>

<bundles_post_ra>
// kernel: tpu_custom_call.1
= control target key start
LH: loop header
LB: loop body
LE: loop exit
PB: predicated region body
PF: predicated region fallthrough
CT: control target
= control target key end

     0   :  { %s11114_s0 = inlined_call_operand.vmem [shape: bf16[2,16,16,4], index: 0, kind: input, shape index: {}]   ;;  %s11115_s1 = inlined_call_operand.vmem [shape: bf16[36,8], index: 1, kind: input, shape index: {}]   ;;  %s11116_s2 = inlined_call_operand.vmem [shape: f32[1,8], index: 2, kind: input, shape index: {}]   ;;  %s11117_s3 = inlined_call_operand.vmem [shape: f32[1,8], index: 3, kind: input, shape index: {}]   ;;  %s11118_s4 = inlined_call_operand.vmem [shape: f32[1,8], index: 4, kind: input, shape index: {}]   ;;  %s11119_s5 = inlined_call_operand.vmem [shape: bf16[72,8], index: 5, kind: input, shape index: {}]   ;;  %s11120_s6 = inlined_call_operand.vmem [shape: f32[1,8], index: 6, kind: input, shape index: {}]   ;;  %s11121_s7 = inlined_call_operand.vmem [shape: bf16[4,8], index: 7, kind: input, shape index: {}]   ;;  %s11122_s8 = inlined_call_operand.vmem [shape: f32[1,8], index: 8, kind: input, shape index: {}]   ;;  %s11123_s9 = inlined_call_operand.vmem [shape: bf16[72,8], index: 9, kind: input, shape index: {}]   ;;  %s11124_s10 = inlined_call_operand.vmem [shape: f32[2,16,16,8], index: 10, kind: output, shape index: {0}]   ;;  %s11125_s11 = inlined_call_operand.hbm [shape: f32[2,8,8,8], index: 11, kind: output, shape index: {1}]  }
   0x1   :  { %11225 = sst [smem:[#allocation28_spill]] %s11114_s0 }
   0x2   :  { %11226 = sst [smem:[#allocation29_spill]] %s11115_s1 }
   0x3   :  { %17 = vsyncpa [#allocation5], 0 }
   0x4   :  { %19 = vsyncpa [#allocation5 + $0x1], 0  ;;  %s7447_s17 = smov 0   ;;  %s7449_s18 = smov 0  }
   0x5   :  { %s7451_s19 = smov 0   ;;  %s7453_s20 = smov 0  }
   0x6 LB: > { %s7468_s21 = sadd.s32 4294967295, %s7370_s20   ;;  %s5362_s22 = sadd.s32 4294967294, %s7370_s20   ;;  %s7370_s20 = sphi %s7453_s20, %s11568_s20   ;;  %s7366_s19 = sphi %s7451_s19, %s11567_s19   ;;  %s7362_s18 = sphi %s7449_s18, %s11566_s18   ;;  %s7358_s17 = sphi %s7447_s17, %s11565_s17  }
   0x7   : > { %s7472_s23 = sadd.s32 1, %s7370_s20   ;;  %s273_s24 = sadd.s32 1, %s7366_s19 }
   0x8   : > { %s270_s25 = ssub.s32 %s7370_s20, %s7472_s23  ;;  %p283_p0 = scmp.ne.s32.totalorder %s7366_s19, %s7362_s18 }
   0x9   : > { %p271_p1 = scmp.eq.s32.totalorder %s270_s25, 0  ;;  %p284_p2 = scmp.eq.s32.totalorder %s7468_s21, 1 }
   0xa   : > { %p289_p3 = scmp.ne.s32.totalorder %s7362_s18, %s7358_s17  ;;  %p290_p4 = scmp.eq.s32.totalorder %s5362_s22, 1 }
   0xb   : > { %s7483_s26 = scalar_select %p271_p1, %s7366_s19, %s273_s24  }
   0xc   : > { %p7485_p5 = por %p284_p2, %p283_p0  ;;  %p7489_p6 = por %p290_p4, %p289_p3 }
   0xd   : > { %p5365_p7 = scmp.ge.s32.totalorder %s7370_s20, 1  ;;  %p343_p8 = scmp.lt.s32.totalorder %s7370_s20, 3 }
   0xf   : > { %p344_p9 = pnand %p5365_p7, %p343_p8 }
  0x11   : > { %347 = sbr.rel (%p344_p9) target bundleno = 1668 (0x684), region = 60 }
  0x16   : > { %vm11200_vm0 = vcmask 31744   ;;  %vm402_vm1 = vcmask 25600   ;;  %p388_p10 = scmp.lt.s32.totalorder %s7468_s21, 1  ;;  %v11126_v0 = vmov 0.0   ;;  %s11229_s0 = sld [smem:[#allocation28_spill]]  ;;  %vm11203_vm2 = vcmask 1046528  }
  0x17   : > { %400 = vst.msk [vmem:[#allocation2] sm:$0xff] %vm11200_vm0, %v11126_v0  ;;  %401 = vst.msk [vmem:[#allocation2 + $0x8] sm:$0xff] %vm11200_vm0, %v11126_v0  ;;  %s7373_s15 = smov 4   ;;  %vm11202_vm3 = vcmask 1045504   ;;  %s11223_s16 = smov 8   ;;  %vm455_vm4 = vcmask 64512  }
  0x18   : > { %403 = vst.msk [vmem:[#allocation2 + $0x10] sm:$0x3] %vm402_vm1, %v11126_v0  ;;  %406 = vst.msk [vmem:[#allocation2 + $0x28] sm:$0x3] %vm402_vm1, %v11126_v0  ;;  %s7607_s29 = scalar_select %p388_p10, %s7468_s21, 1  ;;  %vm11201_vm5 = vcmask 1041408  }
  0x19   : > { %404 = vst.msk [vmem:[#allocation2 + $0x18] sm:$0xff] %vm11200_vm0, %v11126_v0  ;;  %405 = vst.msk [vmem:[#allocation2 + $0x20] sm:$0xff] %vm11200_vm0, %v11126_v0  ;;  %s7375_s22 = smov 12   ;;  %s11255_s1 = sld [smem:[#allocation29_spill]]  ;;  %vm1730_vm6 = vcmask 97280   ;;  %vm11199_vm7 = vcmask 130048  }
  0x1a   : > { %407 = vst.msk [vmem:[#allocation2 + $0x30] sm:$0xff] %vm11200_vm0, %v11126_v0  ;;  %408 = vst.msk [vmem:[#allocation2 + $0x38] sm:$0xff] %vm11200_vm0, %v11126_v0  ;;  %s5446_s30 = sshll.u32 %s7607_s29, 7  ;;  %s11204_s12 = smov 24   ;;  %vm1796_vm8 = vcmask 162816   ;;  %vm11198_vm9 = vcmask 195584  }
  0x1b   : > { %409 = vst.msk [vmem:[#allocation2 + $0x40] sm:$0x3] %vm402_vm1, %v11126_v0  ;;  %412 = vst.msk [vmem:[#allocation2 + $0x58] sm:$0x3] %vm402_vm1, %v11126_v0  ;;  %s7379_s13 = smov 28   ;;  %s11215_s24 = smov 32  }
  0x1c   : > { %410 = vst.msk [vmem:[#allocation2 + $0x48] sm:$0xff] %vm11200_vm0, %v11126_v0  ;;  %411 = vst.msk [vmem:[#allocation2 + $0x50] sm:$0xff] %vm11200_vm0, %v11126_v0  ;;  %s7613_s14 = scalar_lea.vmem %s11229_s0, %s5446_s30  ;;  %s11221_s30 = smov 16   ;;  %vm1862_vm10 = vcmask 228352   ;;  %vm11197_vm11 = vcmask 261120   ;;  %vm1971_vm12 = vcmask 293888  }
  0x1d   : > { %413 = vst.msk [vmem:[#allocation2 + $0x60] sm:$0xff] %vm11200_vm0, %v11126_v0  ;;  %414 = vst.msk [vmem:[#allocation2 + $0x68] sm:$0xff] %vm11200_vm0, %v11126_v0  ;;  %v5513_v1 = vld [vmem:[%s7613_s14 + $0x8] sm:$0xff]   ;;  %v5450_v2 = vld [vmem:[%s7613_s14] sm:$0xff]   ;;  %vm458_vm13 = vcmask 58368   ;;  %s11464_s25 = smov 24  }
  0x1e   : > { %415 = vst.msk [vmem:[#allocation2 + $0x70] sm:$0x3] %vm402_vm1, %v11126_v0  ;;  %418 = vst.msk [vmem:[#allocation2 + $0x88] sm:$0x3] %vm402_vm1, %v11126_v0  ;;  %v5514_v3 = vld [vmem:[%s7613_s14 + $0x10] sm:$0xff]   ;;  %v5455_v4 = vunpack.c.l.bf16 %v5513_v1  ;;  %v5456_v5 = vunpack.c.h.bf16 %v5513_v1  ;;  %v5451_v6 = vunpack.c.l.bf16 %v5450_v2  ;;  %v5452_v7 = vunpack.c.h.bf16 %v5450_v2  ;;  %v5515_v8 = vld [vmem:[%s7613_s14 + $0x18] sm:$0xff]  }
  0x1f   : > { %416 = vst.msk [vmem:[#allocation2 + $0x78] sm:$0xff] %vm11200_vm0, %v11126_v0  ;;  %417 = vst.msk [vmem:[#allocation2 + $0x80] sm:$0xff] %vm11200_vm0, %v11126_v0  ;;  %v5516_v9 = vld [vmem:[%s7613_s14 + $0x20] sm:$0xff]   ;;  %v5517_v10 = vld [vmem:[%s7613_s14 + $0x28] sm:$0xff]   ;;  %v5459_v14 = vunpack.c.l.bf16 %v5514_v3  ;;  %v5460_v15 = vunpack.c.h.bf16 %v5514_v3  ;;  %v5463_v16 = vunpack.c.l.bf16 %v5515_v8  ;;  %v5464_v17 = vunpack.c.h.bf16 %v5515_v8  ;;  %s11539_s0 = smov 8  }
  0x20   : > { %419 = vst.msk [vmem:[#allocation2 + $0x90] sm:$0xff] %vm11200_vm0, %v11126_v0  ;;  %420 = vst.msk [vmem:[#allocation2 + $0x98] sm:$0xff] %vm11200_vm0, %v11126_v0  ;;  %v7621_v11 = vld [vmem:[#allocation2] sm:$0xff]  ;;  %v7623_v12 = vld [vmem:[#allocation2 + $0x8] sm:$0xff]  ;;  %v5467_v23 = vunpack.c.l.bf16 %v5516_v9  ;;  %v5468_v24 = vunpack.c.h.bf16 %v5516_v9  ;;  %v5471_v25 = vunpack.c.l.bf16 %v5517_v10  ;;  %v5472_v26 = vunpack.c.h.bf16 %v5517_v10 }
  0x21   : > { %421 = vst.msk [vmem:[#allocation2 + $0xa0] sm:$0x3] %vm402_vm1, %v11126_v0  ;;  %424 = vst.msk [vmem:[#allocation2 + $0xb8] sm:$0x3] %vm402_vm1, %v11126_v0  ;;  %v7625_v13 = vld [vmem:[#allocation2 + $0x10] sm:$0x3] }
  0x22   : > { %422 = vst.msk [vmem:[#allocation2 + $0xa8] sm:$0xff] %vm11200_vm0, %v11126_v0  ;;  %423 = vst.msk [vmem:[#allocation2 + $0xb0] sm:$0xff] %vm11200_vm0, %v11126_v0  ;;  %v711_v18 = vrot.slane %v7621_v11, 1  ;;  %v712_v19 = vrot.slane %v7623_v12, 1  ;;  %v714_v20 = vrot.slane %v7625_v13, 1  ;;  %v5518_v21 = vld [vmem:[%s7613_s14 + $0x30] sm:$0xff]  }
  0x23   : > { %425 = vst.msk [vmem:[#allocation2 + $0xc0] sm:$0xff] %vm11200_vm0, %v11126_v0  ;;  %426 = vst.msk [vmem:[#allocation2 + $0xc8] sm:$0xff] %vm11200_vm0, %v11126_v0  ;;  %v5519_v22 = vld [vmem:[%s7613_s14 + $0x38] sm:$0xff]   ;;  %v5520_v27 = vld [vmem:[%s7613_s14 + $0x40] sm:$0xff]   ;;  %v5475_v32 = vunpack.c.l.bf16 %v5518_v21  ;;  %v5476_v33 = vunpack.c.h.bf16 %v5518_v21 }
  0x24   : > { %427 = vst.msk [vmem:[#allocation2 + $0xd0] sm:$0x3] %vm402_vm1, %v11126_v0  ;;  %430 = vst.msk [vmem:[#allocation2 + $0xe8] sm:$0x3] %vm402_vm1, %v11126_v0  ;;  %v5521_v28 = vld [vmem:[%s7613_s14 + $0x48] sm:$0xff]   ;;  %v5522_v29 = vld [vmem:[%s7613_s14 + $0x50] sm:$0xff]   ;;  %v713_v30 = vsel %vm11203_vm2, %v711_v18, %v712_v19  ;;  %v715_v31 = vsel %vm11203_vm2, %v712_v19, %v714_v20  ;;  %v5479_v38 = vunpack.c.l.bf16 %v5519_v22  ;;  %v5480_v39 = vunpack.c.h.bf16 %v5519_v22 }
  0x25   : > { %428 = vst.msk [vmem:[#allocation2 + $0xd8] sm:$0xff] %vm11200_vm0, %v11126_v0  ;;  %429 = vst.msk [vmem:[#allocation2 + $0xe0] sm:$0xff] %vm11200_vm0, %v11126_v0  ;;  %v5523_v34 = vld [vmem:[%s7613_s14 + $0x58] sm:$0xff]   ;;  %v5524_v35 = vld [vmem:[%s7613_s14 + $0x60] sm:$0xff]   ;;  %v5790_v37 = vpack.i.bf16 %v715_v31, %v713_v30  ;;  %v5483_v40 = vunpack.c.l.bf16 %v5520_v27  ;;  %v5484_v42 = vunpack.c.h.bf16 %v5520_v27  ;;  %v5487_v43 = vunpack.c.l.bf16 %v5521_v28 }
  0x26   : > { %431 = vst.msk [vmem:[#allocation2 + $0xf0] sm:$0xff] %vm11200_vm0, %v11126_v0  ;;  %432 = vst.msk [vmem:[#allocation2 + $0xf8] sm:$0xff] %vm11200_vm0, %v11126_v0  ;;  %v5525_v36 = vld [vmem:[%s7613_s14 + $0x68] sm:$0xff]   ;;  %v5526_v41 = vld [vmem:[%s7613_s14 + $0x70] sm:$0xff]   ;;  %v5488_v44 = vunpack.c.h.bf16 %v5521_v28  ;;  %v5491_v45 = vunpack.c.l.bf16 %v5522_v29  ;;  %v5492_v46 = vunpack.c.h.bf16 %v5522_v29  ;;  %v5495_v47 = vunpack.c.l.bf16 %v5523_v34 }
  0x27   : > { %433 = vst.msk [vmem:[#allocation2 + $0x100] sm:$0x3] %vm402_vm1, %v11126_v0  ;;  %436 = vst.msk [vmem:[#allocation2 + $0x118] sm:$0x3] %vm402_vm1, %v11126_v0  ;;  %5791 = vrot.lane.b32.xlu0 %v5790_v37, %s7373_s15  ;;  %v5496_v48 = vunpack.c.h.bf16 %v5523_v34  ;;  %v5499_v49 = vunpack.c.l.bf16 %v5524_v35  ;;  %v5500_v50 = vunpack.c.h.bf16 %v5524_v35  ;;  %v5503_v51 = vunpack.c.l.bf16 %v5525_v36 }
  0x28   : > { %434 = vst.msk [vmem:[#allocation2 + $0x108] sm:$0xff] %vm11200_vm0, %v11126_v0  ;;  %435 = vst.msk [vmem:[#allocation2 + $0x110] sm:$0xff] %vm11200_vm0, %v11126_v0  ;;  %v5504_v52 = vunpack.c.h.bf16 %v5525_v36  ;;  %v5507_v53 = vunpack.c.l.bf16 %v5526_v41  ;;  %v5508_v57 = vunpack.c.h.bf16 %v5526_v41 }
  0x29   : > { %437 = vst.msk [vmem:[#allocation2 + $0x120] sm:$0xff] %vm11200_vm0, %v11126_v0  ;;  %438 = vst.msk [vmem:[#allocation2 + $0x128] sm:$0xff] %vm11200_vm0, %v11126_v0 }
  0x2a   : > { %439 = vst.msk [vmem:[#allocation2 + $0x130] sm:$0x3] %vm402_vm1, %v11126_v0  ;;  %442 = vst.msk [vmem:[#allocation2 + $0x148] sm:$0x3] %vm402_vm1, %v11126_v0 }
  0x2b   : > { %440 = vst.msk [vmem:[#allocation2 + $0x138] sm:$0xff] %vm11200_vm0, %v11126_v0  ;;  %441 = vst.msk [vmem:[#allocation2 + $0x140] sm:$0xff] %vm11200_vm0, %v11126_v0 }
  0x2c   : > { %443 = vst.msk [vmem:[#allocation2 + $0x150] sm:$0xff] %vm11200_vm0, %v11126_v0  ;;  %444 = vst.msk [vmem:[#allocation2 + $0x158] sm:$0xff] %vm11200_vm0, %v11126_v0 }
  0x2d   : > { %445 = vst.msk [vmem:[#allocation2 + $0x160] sm:$0x3] %vm402_vm1, %v11126_v0  ;;  %448 = vst.msk [vmem:[#allocation2 + $0x178] sm:$0x3] %vm402_vm1, %v11126_v0 }
  0x2e   : > { %446 = vst.msk [vmem:[#allocation2 + $0x168] sm:$0xff] %vm11200_vm0, %v11126_v0  ;;  %447 = vst.msk [vmem:[#allocation2 + $0x170] sm:$0xff] %vm11200_vm0, %v11126_v0 }
  0x2f   : > { %449 = vst.msk [vmem:[#allocation2 + $0x180] sm:$0xff] %vm11200_vm0, %v11126_v0  ;;  %450 = vst.msk [vmem:[#allocation2 + $0x188] sm:$0xff] %vm11200_vm0, %v11126_v0 }
  0x30   : > { %451 = vst.msk [vmem:[#allocation2 + $0x190] sm:$0x3] %vm402_vm1, %v11126_v0  ;;  %454 = vst.msk [vmem:[#allocation2 + $0x1a8] sm:$0x3] %vm402_vm1, %v11126_v0 }
  0x31   : > { %452 = vst.msk [vmem:[#allocation2 + $0x198] sm:$0xff] %vm11200_vm0, %v11126_v0  ;;  %453 = vst.msk [vmem:[#allocation2 + $0x1a0] sm:$0xff] %vm11200_vm0, %v11126_v0 }
  0x32   : > { %578 = vst.msk [vmem:[#allocation2 + $0x31] sm:$0xff] %vm11200_vm0, %v5455_v4  ;;  %579 = vst.msk [vmem:[#allocation2 + $0x39] sm:$0xff] %vm11200_vm0, %v5456_v5 }
  0x33   : > { %576 = vst.msk [vmem:[#allocation2 + $0x19] sm:$0xff] %vm11200_vm0, %v5451_v6  ;;  %577 = vst.msk [vmem:[#allocation2 + $0x21] sm:$0xff] %vm11200_vm0, %v5452_v7 }
  0x34   : > { %580 = vst.msk [vmem:[#allocation2 + $0x49] sm:$0xff] %vm11200_vm0, %v5459_v14  ;;  %581 = vst.msk [vmem:[#allocation2 + $0x51] sm:$0xff] %vm11200_vm0, %v5460_v15 }
  0x35   : > { %582 = vst.msk [vmem:[#allocation2 + $0x61] sm:$0xff] %vm11200_vm0, %v5463_v16  ;;  %583 = vst.msk [vmem:[#allocation2 + $0x69] sm:$0xff] %vm11200_vm0, %v5464_v17 }
  0x36   : > { %584 = vst.msk [vmem:[#allocation2 + $0x79] sm:$0xff] %vm11200_vm0, %v5467_v23  ;;  %585 = vst.msk [vmem:[#allocation2 + $0x81] sm:$0xff] %vm11200_vm0, %v5468_v24 }
  0x37   : > { %586 = vst.msk [vmem:[#allocation2 + $0x91] sm:$0xff] %vm11200_vm0, %v5471_v25  ;;  %587 = vst.msk [vmem:[#allocation2 + $0x99] sm:$0xff] %vm11200_vm0, %v5472_v26 }
  0x38   : > { %588 = vst.msk [vmem:[#allocation2 + $0xa9] sm:$0xff] %vm11200_vm0, %v5475_v32  ;;  %589 = vst.msk [vmem:[#allocation2 + $0xb1] sm:$0xff] %vm11200_vm0, %v5476_v33 }
  0x39   : > { %590 = vst.msk [vmem:[#allocation2 + $0xc1] sm:$0xff] %vm11200_vm0, %v5479_v38  ;;  %591 = vst.msk [vmem:[#allocation2 + $0xc9] sm:$0xff] %vm11200_vm0, %v5480_v39  ;;  %v7663_v54 = vld [vmem:[#allocation2 + $0x30] sm:$0xff]  ;;  %v7665_v55 = vld [vmem:[#allocation2 + $0x38] sm:$0xff] }
  0x3a   : > { %592 = vst.msk [vmem:[#allocation2 + $0xd9] sm:$0xff] %vm11200_vm0, %v5483_v40  ;;  %593 = vst.msk [vmem:[#allocation2 + $0xe1] sm:$0xff] %vm11200_vm0, %v5484_v42  ;;  %v7667_v56 = vld [vmem:[#allocation2 + $0x40] sm:$0x3]  ;;  %v721_v58 = vrot.slane %v7663_v54, 1  ;;  %v722_v59 = vrot.slane %v7665_v55, 1 }
  0x3b   : > { %594 = vst.msk [vmem:[#allocation2 + $0xf1] sm:$0xff] %vm11200_vm0, %v5487_v43  ;;  %595 = vst.msk [vmem:[#allocation2 + $0xf9] sm:$0xff] %vm11200_vm0, %v5488_v44  ;;  %v724_v60 = vrot.slane %v7667_v56, 1  ;;  %v7676_v61 = vld [vmem:[#allocation2 + $0x18] sm:$0xff]  ;;  %v7678_v62 = vld [vmem:[#allocation2 + $0x20] sm:$0xff] }
  0x3c   : > { %596 = vst.msk [vmem:[#allocation2 + $0x109] sm:$0xff] %vm11200_vm0, %v5491_v45  ;;  %597 = vst.msk [vmem:[#allocation2 + $0x111] sm:$0xff] %vm11200_vm0, %v5492_v46  ;;  %v7684_v63 = vld [vmem:[#allocation2 + $0x28] sm:$0x3]  ;;  %v716_v1 = vrot.slane %v7676_v61, 1  ;;  %v717_v2 = vrot.slane %v7678_v62, 1  ;;  %v723_v5 = vsel %vm11203_vm2, %v721_v58, %v722_v59 }
  0x3d   : > { %598 = vst.msk [vmem:[#allocation2 + $0x121] sm:$0xff] %vm11200_vm0, %v5495_v47  ;;  %599 = vst.msk [vmem:[#allocation2 + $0x129] sm:$0xff] %vm11200_vm0, %v5496_v48  ;;  %v7688_v3 = vld [vmem:[#allocation2 + $0x48] sm:$0xff]  ;;  %v7690_v4 = vld [vmem:[#allocation2 + $0x50] sm:$0xff]  ;;  %v725_v6 = vsel %vm11203_vm2, %v722_v59, %v724_v60  ;;  %v719_v7 = vrot.slane %v7684_v63, 1 }
  0x3e   : > { %600 = vst.msk [vmem:[#allocation2 + $0x139] sm:$0xff] %vm11200_vm0, %v5499_v49  ;;  %601 = vst.msk [vmem:[#allocation2 + $0x141] sm:$0xff] %vm11200_vm0, %v5500_v50  ;;  %v7696_v8 = vld [vmem:[#allocation2 + $0x58] sm:$0x3]  ;;  %v726_v9 = vrot.slane %v7688_v3, 1  ;;  %v7699_v10 = vld [vmem:[#allocation2 + $0x60] sm:$0xff]  ;;  %v7703_v15 = vpack.i.bf16 %v725_v6, %v723_v5  ;;  %v718_v16 = vsel %vm11203_vm2, %v716_v1, %v717_v2 }
  0x3f   : > { %602 = vst.msk [vmem:[#allocation2 + $0x151] sm:$0xff] %vm11200_vm0, %v5503_v51  ;;  %603 = vst.msk [vmem:[#allocation2 + $0x159] sm:$0xff] %vm11200_vm0, %v5504_v52  ;;  %v7701_v14 = vld [vmem:[#allocation2 + $0x68] sm:$0xff]  ;;  %v727_v17 = vrot.slane %v7690_v4, 1  ;;  %v729_v18 = vrot.slane %v7696_v8, 1  ;;  %v7710_v20 = vld [vmem:[#allocation2 + $0x78] sm:$0xff]  ;;  %v720_v22 = vsel %vm11203_vm2, %v717_v2, %v719_v7 }
  0x40   : > { %604 = vst.msk [vmem:[#allocation2 + $0x169] sm:$0xff] %vm11200_vm0, %v5507_v53  ;;  %605 = vst.msk [vmem:[#allocation2 + $0x171] sm:$0xff] %vm11200_vm0, %v5508_v57  ;;  %v7708_v19 = vld [vmem:[#allocation2 + $0x70] sm:$0x3]  ;;  %v7712_v21 = vld [vmem:[#allocation2 + $0x80] sm:$0xff]  ;;  %v731_v23 = vrot.slane %v7699_v10, 1  ;;  %5801 = vrot.lane.b32.xlu1 %v7703_v15, %s7373_s15  ;;  %v7724_v28 = vpack.i.bf16 %v720_v22, %v718_v16 }
  0x41   : > { %11230 = vst [vmem:[#allocation7_spill] sm:$0xff] %v7703_v15  ;;  %v732_v24 = vrot.slane %v7701_v14, 1  ;;  %v734_v25 = vrot.slane %v7708_v19, 1  ;;  %v7718_v26 = vld [vmem:[#allocation2 + $0x88] sm:$0x3]  ;;  %v7720_v27 = vld [vmem:[#allocation2 + $0x90] sm:$0xff]  ;;  %v728_v29 = vsel %vm11203_vm2, %v726_v9, %v727_v17  ;;  %v730_v30 = vsel %vm11203_vm2, %v727_v17, %v729_v18 }
  0x42   : > { %11231 = vst [vmem:[#allocation8_spill] sm:$0xff] %v7724_v28  ;;  %v736_v31 = vrot.slane %v7710_v20, 1  ;;  %v7729_v32 = vld [vmem:[#allocation2 + $0x98] sm:$0xff]  ;;  %v7731_v33 = vld [vmem:[#allocation2 + $0xa0] sm:$0x3]  ;;  %v7733_v34 = vld [vmem:[#allocation2 + $0xa8] sm:$0xff]  ;;  %v7735_v35 = vpack.i.bf16 %v730_v30, %v728_v29  ;;  %5796 = vrot.lane.b32.xlu0 %v7724_v28, %s7373_s15 }
  0x43   : > { %v733_v36 = vsel %vm11203_vm2, %v731_v23, %v732_v24  ;;  %v735_v37 = vsel %vm11203_vm2, %v732_v24, %v734_v25  ;;  %v737_v38 = vrot.slane %v7712_v21, 1  ;;  %v7740_v39 = vld [vmem:[#allocation2 + $0xb0] sm:$0xff]  ;;  %v7742_v40 = vld [vmem:[#allocation2 + $0xb8] sm:$0x3]  ;;  %v7744_v41 = vld [vmem:[#allocation2 + $0xc0] sm:$0xff]  ;;  %v739_v43 = vrot.slane %v7718_v26, 1 }
  0x44   : > { %11232 = vst [vmem:[#allocation9_spill] sm:$0xff] %v7735_v35  ;;  %v7748_v42 = vpack.i.bf16 %v735_v37, %v733_v36  ;;  %v741_v44 = vrot.slane %v7720_v27, 1  ;;  %v742_v45 = vrot.slane %v7729_v32, 1  ;;  %v7753_v46 = vld [vmem:[#allocation2 + $0xc8] sm:$0xff]  ;;  %v744_v48 = vrot.slane %v7731_v33, 1  ;;  %v7761_v52 = vld [vmem:[#allocation2 + $0xd8] sm:$0xff]  ;;  %5806 = vrot.lane.b32.xlu1 %v7735_v35, %s7373_s15 }
  0x45   : > { %v738_v47 = vsel %vm11203_vm2, %v736_v31, %v737_v38  ;;  %v746_v49 = vrot.slane %v7733_v34, 1  ;;  %v747_v50 = vrot.slane %v7740_v39, 1  ;;  %v7759_v51 = vld [vmem:[#allocation2 + $0xd0] sm:$0x3]  ;;  %v740_v53 = vsel %vm11203_vm2, %v737_v38, %v739_v43  ;;  %v7769_v60 = vld [vmem:[#allocation2 + $0xe0] sm:$0xff]  ;;  %v7780_v16 = vld [vmem:[#allocation2 + $0xf8] sm:$0xff] }
  0x46   : > { %11233 = vst [vmem:[#allocation10_spill] sm:$0xff] %v7748_v42  ;;  %v743_v57 = vsel %vm11203_vm2, %v741_v44, %v742_v45  ;;  %v749_v58 = vrot.slane %v7742_v40, 1  ;;  %v751_v59 = vrot.slane %v7744_v41, 1  ;;  %v7771_v1 = vld [vmem:[#allocation2 + $0xe8] sm:$0x3]  ;;  %v7773_v2 = vpack.i.bf16 %v740_v53, %v738_v47  ;;  %v7778_v9 = vld [vmem:[#allocation2 + $0xf0] sm:$0xff]  ;;  %5811 = vrot.lane.b32.xlu0 %v7748_v42, %s7373_s15 }
  0x47   : > { %v745_v5 = vsel %vm11203_vm2, %v742_v45, %v744_v48  ;;  %v748_v6 = vsel %vm11203_vm2, %v746_v49, %v747_v50  ;;  %v752_v7 = vrot.slane %v7753_v46, 1  ;;  %v7782_v17 = vld [vmem:[#allocation2 + $0x100] sm:$0x3]  ;;  %v754_v23 = vrot.slane %v7759_v51, 1  ;;  %v7791_v25 = vld [vmem:[#allocation2 + $0x108] sm:$0xff]  ;;  %v7798_v37 = vld [vmem:[#allocation2 + $0x110] sm:$0xff] }
  0x48   : > { %11234 = vst [vmem:[#allocation11_spill] sm:$0xff] %v7773_v2  ;;  %v7786_v18 = vpack.i.bf16 %v745_v5, %v743_v57  ;;  %v750_v22 = vsel %vm11203_vm2, %v747_v50, %v749_v58  ;;  %v756_v24 = vrot.slane %v7761_v52, 1  ;;  %v757_v31 = vrot.slane %v7769_v60, 1  ;;  %v7800_v38 = vld [vmem:[#allocation2 + $0x118] sm:$0x3]  ;;  %5816 = vrot.lane.b32.xlu1 %v7773_v2, %s7373_s15  ;;  %v7808_v48 = vld [vmem:[#allocation2 + $0x120] sm:$0xff] }
  0x49   : > { %v7793_v29 = vpack.i.bf16 %v750_v22, %v748_v6  ;;  %v753_v30 = vsel %vm11203_vm2, %v751_v59, %v752_v7  ;;  %v759_v36 = vrot.slane %v7771_v1, 1  ;;  %v755_v43 = vsel %vm11203_vm2, %v752_v7, %v754_v23  ;;  %v7810_v49 = vld [vmem:[#allocation2 + $0x128] sm:$0xff]  ;;  %v7815_v58 = vld [vmem:[#allocation2 + $0x130] sm:$0x3]  ;;  %v7817_v59 = vld [vmem:[#allocation2 + $0x138] sm:$0xff] }
  0x4a   : > { %11235 = vst [vmem:[#allocation12_spill] sm:$0xff] %v7786_v18  ;;  %v761_v44 = vrot.slane %v7778_v9, 1  ;;  %v762_v45 = vrot.slane %v7780_v16, 1  ;;  %v764_v47 = vrot.slane %v7782_v17, 1  ;;  %11237 = vst [vmem:[#allocation14_spill] sm:$0xff] %v7810_v49  ;;  %v758_v50 = vsel %vm11203_vm2, %v756_v24, %v757_v31  ;;  %5821 = vrot.lane.b32.xlu0 %v7786_v18, %s7373_s15  ;;  %v7827_v23 = vld [vmem:[#allocation2 + $0x140] sm:$0xff] }
  0x4b   : > { %11236 = vst [vmem:[#allocation13_spill] sm:$0xff] %v7793_v29  ;;  %v760_v53 = vsel %vm11203_vm2, %v757_v31, %v759_v36  ;;  %v766_v57 = vrot.slane %v7791_v25, 1  ;;  %11238 = vst [vmem:[#allocation15_spill] sm:$0xff] %v7815_v58  ;;  %v7819_v5 = vld [vmem:[#allocation2 + $0x148] sm:$0x3]  ;;  %v7823_v6 = vpack.i.bf16 %v755_v43, %v753_v30  ;;  %v767_v22 = vrot.slane %v7798_v37, 1 }
  0x4c   : > { %11239 = vst [vmem:[#allocation16_spill] sm:$0xff] %v7817_v59  ;;  %11240 = vst [vmem:[#allocation17_spill] sm:$0xff] %v7819_v5  ;;  %v763_v7 = vsel %vm11203_vm2, %v761_v44, %v762_v45  ;;  %v765_v24 = vsel %vm11203_vm2, %v762_v45, %v764_v47  ;;  %v769_v31 = vrot.slane %v7800_v38, 1  ;;  %v771_v36 = vrot.slane %v7808_v48, 1  ;;  %5826 = vrot.lane.b32.xlu1 %v7793_v29, %s7373_s15  ;;  %v7839_v44 = vld [vmem:[#allocation2 + $0x150] sm:$0xff]  ;;  %v7841_v2 = vld [vmem:[#allocation2 + $0x158] sm:$0xff] }
  0x4d   : > { %11241 = vst [vmem:[#allocation18_spill] sm:$0xff] %v7823_v6  ;;  %11242 = vst [vmem:[#allocation19_spill] sm:$0xff] %v7827_v23  ;;  %v772_v0 = vrot.slane %v7810_v49, 1  ;;  %v7835_v18 = vpack.i.bf16 %v760_v53, %v758_v50  ;;  %v768_v30 = vsel %vm11203_vm2, %v766_v57, %v767_v22  ;;  %v774_v43 = vrot.slane %v7815_v58, 1  ;;  %v7843_v45 = vld [vmem:[#allocation2 + $0x160] sm:$0x3] }
  0x4e   : > { %v770_v47 = vsel %vm11203_vm2, %v767_v22, %v769_v31  ;;  %v776_v42 = vrot.slane %v7817_v59, 1  ;;  %v777_v35 = vrot.slane %v7827_v23, 1  ;;  %v779_v29 = vrot.slane %v7819_v5, 1  ;;  %v7849_v50 = vld [vmem:[#allocation2 + $0x168] sm:$0xff]  ;;  %v7851_v53 = vld [vmem:[#allocation2 + $0x170] sm:$0xff]  ;;  %5831 = vrot.lane.b32.xlu0 %v7823_v6, %s7373_s15 }
  0x4f   : > { %11243 = vst [vmem:[#allocation20_spill] sm:$0xff] %v7835_v18  ;;  %11244 = vst [vmem:[#allocation21_spill] sm:$0xff] %v7851_v53  ;;  %v7855_v57 = vpack.i.bf16 %v765_v24, %v763_v7  ;;  %v773_v15 = vsel %vm11203_vm2, %v771_v36, %v772_v0  ;;  %v7858_v28 = vld [vmem:[#allocation2 + $0x178] sm:$0x3]  ;;  %v888_v22 = vrot.slane %v7621_v11, 2  ;;  %v889_v31 = vrot.slane %v7623_v12, 2 }
  0x50   : > { %v775_v23 = vsel %vm11203_vm2, %v772_v0, %v774_v43  ;;  %v781_v5 = vrot.slane %v7839_v44, 1  ;;  %v782_v59 = vrot.slane %v7841_v2, 1  ;;  %v784_v58 = vrot.slane %v7843_v45, 1  ;;  %5836 = vrot.lane.b32.xlu1 %v7835_v18, %s7373_s15 }
  0x51   : > { %v7868_v7 = vpack.i.bf16 %v770_v47, %v768_v30  ;;  %v786_v24 = vrot.slane %v7849_v50, 1  ;;  %v787_v36 = vrot.slane %v7851_v53, 1  ;;  %v778_v11 = vsel %vm11203_vm2, %v776_v42, %v777_v35 }
  0x52   : > { %v780_v0 = vsel %vm11203_vm2, %v777_v35, %v779_v29  ;;  %v789_v12 = vrot.slane %v7858_v28, 1  ;;  %v891_v43 = vrot.slane %v7625_v13, 2  ;;  %5841 = vrot.lane.b32.xlu0 %v7855_v57, %s7373_s15  ;;  %v7878_v6 = vpack.i.bf16 %v775_v23, %v773_v15 }
  0x53   : > { %v901_v30 = vrot.slane %v7667_v56, 2  ;;  %v783_v47 = vsel %vm11203_vm2, %v781_v5, %v782_v59  ;;  %v785_v18 = vsel %vm11203_vm2, %v782_v59, %v784_v58  ;;  %v890_v53 = vsel %vm11202_vm3, %v888_v22, %v889_v31 }
  0x54   : > { %11245 = vst [vmem:[#allocation22_spill] sm:$0xff] %v7878_v6  ;;  %5846 = vrot.lane.b32.xlu1 %v7868_v7, %s7373_s15  ;;  %v7886_v35 = vpack.i.bf16 %v780_v0, %v778_v11  ;;  %v788_v13 = vsel %vm11203_vm2, %v786_v24, %v787_v36  ;;  %v893_v42 = vrot.slane %v7676_v61, 2  ;;  %v894_v15 = vrot.slane %v7678_v62, 2 }
  0x55   : > { %v790_v29 = vsel %vm11203_vm2, %v787_v36, %v789_v12  ;;  %v896_v56 = vrot.slane %v7684_v63, 2  ;;  %v898_v5 = vrot.slane %v7663_v54, 2  ;;  %v899_v58 = vrot.slane %v7665_v55, 2 }
  0x56   : > { %11246 = vst [vmem:[#allocation23_spill] sm:$0xff] %v7886_v35  ;;  %5851 = vrot.lane.b32.xlu0 %v7878_v6, %s7373_s15  ;;  %v7897_v59 = vpack.i.bf16 %v785_v18, %v783_v47  ;;  %v892_v23 = vsel %vm11202_vm3, %v889_v31, %v891_v43  ;;  %v903_v22 = vrot.slane %v7688_v3, 2  ;;  %v904_v24 = vrot.slane %v7690_v4, 2 }
  0x57   : > { %v906_v11 = vrot.slane %v7696_v8, 2  ;;  %v7905_v63 = vpack.i.bf16 %v790_v29, %v788_v13  ;;  %v908_v36 = vrot.slane %v7699_v10, 2  ;;  %v909_v0 = vrot.slane %v7701_v14, 2 }
  0x58   : > { %11247 = vst [vmem:[#allocation24_spill] sm:$0xff] %v7897_v59  ;;  %5856 = vrot.lane.b32.xlu1 %v7886_v35, %s7373_s15  ;;  %v911_v18 = vrot.slane %v7708_v19, 2  ;;  %v5870_v12 = vpack.i.bf16 %v892_v23, %v890_v53  ;;  %v895_v31 = vsel %vm11202_vm3, %v893_v42, %v894_v15  ;;  %v897_v43 = vsel %vm11202_vm3, %v894_v15, %v896_v56 }
  0x59   : > { %11248 = vst [vmem:[#allocation25_spill] sm:$0xff] %v7905_v63  ;;  %v900_v47 = vsel %vm11202_vm3, %v898_v5, %v899_v58  ;;  %v902_v8 = vsel %vm11202_vm3, %v899_v58, %v901_v30  ;;  %v905_v13 = vsel %vm11202_vm3, %v903_v22, %v904_v24  ;;  %v913_v29 = vrot.slane %v7710_v20, 2 }
  0x5a   : > { %5861 = vrot.lane.b32.xlu0 %v7897_v59, %s7373_s15  ;;  %v914_v35 = vrot.slane %v7712_v21, 2  ;;  %v907_v19 = vsel %vm11202_vm3, %v904_v24, %v906_v11  ;;  %v916_v53 = vrot.slane %v7718_v26, 2  ;;  %v918_v42 = vrot.slane %v7720_v27, 2 }
  0x5b   : > { %v919_v15 = vrot.slane %v7729_v32, 2  ;;  %v7925_v56 = vpack.i.bf16 %v897_v43, %v895_v31  ;;  %v910_v30 = vsel %vm11202_vm3, %v908_v36, %v909_v0  ;;  %v912_v5 = vsel %vm11202_vm3, %v909_v0, %v911_v18 }
  0x5c   : > { %5866 = vrot.lane.b32.xlu1 %v7905_v63, %s7373_s15  ;;  %v921_v58 = vrot.slane %v7731_v33, 2  ;;  %v7931_v23 = vpack.i.bf16 %v902_v8, %v900_v47  ;;  %v7933_v26 = vpack.i.bf16 %v907_v19, %v905_v13  ;;  %v915_v22 = vsel %vm11202_vm3, %v913_v29, %v914_v35  ;;  %s7377_s15 = smov 20  }
  0x5d   : > { %v7936_v24 = vpack.i.bf16 %v912_v5, %v910_v30  ;;  %v917_v11 = vsel %vm11202_vm3, %v914_v35, %v916_v53  ;;  %v920_v31 = vsel %vm11202_vm3, %v918_v42, %v919_v15  ;;  %v923_v36 = vrot.slane %v7733_v34, 2 }
  0x5e   : > { %5871 = vrot.lane.b32.xlu0 %v5870_v12, %s11223_s16  ;;  %v922_v33 = vsel %vm11202_vm3, %v919_v15, %v921_v58  ;;  %v924_v0 = vrot.slane %v7740_v39, 2  ;;  %v926_v18 = vrot.slane %v7742_v40, 2  ;;  %v928_v12 = vrot.slane %v7744_v41, 2  ;;  %v11249_v58 = vld [vmem:[#allocation15_spill] sm:$0xff] }
  0x5f   : > { %v929_v43 = vrot.slane %v7753_v46, 2  ;;  %v931_v47 = vrot.slane %v7759_v51, 2  ;;  %v933_v35 = vrot.slane %v7761_v52, 2  ;;  %v934_v8 = vrot.slane %v7769_v60, 2 }
  0x60   : > { %5876 = vrot.lane.b32.xlu1 %v7925_v56, %s11223_s16  ;;  %v936_v13 = vrot.slane %v7771_v1, 2  ;;  %v938_v29 = vrot.slane %v7778_v9, 2  ;;  %v939_v19 = vrot.slane %v7780_v16, 2  ;;  %v941_v40 = vrot.slane %v7782_v17, 2 }
  0x61   : > { %v7957_v53 = vpack.i.bf16 %v917_v11, %v915_v22  ;;  %v943_v42 = vrot.slane %v7791_v25, 2  ;;  %v944_v51 = vrot.slane %v7798_v37, 2  ;;  %v946_v15 = vrot.slane %v7800_v38, 2 }
  0x62   : > { %5881 = vrot.lane.b32.xlu0 %v7931_v23, %s11223_s16  ;;  %v7964_v30 = vpack.i.bf16 %v922_v33, %v920_v31  ;;  %v948_v1 = vrot.slane %v7808_v48, 2  ;;  %v949_v5 = vrot.slane %v7810_v49, 2  ;;  %v951_v63 = vrot.slane %v11249_v58, 2 }
  0x63   : > { %v925_v17 = vsel %vm11202_vm3, %v923_v36, %v924_v0  ;;  %v927_v22 = vsel %vm11202_vm3, %v924_v0, %v926_v18  ;;  %v930_v11 = vsel %vm11202_vm3, %v928_v12, %v929_v43  ;;  %v932_v59 = vsel %vm11202_vm3, %v929_v43, %v931_v47  ;;  %v11250_v0 = vld [vmem:[#allocation16_spill] sm:$0xff]  ;;  %v11251_v12 = vld [vmem:[#allocation19_spill] sm:$0xff] }
  0x64   : > { %5886 = vrot.lane.b32.xlu1 %v7933_v26, %s11223_s16  ;;  %v935_v38 = vsel %vm11202_vm3, %v933_v35, %v934_v8  ;;  %v937_v31 = vsel %vm11202_vm3, %v934_v8, %v936_v13  ;;  %v940_v33 = vsel %vm11202_vm3, %v938_v29, %v939_v19  ;;  %v942_v6 = vsel %vm11202_vm3, %v939_v19, %v941_v40  ;;  %v11252_v13 = vld [vmem:[#allocation17_spill] sm:$0xff] }
  0x65   : > { %v945_v58 = vsel %vm11202_vm3, %v943_v42, %v944_v51  ;;  %v947_v36 = vsel %vm11202_vm3, %v944_v51, %v946_v15  ;;  %v953_v18 = vrot.slane %v11250_v0, 2  ;;  %v954_v49 = vrot.slane %v11251_v12, 2 }
  0x66   : > { %5891 = vrot.lane.b32.xlu0 %v7936_v24, %s11223_s16  ;;  %v7985_v43 = vpack.i.bf16 %v927_v22, %v925_v17  ;;  %v950_v47 = vsel %vm11202_vm3, %v948_v1, %v949_v5  ;;  %v952_v35 = vsel %vm11202_vm3, %v949_v5, %v951_v63  ;;  %v7989_v8 = vpack.i.bf16 %v932_v59, %v930_v11  ;;  %v11253_v17 = vld [vmem:[#allocation21_spill] sm:$0xff] }
  0x67   : > { %v956_v29 = vrot.slane %v11252_v13, 2  ;;  %v7994_v19 = vpack.i.bf16 %v937_v31, %v935_v38  ;;  %v7996_v40 = vpack.i.bf16 %v942_v6, %v940_v33  ;;  %v7998_v42 = vpack.i.bf16 %v947_v36, %v945_v58 }
  0x68   : > { %5896 = vrot.lane.b32.xlu1 %v7957_v53, %s11223_s16  ;;  %v958_v51 = vrot.slane %v7839_v44, 2  ;;  %v8001_v15 = vpack.i.bf16 %v952_v35, %v950_v47  ;;  %v955_v1 = vsel %vm11202_vm3, %v953_v18, %v954_v49  ;;  %v959_v59 = vrot.slane %v7841_v2, 2 }
  0x69   : > { %v961_v63 = vrot.slane %v7843_v45, 2  ;;  %v957_v5 = vsel %vm11202_vm3, %v954_v49, %v956_v29  ;;  %v963_v6 = vrot.slane %v7849_v50, 2  ;;  %v964_v22 = vrot.slane %v11253_v17, 2 }
  0x6a   : > { %5901 = vrot.lane.b32.xlu0 %v7964_v30, %s11223_s16  ;;  %v966_v11 = vrot.slane %v7858_v28, 2  ;;  %v8016_v38 = vpack.i.bf16 %v957_v5, %v955_v1  ;;  %v960_v31 = vsel %vm11202_vm3, %v958_v51, %v959_v59  ;;  %v11254_v33 = vmov 0.0   ;;  %v11261_v51 = vld [vmem:[#allocation12_spill] sm:$0xff] }
  0x6b   : > { %v962_v49 = vsel %vm11202_vm3, %v959_v59, %v961_v63  ;;  %v965_v45 = vsel %vm11202_vm3, %v963_v6, %v964_v22  ;;  %456 = vst.msk [vmem:[#allocation3] sm:$0xff] %vm455_vm4, %v11254_v33  ;;  %457 = vst.msk [vmem:[#allocation3 + $0x8] sm:$0xff] %vm455_vm4, %v11254_v33  ;;  %v5950_v18 = vpack.i.bf16 %v7678_v62, %v7676_v61 }
  0x6c   : > { %5906 = vrot.lane.b32.xlu1 %v7985_v43, %s11223_s16  ;;  %460 = vst.msk [vmem:[#allocation3 + $0x18] sm:$0xff] %vm455_vm4, %v11254_v33  ;;  %461 = vst.msk [vmem:[#allocation3 + $0x20] sm:$0xff] %vm455_vm4, %v11254_v33  ;;  %v967_v28 = vsel %vm11202_vm3, %v964_v22, %v966_v11  ;;  %v8100_v58 = vpack.i.bf16 %v962_v49, %v960_v31  ;;  %v5955_v47 = vpack.i.bf16 %v7665_v55, %v7663_v54 }
  0x6d   : > { %463 = vst.msk [vmem:[#allocation3 + $0x30] sm:$0xff] %vm455_vm4, %v11254_v33  ;;  %464 = vst.msk [vmem:[#allocation3 + $0x38] sm:$0xff] %vm455_vm4, %v11254_v33  ;;  %v8104_v36 = vpack.i.bf16 %v967_v28, %v965_v45  ;;  %v5960_v35 = vpack.i.bf16 %v7690_v4, %v7688_v3  ;;  %v5965_v13 = vpack.i.bf16 %v7701_v14, %v7699_v10  ;;  %v7230_v4 = vld [vmem:[%s11255_s1 + $0x10] ss:$0 sps:$4 sm:$0x33]   ;;  %v11256_v14 = vld [vmem:[#allocation8_spill] sm:$0xff] }
  0x6e   : > { %5911 = vrot.lane.b32.xlu0 %v7989_v8, %s11223_s16  ;;  %466 = vst.msk [vmem:[#allocation3 + $0x48] sm:$0xff] %vm455_vm4, %v11254_v33  ;;  %467 = vst.msk [vmem:[#allocation3 + $0x50] sm:$0xff] %vm455_vm4, %v11254_v33  ;;  %v5970_v61 = vpack.i.bf16 %v7712_v21, %v7710_v20  ;;  %v8126_v54 = vpack.i.bf16 %v7729_v32, %v7720_v27  ;;  %v8131_v55 = vpack.i.bf16 %v7740_v39, %v7733_v34  ;;  %v7231_v20 = vld [vmem:[%s11255_s1 + $0x8] sm:$0xff]   ;;  %v11257_v21 = vld [vmem:[#allocation7_spill] sm:$0xff] }
  0x6f   : > { %469 = vst.msk [vmem:[#allocation3 + $0x60] sm:$0xff] %vm455_vm4, %v11254_v33  ;;  %470 = vst.msk [vmem:[#allocation3 + $0x68] sm:$0xff] %vm455_vm4, %v11254_v33  ;;  %v8137_v62 = vpack.i.bf16 %v7753_v46, %v7744_v41  ;;  %v8143_v3 = vpack.i.bf16 %v7769_v60, %v7761_v52  ;;  %5732 = vmatprep.subr.msk.bf16.mxu0 %vm11201_vm5, %v7230_v4  ;;  %v2022_v10 = vsel %vm11201_vm5, %v7230_v4, 0  ;;  %5733 = vmatprep.subr.msk.bf16.mxu1 %vm11201_vm5, %v7230_v4  ;;  %v7232_v27 = vld [vmem:[%s11255_s1] sm:$0xff]   ;;  %v5527_v32 = vld [vmem:[%s7613_s14 + $0x78] sm:$0xff]  }
  0x70   : > { %5916 = vrot.lane.b32.xlu1 %v7994_v19, %s11223_s16  ;;  %472 = vst.msk [vmem:[#allocation3 + $0x78] sm:$0xff] %vm455_vm4, %v11254_v33  ;;  %473 = vst.msk [vmem:[#allocation3 + $0x80] sm:$0xff] %vm455_vm4, %v11254_v33  ;;  %5595 = vmatpush3.bf16.msra.mxu0 %v2022_v10  ;;  %v11258_v34 = vld [vmem:[#allocation9_spill] sm:$0xff]  ;;  %v5511_v39 = vunpack.c.l.bf16 %v5527_v32  ;;  %v5512_v41 = vunpack.c.h.bf16 %v5527_v32  ;;  %v11259_v46 = vld [vmem:[#allocation10_spill] sm:$0xff] }
  0x71   : > { %475 = vst.msk [vmem:[#allocation3 + $0x90] sm:$0xff] %vm455_vm4, %v11254_v33  ;;  %476 = vst.msk [vmem:[#allocation3 + $0x98] sm:$0xff] %vm455_vm4, %v11254_v33  ;;  %5729 = vmatpush3.bf16.msra.mxu1 %v2022_v10  ;;  %5596 = vmatprep.subr.bf16.mxu0 %v7231_v20  ;;  %v11260_v60 = vld [vmem:[#allocation11_spill] sm:$0xff]  ;;  %v11268_v45 = vld [vmem:[#allocation18_spill] sm:$0xff] }
  0x72   : > { %5921 = vrot.lane.b32.xlu0 %v7996_v40, %s11223_s16  ;;  %478 = vst.msk [vmem:[#allocation3 + $0xa8] sm:$0xff] %vm455_vm4, %v11254_v33  ;;  %479 = vst.msk [vmem:[#allocation3 + $0xb0] sm:$0xff] %vm455_vm4, %v11254_v33  ;;  %5727 = vmatprep.subr.bf16.mxu1 %v7231_v20 }
  0x73   : > { %481 = vst.msk [vmem:[#allocation3 + $0xc0] sm:$0xff] %vm455_vm4, %v11254_v33  ;;  %482 = vst.msk [vmem:[#allocation3 + $0xc8] sm:$0xff] %vm455_vm4, %v11254_v33 }
  0x74   : > { %5926 = vrot.lane.b32.xlu1 %v7998_v42, %s11223_s16  ;;  %484 = vst.msk [vmem:[#allocation3 + $0xd8] sm:$0xff] %vm455_vm4, %v11254_v33  ;;  %485 = vst.msk [vmem:[#allocation3 + $0xe0] sm:$0xff] %vm455_vm4, %v11254_v33  ;;  %5597 = vmatpush3.bf16.msra.mxu0 %v7231_v20 }
  0x75   : > { %487 = vst.msk [vmem:[#allocation3 + $0xf0] sm:$0xff] %vm455_vm4, %v11254_v33  ;;  %488 = vst.msk [vmem:[#allocation3 + $0xf8] sm:$0xff] %vm455_vm4, %v11254_v33  ;;  %5730 = vmatpush3.bf16.msra.mxu1 %v7231_v20  ;;  %5598 = vmatprep.subr.bf16.mxu0 %v7232_v27 }
  0x76   : > { %490 = vst.msk [vmem:[#allocation3 + $0x108] sm:$0xff] %vm455_vm4, %v11254_v33  ;;  %491 = vst.msk [vmem:[#allocation3 + $0x110] sm:$0xff] %vm455_vm4, %v11254_v33  ;;  %5931 = vrot.lane.b32.xlu0 %v8001_v15, %s11223_s16  ;;  %5728 = vmatprep.subr.bf16.mxu1 %v7232_v27 }
  0x77   : > { %493 = vst.msk [vmem:[#allocation3 + $0x120] sm:$0xff] %vm455_vm4, %v11254_v33  ;;  %494 = vst.msk [vmem:[#allocation3 + $0x128] sm:$0xff] %vm455_vm4, %v11254_v33 }
  0x78   : > { %496 = vst.msk [vmem:[#allocation3 + $0x138] sm:$0xff] %vm455_vm4, %v11254_v33  ;;  %497 = vst.msk [vmem:[#allocation3 + $0x140] sm:$0xff] %vm455_vm4, %v11254_v33  ;;  %5936 = vrot.lane.b32.xlu1 %v8016_v38, %s11223_s16  ;;  %5599 = vmatpush3.bf16.msra.mxu0 %v7232_v27 }
  0x79   : > { %499 = vst.msk [vmem:[#allocation3 + $0x150] sm:$0xff] %vm455_vm4, %v11254_v33  ;;  %500 = vst.msk [vmem:[#allocation3 + $0x158] sm:$0xff] %vm455_vm4, %v11254_v33  ;;  %5731 = vmatpush3.bf16.msra.mxu1 %v7232_v27  ;;  %v11277_v27 = vld [vmem:[#allocation14_spill] sm:$0xff] }
  0x7a   : > { %502 = vst.msk [vmem:[#allocation3 + $0x168] sm:$0xff] %vm455_vm4, %v11254_v33  ;;  %503 = vst.msk [vmem:[#allocation3 + $0x170] sm:$0xff] %vm455_vm4, %v11254_v33  ;;  %5941 = vrot.lane.b32.xlu0 %v8100_v58, %s11223_s16 }
  0x7b   : > { %505 = vst.msk [vmem:[#allocation3 + $0x180] sm:$0xff] %vm455_vm4, %v11254_v33  ;;  %506 = vst.msk [vmem:[#allocation3 + $0x188] sm:$0xff] %vm455_vm4, %v11254_v33 }
  0x7c   : > { %508 = vst.msk [vmem:[#allocation3 + $0x198] sm:$0xff] %vm455_vm4, %v11254_v33  ;;  %509 = vst.msk [vmem:[#allocation3 + $0x1a0] sm:$0xff] %vm455_vm4, %v11254_v33  ;;  %5946 = vrot.lane.b32.xlu1 %v8104_v36, %s11223_s16 }
  0x7d   : > { %606 = vst.msk [vmem:[#allocation2 + $0x181] sm:$0xff] %vm11200_vm0, %v5511_v39  ;;  %607 = vst.msk [vmem:[#allocation2 + $0x189] sm:$0xff] %vm11200_vm0, %v5512_v41  ;;  %v11278_v41 = vld [vmem:[#allocation22_spill] sm:$0xff] }
  0x7e   : > { %5951 = vrot.lane.b32.xlu0 %v5950_v18, %s7375_s22 }
  0x80   : > { %5956 = vrot.lane.b32.xlu1 %v5955_v47, %s7375_s22 }
  0x82   : > { %5961 = vrot.lane.b32.xlu0 %v5960_v35, %s7375_s22 }
  0x84   : > { %5966 = vrot.lane.b32.xlu1 %v5965_v13, %s7375_s22 }
  0x86   : > { %5971 = vrot.lane.b32.xlu0 %v5970_v61, %s7375_s22 }
  0x88   : > { %5976 = vrot.lane.b32.xlu1 %v8126_v54, %s7375_s22 }
  0x8a   : > { %5981 = vrot.lane.b32.xlu0 %v8131_v55, %s7375_s22 }
  0x8c   : > { %5986 = vrot.lane.b32.xlu1 %v8137_v62, %s7375_s22 }
  0x8e   : > { %5991 = vrot.lane.b32.xlu0 %v8143_v3, %s7375_s22 }
  0x90   : > { %5996 = vrot.lane.b32.xlu1 %v11256_v14, %s11221_s30 }
  0x92   : > { %6001 = vrot.lane.b32.xlu0 %v11257_v21, %s11221_s30 }
  0x94   : > { %6006 = vrot.lane.b32.xlu1 %v7925_v56, %s7377_s15 }
  0x96   : > { %6011 = vrot.lane.b32.xlu0 %v7931_v23, %s7377_s15 }
  0x98   : > { %6016 = vrot.lane.b32.xlu1 %v5955_v47, %s11204_s12 }
  0x99   : > { %v8192_v52 = vpop.permute.xlu0 %5791 }
  0x9a   : > { %6021 = vrot.lane.b32.xlu0 %v5960_v35, %s11204_s12 }
  0x9c   : > { %6026 = vrot.lane.b32.xlu1 %v11257_v21, %s7379_s13 }
  0x9e   : > { %6031 = vrot.lane.b32.xlu0 %v11258_v34, %s7379_s13 }
  0xa0   : > { %6036 = vrot.lane.b32.xlu1 %v7931_v23, %s11215_s24 }
  0xa2   : > { %6041 = vrot.lane.b32.xlu0 %v7933_v26, %s11215_s24 }
  0xa4   : > { %6046 = vrot.lane.b32.xlu1 %v11258_v34, %s11221_s30 }
  0xa6   : > { %6051 = vrot.lane.b32.xlu0 %v11259_v46, %s11221_s30 }
  0xa8   : > { %6056 = vrot.lane.b32.xlu1 %v7933_v26, %s7377_s15 }
  0xaa   : > { %6061 = vrot.lane.b32.xlu0 %v7936_v24, %s7377_s15 }
  0xac   : > { %6066 = vrot.lane.b32.xlu1 %v5965_v13, %s11204_s12 }
  0xae   : > { %6071 = vrot.lane.b32.xlu0 %v5970_v61, %s11204_s12 }
  0xb0   : > { %6076 = vrot.lane.b32.xlu1 %v11259_v46, %s7379_s13  ;;  %v8353_v46 = vld [vmem:[#allocation2 + $0x180] sm:$0xff] }
  0xb2   : > { %6081 = vrot.lane.b32.xlu0 %v11260_v60, %s7379_s13  ;;  %v8198_v56 = vpop.permute.xlu1 %5801 }
  0xb4   : > { %v8200_v23 = vpop.permute.xlu0 %5796  ;;  %6086 = vrot.lane.b32.xlu1 %v7936_v24, %s11215_s24 }
  0xb6   : > { %6091 = vrot.lane.b32.xlu0 %v7957_v53, %s11215_s24  ;;  %v8206_v26 = vpop.permute.xlu1 %5806 }
  0xb8   : > { %v8208_v29 = vpop.permute.xlu0 %5811  ;;  %6096 = vrot.lane.b32.xlu1 %v11260_v60, %s11221_s30  ;;  %v8355_v60 = vld [vmem:[#allocation2 + $0x188] sm:$0xff] }
  0xba   : > { %6101 = vrot.lane.b32.xlu0 %v11261_v51, %s11221_s30  ;;  %v8214_v1 = vpop.permute.xlu1 %5816 }
  0xbc   : > { %v8216_v59 = vpop.permute.xlu0 %5821  ;;  %6106 = vrot.lane.b32.xlu1 %v7957_v53, %s7377_s15  ;;  %v11263_v53 = vld [vmem:[#allocation13_spill] sm:$0xff] }
  0xbe   : > { %6111 = vrot.lane.b32.xlu0 %v7964_v30, %s7377_s15  ;;  %v8222_v24 = vpop.permute.xlu1 %5826 }
  0xc0   : > { %v8224_v63 = vpop.permute.xlu0 %5831  ;;  %6116 = vrot.lane.b32.xlu1 %v8126_v54, %s11204_s12 }
  0xc2   : > { %6121 = vrot.lane.b32.xlu0 %v8131_v55, %s11204_s12  ;;  %v8230_v5 = vpop.permute.xlu1 %5836  ;;  %v6195_v55 = vpack.i.bf16 %v7780_v16, %v7778_v9 }
  0xc4   : > { %v8232_v6 = vpop.permute.xlu0 %5841  ;;  %6126 = vrot.lane.b32.xlu1 %v11261_v51, %s7379_s13 }
  0xc5   : > { %11262 = vst [vmem:[#allocation15_spill] sm:$0xff] %v8232_v6 }
  0xc6   : > { %6131 = vrot.lane.b32.xlu0 %v11263_v53, %s7379_s13  ;;  %v8238_v22 = vpop.permute.xlu1 %5846 }
  0xc7   : > { %11264 = vst [vmem:[#allocation16_spill] sm:$0xff] %v8238_v22 }
  0xc8   : > { %v8240_v11 = vpop.permute.xlu0 %5851  ;;  %6136 = vrot.lane.b32.xlu1 %v7964_v30, %s11215_s24 }
  0xc9   : > { %11265 = vst [vmem:[#allocation19_spill] sm:$0xff] %v8240_v11  ;;  %v11280_v11 = vld [vmem:[#allocation23_spill] sm:$0xff] }
  0xca   : > { %6141 = vrot.lane.b32.xlu0 %v7985_v43, %s11215_s24  ;;  %v8246_v31 = vpop.permute.xlu1 %5856 }
  0xcb   : > { %11266 = vst [vmem:[#allocation17_spill] sm:$0xff] %v8246_v31 }
  0xcc   : > { %v8248_v49 = vpop.permute.xlu0 %5861  ;;  %6146 = vrot.lane.b32.xlu1 %v11263_v53, %s11221_s30  ;;  %v8365_v53 = vld [vmem:[#allocation2 + $0x190] sm:$0x3] }
  0xcd   : > { %11267 = vst [vmem:[#allocation21_spill] sm:$0xff] %v8248_v49 }
  0xce   : > { %6151 = vrot.lane.b32.xlu0 %v11268_v45, %s11221_s30  ;;  %v8254_v28 = vpop.permute.xlu1 %5866 }
  0xcf   : > { %11269 = vst [vmem:[#allocation8_spill] sm:$0xff] %v8254_v28 }
  0xd0   : > { %v8256_v18 = vpop.permute.xlu0 %5871  ;;  %6156 = vrot.lane.b32.xlu1 %v7985_v43, %s7377_s15  ;;  %v11270_v43 = vld [vmem:[#allocation20_spill] sm:$0xff] }
  0xd2   : > { %6161 = vrot.lane.b32.xlu0 %v7989_v8, %s7377_s15  ;;  %v8262_v30 = vpop.permute.xlu1 %5876 }
  0xd4   : > { %v8264_v47 = vpop.permute.xlu0 %5881  ;;  %6166 = vrot.lane.b32.xlu1 %v8137_v62, %s11204_s12 }
  0xd6   : > { %6171 = vrot.lane.b32.xlu0 %v8143_v3, %s11204_s12  ;;  %v8270_v35 = vpop.permute.xlu1 %5886 }
  0xd8   : > { %v8272_v13 = vpop.permute.xlu0 %5891  ;;  %6176 = vrot.lane.b32.xlu1 %v11268_v45, %s7379_s13  ;;  %v1163_v45 = vrot.slane %v8353_v46, 1 }
  0xda   : > { %6181 = vrot.lane.b32.xlu0 %v11270_v43, %s7379_s13  ;;  %v8278_v61 = vpop.permute.xlu1 %5896 }
  0xdc   : > { %v8280_v54 = vpop.permute.xlu0 %5901  ;;  %6186 = vrot.lane.b32.xlu1 %v7989_v8, %s11215_s24  ;;  %v6225_v8 = vpack.i.bf16 %v7798_v37, %v7791_v25 }
  0xde   : > { %6191 = vrot.lane.b32.xlu0 %v7994_v19, %s11215_s24  ;;  %v8288_v62 = vpop.permute.xlu1 %5906 }
  0xe0   : > { %v8290_v3 = vpop.permute.xlu0 %5911  ;;  %6196 = vrot.lane.b32.xlu1 %v6195_v55, %s7375_s22 }
  0xe2   : > { %6201 = vrot.lane.b32.xlu0 %v11270_v43, %s11221_s30  ;;  %v8295_v4 = vpop.permute.xlu1 %5916  ;;  %v1164_v43 = vrot.slane %v8355_v60, 1 }
  0xe4   : > { %v8297_v10 = vpop.permute.xlu0 %5921  ;;  %6206 = vrot.lane.b32.xlu1 %v7855_v57, %s11221_s30  ;;  %v8392_v49 = vsel %vm11203_vm2, %v1163_v45, %v1164_v43 }
  0xe5   : > { %11271 = vst [vmem:[#allocation7_spill] sm:$0xff] %v8297_v10  ;;  %v7248_v10 = vld [vmem:[#allocation2 + $0x18] sm:$0xff] }
  0xe6   : > { %6211 = vrot.lane.b32.xlu0 %v7994_v19, %s7377_s15  ;;  %v8303_v9 = vpop.permute.xlu1 %5926 }
  0xe7   : > { %11272 = vst [vmem:[#allocation9_spill] sm:$0xff] %v8303_v9 }
  0xe8   : > { %v8305_v16 = vpop.permute.xlu0 %5931  ;;  %6216 = vrot.lane.b32.xlu1 %v7996_v40, %s7377_s15 }
  0xe9   : > { %11273 = vst [vmem:[#allocation10_spill] sm:$0xff] %v8305_v16 }
  0xea   : > { %6221 = vrot.lane.b32.xlu0 %v6195_v55, %s11204_s12  ;;  %v8312_v14 = vpop.permute.xlu1 %5936  ;;  %v5794_v55 = vunpack.i.h.bf16 %v8192_v52 }
  0xeb   : > { %11274 = vst [vmem:[#allocation11_spill] sm:$0xff] %v8312_v14 }
  0xec   : > { %v8314_v20 = vpop.permute.xlu0 %5941  ;;  %6226 = vrot.lane.b32.xlu1 %v6225_v8, %s11204_s12 }
  0xed   : > { %11275 = vst [vmem:[#allocation12_spill] sm:$0xff] %v8314_v20  ;;  %v5798_v20 = vunpack.i.l.bf16 %v8200_v23 }
  0xee   : > { %6231 = vrot.lane.b32.xlu0 %v7855_v57, %s7379_s13  ;;  %v8319_v19 = vpop.permute.xlu1 %5946  ;;  %v6255_v57 = vpack.i.bf16 %v11277_v27, %v7808_v48 }
  0xef   : > { %11276 = vst [vmem:[#allocation13_spill] sm:$0xff] %v8319_v19  ;;  %v5799_v19 = vunpack.i.h.bf16 %v8200_v23  ;;  %v5879_v23 = vunpack.i.h.bf16 %v8262_v30 }
  0xf0   : > { %v8321_v21 = vpop.permute.xlu0 %5951  ;;  %6236 = vrot.lane.b32.xlu1 %v7868_v7, %s7379_s13 }
  0xf1   : > { %v5954_v16 = vunpack.i.h.bf16 %v8321_v21  ;;  %v5953_v31 = vunpack.i.l.bf16 %v8321_v21  ;;  %v1668_v21 = vsel %vm11200_vm0, %v7248_v10, %v5798_v20 }
  0xf2   : > { %6241 = vrot.lane.b32.xlu0 %v7996_v40, %s11215_s24  ;;  %v8327_v25 = vpop.permute.xlu1 %5956 }
  0xf3   : > { %v5959_v22 = vunpack.i.h.bf16 %v8327_v25  ;;  %v5958_v6 = vunpack.i.l.bf16 %v8327_v25 }
  0xf4   : > { %v8329_v37 = vpop.permute.xlu0 %5961  ;;  %6246 = vrot.lane.b32.xlu1 %v7998_v42, %s11215_s24 }
  0xf6   : > { %6251 = vrot.lane.b32.xlu0 %v6225_v8, %s7375_s22  ;;  %v8336_v32 = vpop.permute.xlu1 %5966  ;;  %v1166_v8 = vrot.slane %v8365_v53, 1 }
  0xf8   : > { %v8338_v34 = vpop.permute.xlu0 %5971  ;;  %6256 = vrot.lane.b32.xlu1 %v6255_v57, %s7375_s22  ;;  %v8398_v14 = vsel %vm11203_vm2, %v1164_v43, %v1166_v8 }
  0xfa   : > { %6261 = vrot.lane.b32.xlu0 %v7868_v7, %s11221_s30  ;;  %v8343_v40 = vpop.permute.xlu1 %5976  ;;  %v8363_v7 = vpack.i.bf16 %v11251_v12, %v11250_v0  ;;  %v8380_v0 = vpack.i.bf16 %v7841_v2, %v7839_v44  ;;  %v5793_v12 = vunpack.i.l.bf16 %v8192_v52  ;;  %v7245_v2 = vld [vmem:[#allocation2 + $0x8] sm:$0xff]  ;;  %v5874_v52 = vunpack.i.h.bf16 %v8256_v18 }
  0xfb   : > { %v1667_v44 = vsel %vm11200_vm0, %v7245_v2, %v5794_v55  ;;  %v7246_v55 = vld [vmem:[#allocation2] sm:$0xff] }
  0xfc   : > { %v8345_v39 = vpop.permute.xlu0 %5981  ;;  %6266 = vrot.lane.b32.xlu1 %v11278_v41, %s11221_s30  ;;  %v1666_v2 = vsel %vm11200_vm0, %v7246_v55, %v5793_v12  ;;  %v1699_v55 = vsel %vm455_vm4, %v1667_v44, %v5874_v52 }
  0xfd   : > { %v1732_v25 = vsel %vm1730_vm6, %v1699_v55, %v5954_v16 }
  0xfe   : > { %6271 = vrot.lane.b32.xlu0 %v7998_v42, %s7377_s15  ;;  %v8351_v48 = vpop.permute.xlu1 %5986 }
 0x100   : > { %v8357_v51 = vpop.permute.xlu0 %5991  ;;  %6276 = vrot.lane.b32.xlu1 %v8001_v15, %s7377_s15 }
 0x101   : > { %11279 = vst [vmem:[#allocation18_spill] sm:$0xff] %v8357_v51 }
 0x102   : > { %6281 = vrot.lane.b32.xlu0 %v6255_v57, %s11204_s12  ;;  %v8368_v42 = vpop.permute.xlu1 %5996  ;;  %v5873_v57 = vunpack.i.l.bf16 %v8256_v18 }
 0x103   : > { %v5999_v8 = vunpack.i.h.bf16 %v8368_v42 }
 0x104   : > { %v8374_v27 = vpop.permute.xlu0 %6001  ;;  %6286 = vrot.lane.b32.xlu1 %v8363_v7, %s11204_s12  ;;  %v1698_v18 = vsel %vm455_vm4, %v1666_v2, %v5873_v57 }
 0x105   : > { %v1731_v20 = vsel %vm1730_vm6, %v1698_v18, %v5953_v31  ;;  %v6003_v57 = vunpack.i.l.bf16 %v8374_v27  ;;  %v1765_v2 = vsel %vm11199_vm7, %v1732_v25, %v5999_v8 }
 0x106   : > { %6291 = vrot.lane.b32.xlu0 %v11278_v41, %s7379_s13  ;;  %v8389_v28 = vpop.permute.xlu1 %6006  ;;  %v5878_v41 = vunpack.i.l.bf16 %v8262_v30  ;;  %v7247_v30 = vld [vmem:[#allocation2 + $0x20] sm:$0xff] }
 0x107   : > { %v1669_v9 = vsel %vm11200_vm0, %v7247_v30, %v5799_v19  ;;  %v5998_v19 = vunpack.i.l.bf16 %v8368_v42  ;;  %v6009_v44 = vunpack.i.h.bf16 %v8389_v28  ;;  %v6008_v42 = vunpack.i.l.bf16 %v8389_v28 }
 0x108   : > { %v6012_v45 = vpop.permute.xlu0 %6011  ;;  %6296 = vrot.lane.b32.xlu1 %v11280_v11, %s7379_s13  ;;  %v1700_v30 = vsel %vm455_vm4, %v1668_v21, %v5878_v41  ;;  %v1701_v10 = vsel %vm455_vm4, %v1669_v9, %v5879_v23 }
 0x109   : > { %v1733_v52 = vsel %vm1730_vm6, %v1700_v30, %v5958_v6  ;;  %v1734_v9 = vsel %vm1730_vm6, %v1701_v10, %v5959_v22  ;;  %v6014_v31 = vunpack.i.h.bf16 %v6012_v45  ;;  %v6013_v23 = vunpack.i.l.bf16 %v6012_v45 }
 0x10a   : > { %6301 = vrot.lane.b32.xlu0 %v8001_v15, %s11215_s24  ;;  %v6017_v12 = vpop.permute.xlu1 %6016  ;;  %v6004_v15 = vunpack.i.h.bf16 %v8374_v27  ;;  %v1764_v41 = vsel %vm11199_vm7, %v1731_v20, %v5998_v19  ;;  %v1766_v6 = vsel %vm11199_vm7, %v1733_v52, %v6003_v57  ;;  %v1798_v45 = vsel %vm1796_vm8, %v1765_v2, %v6009_v44  ;;  %v11281_v52 = vld [vmem:[#allocation24_spill] sm:$0xff] }
 0x10b   : > { %v6019_v27 = vunpack.i.h.bf16 %v6017_v12  ;;  %v6018_v18 = vunpack.i.l.bf16 %v6017_v12  ;;  %v1799_v8 = vsel %vm1796_vm8, %v1766_v6, %v6013_v23 }
 0x10c   : > { %v6022_v43 = vpop.permute.xlu0 %6021  ;;  %6306 = vrot.lane.b32.xlu1 %v8016_v38, %s11215_s24  ;;  %v1767_v22 = vsel %vm11199_vm7, %v1734_v9, %v6004_v15 }
 0x10d   : > { %v6024_v21 = vunpack.i.h.bf16 %v6022_v43  ;;  %v6023_v55 = vunpack.i.l.bf16 %v6022_v43  ;;  %v1800_v12 = vsel %vm1796_vm8, %v1767_v22, %v6014_v31  ;;  %v1831_v15 = vsel %vm11198_vm9, %v1798_v45, %v6019_v27  ;;  %v8479_v45 = vld [vmem:[#allocation2 + $0x1a0] sm:$0xff] }
 0x10e   : > { %6311 = vrot.lane.b32.xlu0 %v8363_v7, %s7375_s22  ;;  %v6027_v16 = vpop.permute.xlu1 %6026  ;;  %v1797_v7 = vsel %vm1796_vm8, %v1764_v41, %v6008_v42  ;;  %v5804_v41 = vunpack.i.h.bf16 %v8198_v56 }
 0x10f   : > { %v6029_v28 = vunpack.i.h.bf16 %v6027_v16  ;;  %v6028_v33 = vunpack.i.l.bf16 %v6027_v16  ;;  %v1830_v25 = vsel %vm11198_vm9, %v1797_v7, %v6018_v18  ;;  %v1832_v57 = vsel %vm11198_vm9, %v1799_v8, %v6023_v55  ;;  %v8471_v7 = vld [vmem:[#allocation2 + $0x168] sm:$0xff] }
 0x110   : > { %v6032_v51 = vpop.permute.xlu0 %6031  ;;  %6316 = vrot.lane.b32.xlu1 %v8380_v0, %s7375_s22  ;;  %v1833_v44 = vsel %vm11198_vm9, %v1800_v12, %v6024_v21  ;;  %v5803_v21 = vunpack.i.l.bf16 %v8198_v56  ;;  %v8477_v56 = vpack.i.bf16 %v8355_v60, %v8353_v46  ;;  %v8483_v8 = vpack.i.bf16 %v8398_v14, %v8392_v49 }
 0x111   : > { %v6034_v19 = vunpack.i.h.bf16 %v6032_v51  ;;  %v6033_v43 = vunpack.i.l.bf16 %v6032_v51  ;;  %v1863_v51 = vsel %vm1862_vm10, %v1830_v25, %v6028_v33  ;;  %v1864_v9 = vsel %vm1862_vm10, %v1831_v15, %v6029_v28 }
 0x112   : > { %6321 = vrot.lane.b32.xlu0 %v11280_v11, %s11221_s30  ;;  %v6037_v30 = vpop.permute.xlu1 %6036  ;;  %v11282_v12 = vrot.slane %v8355_v60, 2  ;;  %v5808_v25 = vunpack.i.l.bf16 %v8206_v26  ;;  %v11284_v14 = vrot.slane %v8365_v53, 2  ;;  %v5889_v53 = vunpack.i.h.bf16 %v8270_v35 }
 0x113   : > { %v6039_v10 = vunpack.i.h.bf16 %v6037_v30  ;;  %v6038_v20 = vunpack.i.l.bf16 %v6037_v30  ;;  %v1865_v2 = vsel %vm1862_vm10, %v1832_v57, %v6033_v43  ;;  %v1866_v27 = vsel %vm1862_vm10, %v1833_v44, %v6034_v19  ;;  %v7250_v30 = vld [vmem:[#allocation2 + $0x38] sm:$0xff]  ;;  %v8507_v44 = vld [vmem:[#allocation2 + $0x1a8] sm:$0x3] }
 0x114   : > { %v6042_v42 = vpop.permute.xlu0 %6041  ;;  %6326 = vrot.lane.b32.xlu1 %v11281_v52, %s11221_s30  ;;  %v11283_v19 = vrot.slane %v8353_v46, 2  ;;  %v11285_v46 = vmov %v11282_v12  ;;  %v8505_v57 = vld [vmem:[#allocation2 + $0x198] sm:$0xff]  ;;  %v5888_v60 = vunpack.i.l.bf16 %v8270_v35 }
 0x115   : > { %v6044_v11 = vunpack.i.h.bf16 %v6042_v42  ;;  %v6043_v31 = vunpack.i.l.bf16 %v6042_v42  ;;  %v1896_v23 = vsel %vm11197_vm11, %v1863_v51, %v6038_v20  ;;  %v1897_v16 = vsel %vm11197_vm11, %v1864_v9, %v6039_v10  ;;  %v7251_v42 = vld [vmem:[#allocation2 + $0x30] sm:$0xff] }
 0x116   : > { %6331 = vrot.lane.b32.xlu0 %v8016_v38, %s7377_s15  ;;  %v8461_v18 = vpop.permute.xlu1 %6046  ;;  %v1928_v33 = vpack.c.bf16 %v1897_v16, %v1896_v23  ;;  %v6370_v38 = vpack.i.bf16 %v11253_v17, %v8471_v7  ;;  %v8490_v43 = vsel %vm11202_vm3, %v11283_v19, %v11282_v12  ;;  %v1671_v10 = vsel %vm11200_vm0, %v7250_v30, %v5804_v41 }
 0x117   : > { %v1898_v55 = vsel %vm11197_vm11, %v1865_v2, %v6043_v31  ;;  %v1899_v28 = vsel %vm11197_vm11, %v1866_v27, %v6044_v11  ;;  %v5809_v20 = vunpack.i.h.bf16 %v8206_v26  ;;  %v8503_v15 = vsel %vm11202_vm3, %v11285_v46, %v11284_v14 }
 0x118   : > { %v8466_v6 = vpop.permute.xlu0 %6051  ;;  %6336 = vrot.lane.b32.xlu1 %v8100_v58, %s7377_s15  ;;  %5600 = vmatprep.mubr.msk.bf16.mxu0 %vm1971_vm12, %v1928_v33  ;;  %v1929_v22 = vpack.c.bf16 %v1899_v28, %v1898_v55  ;;  %v1670_v26 = vsel %vm11200_vm0, %v7251_v42, %v5803_v21  ;;  %v5884_v51 = vunpack.i.h.bf16 %v8264_v47  ;;  %v1465_v9 = vrot.slane %v8479_v45, 1  ;;  %v7252_v33 = vld [vmem:[#allocation2 + $0x50] sm:$0xff]  ;;  %v7253_v21 = vld [vmem:[#allocation2 + $0x48] sm:$0xff] }
 0x119   : > { %v5964_v11 = vunpack.i.h.bf16 %v8329_v37  ;;  %v5963_v31 = vunpack.i.l.bf16 %v8329_v37  ;;  %v11286_v16 = vpack.i.bf16 %v11253_v17, %v7849_v50  ;;  %v1566_v41 = vrot.slane %v8479_v45, 2 }
 0x11a   : > { %6341 = vrot.lane.b32.xlu0 %v8380_v0, %s11204_s12  ;;  %5601 = vmatmul.mubr.msk.bf16.vlgmr.msra.gmra.mxu0 %vm1971_vm12, %v1929_v22  ;;  %v6057_v49 = vpop.permute.xlu1 %6056  ;;  %v5883_v0 = vunpack.i.l.bf16 %v8264_v47  ;;  %v1464_v47 = vrot.slane %v8505_v57, 1  ;;  %v1565_v2 = vrot.slane %v8505_v57, 2  ;;  %v1467_v27 = vrot.slane %v8507_v44, 1 }
 0x11b   : > { %v1673_v35 = vsel %vm11200_vm0, %v7252_v33, %v5809_v20  ;;  %v1672_v37 = vsel %vm11200_vm0, %v7253_v21, %v5808_v25  ;;  %v5969_v55 = vunpack.i.h.bf16 %v8336_v32  ;;  %v5968_v28 = vunpack.i.l.bf16 %v8336_v32 }
 0x11c   : > { %v6062_v23 = vpop.permute.xlu0 %6061  ;;  %6346 = vrot.lane.b32.xlu1 %v11286_v16, %s11204_s12  ;;  %v1703_v22 = vsel %vm455_vm4, %v1671_v10, %v5884_v51  ;;  %v1702_v12 = vsel %vm455_vm4, %v1670_v26, %v5883_v0  ;;  %v6049_v19 = vunpack.i.h.bf16 %v8461_v18  ;;  %v6048_v30 = vunpack.i.l.bf16 %v8461_v18 }
 0x11d   : > { %v1705_v20 = vsel %vm455_vm4, %v1673_v35, %v5889_v53  ;;  %v1704_v25 = vsel %vm455_vm4, %v1672_v37, %v5888_v60  ;;  %v1735_v14 = vsel %vm1730_vm6, %v1702_v12, %v5963_v31  ;;  %v1736_v32 = vsel %vm1730_vm6, %v1703_v22, %v5964_v11 }
 0x11e   : > { %6351 = vrot.lane.b32.xlu0 %v11281_v52, %s7379_s13  ;;  %v6067_v50 = vpop.permute.xlu1 %6066  ;;  %v11287_v52 = vld [vmem:[#allocation25_spill] sm:$0xff]  ;;  %v6054_v10 = vunpack.i.h.bf16 %v8466_v6  ;;  %v6053_v42 = vunpack.i.l.bf16 %v8466_v6  ;;  %v6059_v26 = vunpack.i.h.bf16 %v6057_v49  ;;  %v6058_v51 = vunpack.i.l.bf16 %v6057_v49 }
 0x11f   : > { %v1737_v18 = vsel %vm1730_vm6, %v1704_v25, %v5968_v28  ;;  %v1738_v0 = vsel %vm1730_vm6, %v1705_v20, %v5969_v55  ;;  %v6064_v53 = vunpack.i.h.bf16 %v6062_v23  ;;  %v6063_v60 = vunpack.i.l.bf16 %v6062_v23 }
 0x120   : > { %v6072_v46 = vpop.permute.xlu0 %6071  ;;  %6356 = vrot.lane.b32.xlu1 %v11287_v52, %s7379_s13  ;;  %v1768_v31 = vsel %vm11199_vm7, %v1735_v14, %v6048_v30  ;;  %v1769_v16 = vsel %vm11199_vm7, %v1736_v32, %v6049_v19  ;;  %v6069_v33 = vunpack.i.h.bf16 %v6067_v50  ;;  %v6068_v35 = vunpack.i.l.bf16 %v6067_v50 }
 0x121   : > { %v6074_v21 = vunpack.i.h.bf16 %v6072_v46  ;;  %v6073_v6 = vunpack.i.l.bf16 %v6072_v46  ;;  %v1771_v23 = vsel %vm11199_vm7, %v1738_v0, %v6054_v10  ;;  %v1770_v55 = vsel %vm11199_vm7, %v1737_v18, %v6053_v42 }
 0x122   : > { %6361 = vrot.lane.b32.xlu0 %v8100_v58, %s11215_s24  ;;  %v6077_v11 = vpop.permute.xlu1 %6076  ;;  %v1801_v58 = vsel %vm1796_vm8, %v1768_v31, %v6058_v51  ;;  %v1802_v28 = vsel %vm1796_vm8, %v1769_v16, %v6059_v26  ;;  %v1803_v12 = vsel %vm1796_vm8, %v1770_v55, %v6063_v60  ;;  %v1804_v50 = vsel %vm1796_vm8, %v1771_v23, %v6064_v53 }
 0x123   : > { %v6079_v37 = vunpack.i.h.bf16 %v6077_v11  ;;  %v6078_v49 = vunpack.i.l.bf16 %v6077_v11  ;;  %v1834_v25 = vsel %vm11198_vm9, %v1801_v58, %v6068_v35  ;;  %v1835_v14 = vsel %vm11198_vm9, %v1802_v28, %v6069_v33 }
 0x124   : > { %v6082_v22 = vpop.permute.xlu0 %6081  ;;  %6366 = vrot.lane.b32.xlu1 %v8104_v36, %s11215_s24  ;;  %v1836_v10 = vsel %vm11198_vm9, %v1803_v12, %v6073_v6  ;;  %v1837_v42 = vsel %vm11198_vm9, %v1804_v50, %v6074_v21  ;;  %v8582_v16 = vsel %vm11203_vm2, %v1464_v47, %v1465_v9  ;;  %v1568_v21 = vrot.slane %v8507_v44, 2  ;;  %v7255_v50 = vld [vmem:[#allocation2 + $0x60] sm:$0xff] }
 0x125   : > { %v6084_v19 = vunpack.i.h.bf16 %v6082_v22  ;;  %v6083_v30 = vunpack.i.l.bf16 %v6082_v22  ;;  %v1867_v26 = vsel %vm1862_vm10, %v1834_v25, %v6078_v49  ;;  %v1868_v51 = vsel %vm1862_vm10, %v1835_v14, %v6079_v37 }
 0x126   : > { %6371 = vrot.lane.b32.xlu0 %v6370_v38, %s7375_s22  ;;  %v6087_v20 = vpop.permute.xlu1 %6086  ;;  %v8601_v37 = vpack.i.bf16 %v8503_v15, %v8490_v43  ;;  %v5814_v49 = vunpack.i.h.bf16 %v8208_v29  ;;  %v5813_v22 = vunpack.i.l.bf16 %v8208_v29  ;;  %v5818_v44 = vunpack.i.l.bf16 %v8214_v1 }
 0x127   : > { %v6089_v32 = vunpack.i.h.bf16 %v6087_v20  ;;  %v6088_v46 = vunpack.i.l.bf16 %v6087_v20  ;;  %v1869_v53 = vsel %vm1862_vm10, %v1836_v10, %v6083_v30  ;;  %v1870_v60 = vsel %vm1862_vm10, %v1837_v42, %v6084_v19  ;;  %v7257_v30 = vld [vmem:[#allocation2 + $0x78] sm:$0xff] }
 0x128   : > { %v6092_v18 = vpop.permute.xlu0 %6091  ;;  %6376 = vrot.lane.b32.xlu1 %v8477_v56, %s7375_s22  ;;  %v6405_v23 = vpack.i.bf16 %v8479_v45, %v8505_v57  ;;  %v5894_v15 = vunpack.i.h.bf16 %v8272_v13  ;;  %v5893_v29 = vunpack.i.l.bf16 %v8272_v13  ;;  %v5899_v55 = vunpack.i.h.bf16 %v8278_v61  ;;  %v7254_v57 = vld [vmem:[#allocation2 + $0x68] sm:$0xff]  ;;  %s11206_s22 = smov 48  }
 0x129   : > { %v1900_v17 = vsel %vm11197_vm11, %v1867_v26, %v6088_v46  ;;  %v1901_v7 = vsel %vm11197_vm11, %v1868_v51, %v6089_v32  ;;  %v6094_v38 = vunpack.i.h.bf16 %v6092_v18  ;;  %v6093_v0 = vunpack.i.l.bf16 %v6092_v18 }
 0x12a   : > { %6381 = vrot.lane.b32.xlu0 %v11287_v52, %s11221_s30  ;;  %v8575_v11 = vpop.permute.xlu1 %6096  ;;  %v1930_v31 = vpack.c.bf16 %v1901_v7, %v1900_v17  ;;  %v8591_v52 = vsel %vm11203_vm2, %v1465_v9, %v1467_v27  ;;  %v5819_v9 = vunpack.i.h.bf16 %v8214_v1  ;;  %v8621_v1 = vsel %vm11202_vm3, %v1565_v2, %v1566_v41 }
 0x12b   : > { %v1902_v33 = vsel %vm11197_vm11, %v1869_v53, %v6093_v0  ;;  %v1903_v35 = vsel %vm11197_vm11, %v1870_v60, %v6094_v38  ;;  %v6415_v43 = vpack.i.bf16 %v8591_v52, %v8582_v16  ;;  %v5898_v58 = vunpack.i.l.bf16 %v8278_v61 }
 0x12c   : > { %v8594_v6 = vpop.permute.xlu0 %6101  ;;  %6386 = vrot.lane.b32.xlu1 %v8483_v8, %s11221_s30  ;;  %5604 = vmatprep.mubr.msk.bf16.mxu0 %vm1971_vm12, %v1930_v31  ;;  %v1931_v47 = vpack.c.bf16 %v1903_v35, %v1902_v33  ;;  %v5974_v28 = vunpack.i.h.bf16 %v8338_v34  ;;  %v5973_v13 = vunpack.i.l.bf16 %v8338_v34  ;;  %v1675_v2 = vsel %vm11200_vm0, %v7254_v57, %v5814_v49 }
 0x12d   : > { %v1674_v45 = vsel %vm11200_vm0, %v7255_v50, %v5813_v22  ;;  %v1676_v61 = vsel %vm11200_vm0, %v7257_v30, %v5818_v44  ;;  %v5979_v20 = vunpack.i.h.bf16 %v8343_v40  ;;  %v5978_v34 = vunpack.i.l.bf16 %v8343_v40 }
 0x12e   : > { %6391 = vrot.lane.b32.xlu0 %v8104_v36, %s7377_s15  ;;  %5605 = vmatmul.mubr.msk.bf16.gmra.mxu0 %vm1971_vm12, %v1931_v47  ;;  %v6107_v27 = vpop.permute.xlu1 %6106  ;;  %v8626_v36 = vsel %vm11202_vm3, %v1566_v41, %v1568_v21  ;;  %v7256_v41 = vld [vmem:[#allocation2 + $0x80] sm:$0xff]  ;;  %v1706_v32 = vsel %vm455_vm4, %v1674_v45, %v5893_v29  ;;  %v1707_v46 = vsel %vm455_vm4, %v1675_v2, %v5894_v15  ;;  %v6099_v10 = vunpack.i.h.bf16 %v8575_v11 }
 0x12f   : > { %v1677_v19 = vsel %vm11200_vm0, %v7256_v41, %v5819_v9  ;;  %v6425_v14 = vpack.i.bf16 %v8626_v36, %v8621_v1  ;;  %v6098_v42 = vunpack.i.l.bf16 %v8575_v11  ;;  %v1708_v51 = vsel %vm455_vm4, %v1676_v61, %v5898_v58 }
 0x130   : > { %v6112_v12 = vpop.permute.xlu0 %6111  ;;  %6396 = vrot.lane.b32.xlu1 %v8601_v37, %s7377_s15  ;;  %v1709_v26 = vsel %vm455_vm4, %v1677_v19, %v5899_v55  ;;  %v1739_v40 = vsel %vm1730_vm6, %v1706_v32, %v5973_v13  ;;  %v6104_v17 = vunpack.i.h.bf16 %v8594_v6  ;;  %v6103_v7 = vunpack.i.l.bf16 %v8594_v6  ;;  %s11213_s15 = smov 40  }
 0x131   : > { %v6109_v38 = vunpack.i.h.bf16 %v6107_v27  ;;  %v6108_v0 = vunpack.i.l.bf16 %v6107_v27  ;;  %v1741_v53 = vsel %vm1730_vm6, %v1708_v51, %v5978_v34  ;;  %v1742_v60 = vsel %vm1730_vm6, %v1709_v26, %v5979_v20 }
 0x132   : > { %6401 = vrot.lane.b32.xlu0 %v8477_v56, %s11204_s12  ;;  %v6117_v25 = vpop.permute.xlu1 %6116  ;;  %v1740_v56 = vsel %vm1730_vm6, %v1707_v46, %v5974_v28  ;;  %v6114_v11 = vunpack.i.h.bf16 %v6112_v12  ;;  %v6113_v31 = vunpack.i.l.bf16 %v6112_v12  ;;  %v1772_v33 = vsel %vm11199_vm7, %v1739_v40, %v6098_v42 }
 0x133   : > { %v1773_v35 = vsel %vm11199_vm7, %v1740_v56, %v6099_v10  ;;  %v6119_v52 = vunpack.i.h.bf16 %v6117_v25  ;;  %v6118_v21 = vunpack.i.l.bf16 %v6117_v25  ;;  %v1775_v44 = vsel %vm11199_vm7, %v1742_v60, %v6104_v17  ;;  %v7258_v60 = vld [vmem:[#allocation2 + $0x98] sm:$0xff] }
 0x134   : > { %v6122_v18 = vpop.permute.xlu0 %6121  ;;  %6406 = vrot.lane.b32.xlu1 %v6405_v23, %s11204_s12  ;;  %v1774_v27 = vsel %vm11199_vm7, %v1741_v53, %v6103_v7  ;;  %v1806_v23 = vsel %vm1796_vm8, %v1773_v35, %v6109_v38  ;;  %v1808_v29 = vsel %vm1796_vm8, %v1775_v44, %v6114_v11  ;;  %v5824_v42 = vunpack.i.h.bf16 %v8216_v59  ;;  %v7261_v35 = vld [vmem:[#allocation2 + $0xa8] sm:$0xff] }
 0x135   : > { %v6124_v47 = vunpack.i.h.bf16 %v6122_v18  ;;  %v6123_v6 = vunpack.i.l.bf16 %v6122_v18  ;;  %v1807_v15 = vsel %vm1796_vm8, %v1774_v27, %v6113_v31  ;;  %v1839_v58 = vsel %vm11198_vm9, %v1806_v23, %v6119_v52 }
 0x136   : > { %6411 = vrot.lane.b32.xlu0 %v8483_v8, %s7379_s13  ;;  %v6127_v16 = vpop.permute.xlu1 %6126  ;;  %v1805_v8 = vsel %vm1796_vm8, %v1772_v33, %v6108_v0  ;;  %v5823_v26 = vunpack.i.l.bf16 %v8216_v59  ;;  %v5829_v51 = vunpack.i.h.bf16 %v8222_v24  ;;  %v5828_v40 = vunpack.i.l.bf16 %v8222_v24  ;;  %v7259_v24 = vld [vmem:[#allocation2 + $0x90] sm:$0xff] }
 0x137   : > { %v6129_v49 = vunpack.i.h.bf16 %v6127_v16  ;;  %v6128_v22 = vunpack.i.l.bf16 %v6127_v16  ;;  %v1840_v12 = vsel %vm11198_vm9, %v1807_v15, %v6123_v6  ;;  %v1841_v57 = vsel %vm11198_vm9, %v1808_v29, %v6124_v47  ;;  %v7260_v16 = vld [vmem:[#allocation2 + $0xb0] sm:$0xff] }
 0x138   : > { %v6132_v9 = vpop.permute.xlu0 %6131  ;;  %6416 = vrot.lane.b32.xlu1 %v6415_v43, %s7379_s13  ;;  %v1838_v43 = vsel %vm11198_vm9, %v1805_v8, %v6118_v21  ;;  %v5904_v18 = vunpack.i.h.bf16 %v8280_v54  ;;  %v5903_v17 = vunpack.i.l.bf16 %v8280_v54  ;;  %v5909_v7 = vunpack.i.h.bf16 %v8288_v62  ;;  %s11219_s13 = smov 56  }
 0x139   : > { %v6134_v1 = vunpack.i.h.bf16 %v6132_v9  ;;  %v6133_v36 = vunpack.i.l.bf16 %v6132_v9  ;;  %v1871_v2 = vsel %vm1862_vm10, %v1838_v43, %v6128_v22  ;;  %v1872_v50 = vsel %vm1862_vm10, %v1839_v58, %v6129_v49 }
 0x13a   : > { %6421 = vrot.lane.b32.xlu0 %v8601_v37, %s11215_s24  ;;  %v6137_v55 = vpop.permute.xlu1 %6136  ;;  %v5908_v38 = vunpack.i.l.bf16 %v8288_v62  ;;  %v5984_v0 = vunpack.i.h.bf16 %v8345_v39  ;;  %v5983_v53 = vunpack.i.l.bf16 %v8345_v39  ;;  %v1679_v11 = vsel %vm11200_vm0, %v7258_v60, %v5824_v42 }
 0x13b   : > { %v6139_v28 = vunpack.i.h.bf16 %v6137_v55  ;;  %v6138_v13 = vunpack.i.l.bf16 %v6137_v55  ;;  %v1873_v61 = vsel %vm1862_vm10, %v1840_v12, %v6133_v36  ;;  %v1874_v20 = vsel %vm1862_vm10, %v1841_v57, %v6134_v1 }
 0x13c   : > { %v6142_v45 = vpop.permute.xlu0 %6141  ;;  %6426 = vrot.lane.b32.xlu1 %v6425_v14, %s11215_s24  ;;  %v1678_v31 = vsel %vm11200_vm0, %v7259_v24, %v5823_v26  ;;  %v1681_v33 = vsel %vm11200_vm0, %v7260_v16, %v5829_v51  ;;  %v1680_v54 = vsel %vm11200_vm0, %v7261_v35, %v5828_v40  ;;  %v5989_v52 = vunpack.i.h.bf16 %v8351_v48 }
 0x13d   : > { %v1904_v37 = vsel %vm11197_vm11, %v1871_v2, %v6138_v13  ;;  %v1905_v41 = vsel %vm11197_vm11, %v1872_v50, %v6139_v28  ;;  %v6144_v19 = vunpack.i.h.bf16 %v6142_v45  ;;  %v6143_v30 = vunpack.i.l.bf16 %v6142_v45 }
 0x13e   : > { %v6147_v34 = vpop.permute.xlu1 %6146  ;;  %v1932_v25 = vpack.c.bf16 %v1905_v41, %v1904_v37  ;;  %v5988_v62 = vunpack.i.l.bf16 %v8351_v48  ;;  %v1710_v39 = vsel %vm455_vm4, %v1678_v31, %v5903_v17  ;;  %v1711_v47 = vsel %vm455_vm4, %v1679_v11, %v5904_v18 }
 0x13f   : > { %v1906_v32 = vsel %vm11197_vm11, %v1873_v61, %v6143_v30  ;;  %v1907_v46 = vsel %vm11197_vm11, %v1874_v20, %v6144_v19  ;;  %v6149_v6 = vunpack.i.h.bf16 %v6147_v34  ;;  %v6148_v49 = vunpack.i.l.bf16 %v6147_v34 }
 0x140   : > { %v6152_v10 = vpop.permute.xlu0 %6151  ;;  %5608 = vmatprep.mubr.msk.bf16.mxu0 %vm1971_vm12, %v1932_v25  ;;  %v1933_v14 = vpack.c.bf16 %v1907_v46, %v1906_v32  ;;  %v1713_v22 = vsel %vm455_vm4, %v1681_v33, %v5909_v7  ;;  %v1712_v9 = vsel %vm455_vm4, %v1680_v54, %v5908_v38  ;;  %v1743_v44 = vsel %vm1730_vm6, %v1710_v39, %v5983_v53 }
 0x141   : > { %v1744_v27 = vsel %vm1730_vm6, %v1711_v47, %v5984_v0  ;;  %v6154_v23 = vunpack.i.h.bf16 %v6152_v10  ;;  %v6153_v15 = vunpack.i.l.bf16 %v6152_v10  ;;  %v1745_v1 = vsel %vm1730_vm6, %v1712_v9, %v5988_v62 }
 0x142   : > { %5609 = vmatmul.mubr.msk.bf16.gmra.mxu0 %vm1971_vm12, %v1933_v14  ;;  %v6157_v56 = vpop.permute.xlu1 %6156  ;;  %v1746_v36 = vsel %vm1730_vm6, %v1713_v22, %v5989_v52  ;;  %v1776_v28 = vsel %vm11199_vm7, %v1743_v44, %v6148_v49  ;;  %v1777_v13 = vsel %vm11199_vm7, %v1744_v27, %v6149_v6  ;;  %v5834_v62 = vunpack.i.h.bf16 %v8224_v63  ;;  %v11288_v27 = vld [vmem:[#allocation18_spill] sm:$0xff] }
 0x143   : > { %v6159_v29 = vunpack.i.h.bf16 %v6157_v56  ;;  %v6158_v48 = vunpack.i.l.bf16 %v6157_v56  ;;  %v1779_v19 = vsel %vm11199_vm7, %v1746_v36, %v6154_v23  ;;  %v1778_v30 = vsel %vm11199_vm7, %v1745_v1, %v6153_v15  ;;  %v7264_v36 = vld [vmem:[#allocation2 + $0xe0] sm:$0xff] }
 0x144   : > { %v6162_v59 = vpop.permute.xlu0 %6161  ;;  %v5839_v39 = vunpack.i.h.bf16 %v8230_v5  ;;  %v5838_v47 = vunpack.i.l.bf16 %v8230_v5  ;;  %v5914_v49 = vunpack.i.h.bf16 %v8290_v3  ;;  %v5913_v22 = vunpack.i.l.bf16 %v8290_v3  ;;  %v7263_v5 = vld [vmem:[#allocation2 + $0xc0] sm:$0xff] }
 0x145   : > { %v6164_v55 = vunpack.i.h.bf16 %v6162_v59  ;;  %v6163_v43 = vunpack.i.l.bf16 %v6162_v59  ;;  %v1809_v61 = vsel %vm1796_vm8, %v1776_v28, %v6158_v48  ;;  %v1810_v20 = vsel %vm1796_vm8, %v1777_v13, %v6159_v29 }
 0x146   : > { %v6167_v21 = vpop.permute.xlu1 %6166  ;;  %v5919_v9 = vunpack.i.h.bf16 %v8295_v4  ;;  %v5918_v44 = vunpack.i.l.bf16 %v8295_v4  ;;  %v5993_v23 = vunpack.i.l.bf16 %v11288_v27  ;;  %v1685_v3 = vsel %vm11200_vm0, %v7264_v36, %v5839_v39 }
 0x147   : > { %v6169_v12 = vunpack.i.h.bf16 %v6167_v21  ;;  %v6168_v57 = vunpack.i.l.bf16 %v6167_v21  ;;  %v1811_v34 = vsel %vm1796_vm8, %v1778_v30, %v6163_v43  ;;  %v1812_v25 = vsel %vm1796_vm8, %v1779_v19, %v6164_v55  ;;  %v7265_v55 = vld [vmem:[#allocation2 + $0xd8] sm:$0xff] }
 0x148   : > { %v6172_v8 = vpop.permute.xlu0 %6171  ;;  %v5833_v21 = vunpack.i.l.bf16 %v8224_v63  ;;  %v7262_v63 = vld [vmem:[#allocation2 + $0xc8] sm:$0xff]  ;;  %v1684_v43 = vsel %vm11200_vm0, %v7265_v55, %v5838_v47  ;;  %v11290_v55 = vld [vmem:[#allocation15_spill] sm:$0xff] }
 0x149   : > { %v6174_v2 = vunpack.i.h.bf16 %v6172_v8  ;;  %v6173_v50 = vunpack.i.l.bf16 %v6172_v8  ;;  %v1842_v14 = vsel %vm11198_vm9, %v1809_v61, %v6168_v57  ;;  %v1843_v42 = vsel %vm11198_vm9, %v1810_v20, %v6169_v12 }
 0x14a   : > { %v6177_v58 = vpop.permute.xlu1 %6176  ;;  %v5994_v8 = vunpack.i.h.bf16 %v11288_v27  ;;  %v1683_v48 = vsel %vm11200_vm0, %v7262_v63, %v5834_v62  ;;  %v1682_v1 = vsel %vm11200_vm0, %v7263_v5, %v5833_v21  ;;  %v1717_v57 = vsel %vm455_vm4, %v1685_v3, %v5919_v9 }
 0x14b   : > { %v6179_v45 = vunpack.i.h.bf16 %v6177_v58  ;;  %v6178_v37 = vunpack.i.l.bf16 %v6177_v58  ;;  %v1844_v40 = vsel %vm11198_vm9, %v1811_v34, %v6173_v50  ;;  %v1845_v56 = vsel %vm11198_vm9, %v1812_v25, %v6174_v2 }
 0x14c   : > { %v6182_v41 = vpop.permute.xlu0 %6181  ;;  %v1714_v13 = vsel %vm455_vm4, %v1682_v1, %v5913_v22  ;;  %v1715_v12 = vsel %vm455_vm4, %v1683_v48, %v5914_v49  ;;  %v1716_v50 = vsel %vm455_vm4, %v1684_v43, %v5918_v44  ;;  %v5844_v43 = vunpack.i.h.bf16 %v11290_v55 }
 0x14d   : > { %v6184_v32 = vunpack.i.h.bf16 %v6182_v41  ;;  %v6183_v46 = vunpack.i.l.bf16 %v6182_v41  ;;  %v1875_v18 = vsel %vm1862_vm10, %v1842_v14, %v6178_v37  ;;  %v1876_v17 = vsel %vm1862_vm10, %v1843_v42, %v6179_v45 }
 0x14e   : > { %v6187_v10 = vpop.permute.xlu1 %6186  ;;  %v1747_v45 = vsel %vm1730_vm6, %v1714_v13, %v5993_v23  ;;  %v1748_v37 = vsel %vm1730_vm6, %v1715_v12, %v5994_v8 }
 0x14f   : > { %v6189_v26 = vunpack.i.h.bf16 %v6187_v10  ;;  %v6188_v51 = vunpack.i.l.bf16 %v6187_v10  ;;  %v1877_v60 = vsel %vm1862_vm10, %v1844_v40, %v6183_v46  ;;  %v1878_v11 = vsel %vm1862_vm10, %v1845_v56, %v6184_v32 }
 0x150   : > { %v6192_v7 = vpop.permute.xlu0 %6191 }
 0x151   : > { %v1908_v38 = vsel %vm11197_vm11, %v1875_v18, %v6188_v51  ;;  %v1909_v0 = vsel %vm11197_vm11, %v1876_v17, %v6189_v26  ;;  %v6194_v53 = vunpack.i.h.bf16 %v6192_v7  ;;  %v6193_v59 = vunpack.i.l.bf16 %v6192_v7 }
 0x152   : > { %v6197_v24 = vpop.permute.xlu1 %6196  ;;  %v1934_v31 = vpack.c.bf16 %v1909_v0, %v1908_v38 }
 0x153   : > { %v1910_v16 = vsel %vm11197_vm11, %v1877_v60, %v6193_v59  ;;  %v1911_v33 = vsel %vm11197_vm11, %v1878_v11, %v6194_v53  ;;  %v6199_v15 = vunpack.i.h.bf16 %v6197_v24  ;;  %v6198_v4 = vunpack.i.l.bf16 %v6197_v24 }
 0x154   : > { %v6202_v35 = vpop.permute.xlu0 %6201  ;;  %5612 = vmatprep.mubr.msk.bf16.mxu0 %vm1971_vm12, %v1934_v31  ;;  %v1935_v54 = vpack.c.bf16 %v1911_v33, %v1910_v16  ;;  %v11289_v60 = vmov 0.0  }
 0x155   : > { %v6203_v58 = vunpack.i.l.bf16 %v6202_v35  ;;  %v6204_v2 = vunpack.i.h.bf16 %v6202_v35  ;;  %v1750_v41 = vsel %vm1730_vm6, %v1717_v57, %v6199_v15  ;;  %v1749_v25 = vsel %vm1730_vm6, %v1716_v50, %v6198_v4  ;;  %465 = vst.msk [vmem:[#allocation3 + $0x40] sm:$0x3] %vm458_vm13, %v11289_v60  ;;  %459 = vst.msk [vmem:[#allocation3 + $0x10] sm:$0x3] %vm458_vm13, %v11289_v60  ;;  %v11292_v57 = vld [vmem:[#allocation7_spill] sm:$0xff] }
 0x156   : > { %5613 = vmatmul.mubr.msk.bf16.gmra.mxu0 %vm1971_vm12, %v1935_v54  ;;  %v6207_v52 = vpop.permute.xlu1 %6206  ;;  %462 = vst.msk [vmem:[#allocation3 + $0x28] sm:$0x3] %vm458_vm13, %v11289_v60  ;;  %468 = vst.msk [vmem:[#allocation3 + $0x58] sm:$0x3] %vm458_vm13, %v11289_v60  ;;  %v5843_v4 = vunpack.i.l.bf16 %v11290_v55  ;;  %v5923_v50 = vunpack.i.l.bf16 %v11292_v57 }
 0x157   : > { %v6209_v30 = vunpack.i.h.bf16 %v6207_v52  ;;  %v6208_v61 = vunpack.i.l.bf16 %v6207_v52  ;;  %v1780_v32 = vsel %vm11199_vm7, %v1747_v45, %v6203_v58  ;;  %v1781_v42 = vsel %vm11199_vm7, %v1748_v37, %v6204_v2  ;;  %471 = vst.msk [vmem:[#allocation3 + $0x70] sm:$0x3] %vm458_vm13, %v11289_v60  ;;  %474 = vst.msk [vmem:[#allocation3 + $0x88] sm:$0x3] %vm458_vm13, %v11289_v60  ;;  %v11291_v58 = vld [vmem:[#allocation16_spill] sm:$0xff]  ;;  %v11293_v45 = vld [vmem:[#allocation9_spill] sm:$0xff] }
 0x158   : > { %v6212_v6 = vpop.permute.xlu0 %6211  ;;  %477 = vst.msk [vmem:[#allocation3 + $0xa0] sm:$0x3] %vm458_vm13, %v11289_v60  ;;  %480 = vst.msk [vmem:[#allocation3 + $0xb8] sm:$0x3] %vm458_vm13, %v11289_v60  ;;  %v5848_v13 = vunpack.i.l.bf16 %v11291_v58  ;;  %v5924_v2 = vunpack.i.h.bf16 %v11292_v57  ;;  %v5929_v37 = vunpack.i.h.bf16 %v11293_v45 }
 0x159   : > { %v6214_v20 = vunpack.i.h.bf16 %v6212_v6  ;;  %v6213_v34 = vunpack.i.l.bf16 %v6212_v6  ;;  %v1782_v38 = vsel %vm11199_vm7, %v1749_v25, %v6208_v61  ;;  %v1783_v0 = vsel %vm11199_vm7, %v1750_v41, %v6209_v30  ;;  %483 = vst.msk [vmem:[#allocation3 + $0xd0] sm:$0x3] %vm458_vm13, %v11289_v60  ;;  %486 = vst.msk [vmem:[#allocation3 + $0xe8] sm:$0x3] %vm458_vm13, %v11289_v60  ;;  %v7267_v25 = vld [vmem:[#allocation2 + $0xf0] sm:$0xff] }
 0x15a   : > { %v8741_v29 = vpop.permute.xlu1 %6216  ;;  %489 = vst.msk [vmem:[#allocation3 + $0x100] sm:$0x3] %vm458_vm13, %v11289_v60  ;;  %492 = vst.msk [vmem:[#allocation3 + $0x118] sm:$0x3] %vm458_vm13, %v11289_v60  ;;  %v5928_v41 = vunpack.i.l.bf16 %v11293_v45 }
 0x15b   : > { %v6219_v46 = vunpack.i.h.bf16 %v8741_v29  ;;  %v6218_v10 = vunpack.i.l.bf16 %v8741_v29  ;;  %v1813_v53 = vsel %vm1796_vm8, %v1780_v32, %v6213_v34  ;;  %v1814_v59 = vsel %vm1796_vm8, %v1781_v42, %v6214_v20  ;;  %495 = vst.msk [vmem:[#allocation3 + $0x130] sm:$0x3] %vm458_vm13, %v11289_v60  ;;  %498 = vst.msk [vmem:[#allocation3 + $0x148] sm:$0x3] %vm458_vm13, %v11289_v60  ;;  %v7266_v20 = vld [vmem:[#allocation2 + $0xf8] sm:$0xff] }
 0x15c   : > { %v6222_v28 = vpop.permute.xlu0 %6221  ;;  %501 = vst.msk [vmem:[#allocation3 + $0x160] sm:$0x3] %vm458_vm13, %v11289_v60  ;;  %504 = vst.msk [vmem:[#allocation3 + $0x178] sm:$0x3] %vm458_vm13, %v11289_v60  ;;  %v1687_v34 = vsel %vm11200_vm0, %v7266_v20, %v5844_v43  ;;  %v1686_v32 = vsel %vm11200_vm0, %v7267_v25, %v5843_v4 }
 0x15d   : > { %v6224_v26 = vunpack.i.h.bf16 %v6222_v28  ;;  %v6223_v51 = vunpack.i.l.bf16 %v6222_v28  ;;  %507 = vst.msk [vmem:[#allocation3 + $0x190] sm:$0x3] %vm458_vm13, %v11289_v60  ;;  %510 = vst.msk [vmem:[#allocation3 + $0x1a8] sm:$0x3] %vm458_vm13, %v11289_v60  ;;  %v1815_v11 = vsel %vm1796_vm8, %v1782_v38, %v6218_v10  ;;  %v1816_v24 = vsel %vm1796_vm8, %v1783_v0, %v6219_v46  ;;  %v7268_v46 = vld [vmem:[#allocation2 + $0x110] sm:$0xff] }
 0x15e   : > { %v6227_v19 = vpop.permute.xlu1 %6226  ;;  %v5849_v28 = vunpack.i.h.bf16 %v11291_v58 }
 0x15f   : > { %v6229_v40 = vunpack.i.h.bf16 %v6227_v19  ;;  %v6228_v56 = vunpack.i.l.bf16 %v6227_v19  ;;  %v1846_v35 = vsel %vm11198_vm9, %v1813_v53, %v6223_v51  ;;  %v1847_v54 = vsel %vm11198_vm9, %v1814_v59, %v6224_v26 }
 0x160   : > { %v6232_v14 = vpop.permute.xlu0 %6231  ;;  %v1689_v10 = vsel %vm11200_vm0, %v7268_v46, %v5849_v28 }
 0x161   : > { %v6234_v18 = vunpack.i.h.bf16 %v6232_v14  ;;  %v6233_v17 = vunpack.i.l.bf16 %v6232_v14  ;;  %v1848_v21 = vsel %vm11198_vm9, %v1815_v11, %v6228_v56  ;;  %v1849_v39 = vsel %vm11198_vm9, %v1816_v24, %v6229_v40  ;;  %v7269_v14 = vld [vmem:[#allocation2 + $0x108] sm:$0xff] }
 0x162   : > { %v6237_v7 = vpop.permute.xlu1 %6236  ;;  %v1688_v42 = vsel %vm11200_vm0, %v7269_v14, %v5848_v13  ;;  %v1718_v56 = vsel %vm455_vm4, %v1686_v32, %v5923_v50  ;;  %v1721_v38 = vsel %vm455_vm4, %v1689_v10, %v5929_v37  ;;  %v11294_v14 = vld [vmem:[#allocation19_spill] sm:$0xff] }
 0x163   : > { %v6239_v31 = vunpack.i.h.bf16 %v6237_v7  ;;  %v6238_v16 = vunpack.i.l.bf16 %v6237_v7  ;;  %v1879_v47 = vsel %vm1862_vm10, %v1846_v35, %v6233_v17  ;;  %v1880_v6 = vsel %vm1862_vm10, %v1847_v54, %v6234_v18 }
 0x164   : > { %v6242_v33 = vpop.permute.xlu0 %6241  ;;  %v1719_v18 = vsel %vm455_vm4, %v1687_v34, %v5924_v2  ;;  %v1720_v0 = vsel %vm455_vm4, %v1688_v42, %v5928_v41  ;;  %v5854_v42 = vunpack.i.h.bf16 %v11294_v14 }
 0x165   : > { %v6244_v52 = vunpack.i.h.bf16 %v6242_v33  ;;  %v6243_v62 = vunpack.i.l.bf16 %v6242_v33  ;;  %v1881_v8 = vsel %vm1862_vm10, %v1848_v21, %v6238_v16  ;;  %v1882_v23 = vsel %vm1862_vm10, %v1849_v39, %v6239_v31 }
 0x166   : > { %v6247_v49 = vpop.permute.xlu1 %6246 }
 0x167   : > { %v1912_v22 = vsel %vm11197_vm11, %v1879_v47, %v6243_v62  ;;  %v1913_v9 = vsel %vm11197_vm11, %v1880_v6, %v6244_v52  ;;  %v6249_v44 = vunpack.i.h.bf16 %v6247_v49  ;;  %v6248_v27 = vunpack.i.l.bf16 %v6247_v49 }
 0x168   : > { %v6252_v15 = vpop.permute.xlu0 %6251  ;;  %v1936_v29 = vpack.c.bf16 %v1913_v9, %v1912_v22 }
 0x169   : > { %v1914_v63 = vsel %vm11197_vm11, %v1881_v8, %v6248_v27  ;;  %v1915_v48 = vsel %vm11197_vm11, %v1882_v23, %v6249_v44  ;;  %v6254_v19 = vunpack.i.h.bf16 %v6252_v15  ;;  %v6253_v30 = vunpack.i.l.bf16 %v6252_v15 }
 0x16a   : > { %5616 = vmatprep.mubr.msk.bf16.mxu0 %vm1971_vm12, %v1936_v29  ;;  %v6257_v5 = vpop.permute.xlu1 %6256  ;;  %v1937_v1 = vpack.c.bf16 %v1915_v48, %v1914_v63 }
 0x16b   : > { %v6259_v26 = vunpack.i.h.bf16 %v6257_v5  ;;  %v6258_v51 = vunpack.i.l.bf16 %v6257_v5  ;;  %v1751_v53 = vsel %vm1730_vm6, %v1718_v56, %v6253_v30  ;;  %v1752_v59 = vsel %vm1730_vm6, %v1719_v18, %v6254_v19 }
 0x16c   : > { %v6262_v36 = vpop.permute.xlu0 %6261  ;;  %5617 = vmatmul.mubr.msk.bf16.gmra.mxu0 %vm1971_vm12, %v1937_v1 }
 0x16d   : > { %v6264_v17 = vunpack.i.h.bf16 %v6262_v36  ;;  %v6263_v7 = vunpack.i.l.bf16 %v6262_v36  ;;  %v1754_v33 = vsel %vm1730_vm6, %v1721_v38, %v6259_v26  ;;  %v1753_v35 = vsel %vm1730_vm6, %v1720_v0, %v6258_v51  ;;  %v11295_v51 = vld [vmem:[#allocation17_spill] sm:$0xff]  ;;  %v11297_v0 = vld [vmem:[#allocation11_spill] sm:$0xff] }
 0x16e   : > { %v6267_v3 = vpop.permute.xlu1 %6266  ;;  %v5853_v26 = vunpack.i.l.bf16 %v11294_v14  ;;  %v5858_v56 = vunpack.i.l.bf16 %v11295_v51 }
 0x16f   : > { %v6269_v11 = vunpack.i.h.bf16 %v6267_v3  ;;  %v6268_v24 = vunpack.i.l.bf16 %v6267_v3  ;;  %v1784_v21 = vsel %vm11199_vm7, %v1751_v53, %v6263_v7  ;;  %v1785_v39 = vsel %vm11199_vm7, %v1752_v59, %v6264_v17  ;;  %v11296_v17 = vld [vmem:[#allocation10_spill] sm:$0xff] }
 0x170   : > { %v6272_v12 = vpop.permute.xlu0 %6271  ;;  %v5934_v7 = vunpack.i.h.bf16 %v11296_v17  ;;  %v5933_v38 = vunpack.i.l.bf16 %v11296_v17  ;;  %v5939_v53 = vunpack.i.h.bf16 %v11297_v0  ;;  %v5938_v59 = vunpack.i.l.bf16 %v11297_v0 }
 0x171   : > { %v6274_v31 = vunpack.i.h.bf16 %v6272_v12  ;;  %v6273_v16 = vunpack.i.l.bf16 %v6272_v12  ;;  %v1786_v8 = vsel %vm11199_vm7, %v1753_v35, %v6268_v24  ;;  %v1787_v23 = vsel %vm11199_vm7, %v1754_v33, %v6269_v11  ;;  %v7271_v33 = vld [vmem:[#allocation2 + $0x120] sm:$0xff] }
 0x172   : > { %v6277_v61 = vpop.permute.xlu1 %6276  ;;  %v1690_v35 = vsel %vm11200_vm0, %v7271_v33, %v5853_v26 }
 0x173   : > { %v6279_v54 = vunpack.i.h.bf16 %v6277_v61  ;;  %v6278_v52 = vunpack.i.l.bf16 %v6277_v61  ;;  %v1817_v15 = vsel %vm1796_vm8, %v1784_v21, %v6273_v16  ;;  %v1818_v29 = vsel %vm1796_vm8, %v1785_v39, %v6274_v31  ;;  %v7270_v31 = vld [vmem:[#allocation2 + $0x128] sm:$0xff] }
 0x174   : > { %v6282_v40 = vpop.permute.xlu0 %6281  ;;  %v1691_v16 = vsel %vm11200_vm0, %v7270_v31, %v5854_v42 }
 0x175   : > { %v6284_v47 = vunpack.i.h.bf16 %v6282_v40  ;;  %v6283_v6 = vunpack.i.l.bf16 %v6282_v40  ;;  %v1819_v63 = vsel %vm1796_vm8, %v1786_v8, %v6278_v52  ;;  %v1820_v48 = vsel %vm1796_vm8, %v1787_v23, %v6279_v54  ;;  %v7272_v54 = vld [vmem:[#allocation2 + $0x140] sm:$0xff] }
 0x176   : > { %v6287_v60 = vpop.permute.xlu1 %6286  ;;  %v5859_v40 = vunpack.i.h.bf16 %v11295_v51 }
 0x177   : > { %v6289_v49 = vunpack.i.h.bf16 %v6287_v60  ;;  %v6288_v22 = vunpack.i.l.bf16 %v6287_v60  ;;  %v1850_v43 = vsel %vm11198_vm9, %v1817_v15, %v6283_v6  ;;  %v1851_v4 = vsel %vm11198_vm9, %v1818_v29, %v6284_v47 }
 0x178   : > { %v6292_v62 = vpop.permute.xlu0 %6291  ;;  %v1693_v52 = vsel %vm11200_vm0, %v7272_v54, %v5859_v40 }
 0x179   : > { %v6294_v9 = vunpack.i.h.bf16 %v6292_v62  ;;  %v6293_v44 = vunpack.i.l.bf16 %v6292_v62  ;;  %v1852_v58 = vsel %vm11198_vm9, %v1819_v63, %v6288_v22  ;;  %v1853_v28 = vsel %vm11198_vm9, %v1820_v48, %v6289_v49  ;;  %v7273_v62 = vld [vmem:[#allocation2 + $0x138] sm:$0xff] }
 0x17a   : > { %v6297_v27 = vpop.permute.xlu1 %6296  ;;  %v1692_v21 = vsel %vm11200_vm0, %v7273_v62, %v5858_v56  ;;  %v1722_v49 = vsel %vm455_vm4, %v1690_v35, %v5933_v38  ;;  %v1723_v22 = vsel %vm455_vm4, %v1691_v16, %v5934_v7  ;;  %v11298_v62 = vld [vmem:[#allocation21_spill] sm:$0xff] }
 0x17b   : > { %v6299_v5 = vunpack.i.h.bf16 %v6297_v27  ;;  %v6298_v1 = vunpack.i.l.bf16 %v6297_v27  ;;  %v1883_v12 = vsel %vm1862_vm10, %v1850_v43, %v6293_v44  ;;  %v1884_v57 = vsel %vm1862_vm10, %v1851_v4, %v6294_v9 }
 0x17c   : > { %v6302_v36 = vpop.permute.xlu0 %6301  ;;  %v1725_v27 = vsel %vm455_vm4, %v1693_v52, %v5939_v53  ;;  %v1724_v8 = vsel %vm455_vm4, %v1692_v21, %v5938_v59  ;;  %v5864_v21 = vunpack.i.h.bf16 %v11298_v62 }
 0x17d   : > { %v6304_v3 = vunpack.i.h.bf16 %v6302_v36  ;;  %v6303_v55 = vunpack.i.l.bf16 %v6302_v36  ;;  %v1885_v41 = vsel %vm1862_vm10, %v1852_v58, %v6298_v1  ;;  %v1886_v19 = vsel %vm1862_vm10, %v1853_v28, %v6299_v5 }
 0x17e   : > { %v6307_v13 = vpop.permute.xlu1 %6306 }
 0x17f   : > { %v6309_v2 = vunpack.i.h.bf16 %v6307_v13  ;;  %v6308_v50 = vunpack.i.l.bf16 %v6307_v13  ;;  %v1916_v45 = vsel %vm11197_vm11, %v1883_v12, %v6303_v55  ;;  %v1917_v37 = vsel %vm11197_vm11, %v1884_v57, %v6304_v3 }
 0x180   : > { %v6312_v30 = vpop.permute.xlu0 %6311  ;;  %v1938_v61 = vpack.c.bf16 %v1917_v37, %v1916_v45 }
 0x181   : > { %v1918_v20 = vsel %vm11197_vm11, %v1885_v41, %v6308_v50  ;;  %v1919_v34 = vsel %vm11197_vm11, %v1886_v19, %v6309_v2  ;;  %v6314_v60 = vunpack.i.h.bf16 %v6312_v30  ;;  %v6313_v11 = vunpack.i.l.bf16 %v6312_v30 }
 0x182   : > { %5620 = vmatprep.mubr.msk.bf16.mxu1 %vm1971_vm12, %v1938_v61  ;;  %v6317_v25 = vpop.permute.xlu1 %6316  ;;  %v1939_v32 = vpack.c.bf16 %v1919_v34, %v1918_v20 }
 0x183   : > { %v6319_v39 = vunpack.i.h.bf16 %v6317_v25  ;;  %v6318_v47 = vunpack.i.l.bf16 %v6317_v25  ;;  %v1755_v23 = vsel %vm1730_vm6, %v1722_v49, %v6313_v11  ;;  %v1756_v15 = vsel %vm1730_vm6, %v1723_v22, %v6314_v60 }
 0x184   : > { %v6322_v46 = vpop.permute.xlu0 %6321  ;;  %5621 = vmatmul.mubr.msk.bf16.vlgmr.msra.gmra.mxu1 %vm1971_vm12, %v1939_v32 }
 0x185   : > { %v6324_v9 = vunpack.i.h.bf16 %v6322_v46  ;;  %v6323_v44 = vunpack.i.l.bf16 %v6322_v46  ;;  %v1758_v36 = vsel %vm1730_vm6, %v1725_v27, %v6319_v39  ;;  %v1757_v3 = vsel %vm1730_vm6, %v1724_v8, %v6318_v47  ;;  %v11299_v47 = vld [vmem:[#allocation8_spill] sm:$0xff]  ;;  %v11301_v8 = vld [vmem:[#allocation13_spill] sm:$0xff] }
 0x186   : > { %v6327_v10 = vpop.permute.xlu1 %6326  ;;  %v5863_v39 = vunpack.i.l.bf16 %v11298_v62  ;;  %v5868_v49 = vunpack.i.l.bf16 %v11299_v47 }
 0x187   : > { %v6329_v63 = vunpack.i.h.bf16 %v6327_v10  ;;  %v6328_v48 = vunpack.i.l.bf16 %v6327_v10  ;;  %v1788_v58 = vsel %vm11199_vm7, %v1755_v23, %v6323_v44  ;;  %v1789_v28 = vsel %vm11199_vm7, %v1756_v15, %v6324_v9  ;;  %v11300_v9 = vld [vmem:[#allocation12_spill] sm:$0xff] }
 0x188   : > { %v6332_v18 = vpop.permute.xlu0 %6331  ;;  %v5944_v44 = vunpack.i.h.bf16 %v11300_v9  ;;  %v5943_v27 = vunpack.i.l.bf16 %v11300_v9  ;;  %v5949_v23 = vunpack.i.h.bf16 %v11301_v8  ;;  %v5948_v15 = vunpack.i.l.bf16 %v11301_v8 }
 0x189   : > { %v6334_v5 = vunpack.i.h.bf16 %v6332_v18  ;;  %v6333_v1 = vunpack.i.l.bf16 %v6332_v18  ;;  %v1790_v41 = vsel %vm11199_vm7, %v1757_v3, %v6328_v48  ;;  %v1791_v19 = vsel %vm11199_vm7, %v1758_v36, %v6329_v63  ;;  %v7275_v36 = vld [vmem:[#allocation2 + $0x150] sm:$0xff] }
 0x18a   : > { %v6337_v24 = vpop.permute.xlu1 %6336  ;;  %v1694_v3 = vsel %vm11200_vm0, %v7275_v36, %v5863_v39 }
 0x18b   : > { %v6339_v55 = vunpack.i.h.bf16 %v6337_v24  ;;  %v6338_v43 = vunpack.i.l.bf16 %v6337_v24  ;;  %v1821_v30 = vsel %vm1796_vm8, %v1788_v58, %v6333_v1  ;;  %v1822_v61 = vsel %vm1796_vm8, %v1789_v28, %v6334_v5  ;;  %v7274_v5 = vld [vmem:[#allocation2 + $0x158] sm:$0xff] }
 0x18c   : > { %v6342_v6 = vpop.permute.xlu0 %6341  ;;  %v1695_v1 = vsel %vm11200_vm0, %v7274_v5, %v5864_v21 }
 0x18d   : > { %v6344_v13 = vunpack.i.h.bf16 %v6342_v6  ;;  %v6343_v12 = vunpack.i.l.bf16 %v6342_v6  ;;  %v1823_v20 = vsel %vm1796_vm8, %v1790_v41, %v6338_v43  ;;  %v1824_v34 = vsel %vm1796_vm8, %v1791_v19, %v6339_v55  ;;  %v7276_v55 = vld [vmem:[#allocation2 + $0x170] sm:$0xff] }
 0x18e   : > { %v6347_v29 = vpop.permute.xlu1 %6346  ;;  %v5869_v6 = vunpack.i.h.bf16 %v11299_v47 }
 0x18f   : > { %v6349_v57 = vunpack.i.h.bf16 %v6347_v29  ;;  %v6348_v2 = vunpack.i.l.bf16 %v6347_v29  ;;  %v1854_v10 = vsel %vm11198_vm9, %v1821_v30, %v6343_v12  ;;  %v1855_v14 = vsel %vm11198_vm9, %v1822_v61, %v6344_v13 }
 0x190   : > { %v6352_v4 = vpop.permute.xlu0 %6351  ;;  %v1697_v43 = vsel %vm11200_vm0, %v7276_v55, %v5869_v6 }
 0x191   : > { %v6354_v50 = vunpack.i.h.bf16 %v6352_v4  ;;  %v6353_v45 = vunpack.i.l.bf16 %v6352_v4  ;;  %v1856_v51 = vsel %vm11198_vm9, %v1823_v20, %v6348_v2  ;;  %v1857_v40 = vsel %vm11198_vm9, %v1824_v34, %v6349_v57  ;;  %v7277_v4 = vld [vmem:[#allocation2 + $0x168] sm:$0xff] }
 0x192   : > { %v6357_v37 = vpop.permute.xlu1 %6356  ;;  %v1696_v58 = vsel %vm11200_vm0, %v7277_v4, %v5868_v49  ;;  %v1726_v57 = vsel %vm455_vm4, %v1694_v3, %v5943_v27  ;;  %v1727_v2 = vsel %vm455_vm4, %v1695_v1, %v5944_v44 }
 0x193   : > { %v6359_v25 = vunpack.i.h.bf16 %v6357_v37  ;;  %v6358_v32 = vunpack.i.l.bf16 %v6357_v37  ;;  %v1887_v56 = vsel %vm1862_vm10, %v1854_v10, %v6353_v45  ;;  %v1888_v18 = vsel %vm1862_vm10, %v1855_v14, %v6354_v50 }
 0x194   : > { %v6362_v46 = vpop.permute.xlu0 %6361  ;;  %v1729_v37 = vsel %vm455_vm4, %v1697_v43, %v5949_v23  ;;  %v1728_v41 = vsel %vm455_vm4, %v1696_v58, %v5948_v15 }
 0x195   : > { %v6364_v42 = vunpack.i.h.bf16 %v6362_v46  ;;  %v6363_v26 = vunpack.i.l.bf16 %v6362_v46  ;;  %v1889_v59 = vsel %vm1862_vm10, %v1856_v51, %v6358_v32  ;;  %v1890_v60 = vsel %vm1862_vm10, %v1857_v40, %v6359_v25 }
 0x196   : > { %v6367_v17 = vpop.permute.xlu1 %6366 }
 0x197   : > { %v1920_v7 = vsel %vm11197_vm11, %v1887_v56, %v6363_v26  ;;  %v1921_v38 = vsel %vm11197_vm11, %v1888_v18, %v6364_v42  ;;  %v6369_v0 = vunpack.i.h.bf16 %v6367_v17  ;;  %v6368_v53 = vunpack.i.l.bf16 %v6367_v17 }
 0x198   : > { %v6372_v11 = vpop.permute.xlu0 %6371  ;;  %v1940_v24 = vpack.c.bf16 %v1921_v38, %v1920_v7 }
 0x199   : > { %v1922_v31 = vsel %vm11197_vm11, %v1889_v59, %v6368_v53  ;;  %v1923_v16 = vsel %vm11197_vm11, %v1890_v60, %v6369_v0  ;;  %v6374_v29 = vunpack.i.h.bf16 %v6372_v11  ;;  %v6373_v63 = vunpack.i.l.bf16 %v6372_v11 }
 0x19a   : > { %5624 = vmatprep.mubr.msk.bf16.mxu1 %vm1971_vm12, %v1940_v24  ;;  %v6377_v33 = vpop.permute.xlu1 %6376  ;;  %v1941_v35 = vpack.c.bf16 %v1923_v16, %v1922_v31 }
 0x19b   : > { %v6379_v28 = vunpack.i.h.bf16 %v6377_v33  ;;  %v6378_v13 = vunpack.i.l.bf16 %v6377_v33  ;;  %v1759_v19 = vsel %vm1730_vm6, %v1726_v57, %v6373_v63  ;;  %v1760_v30 = vsel %vm1730_vm6, %v1727_v2, %v6374_v29 }
 0x19c   : > { %v6382_v54 = vpop.permute.xlu0 %6381  ;;  %5625 = vmatmul.mubr.msk.bf16.gmra.mxu1 %vm1971_vm12, %v1941_v35 }
 0x19d   : > { %v6384_v50 = vunpack.i.h.bf16 %v6382_v54  ;;  %v6383_v45 = vunpack.i.l.bf16 %v6382_v54  ;;  %v1762_v46 = vsel %vm1730_vm6, %v1729_v37, %v6379_v28  ;;  %v1761_v10 = vsel %vm1730_vm6, %v1728_v41, %v6378_v13  ;;  %v8944_v28 = vld [vmem:[%s11116_s2] ss:$0 sm:$0xff] }
 0x19e   : > { %v6387_v52 = vpop.permute.xlu1 %6386 }
 0x19f   : > { %v6389_v20 = vunpack.i.h.bf16 %v6387_v52  ;;  %v6388_v34 = vunpack.i.l.bf16 %v6387_v52  ;;  %v1792_v51 = vsel %vm11199_vm7, %v1759_v19, %v6383_v45  ;;  %v1793_v40 = vsel %vm11199_vm7, %v1760_v30, %v6384_v50 }
 0x1a0   : > { %v6392_v22 = vpop.permute.xlu0 %6391 }
 0x1a1   : > { %v6394_v25 = vunpack.i.h.bf16 %v6392_v22  ;;  %v6393_v32 = vunpack.i.l.bf16 %v6392_v22  ;;  %v1794_v59 = vsel %vm11199_vm7, %v1761_v10, %v6388_v34  ;;  %v1795_v60 = vsel %vm11199_vm7, %v1762_v46, %v6389_v20 }
 0x1a2   : > { %v6397_v48 = vpop.permute.xlu1 %6396 }
 0x1a3   : > { %v6399_v14 = vunpack.i.h.bf16 %v6397_v48  ;;  %v6398_v42 = vunpack.i.l.bf16 %v6397_v48  ;;  %v1825_v11 = vsel %vm1796_vm8, %v1792_v51, %v6393_v32  ;;  %v1826_v24 = vsel %vm1796_vm8, %v1793_v40, %v6394_v25 }
 0x1a4   : > { %v6402_v12 = vpop.permute.xlu0 %6401 }
 0x1a5   : > { %v6404_v56 = vunpack.i.h.bf16 %v6402_v12  ;;  %v6403_v18 = vunpack.i.l.bf16 %v6402_v12  ;;  %v1827_v31 = vsel %vm1796_vm8, %v1794_v59, %v6398_v42  ;;  %v1828_v16 = vsel %vm1796_vm8, %v1795_v60, %v6399_v14 }
 0x1a6   : > { %v6407_v61 = vpop.permute.xlu1 %6406 }
 0x1a7   : > { %v6409_v17 = vunpack.i.h.bf16 %v6407_v61  ;;  %v6408_v7 = vunpack.i.l.bf16 %v6407_v61  ;;  %v1858_v52 = vsel %vm11198_vm9, %v1825_v11, %v6403_v18  ;;  %v1859_v62 = vsel %vm11198_vm9, %v1826_v24, %v6404_v56 }
 0x1a8   : > { %v6412_v26 = vpop.permute.xlu0 %6411 }
 0x1a9   : > { %v6414_v38 = vunpack.i.h.bf16 %v6412_v26  ;;  %v6413_v0 = vunpack.i.l.bf16 %v6412_v26  ;;  %v1860_v47 = vsel %vm11198_vm9, %v1827_v31, %v6408_v7  ;;  %v1861_v6 = vsel %vm11198_vm9, %v1828_v16, %v6409_v17  ;;  %v2669_v16 = vld [vmem:[#allocation3] sm:$0xff] }
 0x1aa   : > { %v6417_v53 = vpop.permute.xlu1 %6416 }
 0x1ab   : > { %v6419_v33 = vunpack.i.h.bf16 %v6417_v53  ;;  %v6418_v35 = vunpack.i.l.bf16 %v6417_v53  ;;  %v1891_v49 = vsel %vm1862_vm10, %v1858_v52, %v6413_v0  ;;  %v1892_v22 = vsel %vm1862_vm10, %v1859_v62, %v6414_v38 }
 0x1ac   : > { %v6422_v54 = vpop.permute.xlu0 %6421 }
 0x1ad   : > { %v6424_v21 = vunpack.i.h.bf16 %v6422_v54  ;;  %v6423_v39 = vunpack.i.l.bf16 %v6422_v54  ;;  %v1893_v15 = vsel %vm1862_vm10, %v1860_v47, %v6418_v35  ;;  %v1894_v29 = vsel %vm1862_vm10, %v1861_v6, %v6419_v33  ;;  %v2670_v33 = vld [vmem:[#allocation3 + $0x8] sm:$0xff]  ;;  %v2671_v35 = vld [vmem:[#allocation3 + $0x10] sm:$0x3] }
 0x1ae   : > { %v6427_v9 = vpop.permute.xlu1 %6426  ;;  %v2948_v47 = vrot.slane %v2670_v33, 2  ;;  %v2950_v6 = vrot.slane %v2671_v35, 2 }
 0x1af   : > { %v1924_v44 = vsel %vm11197_vm11, %v1891_v49, %v6423_v39  ;;  %v1925_v27 = vsel %vm11197_vm11, %v1892_v22, %v6424_v21  ;;  %v6429_v8 = vunpack.i.h.bf16 %v6427_v9  ;;  %v6428_v23 = vunpack.i.l.bf16 %v6427_v9 }
 0x1b0   : > { %v1942_v63 = vpack.c.bf16 %v1925_v27, %v1924_v44  ;;  %v2947_v39 = vrot.slane %v2669_v16, 2  ;;  %v2771_v44 = vrot.slane %v2669_v16, 1 }
 0x1b1   : > { %v1926_v48 = vsel %vm11197_vm11, %v1893_v15, %v6428_v23  ;;  %v1927_v5 = vsel %vm11197_vm11, %v1894_v29, %v6429_v8  ;;  %v2951_v23 = vsel %vm11202_vm3, %v2948_v47, %v2950_v6  ;;  %v2772_v15 = vrot.slane %v2670_v33, 1 }
 0x1b2   : > { %5628 = vmatprep.mubr.msk.bf16.mxu1 %vm1971_vm12, %v1942_v63  ;;  %v1943_v1 = vpack.c.bf16 %v1927_v5, %v1926_v48  ;;  %v2949_v8 = vsel %vm11202_vm3, %v2947_v39, %v2948_v47  ;;  %v2774_v5 = vrot.slane %v2671_v35, 1 }
 0x1b3   : > { %v6435_v48 = vpack.i.bf16 %v2951_v23, %v2949_v8 }
 0x1b4   : > { %5629 = vmatmul.mubr.msk.bf16.gmra.mxu1 %vm1971_vm12, %v1943_v1 }
 0x1b5   : > { %6436 = vrot.lane.b32.xlu1 %v6435_v48, %s11221_s30 }
 0x1da   : > { %v5602_v36 = vpop.f32.mrf.mxu0 }
 0x1db   : > { %v8955_v45 = vadd.f32 %v5602_v36, %v8944_v28 }
 0x1dc   : > { %v2058_v3 = vpop.f32.mrf.mxu0 }
 0x1dd   : > { %v8950_v57 = vadd.f32 %v8944_v28, %v2058_v3  ;;  %v2256_v61 = vmul.f32 %v8955_v45, %v8955_v45  ;;  %v2188_v42 = vsel %vm455_vm4, %v8955_v45, 0.0  ;;  %v2773_v3 = vsel %vm11203_vm2, %v2771_v44, %v2772_v15 }
 0x1de   : > { %v5603_v55 = vpop.f32.mrf.mxu0 }
 0x1df   : > { %v2254_v37 = vmul.f32 %v8950_v57, %v8950_v57  ;;  %v2185_v20 = vsel %vm455_vm4, %v8950_v57, 0.0  ;;  %v8970_v25 = vadd.f32 %v5603_v55, %v8944_v28  ;;  %v2289_v51 = vsel %vm455_vm4, %v2256_v61, 0.0 }
 0x1e0   : > { %v2061_v43 = vpop.f32.mrf.mxu0 }
 0x1e1   : > { %v8947_v13 = vadd.f32 %v8944_v28, %v2061_v43  ;;  %v2286_v34 = vsel %vm455_vm4, %v2254_v37, 0.0  ;;  %v2257_v40 = vmul.f32 %v8970_v25, %v8970_v25  ;;  %v2190_v38 = vsel %vm455_vm4, %v8970_v25, 0.0 }
 0x1e3   : > { %v2255_v2 = vmul.f32 %v8947_v13, %v8947_v13  ;;  %v2186_v19 = vsel %vm455_vm4, %v8947_v13, 0.0  ;;  %v2291_v60 = vsel %vm455_vm4, %v2257_v40, 0.0 }
 0x1e4   : > { %v2187_v32 = vadd.f32 %v2186_v19, %v2185_v20 }
 0x1e5   : > { %v2287_v30 = vsel %vm455_vm4, %v2255_v2, 0.0 }
 0x1e6   : > { %v2288_v14 = vadd.f32 %v2287_v30, %v2286_v34  ;;  %v2189_v56 = vadd.f32 %v2188_v42, %v2187_v32 }
 0x1e8   : > { %v2290_v7 = vadd.f32 %v2289_v51, %v2288_v14  ;;  %v2191_v11 = vadd.f32 %v2190_v38, %v2189_v56 }
 0x1ea   : > { %v2292_v54 = vadd.f32 %v2291_v60, %v2290_v7 }
 0x1ee   : > { %v5606_v4 = vpop.f32.mrf.mxu0 }
 0x1ef   : > { %v8990_v0 = vadd.f32 %v5606_v4, %v8944_v28  ;;  %v2775_v4 = vsel %vm11203_vm2, %v2772_v15, %v2774_v5 }
 0x1f0   : > { %v2074_v58 = vpop.f32.mrf.mxu0 }
 0x1f1   : > { %v8973_v46 = vadd.f32 %v8944_v28, %v2074_v58  ;;  %v2260_v49 = vmul.f32 %v8990_v0, %v8990_v0  ;;  %v2196_v55 = vsel %vm455_vm4, %v8990_v0, 0.0 }
 0x1f2   : > { %v5607_v12 = vpop.f32.mrf.mxu0 }
 0x1f3   : > { %v2258_v18 = vmul.f32 %v8973_v46, %v8973_v46  ;;  %v2192_v53 = vsel %vm455_vm4, %v8973_v46, 0.0  ;;  %v9008_v29 = vadd.f32 %v5607_v12, %v8944_v28  ;;  %v6430_v12 = vpack.i.bf16 %v2775_v4, %v2773_v3 }
 0x1f4   : > { %v2077_v50 = vpop.f32.mrf.mxu0  ;;  %v2193_v62 = vadd.f32 %v2192_v53, %v2191_v11  ;;  %v2297_v2 = vsel %vm455_vm4, %v2260_v49, 0.0 }
 0x1f5   : > { %v8978_v26 = vadd.f32 %v8944_v28, %v2077_v50  ;;  %v2293_v24 = vsel %vm455_vm4, %v2258_v18, 0.0  ;;  %v2261_v50 = vmul.f32 %v9008_v29, %v9008_v29  ;;  %6431 = vrot.lane.b32.xlu0 %v6430_v12, %s11223_s16  ;;  %v2198_v61 = vsel %vm455_vm4, %v9008_v29, 0.0 }
 0x1f6   : > { %v2294_v22 = vadd.f32 %v2293_v24, %v2292_v54 }
 0x1f7   : > { %v2259_v59 = vmul.f32 %v8978_v26, %v8978_v26  ;;  %v2194_v52 = vsel %vm455_vm4, %v8978_v26, 0.0 }
 0x1f8   : > { %v2195_v27 = vadd.f32 %v2194_v52, %v2193_v62 }
 0x1f9   : > { %v2295_v9 = vsel %vm455_vm4, %v2259_v59, 0.0 }
 0x1fa   : > { %v2296_v1 = vadd.f32 %v2295_v9, %v2294_v22  ;;  %v2197_v58 = vadd.f32 %v2196_v55, %v2195_v27 }
 0x1fc   : > { %v2298_v19 = vadd.f32 %v2297_v2, %v2296_v1  ;;  %v2199_v32 = vadd.f32 %v2198_v61, %v2197_v58 }
 0x202   : > { %v8959_v41 = vpop.f32.mrf.mxu0 }
 0x203   : > { %v9036_v14 = vadd.f32 %v8959_v41, %v8944_v28 }
 0x204   : > { %v2090_v10 = vpop.f32.mrf.mxu0 }
 0x205   : > { %v9011_v63 = vadd.f32 %v8944_v28, %v2090_v10  ;;  %v2299_v10 = vsel %vm455_vm4, %v2261_v50, 0.0  ;;  %11302 = vst [vmem:[#allocation20_spill] sm:$0xff] %v9036_v14  ;;  %v2264_v60 = vmul.f32 %v9036_v14, %v9036_v14 }
 0x206   : > { %v8985_v17 = vpop.f32.mrf.mxu0  ;;  %v2300_v56 = vadd.f32 %v2299_v10, %v2298_v19 }
 0x207   : > { %v2262_v37 = vmul.f32 %v9011_v63, %v9011_v63  ;;  %v2200_v20 = vsel %vm455_vm4, %v9011_v63, 0.0  ;;  %v9046_v41 = vadd.f32 %v8985_v17, %v8944_v28  ;;  %v2305_v54 = vsel %vm455_vm4, %v2264_v60, 0.0 }
 0x208   : > { %v2093_v31 = vpop.f32.mrf.mxu0  ;;  %v2201_v40 = vadd.f32 %v2200_v20, %v2199_v32 }
 0x209   : > { %v9017_v43 = vadd.f32 %v8944_v28, %v2093_v31  ;;  %v2301_v42 = vsel %vm455_vm4, %v2262_v37, 0.0  ;;  %11303 = vst [vmem:[#allocation14_spill] sm:$0xff] %v9046_v41  ;;  %v2204_v31 = vsel %vm455_vm4, %v9036_v14, 0.0  ;;  %v2265_v52 = vmul.f32 %v9046_v41, %v9046_v41 }
 0x20a   : > { %v2302_v38 = vadd.f32 %v2301_v42, %v2300_v56  ;;  %v2206_v39 = vsel %vm455_vm4, %v9046_v41, 0.0 }
 0x20b   : > { %v2263_v34 = vmul.f32 %v9017_v43, %v9017_v43  ;;  %v2202_v51 = vsel %vm455_vm4, %v9017_v43, 0.0  ;;  %v2307_v9 = vsel %vm455_vm4, %v2265_v52, 0.0 }
 0x20c   : > { %v2203_v53 = vadd.f32 %v2202_v51, %v2201_v40 }
 0x20d   : > { %v2303_v7 = vsel %vm455_vm4, %v2263_v34, 0.0 }
 0x20e   : > { %v2304_v24 = vadd.f32 %v2303_v7, %v2302_v38  ;;  %v2205_v33 = vadd.f32 %v2204_v31, %v2203_v53 }
 0x210   : > { %v2306_v62 = vadd.f32 %v2305_v54, %v2304_v24  ;;  %v2207_v49 = vadd.f32 %v2206_v39, %v2205_v33 }
 0x212   : > { %v2308_v15 = vadd.f32 %v2307_v9, %v2306_v62 }
 0x216   : > { %v9000_v21 = vpop.f32.mrf.mxu0 }
 0x217   : > { %v9070_v44 = vadd.f32 %v9000_v21, %v8944_v28 }
 0x218   : > { %v2106_v36 = vpop.f32.mrf.mxu0 }
 0x219   : > { %v9049_v11 = vadd.f32 %v8944_v28, %v2106_v36  ;;  %11306 = vst [vmem:[#allocation24_spill] sm:$0xff] %v9070_v44  ;;  %v2268_v55 = vmul.f32 %v9070_v44, %v9070_v44  ;;  %v2212_v12 = vsel %vm455_vm4, %v9070_v44, 0.0 }
 0x21a   : > { %v5615_v30 = vpop.f32.mrf.mxu0 }
 0x21b   : > { %11304 = vst [vmem:[#allocation22_spill] sm:$0xff] %v9049_v11  ;;  %v2266_v17 = vmul.f32 %v9049_v11, %v9049_v11  ;;  %v2208_v47 = vsel %vm455_vm4, %v9049_v11, 0.0  ;;  %v9079_v4 = vadd.f32 %v5615_v30, %v8944_v28  ;;  %v2313_v19 = vsel %vm455_vm4, %v2268_v55, 0.0 }
 0x21c   : > { %v2109_v18 = vpop.f32.mrf.mxu0  ;;  %v2209_v23 = vadd.f32 %v2208_v47, %v2207_v49 }
 0x21d   : > { %v9054_v16 = vadd.f32 %v8944_v28, %v2109_v18  ;;  %v2309_v27 = vsel %vm455_vm4, %v2266_v17, 0.0  ;;  %11307 = vst [vmem:[#allocation25_spill] sm:$0xff] %v9079_v4  ;;  %v2269_v61 = vmul.f32 %v9079_v4, %v9079_v4  ;;  %v2214_v34 = vsel %vm455_vm4, %v9079_v4, 0.0 }
 0x21e   : > { %v2310_v5 = vadd.f32 %v2309_v27, %v2308_v15 }
 0x21f   : > { %11305 = vst [vmem:[#allocation23_spill] sm:$0xff] %v9054_v16  ;;  %v2267_v6 = vmul.f32 %v9054_v16, %v9054_v16  ;;  %v2210_v8 = vsel %vm455_vm4, %v9054_v16, 0.0  ;;  %v2315_v40 = vsel %vm455_vm4, %v2269_v61, 0.0 }
 0x220   : > { %v2211_v1 = vadd.f32 %v2210_v8, %v2209_v23 }
 0x221   : > { %v2311_v48 = vsel %vm455_vm4, %v2267_v6, 0.0 }
 0x222   : > { %v2312_v58 = vadd.f32 %v2311_v48, %v2310_v5  ;;  %v2213_v50 = vadd.f32 %v2212_v12, %v2211_v1 }
 0x224   : > { %v2314_v20 = vadd.f32 %v2313_v19, %v2312_v58  ;;  %v2215_v42 = vadd.f32 %v2214_v34, %v2213_v50 }
 0x226   : > { %v2316_v53 = vadd.f32 %v2315_v40, %v2314_v20 }
 0x22c   : > { %v5618_v59 = vpop.f32.mrf.mxu0 }
 0x22d   : > { %v9102_v56 = vadd.f32 %v5618_v59, %v8944_v28 }
 0x22e   : > { %v2122_v35 = vpop.f32.mrf.mxu0 }
 0x22f   : > { %v9082_v21 = vadd.f32 %v8944_v28, %v2122_v35  ;;  %11310 = vst [vmem:[#allocation16_spill] sm:$0xff] %v9102_v56  ;;  %v2272_v35 = vmul.f32 %v9102_v56, %v9102_v56  ;;  %v2220_v62 = vsel %vm455_vm4, %v9102_v56, 0.0 }
 0x230   : > { %v5619_v22 = vpop.f32.mrf.mxu0 }
 0x231   : > { %11308 = vst [vmem:[#allocation18_spill] sm:$0xff] %v9082_v21  ;;  %v2270_v30 = vmul.f32 %v9082_v21, %v9082_v21  ;;  %v2216_v32 = vsel %vm455_vm4, %v9082_v21, 0.0  ;;  %v9111_v54 = vadd.f32 %v5619_v22, %v8944_v28  ;;  %v2321_v49 = vsel %vm455_vm4, %v2272_v35, 0.0 }
 0x232   : > { %v2125_v36 = vpop.f32.mrf.mxu0  ;;  %v2217_v38 = vadd.f32 %v2216_v32, %v2215_v42 }
 0x233   : > { %v9087_v2 = vadd.f32 %v8944_v28, %v2125_v36  ;;  %v2317_v18 = vsel %vm455_vm4, %v2270_v30, 0.0  ;;  %11311 = vst [vmem:[#allocation7_spill] sm:$0xff] %v9111_v54  ;;  %v2273_v9 = vmul.f32 %v9111_v54, %v9111_v54  ;;  %v2222_v8 = vsel %vm455_vm4, %v9111_v54, 0.0 }
 0x234   : > { %v2318_v24 = vadd.f32 %v2317_v18, %v2316_v53 }
 0x235   : > { %11309 = vst [vmem:[#allocation15_spill] sm:$0xff] %v9087_v2  ;;  %v2271_v10 = vmul.f32 %v9087_v2, %v9087_v2  ;;  %v2218_v7 = vsel %vm455_vm4, %v9087_v2, 0.0  ;;  %v2323_v1 = vsel %vm455_vm4, %v2273_v9, 0.0 }
 0x236   : > { %v2219_v31 = vadd.f32 %v2218_v7, %v2217_v38 }
 0x237   : > { %v2319_v60 = vsel %vm455_vm4, %v2271_v10, 0.0 }
 0x238   : > { %v2320_v52 = vadd.f32 %v2319_v60, %v2318_v24  ;;  %v2221_v47 = vadd.f32 %v2220_v62, %v2219_v31 }
 0x23a   : > { %v2322_v27 = vadd.f32 %v2321_v49, %v2320_v52  ;;  %v2223_v48 = vadd.f32 %v2222_v8, %v2221_v47 }
 0x23c   : > { %v2324_v50 = vadd.f32 %v2323_v1, %v2322_v27 }
 0x244   : > { %v5622_v3 = vpop.f32.mrf.mxu1 }
 0x245   : > { %v9134_v36 = vadd.f32 %v5622_v3, %v8944_v28 }
 0x246   : > { %v2138_v37 = vpop.f32.mrf.mxu1 }
 0x247   : > { %v9114_v59 = vadd.f32 %v8944_v28, %v2138_v37  ;;  %11314 = vst [vmem:[#allocation17_spill] sm:$0xff] %v9134_v36  ;;  %v2276_v20 = vmul.f32 %v9134_v36, %v9134_v36  ;;  %v2228_v10 = vsel %vm455_vm4, %v9134_v36, 0.0 }
 0x248   : > { %v5623_v51 = vpop.f32.mrf.mxu1 }
 0x249   : > { %11312 = vst [vmem:[#allocation9_spill] sm:$0xff] %v9114_v59  ;;  %v2274_v22 = vmul.f32 %v9114_v59, %v9114_v59  ;;  %v2224_v23 = vsel %vm455_vm4, %v9114_v59, 0.0  ;;  %v9143_v34 = vadd.f32 %v5623_v51, %v8944_v28  ;;  %v2329_v18 = vsel %vm455_vm4, %v2276_v20, 0.0 }
 0x24a   : > { %v2141_v33 = vpop.f32.mrf.mxu1  ;;  %v2225_v12 = vadd.f32 %v2224_v23, %v2223_v48 }
 0x24b   : > { %v9119_v39 = vadd.f32 %v8944_v28, %v2141_v33  ;;  %v2325_v55 = vsel %vm455_vm4, %v2274_v22, 0.0  ;;  %11315 = vst [vmem:[#allocation10_spill] sm:$0xff] %v9143_v34  ;;  %v2277_v7 = vmul.f32 %v9143_v34, %v9143_v34  ;;  %v2230_v53 = vsel %vm455_vm4, %v9143_v34, 0.0 }
 0x24c   : > { %v2326_v19 = vadd.f32 %v2325_v55, %v2324_v50 }
 0x24d   : > { %11313 = vst [vmem:[#allocation19_spill] sm:$0xff] %v9119_v39  ;;  %v2275_v15 = vmul.f32 %v9119_v39, %v9119_v39  ;;  %v2226_v58 = vsel %vm455_vm4, %v9119_v39, 0.0  ;;  %v2331_v33 = vsel %vm455_vm4, %v2277_v7, 0.0 }
 0x24e   : > { %v2227_v61 = vadd.f32 %v2226_v58, %v2225_v12 }
 0x24f   : > { %v2327_v37 = vsel %vm455_vm4, %v2275_v15, 0.0 }
 0x250   : > { %v2328_v32 = vadd.f32 %v2327_v37, %v2326_v19  ;;  %v2229_v40 = vadd.f32 %v2228_v10, %v2227_v61 }
 0x252   : > { %v2330_v38 = vadd.f32 %v2329_v18, %v2328_v32  ;;  %v2231_v31 = vadd.f32 %v2230_v53, %v2229_v40 }
 0x25c   : > { %v5626_v17 = vpop.f32.mrf.mxu1 }
 0x25d   : > { %v9166_v35 = vadd.f32 %v5626_v17, %v8944_v28 }
 0x25e   : > { %v2154_v6 = vpop.f32.mrf.mxu1 }
 0x25f   : > { %v9146_v3 = vadd.f32 %v8944_v28, %v2154_v6  ;;  %11318 = vst [vmem:[#allocation8_spill] sm:$0xff] %v9166_v35  ;;  %v2332_v6 = vadd.f32 %v2331_v33, %v2330_v38  ;;  %v2280_v27 = vmul.f32 %v9166_v35, %v9166_v35  ;;  %v2236_v15 = vsel %vm455_vm4, %v9166_v35, 0.0 }
 0x260   : > { %v5627_v5 = vpop.f32.mrf.mxu1 }
 0x261   : > { %11316 = vst [vmem:[#allocation11_spill] sm:$0xff] %v9146_v3  ;;  %v2278_v51 = vmul.f32 %v9146_v3, %v9146_v3  ;;  %v2232_v60 = vsel %vm455_vm4, %v9146_v3, 0.0  ;;  %v9175_v8 = vadd.f32 %v5627_v5, %v8944_v28  ;;  %v2337_v55 = vsel %vm455_vm4, %v2280_v27, 0.0 }
 0x262   : > { %v2157_v30 = vpop.f32.mrf.mxu1  ;;  %v2233_v47 = vadd.f32 %v2232_v60, %v2231_v31 }
 0x263   : > { %v9151_v42 = vadd.f32 %v8944_v28, %v2157_v30  ;;  %v2333_v52 = vsel %vm455_vm4, %v2278_v51, 0.0  ;;  %11319 = vst [vmem:[#allocation12_spill] sm:$0xff] %v9175_v8  ;;  %v2281_v58 = vmul.f32 %v9175_v8, %v9175_v8  ;;  %v2238_v5 = vsel %vm455_vm4, %v9175_v8, 0.0 }
 0x264   : > { %v2334_v9 = vadd.f32 %v2333_v52, %v2332_v6 }
 0x265   : > { %11317 = vst [vmem:[#allocation21_spill] sm:$0xff] %v9151_v42  ;;  %v2279_v24 = vmul.f32 %v9151_v42, %v9151_v42  ;;  %v2234_v62 = vsel %vm455_vm4, %v9151_v42, 0.0  ;;  %v2339_v10 = vsel %vm455_vm4, %v2281_v58, 0.0 }
 0x266   : > { %v2235_v22 = vadd.f32 %v2234_v62, %v2233_v47 }
 0x267   : > { %v2335_v49 = vsel %vm455_vm4, %v2279_v24, 0.0 }
 0x268   : > { %v2336_v23 = vadd.f32 %v2335_v49, %v2334_v9  ;;  %v2237_v48 = vadd.f32 %v2236_v15, %v2235_v22 }
 0x26a   : > { %v2338_v50 = vadd.f32 %v2337_v55, %v2336_v23  ;;  %v2239_v20 = vadd.f32 %v2238_v5, %v2237_v48 }
 0x26c   : > { %v2340_v38 = vadd.f32 %v2339_v10, %v2338_v50 }
 0x274   : > { %v5630_v17 = vpop.f32.mrf.mxu1 }
 0x275   : > { %v9188_v19 = vadd.f32 %v5630_v17, %v8944_v28 }
 0x276   : > { %v2170_v1 = vpop.f32.mrf.mxu1 }
 0x277   : > { %v9183_v12 = vadd.f32 %v8944_v28, %v2170_v1  ;;  %11321 = vst [vmem:[#allocation26_spill] sm:$0xff] %v9188_v19  ;;  %v2284_v53 = vmul.f32 %v9188_v19, %v9188_v19  ;;  %v2244_v52 = vsel %vm455_vm4, %v9188_v19, 0.0 }
 0x278   : > { %v5631_v37 = vpop.f32.mrf.mxu1 }
 0x279   : > { %11320 = vst [vmem:[#allocation13_spill] sm:$0xff] %v9183_v12  ;;  %v2240_v61 = vsel %vm455_vm4, %v9183_v12, 0.0  ;;  %v2282_v30 = vmul.f32 %v9183_v12, %v9183_v12  ;;  %v9197_v18 = vadd.f32 %v5631_v37, %v8944_v28  ;;  %v2345_v49 = vsel %vm455_vm4, %v2284_v53, 0.0 }
 0x27a   : > { %v2173_v32 = vpop.f32.mrf.mxu1  ;;  %v2241_v51 = vadd.f32 %v2240_v61, %v2239_v20 }
 0x27b   : > { %v2341_v40 = vsel %vm455_vm4, %v2282_v30, 0.0  ;;  %11322 = vst [vmem:[#allocation27_spill] sm:$0xff] %v9197_v18  ;;  %v9200_v7 = vadd.f32 %v8944_v28, %v2173_v32  ;;  %v2285_v28 = vmul.f32 %v9197_v18, %v9197_v18  ;;  %v2246_v9 = vsel %vm455_vm4, %v9197_v18, 0.0 }
 0x27c   : > { %v2342_v31 = vadd.f32 %v2341_v40, %v2340_v38 }
 0x27d   : > { %v2242_v60 = vsel %vm455_vm4, %v9200_v7, 0.0  ;;  %v2283_v24 = vmul.f32 %v9200_v7, %v9200_v7  ;;  %v2347_v23 = vsel %vm455_vm4, %v2285_v28, 0.0 }
 0x27e   : > { %v2243_v33 = vadd.f32 %v2242_v60, %v2241_v51 }
 0x27f   : > { %v2343_v62 = vsel %vm455_vm4, %v2283_v24, 0.0  ;;  %v2505_v24 = vlaneseq }
 0x280   : > { %v2245_v47 = vadd.f32 %v2244_v52, %v2243_v33  ;;  %v2344_v6 = vadd.f32 %v2343_v62, %v2342_v31 }
 0x281   : > { %v9221_v31 = vand.u32 127, %v2505_v24  ;;  %v9284_v24 = vld [vmem:[%s11118_s4] ss:$0 sm:$0xff] }
 0x282   : > { %v2247_v22 = vadd.f32 %v2246_v9, %v2245_v47  ;;  %v2346_v27 = vadd.f32 %v2345_v49, %v2344_v6 }
 0x283   : > { %vm2507_vm14 = vcmp.lt.s32.totalorder %v9221_v31, 4 }
 0x284   : > { %v2248_v17 = vrot.slane %v2247_v22, 4  ;;  %v2348_v15 = vadd.f32 %v2347_v23, %v2346_v27 }
 0x286   : > { %v2249_v48 = vadd.f32 %v2248_v17, %v2247_v22  ;;  %v2349_v1 = vrot.slane %v2348_v15, 4 }
 0x288   : > { %v2250_v55 = vrot.slane %v2249_v48, 2  ;;  %v2350_v58 = vadd.f32 %v2349_v1, %v2348_v15 }
 0x28a   : > { %v2251_v50 = vadd.f32 %v2250_v55, %v2249_v48  ;;  %v2351_v37 = vrot.slane %v2350_v58, 2 }
 0x28c   : > { %v2252_v5 = vrot.slane %v2251_v50, 1  ;;  %v2352_v61 = vadd.f32 %v2351_v37, %v2350_v58 }
 0x28e   : > { %v2253_v30 = vadd.f32 %v2252_v5, %v2251_v50  ;;  %v2353_v20 = vrot.slane %v2352_v61, 1 }
 0x290   : > { %v2354_v32 = vadd.f32 %v2353_v20, %v2352_v61  ;;  %v9217_v10 = vmul.f32 0.00390625, %v2253_v30  ;;  %v9265_v61 = vld [vmem:[%s11117_s3] ss:$0 sm:$0xff] }
 0x292   : > { %v2357_v40 = vmul.f32 0.00390625, %v2354_v32  ;;  %v2358_v51 = vmul.f32 %v9217_v10, %v9217_v10  ;;  %v2390_v33 = vsub.f32 %v9200_v7, %v9217_v10  ;;  %v2361_v52 = vsub.f32 %v8950_v57, %v9217_v10 }
 0x293   : > { %v2362_v28 = vsub.f32 %v8947_v13, %v9217_v10  ;;  %v2363_v62 = vsub.f32 %v8955_v45, %v9217_v10  ;;  %v2364_v47 = vsub.f32 %v8970_v25, %v9217_v10  ;;  %v2365_v6 = vsub.f32 %v8973_v46, %v9217_v10 }
 0x294   : > { %v2359_v38 = vsub.f32 %v2357_v40, %v2358_v51  ;;  %v2366_v49 = vsub.f32 %v8978_v26, %v9217_v10  ;;  %v2367_v9 = vsub.f32 %v8990_v0, %v9217_v10  ;;  %v2368_v22 = vsub.f32 %v9008_v29, %v9217_v10 }
 0x295   : > { %v2369_v27 = vsub.f32 %v9011_v63, %v9217_v10  ;;  %v2370_v23 = vsub.f32 %v9017_v43, %v9217_v10  ;;  %v2371_v17 = vsub.f32 %v9036_v14, %v9217_v10  ;;  %v2372_v15 = vsub.f32 %v9046_v41, %v9217_v10 }
 0x296   : > { %v2360_v53 = vmax.f32 %v2359_v38, 0.0  ;;  %v2373_v48 = vsub.f32 %v9049_v11, %v9217_v10  ;;  %v2374_v1 = vsub.f32 %v9054_v16, %v9217_v10  ;;  %v2375_v55 = vsub.f32 %v9070_v44, %v9217_v10 }
 0x297   : > { %v2376_v58 = vsub.f32 %v9079_v4, %v9217_v10  ;;  %v2377_v50 = vsub.f32 %v9082_v21, %v9217_v10  ;;  %v2378_v37 = vsub.f32 %v9087_v2, %v9217_v10  ;;  %v2379_v30 = vsub.f32 %v9102_v56, %v9217_v10 }
 0x298   : > { %v2393_v60 = vadd.f32 1e-05, %v2360_v53  ;;  %v2380_v20 = vsub.f32 %v9111_v54, %v9217_v10  ;;  %v2381_v32 = vsub.f32 %v9114_v59, %v9217_v10  ;;  %v2382_v40 = vsub.f32 %v9119_v39, %v9217_v10 }
 0x299   : > { %v2383_v38 = vsub.f32 %v9134_v36, %v9217_v10  ;;  %v2384_v53 = vsub.f32 %v9143_v34, %v9217_v10  ;;  %v2386_v59 = vsub.f32 %v9151_v42, %v9217_v10  ;;  %v2388_v36 = vsub.f32 %v9175_v8, %v9217_v10 }
 0x29a   : > { %7243 = vrsqrt.f32 %v2393_v60  ;;  %v2385_v60 = vsub.f32 %v9146_v3, %v9217_v10  ;;  %v2389_v34 = vsub.f32 %v9183_v12, %v9217_v10  ;;  %v2391_v3 = vsub.f32 %v9188_v19, %v9217_v10 }
 0x29b   : > { %v2392_v54 = vsub.f32 %v9197_v18, %v9217_v10 }
 0x2a7   : > { %v7244_v5 = vpop.eup %7243 }
 0x2a8   : > { %v2424_v51 = vmul.f32 %v7244_v5, %v2390_v33  ;;  %v2387_v33 = vsub.f32 %v9166_v35, %v9217_v10  ;;  %v2395_v56 = vmul.f32 %v7244_v5, %v2361_v52  ;;  %v2396_v2 = vmul.f32 %v7244_v5, %v2362_v28 }
 0x2a9   : > { %v2397_v42 = vmul.f32 %v7244_v5, %v2363_v62  ;;  %v2398_v21 = vmul.f32 %v7244_v5, %v2364_v47  ;;  %v2399_v4 = vmul.f32 %v7244_v5, %v2365_v6  ;;  %v2400_v44 = vmul.f32 %v7244_v5, %v2366_v49 }
 0x2aa   : > { %v2463_v39 = vmul.f32 %v9265_v61, %v2424_v51  ;;  %v2401_v8 = vmul.f32 %v7244_v5, %v2367_v9  ;;  %v2402_v16 = vmul.f32 %v7244_v5, %v2368_v22  ;;  %v2403_v11 = vmul.f32 %v7244_v5, %v2369_v27 }
 0x2ab   : > { %v2404_v12 = vmul.f32 %v7244_v5, %v2370_v23  ;;  %v2405_v41 = vmul.f32 %v7244_v5, %v2371_v17  ;;  %v2406_v51 = vmul.f32 %v7244_v5, %v2372_v15  ;;  %v2407_v14 = vmul.f32 %v7244_v5, %v2373_v48 }
 0x2ac   : > { %v2502_v35 = vadd.f32 %v9284_v24, %v2463_v39  ;;  %v2408_v10 = vmul.f32 %v7244_v5, %v2374_v1  ;;  %v2409_v52 = vmul.f32 %v7244_v5, %v2375_v55  ;;  %v2410_v62 = vmul.f32 %v7244_v5, %v2376_v58 }
 0x2ad   : > { %v2411_v47 = vmul.f32 %v7244_v5, %v2377_v50  ;;  %v2412_v6 = vmul.f32 %v7244_v5, %v2378_v37  ;;  %v2413_v39 = vmul.f32 %v7244_v5, %v2379_v30  ;;  %v2414_v49 = vmul.f32 %v7244_v5, %v2380_v20 }
 0x2ae   : > { %v2537_v19 = vsel %vm2507_vm14, %v2502_v35, %v9200_v7  ;;  %v2415_v9 = vmul.f32 %v7244_v5, %v2381_v32  ;;  %v2416_v27 = vmul.f32 %v7244_v5, %v2382_v40  ;;  %v2417_v23 = vmul.f32 %v7244_v5, %v2383_v38 }
 0x2af   : > { %vm2569_vm15 = vcmp.gt.f32.partialorder %v2537_v19, 0.0  ;;  %v2601_v28 = vmul.f32 0.2, %v2537_v19  ;;  %v2418_v17 = vmul.f32 %v7244_v5, %v2384_v53  ;;  %v2419_v15 = vmul.f32 %v7244_v5, %v2385_v60 }
 0x2b0   : > { %v2420_v18 = vmul.f32 %v7244_v5, %v2386_v59  ;;  %v2421_v35 = vmul.f32 %v7244_v5, %v2387_v33  ;;  %v2422_v7 = vmul.f32 %v7244_v5, %v2388_v36  ;;  %v2423_v48 = vmul.f32 %v7244_v5, %v2389_v34 }
 0x2b1   : > { %v2633_v22 = vsel %vm2569_vm15, %v2537_v19, %v2601_v28  ;;  %v2425_v1 = vmul.f32 %v7244_v5, %v2391_v3  ;;  %v2426_v55 = vmul.f32 %v7244_v5, %v2392_v54  ;;  %v2434_v58 = vmul.f32 %v9265_v61, %v2395_v56 }
 0x2b2   : > { %2666 = vst.msk [vmem:[#allocation3 + $0x171] sm:$0xff] %vm455_vm4, %v2633_v22  ;;  %v2435_v50 = vmul.f32 %v9265_v61, %v2396_v2  ;;  %v2436_v37 = vmul.f32 %v9265_v61, %v2397_v42  ;;  %v2437_v19 = vmul.f32 %v9265_v61, %v2398_v21  ;;  %v2438_v30 = vmul.f32 %v9265_v61, %v2399_v4 }
 0x2b3   : > { %v2439_v20 = vmul.f32 %v9265_v61, %v2400_v44  ;;  %v2440_v32 = vmul.f32 %v9265_v61, %v2401_v8  ;;  %v2441_v59 = vmul.f32 %v9265_v61, %v2402_v16  ;;  %v2442_v36 = vmul.f32 %v9265_v61, %v2403_v11 }
 0x2b4   : > { %v2443_v54 = vmul.f32 %v9265_v61, %v2404_v12  ;;  %v2444_v56 = vmul.f32 %v9265_v61, %v2405_v41  ;;  %v2445_v2 = vmul.f32 %v9265_v61, %v2406_v51  ;;  %v2446_v34 = vmul.f32 %v9265_v61, %v2407_v14 }
 0x2b5   : > { %v2447_v21 = vmul.f32 %v9265_v61, %v2408_v10  ;;  %v2448_v4 = vmul.f32 %v9265_v61, %v2409_v52  ;;  %v2449_v44 = vmul.f32 %v9265_v61, %v2410_v62  ;;  %v2450_v3 = vmul.f32 %v9265_v61, %v2411_v47 }
 0x2b6   : > { %v2451_v16 = vmul.f32 %v9265_v61, %v2412_v6  ;;  %v2452_v11 = vmul.f32 %v9265_v61, %v2413_v39  ;;  %v2453_v42 = vmul.f32 %v9265_v61, %v2414_v49  ;;  %v2454_v41 = vmul.f32 %v9265_v61, %v2415_v9 }
 0x2b7   : > { %v2455_v8 = vmul.f32 %v9265_v61, %v2416_v27  ;;  %v2456_v14 = vmul.f32 %v9265_v61, %v2417_v23  ;;  %v2475_v12 = vadd.f32 %v9284_v24, %v2436_v37  ;;  %v2476_v5 = vadd.f32 %v9284_v24, %v2437_v19 }
 0x2b8   : > { %v2457_v40 = vmul.f32 %v9265_v61, %v2418_v17  ;;  %v2458_v38 = vmul.f32 %v9265_v61, %v2419_v15  ;;  %v2459_v53 = vmul.f32 %v9265_v61, %v2420_v18  ;;  %v2460_v60 = vmul.f32 %v9265_v61, %v2421_v35 }
 0x2b9   : > { %v2461_v33 = vmul.f32 %v9265_v61, %v2422_v7  ;;  %v2462_v51 = vmul.f32 %v9265_v61, %v2423_v48  ;;  %v2510_v10 = vsel %vm2507_vm14, %v2475_v12, %v8955_v45  ;;  %v2511_v52 = vsel %vm2507_vm14, %v2476_v5, %v8970_v25 }
 0x2ba   : > { %vm2542_vm1 = vcmp.gt.f32.partialorder %v2510_v10, 0.0  ;;  %vm2543_vm6 = vcmp.gt.f32.partialorder %v2511_v52, 0.0  ;;  %v2574_v28 = vmul.f32 0.2, %v2510_v10  ;;  %v2575_v62 = vmul.f32 0.2, %v2511_v52 }
 0x2bb   : > { %v2464_v18 = vmul.f32 %v9265_v61, %v2425_v1  ;;  %v2465_v47 = vmul.f32 %v9265_v61, %v2426_v55  ;;  %v2473_v6 = vadd.f32 %v9284_v24, %v2434_v58  ;;  %v2474_v39 = vadd.f32 %v9284_v24, %v2435_v50 }
 0x2bc   : > { %v2606_v49 = vsel %vm2542_vm1, %v2510_v10, %v2574_v28  ;;  %v2607_v9 = vsel %vm2543_vm6, %v2511_v52, %v2575_v62  ;;  %v2477_v45 = vadd.f32 %v9284_v24, %v2438_v30  ;;  %v2478_v22 = vadd.f32 %v9284_v24, %v2439_v20  ;;  %v11329_v52 = vld [vmem:[#allocation18_spill] sm:$0xff]  ;;  %v11330_v62 = vld [vmem:[#allocation15_spill] sm:$0xff] }
 0x2bd   : > { %2639 = vst.msk [vmem:[#allocation3 + $0x31] sm:$0xff] %vm455_vm4, %v2606_v49  ;;  %2640 = vst.msk [vmem:[#allocation3 + $0x39] sm:$0xff] %vm455_vm4, %v2607_v9  ;;  %v2479_v25 = vadd.f32 %v9284_v24, %v2440_v32  ;;  %v2480_v27 = vadd.f32 %v9284_v24, %v2441_v59  ;;  %v2481_v61 = vadd.f32 %v9284_v24, %v2442_v36  ;;  %v11333_v9 = vld [vmem:[#allocation9_spill] sm:$0xff] }
 0x2be   : > { %v2482_v23 = vadd.f32 %v9284_v24, %v2443_v54  ;;  %v2483_v17 = vadd.f32 %v9284_v24, %v2444_v56  ;;  %v2484_v15 = vadd.f32 %v9284_v24, %v2445_v2  ;;  %v2485_v35 = vadd.f32 %v9284_v24, %v2446_v34 }
 0x2bf   : > { %v2486_v7 = vadd.f32 %v9284_v24, %v2447_v21  ;;  %v2487_v48 = vadd.f32 %v9284_v24, %v2448_v4  ;;  %v2488_v1 = vadd.f32 %v9284_v24, %v2449_v44  ;;  %v2489_v55 = vadd.f32 %v9284_v24, %v2450_v3 }
 0x2c0   : > { %v2490_v58 = vadd.f32 %v9284_v24, %v2451_v16  ;;  %v2491_v50 = vadd.f32 %v9284_v24, %v2452_v11  ;;  %v2492_v37 = vadd.f32 %v9284_v24, %v2453_v42  ;;  %v2493_v19 = vadd.f32 %v9284_v24, %v2454_v41 }
 0x2c1   : > { %v2494_v30 = vadd.f32 %v9284_v24, %v2455_v8  ;;  %v2495_v20 = vadd.f32 %v9284_v24, %v2456_v14  ;;  %v2496_v32 = vadd.f32 %v9284_v24, %v2457_v40  ;;  %v2508_v59 = vsel %vm2507_vm14, %v2473_v6, %v8950_v57 }
 0x2c2   : > { %v2509_v36 = vsel %vm2507_vm14, %v2474_v39, %v8947_v13  ;;  %vm2540_vm8 = vcmp.gt.f32.partialorder %v2508_v59, 0.0  ;;  %v2572_v54 = vmul.f32 0.2, %v2508_v59  ;;  %v2497_v2 = vadd.f32 %v9284_v24, %v2458_v38  ;;  %v11332_v39 = vld [vmem:[#allocation7_spill] sm:$0xff] }
 0x2c3   : > { %vm2541_vm10 = vcmp.gt.f32.partialorder %v2509_v36, 0.0  ;;  %v2573_v56 = vmul.f32 0.2, %v2509_v36  ;;  %v2498_v34 = vadd.f32 %v9284_v24, %v2459_v53  ;;  %v2499_v21 = vadd.f32 %v9284_v24, %v2460_v60  ;;  %v11327_v60 = vld [vmem:[#allocation24_spill] sm:$0xff] }
 0x2c4   : > { %v2500_v4 = vadd.f32 %v9284_v24, %v2461_v33  ;;  %v9377_v44 = vld [vmem:[#allocation3 + $0x30] sm:$0xff]  ;;  %v9379_v3 = vld [vmem:[#allocation3 + $0x38] sm:$0xff]  ;;  %v2501_v57 = vadd.f32 %v9284_v24, %v2462_v51  ;;  %v2503_v13 = vadd.f32 %v9284_v24, %v2464_v18  ;;  %v2604_v16 = vsel %vm2540_vm8, %v2508_v59, %v2572_v54  ;;  %v11328_v51 = vld [vmem:[#allocation25_spill] sm:$0xff] }
 0x2c5   : > { %v2605_v11 = vsel %vm2541_vm10, %v2509_v36, %v2573_v56  ;;  %v9385_v42 = vpack.i.bf16 %v9379_v3, %v9377_v44  ;;  %v2504_v41 = vadd.f32 %v9284_v24, %v2465_v47  ;;  %2637 = vst.msk [vmem:[#allocation3 + $0x19] sm:$0xff] %vm455_vm4, %v2604_v16  ;;  %v2512_v8 = vsel %vm2507_vm14, %v2477_v45, %v8973_v46  ;;  %v11331_v47 = vld [vmem:[#allocation16_spill] sm:$0xff]  ;;  %v11341_v54 = vld [vmem:[#allocation13_spill] sm:$0xff] }
 0x2c6   : > { %2638 = vst.msk [vmem:[#allocation3 + $0x21] sm:$0xff] %vm455_vm4, %v2605_v11  ;;  %v2513_v14 = vsel %vm2507_vm14, %v2478_v22, %v8978_v26  ;;  %v9399_v12 = vsel %vm2507_vm14, %v2479_v25, %v8990_v0  ;;  %v9404_v24 = vsel %vm2507_vm14, %v2480_v27, %v9008_v29  ;;  %v9409_v5 = vsel %vm2507_vm14, %v2481_v61, %v9011_v63  ;;  %v11323_v26 = vld [vmem:[#allocation20_spill] sm:$0xff]  ;;  %v11324_v29 = vld [vmem:[#allocation14_spill] sm:$0xff]  ;;  %v11334_v22 = vld [vmem:[#allocation19_spill] sm:$0xff] }
 0x2c7   : > { %v9414_v46 = vsel %vm2507_vm14, %v2482_v23, %v9017_v43  ;;  %6446 = vrot.lane.b32.xlu0 %v9385_v42, %s11204_s12  ;;  %v9421_v0 = vsel %vm2507_vm14, %v2483_v17, %v11323_v26  ;;  %v9426_v40 = vsel %vm2507_vm14, %v2484_v15, %v11324_v29  ;;  %v11325_v63 = vld [vmem:[#allocation22_spill] sm:$0xff]  ;;  %v11326_v43 = vld [vmem:[#allocation23_spill] sm:$0xff]  ;;  %v9441_v33 = vsel %vm2507_vm14, %v2487_v48, %v11327_v60  ;;  %v11335_v23 = vld [vmem:[#allocation17_spill] sm:$0xff] }
 0x2c8   : > { %v9431_v38 = vsel %vm2507_vm14, %v2485_v35, %v11325_v63  ;;  %v9436_v53 = vsel %vm2507_vm14, %v2486_v7, %v11326_v43  ;;  %v9446_v10 = vsel %vm2507_vm14, %v2488_v1, %v11328_v51  ;;  %v9451_v28 = vsel %vm2507_vm14, %v2489_v55, %v11329_v52  ;;  %v11336_v15 = vld [vmem:[#allocation10_spill] sm:$0xff]  ;;  %v11337_v7 = vld [vmem:[#allocation11_spill] sm:$0xff]  ;;  %v11338_v1 = vld [vmem:[#allocation21_spill] sm:$0xff] }
 0x2c9   : > { %v9456_v18 = vsel %vm2507_vm14, %v2490_v58, %v11330_v62  ;;  %v9461_v6 = vsel %vm2507_vm14, %v2491_v50, %v11331_v47  ;;  %v9466_v49 = vsel %vm2507_vm14, %v2492_v37, %v11332_v39  ;;  %v9471_v45 = vsel %vm2507_vm14, %v2493_v19, %v11333_v9  ;;  %v11339_v37 = vld [vmem:[#allocation8_spill] sm:$0xff] }
 0x2ca   : > { %v9476_v25 = vsel %vm2507_vm14, %v2494_v30, %v11334_v22  ;;  %vm2544_vm12 = vcmp.gt.f32.partialorder %v2512_v8, 0.0  ;;  %vm2545_vm13 = vcmp.gt.f32.partialorder %v2513_v14, 0.0  ;;  %v2576_v27 = vmul.f32 0.2, %v2512_v8  ;;  %v11340_v30 = vld [vmem:[#allocation12_spill] sm:$0xff] }
 0x2cb   : > { %v2577_v61 = vmul.f32 0.2, %v2513_v14  ;;  %v9481_v17 = vsel %vm2507_vm14, %v2495_v20, %v11335_v23  ;;  %v9486_v35 = vsel %vm2507_vm14, %v2496_v32, %v11336_v15  ;;  %v9491_v48 = vsel %vm2507_vm14, %v2497_v2, %v11337_v7  ;;  %v11342_v2 = vld [vmem:[#allocation26_spill] sm:$0xff] }
 0x2cc   : > { %v9496_v55 = vsel %vm2507_vm14, %v2498_v34, %v11338_v1  ;;  %v9498_v58 = vld [vmem:[#allocation3 + $0x18] sm:$0xff]  ;;  %v9505_v19 = vsel %vm2507_vm14, %v2499_v21, %v11339_v37  ;;  %v9510_v20 = vsel %vm2507_vm14, %v2500_v4, %v11340_v30  ;;  %v2608_v32 = vsel %vm2544_vm12, %v2512_v8, %v2576_v27  ;;  %v11343_v21 = vld [vmem:[#allocation27_spill] sm:$0xff] }
 0x2cd   : > { %v9500_v50 = vld [vmem:[#allocation3 + $0x20] sm:$0xff]  ;;  %v2609_v59 = vsel %vm2545_vm13, %v2513_v14, %v2577_v61  ;;  %v9517_v56 = vsel %vm2507_vm14, %v2501_v57, %v11341_v54  ;;  %v9522_v34 = vsel %vm2507_vm14, %v2503_v13, %v11342_v2  ;;  %v9527_v4 = vsel %vm2507_vm14, %v2504_v41, %v11343_v21  ;;  %2641 = vst.msk [vmem:[#allocation3 + $0x49] sm:$0xff] %vm455_vm4, %v2608_v32 }
 0x2ce   : > { %v6440_v36 = vpack.i.bf16 %v9500_v50, %v9498_v58  ;;  %2642 = vst.msk [vmem:[#allocation3 + $0x51] sm:$0xff] %vm455_vm4, %v2609_v59  ;;  %vm2546_vm15 = vcmp.gt.f32.partialorder %v9399_v12, 0.0  ;;  %vm2547_vm1 = vcmp.gt.f32.partialorder %v9404_v24, 0.0  ;;  %vm2548_vm6 = vcmp.gt.f32.partialorder %v9409_v5, 0.0 }
 0x2cf   : > { %vm2549_vm8 = vcmp.gt.f32.partialorder %v9414_v46, 0.0  ;;  %vm2550_vm10 = vcmp.gt.f32.partialorder %v9421_v0, 0.0  ;;  %vm2556_vm7 = vcmp.gt.f32.partialorder %v9451_v28, 0.0  ;;  %vm2557_vm0 = vcmp.gt.f32.partialorder %v9456_v18, 0.0 }
 0x2d0   : > { %6441 = vrot.lane.b32.xlu1 %v6440_v36, %s11204_s12  ;;  %vm2558_vm5 = vcmp.gt.f32.partialorder %v9461_v6, 0.0  ;;  %vm2563_vm13 = vcmp.gt.f32.partialorder %v9486_v35, 0.0  ;;  %vm2564_vm11 = vcmp.gt.f32.partialorder %v9491_v48, 0.0  ;;  %v2578_v31 = vmul.f32 0.2, %v9399_v12 }
 0x2d1   : > { %v2579_v57 = vmul.f32 0.2, %v9404_v24  ;;  %v2580_v13 = vmul.f32 0.2, %v9409_v5  ;;  %vm2566_vm3 = vcmp.gt.f32.partialorder %v9505_v19, 0.0  ;;  %vm2567_vm2 = vcmp.gt.f32.partialorder %v9510_v20, 0.0 }
 0x2d2   : > { %vm2568_vm12 = vcmp.gt.f32.partialorder %v9517_v56, 0.0  ;;  %vm2570_vm14 = vcmp.gt.f32.partialorder %v9522_v34, 0.0  ;;  %v2581_v16 = vmul.f32 0.2, %v9414_v46  ;;  %v2582_v11 = vmul.f32 0.2, %v9421_v0 }
 0x2d3   : > { %v2583_v41 = vmul.f32 0.2, %v9426_v40  ;;  %vm2571_vm9 = vcmp.gt.f32.partialorder %v9527_v4, 0.0  ;;  %v2584_v26 = vmul.f32 0.2, %v9431_v38  ;;  %v2610_v63 = vsel %vm2546_vm15, %v9399_v12, %v2578_v31 }
 0x2d4   : > { %v9562_v8 = vld [vmem:[#allocation3 + $0x48] sm:$0xff]  ;;  %v2585_v29 = vmul.f32 0.2, %v9436_v53  ;;  %6451 = vrot.lane.b32.xlu1 %v9385_v42, %s11206_s22  ;;  %v2611_v43 = vsel %vm2547_vm1, %v9404_v24, %v2579_v57  ;;  %v2586_v51 = vmul.f32 0.2, %v9441_v33  ;;  %2643 = vst.msk [vmem:[#allocation3 + $0x61] sm:$0xff] %vm455_vm4, %v2610_v63  ;;  %v2612_v47 = vsel %vm2548_vm6, %v9409_v5, %v2580_v13 }
 0x2d5   : > { %v9564_v14 = vld [vmem:[#allocation3 + $0x50] sm:$0xff]  ;;  %v2587_v52 = vmul.f32 0.2, %v9446_v10  ;;  %v2588_v62 = vmul.f32 0.2, %v9451_v28  ;;  %2644 = vst.msk [vmem:[#allocation3 + $0x69] sm:$0xff] %vm455_vm4, %v2611_v43  ;;  %v2613_v27 = vsel %vm2549_vm8, %v9414_v46, %v2581_v16  ;;  %v2614_v15 = vsel %vm2550_vm10, %v9421_v0, %v2582_v11 }
 0x2d6   : > { %v9579_v60 = vpack.i.bf16 %v9564_v14, %v9562_v8  ;;  %v2589_v42 = vmul.f32 0.2, %v9456_v18  ;;  %v2590_v12 = vmul.f32 0.2, %v9461_v6  ;;  %v2591_v24 = vmul.f32 0.2, %v9466_v49 }
 0x2d7   : > { %v2592_v39 = vmul.f32 0.2, %v9471_v45  ;;  %v2593_v9 = vmul.f32 0.2, %v9476_v25  ;;  %v2594_v22 = vmul.f32 0.2, %v9481_v17  ;;  %v2620_v54 = vsel %vm2556_vm7, %v9451_v28, %v2588_v62 }
 0x2d8   : > { %6456 = vrot.lane.b32.xlu0 %v9579_v60, %s11206_s22  ;;  %2645 = vst.msk [vmem:[#allocation3 + $0x79] sm:$0xff] %vm455_vm4, %v2612_v47  ;;  %v2595_v61 = vmul.f32 0.2, %v9486_v35  ;;  %v2596_v23 = vmul.f32 0.2, %v9491_v48  ;;  %2646 = vst.msk [vmem:[#allocation3 + $0x81] sm:$0xff] %vm455_vm4, %v2613_v27  ;;  %6461 = vrot.lane.b32.xlu1 %v9579_v60, %s11204_s12 }
 0x2d9   : > { %v2597_v5 = vmul.f32 0.2, %v9496_v55  ;;  %v2598_v7 = vmul.f32 0.2, %v9505_v19  ;;  %v2599_v1 = vmul.f32 0.2, %v9510_v20 }
 0x2da   : > { %v2600_v46 = vmul.f32 0.2, %v9517_v56  ;;  %vm11344_vm15 = vcmp.gt.f32.partialorder %v9426_v40, 0.0  ;;  %2647 = vst.msk [vmem:[#allocation3 + $0x91] sm:$0xff] %vm455_vm4, %v2614_v15  ;;  %v2602_v30 = vmul.f32 0.2, %v9522_v34 }
 0x2db   : > { %v2615_v37 = vsel %vm11344_vm15, %v9426_v40, %v2583_v41  ;;  %v2603_v32 = vmul.f32 0.2, %v9527_v4  ;;  %vm11345_vm1 = vcmp.gt.f32.partialorder %v9431_v38, 0.0  ;;  %vm11346_vm6 = vcmp.gt.f32.partialorder %v9436_v53, 0.0  ;;  %2653 = vst.msk [vmem:[#allocation3 + $0xd9] sm:$0xff] %vm455_vm4, %v2620_v54 }
 0x2dc   : > { %v2616_v0 = vsel %vm11345_vm1, %v9431_v38, %v2584_v26  ;;  %v2617_v59 = vsel %vm11346_vm6, %v9436_v53, %v2585_v29  ;;  %2648 = vst.msk [vmem:[#allocation3 + $0x99] sm:$0xff] %vm455_vm4, %v2615_v37  ;;  %vm11347_vm8 = vcmp.gt.f32.partialorder %v9441_v33, 0.0  ;;  %vm11348_vm10 = vcmp.gt.f32.partialorder %v9446_v10, 0.0  ;;  %v9652_v2 = vld [vmem:[#allocation3 + $0x68] sm:$0xff] }
 0x2dd   : > { %v2618_v40 = vsel %vm11347_vm8, %v9441_v33, %v2586_v51  ;;  %v2619_v36 = vsel %vm11348_vm10, %v9446_v10, %v2587_v52  ;;  %v2621_v38 = vsel %vm2557_vm0, %v9456_v18, %v2589_v42  ;;  %2649 = vst.msk [vmem:[#allocation3 + $0xa9] sm:$0xff] %vm455_vm4, %v2616_v0  ;;  %2650 = vst.msk [vmem:[#allocation3 + $0xb1] sm:$0xff] %vm455_vm4, %v2617_v59  ;;  %vm11349_vm15 = vcmp.gt.f32.partialorder %v9466_v49, 0.0  ;;  %v9650_v18 = vld [vmem:[#allocation3 + $0x60] sm:$0xff] }
 0x2de   : > { %v2622_v53 = vsel %vm2558_vm5, %v9461_v6, %v2590_v12  ;;  %v2623_v33 = vsel %vm11349_vm15, %v9466_v49, %v2591_v24  ;;  %vm11350_vm1 = vcmp.gt.f32.partialorder %v9471_v45, 0.0  ;;  %vm11351_vm7 = vcmp.gt.f32.partialorder %v9476_v25, 0.0  ;;  %2651 = vst.msk [vmem:[#allocation3 + $0xc1] sm:$0xff] %vm455_vm4, %v2618_v40  ;;  %2652 = vst.msk [vmem:[#allocation3 + $0xc9] sm:$0xff] %vm455_vm4, %v2619_v36  ;;  %v9779_v0 = vld [vmem:[#allocation3 + $0x40] sm:$0x3] }
 0x2df   : > { %v2624_v10 = vsel %vm11350_vm1, %v9471_v45, %v2592_v39  ;;  %v2625_v28 = vsel %vm11351_vm7, %v9476_v25, %v2593_v9  ;;  %2654 = vst.msk [vmem:[#allocation3 + $0xe1] sm:$0xff] %vm455_vm4, %v2621_v38  ;;  %vm11352_vm0 = vcmp.gt.f32.partialorder %v9481_v17, 0.0  ;;  %v2627_v49 = vsel %vm2563_vm13, %v9486_v35, %v2595_v61  ;;  %2655 = vst.msk [vmem:[#allocation3 + $0xf1] sm:$0xff] %vm455_vm4, %v2622_v53  ;;  %v9785_v36 = vld [vmem:[#allocation3 + $0x28] sm:$0x3] }
 0x2e0   : > { %v2626_v6 = vsel %vm11352_vm0, %v9481_v17, %v2594_v22  ;;  %v2628_v45 = vsel %vm2564_vm11, %v9491_v48, %v2596_v23  ;;  %vm11353_vm5 = vcmp.gt.f32.partialorder %v9496_v55, 0.0  ;;  %2656 = vst.msk [vmem:[#allocation3 + $0xf9] sm:$0xff] %vm455_vm4, %v2623_v33  ;;  %2657 = vst.msk [vmem:[#allocation3 + $0x109] sm:$0xff] %vm455_vm4, %v2624_v10  ;;  %v2630_v17 = vsel %vm2566_vm3, %v9505_v19, %v2598_v7 }
 0x2e1   : > { %v2629_v25 = vsel %vm11353_vm5, %v9496_v55, %v2597_v5  ;;  %2658 = vst.msk [vmem:[#allocation3 + $0x111] sm:$0xff] %vm455_vm4, %v2625_v28  ;;  %v2631_v35 = vsel %vm2567_vm2, %v9510_v20, %v2599_v1  ;;  %v2632_v48 = vsel %vm2568_vm12, %v9517_v56, %v2600_v46  ;;  %v2634_v55 = vsel %vm2570_vm14, %v9522_v34, %v2602_v30  ;;  %v9700_v56 = vld [vmem:[#allocation3 + $0x78] sm:$0xff]  ;;  %v9702_v34 = vld [vmem:[#allocation3 + $0x80] sm:$0xff] }
 0x2e2   : > { %2659 = vst.msk [vmem:[#allocation3 + $0x121] sm:$0xff] %vm455_vm4, %v2626_v6  ;;  %2660 = vst.msk [vmem:[#allocation3 + $0x129] sm:$0xff] %vm455_vm4, %v2627_v49  ;;  %v2635_v19 = vsel %vm2571_vm9, %v9527_v4, %v2603_v32  ;;  %v6465_v20 = vpack.i.bf16 %v9652_v2, %v9650_v18  ;;  %v6475_v21 = vpack.i.bf16 %v9702_v34, %v9700_v56  ;;  %v9709_v4 = vld [vmem:[#allocation3 + $0x90] sm:$0xff]  ;;  %v9733_v63 = vld [vmem:[#allocation3 + $0xd8] sm:$0xff]  ;;  %vm11354_vm2 = vcmask 1046528  }
 0x2e3   : > { %2661 = vst.msk [vmem:[#allocation3 + $0x139] sm:$0xff] %vm455_vm4, %v2628_v45  ;;  %2662 = vst.msk [vmem:[#allocation3 + $0x141] sm:$0xff] %vm455_vm4, %v2629_v25  ;;  %v9711_v31 = vld [vmem:[#allocation3 + $0x98] sm:$0xff]  ;;  %v2781_v54 = vrot.slane %v9377_v44, 1  ;;  %v2782_v38 = vrot.slane %v9379_v3, 1  ;;  %v2784_v10 = vrot.slane %v9779_v0, 1 }
 0x2e4   : > { %2663 = vst.msk [vmem:[#allocation3 + $0x151] sm:$0xff] %vm455_vm4, %v2630_v17  ;;  %2664 = vst.msk [vmem:[#allocation3 + $0x159] sm:$0xff] %vm455_vm4, %v2631_v35  ;;  %6466 = vrot.lane.b32.xlu0 %v6465_v20, %s11204_s12  ;;  %6471 = vrot.lane.b32.xlu1 %v6465_v20, %s11206_s22  ;;  %v6485_v57 = vpack.i.bf16 %v9711_v31, %v9709_v4  ;;  %v9717_v13 = vld [vmem:[#allocation3 + $0xa8] sm:$0xff]  ;;  %v9719_v16 = vld [vmem:[#allocation3 + $0xb0] sm:$0xff]  ;;  %v2776_v28 = vrot.slane %v9498_v58, 1  ;;  %v2777_v6 = vrot.slane %v9500_v50, 1 }
 0x2e5   : > { %2665 = vst.msk [vmem:[#allocation3 + $0x169] sm:$0xff] %vm455_vm4, %v2632_v48  ;;  %2667 = vst.msk [vmem:[#allocation3 + $0x181] sm:$0xff] %vm455_vm4, %v2634_v55  ;;  %v6495_v11 = vpack.i.bf16 %v9719_v16, %v9717_v13  ;;  %v9725_v41 = vld [vmem:[#allocation3 + $0xc0] sm:$0xff]  ;;  %v9727_v26 = vld [vmem:[#allocation3 + $0xc8] sm:$0xff]  ;;  %v2806_v27 = vrot.slane %v9717_v13, 1  ;;  %v2807_v61 = vrot.slane %v9719_v16, 1 }
 0x2e6   : > { %2668 = vst.msk [vmem:[#allocation3 + $0x189] sm:$0xff] %vm455_vm4, %v2635_v19  ;;  %v6505_v29 = vpack.i.bf16 %v9727_v26, %v9725_v41  ;;  %v9735_v43 = vld [vmem:[#allocation3 + $0xe0] sm:$0xff]  ;;  %v9741_v51 = vld [vmem:[#allocation3 + $0xf0] sm:$0xff]  ;;  %v9751_v12 = vld [vmem:[#allocation3 + $0xb8] sm:$0x3]  ;;  %v2811_v39 = vrot.slane %v9725_v41, 1 }
 0x2e7   : > { %v6515_v60 = vpack.i.bf16 %v9735_v43, %v9733_v63  ;;  %v9743_v52 = vld [vmem:[#allocation3 + $0xf8] sm:$0xff]  ;;  %v9749_v42 = vld [vmem:[#allocation3 + $0xd0] sm:$0x3]  ;;  %v9753_v24 = vld [vmem:[#allocation3 + $0x108] sm:$0xff]  ;;  %v2812_v9 = vrot.slane %v9727_v26, 1  ;;  %v2809_v23 = vrot.slane %v9751_v12, 1 }
 0x2e8   : > { %6476 = vrot.lane.b32.xlu0 %v6475_v21, %s11206_s22  ;;  %6481 = vrot.lane.b32.xlu1 %v6475_v21, %s11204_s12  ;;  %v6525_v62 = vpack.i.bf16 %v9743_v52, %v9741_v51  ;;  %v9755_v47 = vld [vmem:[#allocation3 + $0x110] sm:$0xff]  ;;  %v2814_v22 = vrot.slane %v9749_v42, 1  ;;  %vm11355_vm3 = vmmov %vm11354_vm2  ;;  %v2779_v45 = vrot.slane %v9785_v36, 1  ;;  %v9810_v55 = vld [vmem:[#allocation3 + $0x58] sm:$0x3]  ;;  %v2791_v21 = vrot.slane %v9650_v18, 1 }
 0x2e9   : > { %v6535_v5 = vpack.i.bf16 %v9755_v47, %v9753_v24  ;;  %v9767_v15 = vld [vmem:[#allocation3 + $0x120] sm:$0xff]  ;;  %v9769_v7 = vld [vmem:[#allocation3 + $0x128] sm:$0xff]  ;;  %v2813_v1 = vsel %vm11354_vm2, %v2811_v39, %v2812_v9  ;;  %vm11356_vm9 = vmmov %vm11354_vm2  ;;  %v2787_v39 = vrot.slane %v9564_v14, 1 }
 0x2ea   : > { %v2815_v46 = vsel %vm11355_vm3, %v2812_v9, %v2814_v22  ;;  %v2808_v37 = vsel %vm11356_vm9, %v2806_v27, %v2807_v61  ;;  %vm11357_vm11 = vmmov %vm11354_vm2  ;;  %v6545_v32 = vpack.i.bf16 %v9769_v7, %v9767_v15  ;;  %v9781_v59 = vld [vmem:[#allocation3 + $0x138] sm:$0xff]  ;;  %v9783_v40 = vld [vmem:[#allocation3 + $0x140] sm:$0xff]  ;;  %v2789_v9 = vrot.slane %v9810_v55, 1 }
 0x2eb   : > { %v2810_v30 = vsel %vm11357_vm11, %v2807_v61, %v2809_v23  ;;  %v9793_v33 = vpack.i.bf16 %v2815_v46, %v2813_v1  ;;  %v6555_v49 = vpack.i.bf16 %v9783_v40, %v9781_v59  ;;  %v9801_v25 = vld [vmem:[#allocation3 + $0x150] sm:$0xff]  ;;  %v9803_v17 = vld [vmem:[#allocation3 + $0x158] sm:$0xff]  ;;  %vm11358_vm12 = vmmov %vm11354_vm2  ;;  %v2801_v1 = vrot.slane %v9709_v4, 1 }
 0x2ec   : > { %6486 = vrot.lane.b32.xlu0 %v6485_v57, %s11204_s12  ;;  %6491 = vrot.lane.b32.xlu1 %v6485_v57, %s11206_s22  ;;  %v9791_v53 = vpack.i.bf16 %v2810_v30, %v2808_v37  ;;  %v9805_v35 = vld [vmem:[#allocation3 + $0x70] sm:$0x3]  ;;  %v2783_v48 = vsel %vm11358_vm12, %v2781_v54, %v2782_v38  ;;  %vm11359_vm14 = vmmov %vm11354_vm2  ;;  %v2792_v57 = vrot.slane %v9652_v2, 1  ;;  %v9825_v22 = vld [vmem:[#allocation3 + $0xa0] sm:$0x3]  ;;  %v2802_v37 = vrot.slane %v9711_v31, 1 }
 0x2ed   : > { %v2785_v19 = vsel %vm11359_vm14, %v2782_v38, %v2784_v10  ;;  %vm11360_vm13 = vmmov %vm11354_vm2  ;;  %v9830_v27 = vld [vmem:[#allocation3 + $0x88] sm:$0x3]  ;;  %v2804_v30 = vrot.slane %v9825_v22, 1  ;;  %v2797_v10 = vrot.slane %v9702_v34, 1  ;;  %vm4093_vm3 = vcmask 1043456  }
 0x2ee   : > { %v2778_v20 = vsel %vm11360_vm13, %v2776_v28, %v2777_v6  ;;  %vm11361_vm6 = vmmov %vm11354_vm2  ;;  %v9832_v61 = vpack.i.bf16 %v2785_v19, %v2783_v48  ;;  %v2799_v28 = vrot.slane %v9830_v27, 1  ;;  %vm11370_vm9 = vcmask 1045504  }
 0x2ef   : > { %vm11362_vm8 = vmmov %vm11354_vm2  ;;  %vm11374_vm13 = vcmask 1041408  }
 0x2f0   : > { %6496 = vrot.lane.b32.xlu0 %v6495_v11, %s11206_s22  ;;  %6501 = vrot.lane.b32.xlu1 %v6495_v11, %s11204_s12  ;;  %v9818_v11 = vpack.i.bf16 %v9803_v17, %v9801_v25  ;;  %vm11363_vm10 = vmmov %vm11354_vm2 }
 0x2f1   : > { %vm11364_vm15 = vmmov %vm11354_vm2 }
 0x2f2   : > { %vm11365_vm1 = vmmov %vm11354_vm2 }
 0x2f3   : > { %v2790_v38 = vsel %vm11365_vm1, %v2787_v39, %v2789_v9  ;;  %vm11366_vm7 = vmmov %vm11365_vm1 }
 0x2f4   : > { %6506 = vrot.lane.b32.xlu0 %v6505_v29, %s11204_s12  ;;  %6511 = vrot.lane.b32.xlu1 %v6505_v29, %s11206_s22  ;;  %v2780_v29 = vsel %vm11361_vm6, %v2777_v6, %v2779_v45  ;;  %v2803_v45 = vsel %vm11366_vm7, %v2801_v1, %v2802_v37  ;;  %vm11367_vm0 = vmmov %vm11365_vm1 }
 0x2f5   : > { %v6570_v23 = vpack.i.bf16 %v2780_v29, %v2778_v20  ;;  %v2805_v48 = vsel %vm11367_vm0, %v2802_v37, %v2804_v30  ;;  %vm11368_vm5 = vmmov %vm11367_vm0  ;;  %v2958_v37 = vrot.slane %v9379_v3, 2  ;;  %v2960_v30 = vrot.slane %v9779_v0, 2  ;;  %v7237_v3 = vld [vmem:[%s11119_s5] sm:$0xff]  }
 0x2f6   : > { %vm11369_vm2 = vmmov %vm11367_vm0  ;;  %v2962_v0 = vrot.slane %v9562_v8, 2 }
 0x2f7   : > { %v2800_v20 = vsel %vm11369_vm2, %v2797_v10, %v2799_v28  ;;  %vm11371_vm11 = vmmov %vm11370_vm9  ;;  %v4402_v28 = vld [vmem:[%s11121_s7] sm:$0x3] }
 0x2f8   : > { %6516 = vrot.lane.b32.xlu0 %v6515_v60, %s11206_s22  ;;  %6526 = vrot.lane.b32.xlu1 %v6525_v62, %s11204_s12  ;;  %vm11372_vm12 = vmmov %vm11370_vm9 }
 0x2f9   : > { %vm11373_vm14 = vmmov %vm11370_vm9  ;;  %5735 = vmatprep.subr.msk.bf16.mxu0 %vm11374_vm13, %v4402_v28 }
 0x2fa   : > { %vm11375_vm6 = vmmov %vm11374_vm13 }
 0x2fc   : > { %6521 = vrot.lane.b32.xlu0 %v6515_v60, %s11204_s12  ;;  %6536 = vrot.lane.b32.xlu1 %v6535_v5, %s11206_s22  ;;  %v2794_v60 = vrot.slane %v9805_v35, 1 }
 0x2fe   : > { %v2795_v46 = vsel %vm11363_vm10, %v2792_v57, %v2794_v60  ;;  %v2952_v60 = vrot.slane %v9498_v58, 2 }
 0x300   : > { %6531 = vrot.lane.b32.xlu0 %v6525_v62, %s11206_s22  ;;  %6546 = vrot.lane.b32.xlu1 %v6545_v32, %s11204_s12  ;;  %v2786_v62 = vrot.slane %v9562_v8, 1  ;;  %v4459_v8 = vsel %vm11375_vm6, %v4402_v28, 0 }
 0x301   : > { %5675 = vmatpush3.bf16.msra.mxu0 %v4459_v8  ;;  %v4363_v8 = vld [vmem:[#allocation2 + $0x81] sm:$0xff] }
 0x302   : > { %v2788_v54 = vsel %vm11364_vm15, %v2786_v62, %v2787_v39  ;;  %v2953_v62 = vrot.slane %v9500_v50, 2  ;;  %v2955_v39 = vrot.slane %v9785_v36, 2  ;;  %v7235_v36 = vld [vmem:[%s11119_s5 + $0x10] sm:$0xff]   ;;  %vm11378_vm15 = vcmask 31744  }
 0x303   : > { %vm11379_vm1 = vmmov %vm11378_vm15 }
 0x304   : > { %6541 = vrot.lane.b32.xlu0 %v6535_v5, %s11204_s12  ;;  %6556 = vrot.lane.b32.xlu1 %v6555_v49, %s11206_s22  ;;  %v2793_v5 = vsel %vm11362_vm8, %v2791_v21, %v2792_v57  ;;  %v7233_v21 = vld [vmem:[%s11119_s5 + $0x20] ss:$0 sps:$4 sm:$0xff]   ;;  %v9862_v57 = vpack.i.bf16 %v2805_v48, %v2803_v45  ;;  %v2954_v58 = vsel %vm11370_vm9, %v2952_v60, %v2953_v62  ;;  %v4355_v48 = vld [vmem:[#allocation2 + $0x21] sm:$0xff]  ;;  %vm11376_vm8 = vmmov %vm11370_vm9 }
 0x305   : > { %v9847_v6 = vpack.i.bf16 %v2795_v46, %v2793_v5  ;;  %5734 = vmatprep.subr.msk.bf16.mxu1 %vm4093_vm3, %v7233_v21  ;;  %v4095_v9 = vsel %vm4093_vm3, %v7233_v21, 0  ;;  %v7234_v5 = vld [vmem:[%s11119_s5 + $0x18] sm:$0xff]   ;;  %v2956_v50 = vsel %vm11371_vm11, %v2953_v62, %v2955_v39  ;;  %v2957_v46 = vrot.slane %v9377_v44, 2  ;;  %vm11377_vm10 = vmmov %vm11376_vm8 }
 0x306   : > { %5633 = vmatpush3.bf16.msra.mxu1 %v4095_v9  ;;  %v6610_v1 = vpack.i.bf16 %v2956_v50, %v2954_v58  ;;  %v4354_v45 = vld [vmem:[#allocation2 + $0x19] sm:$0xff]  ;;  %v2967_v62 = vrot.slane %v9650_v18, 2  ;;  %v2968_v39 = vrot.slane %v9652_v2, 2  ;;  %v2970_v9 = vrot.slane %v9805_v35, 2  ;;  %vm11380_vm7 = vmmov %vm11376_vm8 }
 0x307   : > { %5634 = vmatprep.subr.bf16.mxu1 %v7234_v5  ;;  %vm11381_vm0 = vmmov %vm11380_vm7  ;;  %v2972_v18 = vrot.slane %v9700_v56, 2  ;;  %v2973_v2 = vrot.slane %v9702_v34, 2  ;;  %v2975_v35 = vrot.slane %v9830_v27, 2  ;;  %v4361_v34 = vld [vmem:[#allocation2 + $0x69] sm:$0xff] }
 0x308   : > { %6551 = vrot.lane.b32.xlu0 %v6545_v32, %s11206_s22  ;;  %6566 = vrot.lane.b32.xlu1 %v9818_v11, %s11204_s12  ;;  %v2796_v32 = vrot.slane %v9700_v56, 1  ;;  %v2971_v58 = vsel %vm11381_vm0, %v2968_v39, %v2970_v9  ;;  %vm11383_vm2 = vmmov %vm11381_vm0  ;;  %v4360_v56 = vld [vmem:[#allocation2 + $0x61] sm:$0xff]  ;;  %v2990_v9 = vrot.slane %v9749_v42, 2  ;;  %s11446_s22 = smov 48  }
 0x309   : > { %vm11384_vm9 = vmmov %vm11379_vm1 }
 0x30a   : > { %v2798_v19 = vsel %vm11368_vm5, %v2796_v32, %v2797_v10  ;;  %5635 = vmatpush3.bf16.msra.mxu1 %v7234_v5  ;;  %v7236_v32 = vld [vmem:[%s11119_s5 + $0x8] sm:$0xff]   ;;  %v2965_v10 = vrot.slane %v9810_v55, 2  ;;  %v2969_v5 = vsel %vm11380_vm7, %v2967_v62, %v2968_v39  ;;  %vm11382_vm5 = vmmov %vm11381_vm0  ;;  %v2987_v62 = vrot.slane %v9725_v41, 2 }
 0x30b   : > { %v9864_v29 = vpack.i.bf16 %v2800_v20, %v2798_v19  ;;  %5636 = vmatprep.subr.bf16.mxu1 %v7235_v36  ;;  %v4357_v20 = vld [vmem:[#allocation2 + $0x39] sm:$0xff]  ;;  %v6680_v50 = vpack.i.bf16 %v2971_v58, %v2969_v5  ;;  %vm11385_vm11 = vmmov %vm11379_vm1  ;;  %v2988_v39 = vrot.slane %v9727_v26, 2  ;;  %v2817_v26 = vrot.slane %v9735_v43, 1 }
 0x30c   : > { %6561 = vrot.lane.b32.xlu0 %v6555_v49, %s11204_s12  ;;  %6571 = vrot.lane.b32.xlu1 %v6570_v23, %s11223_s16  ;;  %v9849_v49 = vpack.i.bf16 %v2790_v38, %v2788_v54  ;;  %v2959_v54 = vsel %vm11372_vm12, %v2957_v46, %v2958_v37  ;;  %v2961_v38 = vsel %vm11373_vm14, %v2958_v37, %v2960_v30  ;;  %s11217_s12 = smov 64   ;;  %vm11386_vm12 = vmmov %vm11381_vm0  ;;  %v2698_v5 = vld [vmem:[#allocation3 + $0xe8] sm:$0x3]  ;;  %vm11394_vm7 = vcmask 1046528  }
 0x30d   : > { %v6630_v44 = vpack.i.bf16 %v2961_v38, %v2959_v54  ;;  %v2974_v46 = vsel %vm11382_vm5, %v2972_v18, %v2973_v2  ;;  %v2976_v37 = vsel %vm11383_vm2, %v2973_v2, %v2975_v35  ;;  %v4389_v30 = vpack.c.bf16 %v4361_v34, %v4360_v56  ;;  %vm11387_vm14 = vmmov %vm11381_vm0  ;;  %v4366_v34 = vld [vmem:[#allocation2 + $0xa9] sm:$0xff] }
 0x30e   : > { %5637 = vmatpush3.bf16.msra.mxu1 %v7235_v36  ;;  %v4359_v36 = vld [vmem:[#allocation2 + $0x51] sm:$0xff]  ;;  %v6700_v27 = vpack.i.bf16 %v2976_v37, %v2974_v46  ;;  %v2977_v54 = vrot.slane %v9709_v4, 2  ;;  %v2978_v38 = vrot.slane %v9711_v31, 2  ;;  %v2982_v31 = vrot.slane %v9717_v13, 2  ;;  %vm11388_vm13 = vmmov %vm11381_vm0 }
 0x30f   : > { %5638 = vmatprep.subr.bf16.mxu1 %v7236_v32  ;;  %vm11389_vm6 = vmmov %vm11381_vm0  ;;  %v2816_v18 = vrot.slane %v9733_v63, 1  ;;  %v2819_v35 = vrot.slane %v2698_v5, 1  ;;  %v2993_v37 = vrot.slane %v9735_v43, 2  ;;  %v2995_v56 = vrot.slane %v2698_v5, 2  ;;  %v2701_v43 = vld [vmem:[#allocation3 + $0x100] sm:$0x3] }
 0x310   : > { %6576 = vrot.lane.b32.xlu0 %v9832_v61, %s11223_s16  ;;  %6581 = vrot.lane.b32.xlu1 %v9849_v49, %s11223_s16 }
 0x312   : > { %5639 = vmatpush3.bf16.msra.mxu1 %v7236_v32  ;;  %v9950_v32 = vpop.permute.xlu0 %6431 }
 0x313   : > { %5640 = vmatprep.subr.bf16.mxu1 %v7237_v3 }
 0x314   : > { %6586 = vrot.lane.b32.xlu0 %v9847_v6, %s11223_s16  ;;  %6591 = vrot.lane.b32.xlu1 %v9864_v29, %s11223_s16 }
 0x316   : > { %5641 = vmatpush3.bf16.msra.mxu1 %v7237_v3 }
 0x318   : > { %6596 = vrot.lane.b32.xlu0 %v9862_v57, %s11223_s16  ;;  %6601 = vrot.lane.b32.xlu1 %v9791_v53, %s11223_s16 }
 0x31c   : > { %6606 = vrot.lane.b32.xlu0 %v9793_v33, %s11223_s16  ;;  %6616 = vrot.lane.b32.xlu1 %v6570_v23, %s11215_s24  ;;  %v2963_v23 = vrot.slane %v9564_v14, 2  ;;  %v4386_v14 = vpack.c.bf16 %v4355_v48, %v4354_v45  ;;  %v4362_v48 = vld [vmem:[#allocation2 + $0x79] sm:$0xff] }
 0x31e   : > { %v2964_v55 = vsel %vm11376_vm8, %v2962_v0, %v2963_v23  ;;  %v2966_v19 = vsel %vm11377_vm10, %v2963_v23, %v2965_v10  ;;  %5676 = vmatprep.mubr.msk.bf16.mxu0 %vm11378_vm15, %v4386_v14  ;;  %v2979_v23 = vsel %vm11386_vm12, %v2977_v54, %v2978_v38  ;;  %v4390_v14 = vpack.c.bf16 %v4363_v8, %v4362_v48  ;;  %vm11390_vm8 = vmmov %vm11379_vm1 }
 0x31f   : > { %v6650_v21 = vpack.i.bf16 %v2966_v19, %v2964_v55  ;;  %vm11391_vm10 = vmmov %vm11379_vm1  ;;  %v2821_v48 = vrot.slane %v9741_v51, 1  ;;  %v2822_v8 = vrot.slane %v9743_v52, 1 }
 0x320   : > { %6611 = vrot.lane.b32.xlu0 %v6610_v1, %s11221_s30  ;;  %6626 = vrot.lane.b32.xlu1 %v6610_v1, %s11213_s15  ;;  %vm11392_vm15 = vmmov %vm11381_vm0 }
 0x321   : > { %v2989_v2 = vsel %vm11392_vm15, %v2987_v62, %v2988_v39  ;;  %v3000_v62 = vrot.slane %v2701_v43, 2 }
 0x324   : > { %6621 = vrot.lane.b32.xlu0 %v9832_v61, %s11215_s24  ;;  %6636 = vrot.lane.b32.xlu1 %v9832_v61, %s11219_s13  ;;  %v4356_v61 = vld [vmem:[#allocation2 + $0x31] sm:$0xff] }
 0x325   : > { %v4387_v60 = vpack.c.bf16 %v4357_v20, %v4356_v61 }
 0x327   : > { %5677 = vmatmul.mubr.msk.bf16.vlgmr.msra.gmra.mxu0 %vm11379_vm1, %v4387_v60  ;;  %vm11393_vm1 = vmmov %vm11381_vm0 }
 0x328   : > { %6631 = vrot.lane.b32.xlu0 %v6630_v44, %s11213_s15  ;;  %6646 = vrot.lane.b32.xlu1 %v6630_v44, %s11217_s12  ;;  %v2991_v41 = vsel %vm11393_vm1, %v2988_v39, %v2990_v9  ;;  %vm11395_vm0 = vmmov %vm11394_vm7  ;;  %v2704_v39 = vld [vmem:[#allocation3 + $0x118] sm:$0x3] }
 0x329   : > { %v2820_v46 = vsel %vm11395_vm0, %v2817_v26, %v2819_v35  ;;  %vm11396_vm5 = vmmov %vm11393_vm1 }
 0x32a   : > { %vm11397_vm2 = vmmov %vm11393_vm1 }
 0x32b   : > { %vm11400_vm12 = vmmov %vm11395_vm0 }
 0x32c   : > { %6641 = vrot.lane.b32.xlu0 %v9849_v49, %s11219_s13  ;;  %6656 = vrot.lane.b32.xlu1 %v6630_v44, %s11221_s30  ;;  %v2980_v44 = vrot.slane %v9825_v22, 2  ;;  %v2983_v22 = vrot.slane %v9719_v16, 2  ;;  %v4364_v16 = vld [vmem:[#allocation2 + $0x91] sm:$0xff]  ;;  %vm11411_vm15 = vmmov %vm11393_vm1 }
 0x32e   : > { %v2981_v10 = vsel %vm11387_vm14, %v2978_v38, %v2980_v44  ;;  %v2984_v55 = vsel %vm11388_vm13, %v2982_v31, %v2983_v22  ;;  %vm11401_vm14 = vmmov %vm11395_vm0 }
 0x32f   : > { %v6730_v4 = vpack.i.bf16 %v2981_v10, %v2979_v23  ;;  %v2996_v23 = vsel %vm11397_vm2, %v2993_v37, %v2995_v56  ;;  %v4369_v10 = vld [vmem:[#allocation2 + $0xc9] sm:$0xff]  ;;  %vm11402_vm13 = vmmov %vm11393_vm1 }
 0x330   : > { %6651 = vrot.lane.b32.xlu0 %v6650_v21, %s11217_s12  ;;  %6666 = vrot.lane.b32.xlu1 %v9849_v49, %s11215_s24  ;;  %v4358_v49 = vld [vmem:[#allocation2 + $0x49] sm:$0xff] }
 0x331   : > { %v4388_v1 = vpack.c.bf16 %v4359_v36, %v4358_v49  ;;  %v6780_v49 = vpack.i.bf16 %v2991_v41, %v2989_v2  ;;  %v2992_v36 = vrot.slane %v9733_v63, 2  ;;  %v2826_v2 = vrot.slane %v9753_v24, 1 }
 0x333   : > { %5680 = vmatprep.mubr.msk.bf16.mxu0 %vm11384_vm9, %v4388_v1  ;;  %v2818_v1 = vsel %vm11394_vm7, %v2816_v18, %v2817_v26  ;;  %v2994_v44 = vsel %vm11396_vm5, %v2992_v36, %v2993_v37  ;;  %vm11398_vm9 = vmmov %vm11390_vm8  ;;  %v2827_v26 = vrot.slane %v9755_v47, 1 }
 0x334   : > { %6661 = vrot.lane.b32.xlu0 %v6650_v21, %s11221_s30  ;;  %6676 = vrot.lane.b32.xlu1 %v6650_v21, %s11213_s15  ;;  %v6790_v38 = vpack.i.bf16 %v2820_v46, %v2818_v1  ;;  %vm11412_vm7 = vmmov %vm11398_vm9 }
 0x335   : > { %5681 = vmatmul.mubr.msk.bf16.gmra.mxu0 %vm11385_vm11, %v4389_v30  ;;  %vm11399_vm11 = vmmov %vm11390_vm8 }
 0x336   : > { %5684 = vmatprep.mubr.msk.bf16.mxu0 %vm11390_vm8, %v4390_v14  ;;  %v2824_v14 = vrot.slane %v2701_v43, 1  ;;  %vm11405_vm8 = vmmov %vm11395_vm0 }
 0x337   : > { %v2828_v1 = vsel %vm11405_vm8, %v2826_v2, %v2827_v26  ;;  %v2710_v2 = vld [vmem:[#allocation3 + $0x148] sm:$0x3]  ;;  %vm11413_vm5 = vmmov %vm11395_vm0 }
 0x338   : > { %6671 = vrot.lane.b32.xlu0 %v9847_v6, %s11215_s24  ;;  %6686 = vrot.lane.b32.xlu1 %v9847_v6, %s11219_s13  ;;  %v9948_v6 = vpop.permute.xlu1 %6436  ;;  %vm11414_vm2 = vmmov %vm11412_vm7 }
 0x339   : > { %v9959_v3 = vpop.permute.xlu0 %6446  ;;  %vm11421_vm8 = vmmov %vm11393_vm1 }
 0x33c   : > { %6681 = vrot.lane.b32.xlu0 %v6680_v50, %s11213_s15  ;;  %6696 = vrot.lane.b32.xlu1 %v6680_v50, %s11217_s12 }
 0x340   : > { %6691 = vrot.lane.b32.xlu0 %v9864_v29, %s11219_s13  ;;  %6706 = vrot.lane.b32.xlu1 %v6680_v50, %s11221_s30 }
 0x342   : > { %v9961_v0 = vpop.permute.xlu1 %6441 }
 0x344   : > { %6701 = vrot.lane.b32.xlu0 %v6700_v27, %s11217_s12  ;;  %6716 = vrot.lane.b32.xlu1 %v9864_v29, %s11215_s24  ;;  %v2985_v29 = vrot.slane %v9751_v12, 2  ;;  %v4365_v12 = vld [vmem:[#allocation2 + $0x99] sm:$0xff] }
 0x345   : > { %v4391_v20 = vpack.c.bf16 %v4365_v12, %v4364_v16  ;;  %v2997_v16 = vrot.slane %v9741_v51, 2  ;;  %v2823_v12 = vsel %vm11400_vm12, %v2821_v48, %v2822_v8  ;;  %vm11417_vm12 = vmmov %vm11393_vm1 }
 0x346   : > { %v9976_v45 = vpop.permute.xlu1 %6451  ;;  %v2986_v13 = vsel %vm11389_vm6, %v2983_v22, %v2985_v29  ;;  %v6800_v22 = vpack.i.bf16 %v2996_v23, %v2994_v44  ;;  %vm11403_vm6 = vmmov %vm11393_vm1  ;;  %v4370_v44 = vld [vmem:[#allocation2 + $0xd9] sm:$0xff]  ;;  %v4371_v23 = vld [vmem:[#allocation2 + $0xe1] sm:$0xff] }
 0x347   : > { %v6750_v61 = vpack.i.bf16 %v2986_v13, %v2984_v55  ;;  %5685 = vmatmul.mubr.msk.bf16.gmra.mxu0 %vm11391_vm10, %v4391_v20  ;;  %v2998_v20 = vrot.slane %v9743_v52, 2  ;;  %v2829_v52 = vrot.slane %v2704_v39, 1  ;;  %vm11406_vm10 = vmmov %vm11395_vm0 }
 0x348   : > { %6711 = vrot.lane.b32.xlu0 %v6700_v27, %s11221_s30  ;;  %6726 = vrot.lane.b32.xlu1 %v6700_v27, %s11213_s15  ;;  %v4367_v27 = vld [vmem:[#allocation2 + $0xb1] sm:$0xff] }
 0x349   : > { %v4392_v63 = vpack.c.bf16 %v4367_v27, %v4366_v34  ;;  %v2999_v51 = vsel %vm11402_vm13, %v2997_v16, %v2998_v20  ;;  %v3001_v41 = vsel %vm11403_vm6, %v2998_v20, %v3000_v62  ;;  %v2830_v46 = vsel %vm11406_vm10, %v2827_v26, %v2829_v52  ;;  %v7279_v52 = vld [vmem:[#allocation3] sm:$0xff]  ;;  %vm11419_vm13 = vmmov %vm11395_vm0 }
 0x34a   : > { %v9974_v28 = vpop.permute.xlu0 %6456  ;;  %v9986_v19 = vpop.permute.xlu1 %6461  ;;  %v6835_v36 = vpack.i.bf16 %v3001_v41, %v2999_v51  ;;  %v10073_v34 = vpack.i.bf16 %v2830_v46, %v2828_v1  ;;  %v3002_v27 = vrot.slane %v9753_v24, 2  ;;  %v6433_v24 = vunpack.i.l.bf16 %v9950_v32  ;;  %v7278_v41 = vld [vmem:[#allocation3 + $0x8] sm:$0xff]  ;;  %vm11420_vm6 = vmmov %vm11395_vm0 }
 0x34b   : > { %5688 = vmatprep.mubr.msk.bf16.mxu0 %vm11398_vm9, %v4392_v63  ;;  %v3005_v63 = vrot.slane %v2704_v39, 2  ;;  %v6439_v20 = vunpack.i.h.bf16 %v9948_v6  ;;  %vm11415_vm9 = vcmask 130048   ;;  %vm11422_vm10 = vmmov %vm11393_vm1 }
 0x34c   : > { %6721 = vrot.lane.b32.xlu0 %v9862_v57, %s11215_s24  ;;  %6736 = vrot.lane.b32.xlu1 %v9862_v57, %s11219_s13  ;;  %v3725_v1 = vsel %vm455_vm4, %v7279_v52, %v6433_v24  ;;  %v2842_v52 = vrot.slane %v9803_v17, 1 }
 0x350   : > { %6731 = vrot.lane.b32.xlu0 %v6730_v4, %s11213_s15  ;;  %6746 = vrot.lane.b32.xlu1 %v6730_v4, %s11217_s12 }
 0x354   : > { %6741 = vrot.lane.b32.xlu0 %v9791_v53, %s11219_s13  ;;  %6756 = vrot.lane.b32.xlu1 %v6730_v4, %s11221_s30 }
 0x356   : > { %v9984_v57 = vpop.permute.xlu0 %6466  ;;  %v9993_v60 = vpop.permute.xlu1 %6471 }
 0x358   : > { %6751 = vrot.lane.b32.xlu0 %v6750_v61, %s11217_s12  ;;  %6766 = vrot.lane.b32.xlu1 %v9791_v53, %s11215_s24 }
 0x35a   : > { %v9991_v21 = vpop.permute.xlu0 %6476  ;;  %v10003_v50 = vpop.permute.xlu1 %6481 }
 0x35c   : > { %6761 = vrot.lane.b32.xlu0 %v6750_v61, %s11221_s30  ;;  %6776 = vrot.lane.b32.xlu1 %v6750_v61, %s11213_s15  ;;  %v2825_v61 = vsel %vm11401_vm14, %v2822_v8, %v2824_v14  ;;  %v2831_v8 = vrot.slane %v9767_v15, 1  ;;  %v2832_v14 = vrot.slane %v9769_v7, 1  ;;  %vm11418_vm14 = vmmov %vm11393_vm1 }
 0x35d   : > { %v6825_v18 = vpack.i.bf16 %v2825_v61, %v2823_v12  ;;  %v4372_v12 = vld [vmem:[#allocation2 + $0xf1] sm:$0xff]  ;;  %v4373_v61 = vld [vmem:[#allocation2 + $0xf9] sm:$0xff] }
 0x35e   : > { %v10001_v58 = vpop.permute.xlu0 %6486  ;;  %v10014_v53 = vpop.permute.xlu1 %6491  ;;  %v4395_v51 = vpack.c.bf16 %v4373_v61, %v4372_v12  ;;  %v2833_v46 = vsel %vm11395_vm0, %v2831_v8, %v2832_v14  ;;  %v2714_v61 = vld [vmem:[#allocation3 + $0x168] sm:$0xff] }
 0x360   : > { %6771 = vrot.lane.b32.xlu0 %v9793_v33, %s11215_s24  ;;  %6786 = vrot.lane.b32.xlu1 %v9793_v33, %s11219_s13  ;;  %v4368_v33 = vld [vmem:[#allocation2 + $0xc1] sm:$0xff] }
 0x361   : > { %v4393_v29 = vpack.c.bf16 %v4369_v10, %v4368_v33  ;;  %v2707_v10 = vld [vmem:[#allocation3 + $0x130] sm:$0x3] }
 0x362   : > { %v10012_v42 = vpop.permute.xlu0 %6496  ;;  %v10025_v54 = vpop.permute.xlu1 %6501  ;;  %v2834_v16 = vrot.slane %v2707_v10, 1 }
 0x363   : > { %5689 = vmatmul.mubr.msk.bf16.gmra.mxu0 %vm11399_vm11, %v4393_v29  ;;  %v6434_v29 = vunpack.i.h.bf16 %v9950_v32  ;;  %vm11416_vm11 = vmmov %vm11415_vm9 }
 0x364   : > { %6781 = vrot.lane.b32.xlu0 %v6780_v49, %s11213_s15  ;;  %6796 = vrot.lane.b32.xlu1 %v6780_v49, %s11217_s12 }
 0x365   : > { %v3726_v26 = vsel %vm455_vm4, %v7278_v41, %v6434_v29 }
 0x366   : > { %v10023_v30 = vpop.permute.xlu0 %6506  ;;  %v10034_v31 = vpop.permute.xlu1 %6511 }
 0x368   : > { %6791 = vrot.lane.b32.xlu0 %v6790_v38, %s11219_s13  ;;  %6806 = vrot.lane.b32.xlu1 %v6790_v38, %s11223_s16 }
 0x36a   : > { %v10032_v4 = vpop.permute.xlu0 %6516  ;;  %v10043_v13 = vpop.permute.xlu1 %6526 }
 0x36c   : > { %6801 = vrot.lane.b32.xlu0 %v6800_v22, %s11217_s12  ;;  %6816 = vrot.lane.b32.xlu1 %v6800_v22, %s11221_s30 }
 0x36e   : > { %v10041_v55 = vpop.permute.xlu0 %6521  ;;  %v10053_v5 = vpop.permute.xlu1 %6536 }
 0x370   : > { %6811 = vrot.lane.b32.xlu0 %v6780_v49, %s11221_s30  ;;  %6826 = vrot.lane.b32.xlu1 %v6825_v18, %s11215_s24 }
 0x372   : > { %v10051_v9 = vpop.permute.xlu0 %6531  ;;  %v10063_v49 = vpop.permute.xlu1 %6546 }
 0x373   : > { %11404 = vst [vmem:[#allocation20_spill] sm:$0xff] %v10063_v49  ;;  %v7281_v49 = vld [vmem:[#allocation3 + $0x18] sm:$0xff] }
 0x374   : > { %6821 = vrot.lane.b32.xlu0 %v6790_v38, %s11215_s24  ;;  %6836 = vrot.lane.b32.xlu1 %v6835_v36, %s11213_s15  ;;  %v3003_v38 = vrot.slane %v9755_v47, 2 }
 0x376   : > { %v10061_v35 = vpop.permute.xlu0 %6541  ;;  %v10071_v56 = vpop.permute.xlu1 %6556  ;;  %v3004_v47 = vsel %vm11411_vm15, %v3002_v27, %v3003_v38  ;;  %v3006_v48 = vsel %vm11393_vm1, %v3003_v38, %v3005_v63  ;;  %v3007_v27 = vrot.slane %v9767_v15, 2  ;;  %v3008_v38 = vrot.slane %v9769_v7, 2  ;;  %vm11423_vm15 = vmmov %vm11395_vm0 }
 0x377   : > { %11408 = vst [vmem:[#allocation22_spill] sm:$0xff] %v10071_v56  ;;  %v6860_v39 = vpack.i.bf16 %v3006_v48, %v3004_v47  ;;  %v3010_v63 = vrot.slane %v2707_v10, 2  ;;  %v3012_v47 = vrot.slane %v9781_v59, 2  ;;  %v3013_v15 = vrot.slane %v9783_v40, 2  ;;  %vm11424_vm1 = vmmov %vm11395_vm0 }
 0x378   : > { %6831 = vrot.lane.b32.xlu0 %v6800_v22, %s11213_s15  ;;  %6846 = vrot.lane.b32.xlu1 %v10073_v34, %s11219_s13  ;;  %v4394_v22 = vpack.c.bf16 %v4371_v23, %v4370_v44  ;;  %v2836_v44 = vrot.slane %v9781_v59, 1  ;;  %v2837_v23 = vrot.slane %v9783_v40, 1  ;;  %v3015_v48 = vrot.slane %v2710_v2, 2 }
 0x379   : > { %v10121_v10 = vsel %vm11416_vm11, %v3726_v26, %v6439_v20  ;;  %v3011_v59 = vsel %vm11418_vm14, %v3008_v38, %v3010_v63  ;;  %v10133_v20 = vld [vmem:[#allocation3 + $0x178] sm:$0x3]  ;;  %v2841_v26 = vrot.slane %v9801_v25, 1  ;;  %vm3886_vm11 = vcmask 392192  }
 0x37a   : > { %v10069_v37 = vpop.permute.xlu0 %6551  ;;  %v10082_v33 = vpop.permute.xlu1 %6566  ;;  %5692 = vmatprep.mubr.msk.bf16.mxu0 %vm11412_vm7, %v4394_v22  ;;  %v2839_v22 = vrot.slane %v2710_v2, 1  ;;  %v2838_v40 = vsel %vm11419_vm13, %v2836_v44, %v2837_v23  ;;  %v10131_v2 = vld [vmem:[#allocation3 + $0x170] sm:$0xff]  ;;  %v3016_v41 = vsel %vm11422_vm10, %v3013_v15, %v3015_v48  ;;  %vm11425_vm7 = vmmov %vm11421_vm8  ;;  %vm3919_vm14 = vcmask 457728  }
 0x37b   : > { %11407 = vst [vmem:[#allocation14_spill] sm:$0xff] %v10069_v37  ;;  %11410 = vst [vmem:[#allocation24_spill] sm:$0xff] %v10082_v33  ;;  %5693 = vmatmul.mubr.msk.bf16.gmra.mxu0 %vm11414_vm2, %v4395_v51  ;;  %v2847_v44 = vrot.slane %v10131_v2, 1  ;;  %vm3952_vm13 = vcmask 523264   ;;  %v6448_v56 = vunpack.i.l.bf16 %v9959_v3 }
 0x37c   : > { %6841 = vrot.lane.b32.xlu0 %v6825_v18, %s11219_s13  ;;  %6856 = vrot.lane.b32.xlu1 %v6825_v18, %s11223_s16  ;;  %v6438_v18 = vunpack.i.l.bf16 %v9948_v6  ;;  %v2835_v6 = vsel %vm11413_vm5, %v2832_v14, %v2834_v16  ;;  %v2713_v14 = vld [vmem:[#allocation3 + $0x160] sm:$0x3]  ;;  %v3009_v16 = vsel %vm11417_vm12, %v3007_v27, %v3008_v38  ;;  %v2840_v12 = vsel %vm11420_vm6, %v2837_v23, %v2839_v22  ;;  %vm11426_vm0 = vmmov %vm11425_vm7 }
 0x37d   : > { %v10125_v8 = vpack.i.bf16 %v2835_v6, %v2833_v46  ;;  %v3017_v46 = vrot.slane %v9801_v25, 2  ;;  %v3018_v27 = vrot.slane %v9803_v17, 2  ;;  %v3020_v38 = vrot.slane %v2713_v14, 2  ;;  %vm11427_vm2 = vmmov %vm11424_vm1 }
 0x37e   : > { %v10080_v43 = vpop.permute.xlu0 %6561  ;;  %v10096_v62 = vpop.permute.xlu1 %6571  ;;  %v10118_v7 = vsel %vm11415_vm9, %v3725_v1, %v6438_v18  ;;  %v3014_v18 = vsel %vm11421_vm8, %v3012_v47, %v3013_v15  ;;  %v2844_v1 = vrot.slane %v2713_v14, 1  ;;  %v10149_v63 = vpack.i.bf16 %v3011_v59, %v3009_v16  ;;  %vm11428_vm9 = vmmov %vm11424_vm1 }
 0x37f   : > { %11409 = vst [vmem:[#allocation23_spill] sm:$0xff] %v10080_v43  ;;  %v2846_v6 = vrot.slane %v2714_v61, 1  ;;  %v2849_v23 = vrot.slane %v10133_v20, 1  ;;  %v10157_v25 = vpack.i.bf16 %v2840_v12, %v2838_v40  ;;  %v10159_v17 = vpack.i.bf16 %v3016_v41, %v3014_v18  ;;  %vm11429_vm12 = vmmov %vm11426_vm0 }
 0x380   : > { %6851 = vrot.lane.b32.xlu0 %v6835_v36, %s11217_s12  ;;  %6866 = vrot.lane.b32.xlu1 %v10073_v34, %s11223_s16  ;;  %v2845_v15 = vsel %vm11424_vm1, %v2842_v52, %v2844_v1  ;;  %v3019_v48 = vsel %vm11425_vm7, %v3017_v46, %v3018_v27  ;;  %v3021_v14 = vsel %vm11426_vm0, %v3018_v27, %v3020_v38  ;;  %vm3853_vm5 = vcmask 326656   ;;  %vm11430_vm6 = vmmov %vm11426_vm0 }
 0x381   : > { %v2848_v16 = vsel %vm11427_vm2, %v2846_v6, %v2847_v44  ;;  %v2850_v59 = vsel %vm11428_vm9, %v2847_v44, %v2849_v23  ;;  %v3022_v40 = vrot.slane %v2714_v61, 2  ;;  %v3023_v12 = vrot.slane %v10131_v2, 2 }
 0x382   : > { %v10094_v32 = vpop.permute.xlu0 %6576  ;;  %v10113_v24 = vpop.permute.xlu1 %6581  ;;  %v10172_v18 = vpack.i.bf16 %v10131_v2, %v2714_v61  ;;  %v10176_v1 = vpack.i.bf16 %v3021_v14, %v3019_v48  ;;  %v3025_v46 = vrot.slane %v10133_v20, 2  ;;  %v6444_v27 = vunpack.i.h.bf16 %v9961_v0 }
 0x383   : > { %v6574_v38 = vunpack.i.h.bf16 %v10096_v62  ;;  %v6573_v6 = vunpack.i.l.bf16 %v10096_v62  ;;  %v10189_v61 = vsel %vm11429_vm12, %v3022_v40, %v3023_v12  ;;  %v6443_v2 = vunpack.i.l.bf16 %v9961_v0 }
 0x384   : > { %6861 = vrot.lane.b32.xlu0 %v6860_v39, %s11217_s12  ;;  %6876 = vrot.lane.b32.xlu1 %v6860_v39, %s11221_s30  ;;  %v3026_v40 = vsel %vm11430_vm6, %v3023_v12, %v3025_v46  ;;  %vm11431_vm8 = vcmask 195584   ;;  %vm11435_vm7 = vcmask 261120   ;;  %vm11436_vm0 = vcmask 31744  }
 0x385   : > { %v3790_v0 = vsel %vm11431_vm8, %v10121_v10, %v6444_v27  ;;  %vm11432_vm10 = vmmov %vm11431_vm8  ;;  %v4376_v27 = vld [vmem:[#allocation2 + $0x121] sm:$0xff]  ;;  %vm4044_vm9 = vcmask 588800  }
 0x386   : > { %v10111_v29 = vpop.permute.xlu0 %6586  ;;  %v3789_v12 = vsel %vm11432_vm10, %v10118_v7, %v6443_v2  ;;  %vm11437_vm2 = vmmov %vm11435_vm7  ;;  %v10212_v7 = vld [vmem:[#allocation3 + $0x188] sm:$0xff] }
 0x387   : > { %vm11438_vm12 = vmmov %vm11431_vm8 }
 0x388   : > { %6871 = vrot.lane.b32.xlu0 %v6835_v36, %s11221_s30  ;;  %v10137_v36 = vpop.permute.xlu1 %6591  ;;  %6886 = vrot.lane.b32.xlu1 %v10125_v8, %s11215_s24  ;;  %vm11439_vm6 = vmmov %vm11431_vm8 }
 0x389   : > { %vm11440_vm8 = vmmov %vm11436_vm0 }
 0x38a   : > { %v10135_v51 = vpop.permute.xlu0 %6596  ;;  %vm11441_vm10 = vmmov %vm11437_vm2 }
 0x38c   : > { %6881 = vrot.lane.b32.xlu0 %v10073_v34, %s11215_s24  ;;  %v10155_v47 = vpop.permute.xlu1 %6601  ;;  %v2843_v34 = vsel %vm11423_vm15, %v2841_v26, %v2842_v52  ;;  %6896 = vrot.lane.b32.xlu1 %v10149_v63, %s11213_s15  ;;  %vm11433_vm15 = vcmask 130048  }
 0x38d   : > { %v10174_v52 = vpack.i.bf16 %v2845_v15, %v2843_v34  ;;  %v4374_v34 = vld [vmem:[#allocation2 + $0x109] sm:$0xff]  ;;  %v4375_v15 = vld [vmem:[#allocation2 + $0x111] sm:$0xff]  ;;  %vm11434_vm1 = vmmov %vm11433_vm15 }
 0x38e   : > { %v10153_v22 = vpop.permute.xlu0 %6606 }
 0x390   : > { %6891 = vrot.lane.b32.xlu0 %v6860_v39, %s11213_s15  ;;  %v6617_v26 = vpop.permute.xlu1 %6616  ;;  %v10178_v39 = vpack.i.bf16 %v2850_v59, %v2848_v16  ;;  %6906 = vrot.lane.b32.xlu1 %v10157_v25, %s11219_s13  ;;  %v4396_v16 = vpack.c.bf16 %v4375_v15, %v4374_v34  ;;  %v6449_v59 = vunpack.i.h.bf16 %v9959_v3 }
 0x391   : > { %v6619_v20 = vunpack.i.h.bf16 %v6617_v26  ;;  %v6618_v48 = vunpack.i.l.bf16 %v6617_v26  ;;  %v3727_v26 = vsel %vm455_vm4, %v7281_v49, %v6573_v6 }
 0x392   : > { %v6612_v41 = vpop.permute.xlu0 %6611  ;;  %5696 = vmatprep.mubr.msk.bf16.mxu0 %vm11436_vm0, %v4396_v16  ;;  %v6454_v16 = vunpack.i.h.bf16 %v9976_v45 }
 0x393   : > { %v6614_v44 = vunpack.i.h.bf16 %v6612_v41  ;;  %v6613_v23 = vunpack.i.l.bf16 %v6612_v41  ;;  %v7280_v41 = vld [vmem:[#allocation3 + $0x20] sm:$0xff]  ;;  %v3822_v10 = vsel %vm11435_vm7, %v3790_v0, %v6619_v20  ;;  %v3821_v49 = vsel %vm11437_vm2, %v3789_v12, %v6618_v48 }
 0x394   : > { %6901 = vrot.lane.b32.xlu0 %v10125_v8, %s11219_s13  ;;  %v6627_v62 = vpop.permute.xlu1 %6626  ;;  %v3728_v37 = vsel %vm455_vm4, %v7280_v41, %v6574_v38  ;;  %6916 = vrot.lane.b32.xlu1 %v10125_v8, %s11223_s16  ;;  %v4377_v38 = vld [vmem:[#allocation2 + $0x129] sm:$0xff]  ;;  %v6453_v48 = vunpack.i.l.bf16 %v9976_v45  ;;  %vm11444_vm7 = vcmask 130048  }
 0x395   : > { %v6629_v33 = vunpack.i.h.bf16 %v6627_v62  ;;  %v6628_v43 = vunpack.i.l.bf16 %v6627_v62  ;;  %v3759_v3 = vsel %vm11433_vm15, %v3727_v26, %v6613_v23  ;;  %v3760_v46 = vsel %vm11434_vm1, %v3728_v37, %v6614_v44  ;;  %v10210_v8 = vld [vmem:[#allocation3 + $0x180] sm:$0xff]  ;;  %vm11442_vm15 = vmmov %vm11437_vm2 }
 0x396   : > { %v6622_v14 = vpop.permute.xlu0 %6621  ;;  %v4397_v2 = vpack.c.bf16 %v4377_v38, %v4376_v27  ;;  %v3791_v41 = vsel %vm11438_vm12, %v3759_v3, %v6448_v56  ;;  %vm11443_vm1 = vcmask 1046528   ;;  %vm11445_vm0 = vmmov %vm11444_vm7 }
 0x397   : > { %v6624_v6 = vunpack.i.h.bf16 %v6622_v14  ;;  %v6623_v34 = vunpack.i.l.bf16 %v6622_v14  ;;  %v3854_v37 = vsel %vm3853_vm5, %v3821_v49, %v6628_v43  ;;  %v3855_v44 = vsel %vm3853_vm5, %v3822_v10, %v6629_v33  ;;  %vm11447_vm2 = vmmov %vm11445_vm0 }
 0x398   : > { %6911 = vrot.lane.b32.xlu0 %v10149_v63, %s11217_s12  ;;  %v6637_v62 = vpop.permute.xlu1 %6636  ;;  %6926 = vrot.lane.b32.xlu1 %v10157_v25, %s11223_s16  ;;  %v3792_v43 = vsel %vm11439_vm6, %v3760_v46, %v6449_v59  ;;  %v10226_v33 = vpack.i.bf16 %v10212_v7, %v10210_v8  ;;  %v3887_v12 = vsel %vm3886_vm11, %v3854_v37, %v6453_v48  ;;  %vm11448_vm12 = vmmov %vm11439_vm6 }
 0x399   : > { %v6639_v0 = vunpack.i.h.bf16 %v6637_v62  ;;  %v6638_v14 = vunpack.i.l.bf16 %v6637_v62  ;;  %5697 = vmatmul.mubr.msk.bf16.gmra.mxu0 %vm11440_vm8, %v4397_v2  ;;  %v3823_v45 = vsel %vm11441_vm10, %v3791_v41, %v6623_v34  ;;  %v3824_v26 = vsel %vm11442_vm15, %v3792_v43, %v6624_v6  ;;  %vm11449_vm8 = vmmov %vm11445_vm0 }
 0x39a   : > { %v6632_v15 = vpop.permute.xlu0 %6631  ;;  %v3888_v10 = vsel %vm3886_vm11, %v3855_v44, %v6454_v16  ;;  %v6459_v6 = vunpack.i.h.bf16 %v9974_v28  ;;  %v6458_v2 = vunpack.i.l.bf16 %v9974_v28  ;;  %v10246_v48 = vpack.i.bf16 %v3026_v40, %v10189_v61  ;;  %vm11450_vm15 = vmmov %vm11441_vm10 }
 0x39b   : > { %v6634_v23 = vunpack.i.h.bf16 %v6632_v15  ;;  %v6633_v20 = vunpack.i.l.bf16 %v6632_v15  ;;  %v3920_v49 = vsel %vm3919_vm14, %v3887_v12, %v6638_v14  ;;  %v3921_v15 = vsel %vm3919_vm14, %v3888_v10, %v6639_v0 }
 0x39c   : > { %6921 = vrot.lane.b32.xlu0 %v10159_v17, %s11217_s12  ;;  %v6647_v38 = vpop.permute.xlu1 %6646  ;;  %6936 = vrot.lane.b32.xlu1 %v10159_v17, %s11221_s30  ;;  %v3222_v0 = vrot.slane %v10210_v8, 1  ;;  %v6578_v61 = vunpack.i.l.bf16 %v10094_v32 }
 0x39d   : > { %v3856_v56 = vsel %vm3853_vm5, %v3823_v45, %v6633_v20  ;;  %v3857_v59 = vsel %vm3853_vm5, %v3824_v26, %v6634_v23  ;;  %v6649_v3 = vunpack.i.h.bf16 %v6647_v38  ;;  %v6648_v46 = vunpack.i.l.bf16 %v6647_v38  ;;  %v10252_v45 = vld [vmem:[#allocation3 + $0x190] sm:$0x3] }
 0x39e   : > { %v6642_v27 = vpop.permute.xlu0 %6641  ;;  %v3889_v14 = vsel %vm3886_vm11, %v3856_v56, %v6458_v2  ;;  %v3890_v41 = vsel %vm3886_vm11, %v3857_v59, %v6459_v6  ;;  %v6579_v26 = vunpack.i.h.bf16 %v10094_v32  ;;  %v3323_v32 = vrot.slane %v10210_v8, 2  ;;  %v7283_v8 = vld [vmem:[#allocation3 + $0x30] sm:$0xff] }
 0x39f   : > { %v6644_v62 = vunpack.i.h.bf16 %v6642_v27  ;;  %v6643_v34 = vunpack.i.l.bf16 %v6642_v27  ;;  %v3953_v37 = vsel %vm3952_vm13, %v3920_v49, %v6648_v46  ;;  %v3954_v44 = vsel %vm3952_vm13, %v3921_v15, %v6649_v3 }
 0x3a0   : > { %6931 = vrot.lane.b32.xlu0 %v10149_v63, %s11221_s30  ;;  %v6657_v20 = vpop.permute.xlu1 %6656  ;;  %v3985_v16 = vpack.c.bf16 %v3954_v44, %v3953_v37  ;;  %v3223_v63 = vrot.slane %v10212_v7, 1  ;;  %6946 = vrot.lane.b32.xlu1 %v10174_v52, %s11215_s24  ;;  %v3225_v49 = vrot.slane %v10252_v45, 1  ;;  %v3324_v15 = vrot.slane %v10212_v7, 2 }
 0x3a1   : > { %v3922_v12 = vsel %vm3919_vm14, %v3889_v14, %v6643_v34  ;;  %v3923_v10 = vsel %vm3919_vm14, %v3890_v41, %v6644_v62  ;;  %v6659_v38 = vunpack.i.h.bf16 %v6657_v20  ;;  %v6658_v59 = vunpack.i.l.bf16 %v6657_v20  ;;  %v7282_v34 = vld [vmem:[#allocation3 + $0x38] sm:$0xff] }
 0x3a2   : > { %v6652_v23 = vpop.permute.xlu0 %6651  ;;  %5642 = vmatprep.mubr.msk.bf16.mxu1 %vm4044_vm9, %v3985_v16  ;;  %v3326_v62 = vrot.slane %v10252_v45, 2  ;;  %v3730_v6 = vsel %vm455_vm4, %v7282_v34, %v6579_v26  ;;  %v6584_v2 = vunpack.i.h.bf16 %v10113_v24  ;;  %v6583_v37 = vunpack.i.l.bf16 %v10113_v24 }
 0x3a3   : > { %v6654_v43 = vunpack.i.h.bf16 %v6652_v23  ;;  %v6653_v28 = vunpack.i.l.bf16 %v6652_v23  ;;  %v6469_v44 = vunpack.i.h.bf16 %v9984_v57  ;;  %v3729_v23 = vsel %vm455_vm4, %v7283_v8, %v6578_v61 }
 0x3a4   : > { %6941 = vrot.lane.b32.xlu0 %v10157_v25, %s11215_s24  ;;  %v6667_v46 = vpop.permute.xlu1 %6666  ;;  %v10269_v25 = vsel %vm11443_vm1, %v3222_v0, %v3223_v63  ;;  %6961 = vrot.lane.b32.xlu1 %v10176_v1, %s11213_s15  ;;  %v3762_v20 = vsel %vm11444_vm7, %v3730_v6, %v6659_v38  ;;  %v3761_v0 = vsel %vm11445_vm0, %v3729_v23, %v6658_v59  ;;  %v6463_v26 = vunpack.i.l.bf16 %v9986_v19  ;;  %vm11451_vm1 = vmmov %vm11439_vm6 }
 0x3a5   : > { %v3955_v40 = vsel %vm3952_vm13, %v3922_v12, %v6653_v28  ;;  %v3956_v27 = vsel %vm3952_vm13, %v3923_v10, %v6654_v43  ;;  %v6669_v24 = vunpack.i.h.bf16 %v6667_v46  ;;  %v6668_v41 = vunpack.i.l.bf16 %v6667_v46  ;;  %vm11452_vm7 = vmmov %vm11451_vm1 }
 0x3a6   : > { %v3986_v56 = vpack.c.bf16 %v3956_v27, %v3955_v40  ;;  %v6662_v3 = vpop.permute.xlu0 %6661  ;;  %v6464_v28 = vunpack.i.h.bf16 %v9986_v19  ;;  %v6468_v61 = vunpack.i.l.bf16 %v9984_v57  ;;  %v6474_v40 = vunpack.i.h.bf16 %v9993_v60  ;;  %v7284_v27 = vld [vmem:[#allocation3 + $0x50] sm:$0xff]  ;;  %vm11453_vm0 = vmmov %vm11441_vm10 }
 0x3a7   : > { %v6663_v16 = vunpack.i.l.bf16 %v6662_v3  ;;  %v6664_v14 = vunpack.i.h.bf16 %v6662_v3  ;;  %v3732_v38 = vsel %vm455_vm4, %v7284_v27, %v6584_v2  ;;  %v3793_v3 = vsel %vm11448_vm12, %v3761_v0, %v6463_v26 }
 0x3a8   : > { %6951 = vrot.lane.b32.xlu0 %v10159_v17, %s11213_s15  ;;  %5643 = vmatmul.mubr.msk.bf16.vlgmr.msra.gmra.mxu1 %vm4044_vm9, %v3986_v56  ;;  %v6677_v17 = vpop.permute.xlu1 %6676  ;;  %v7285_v56 = vld [vmem:[#allocation3 + $0x48] sm:$0xff]  ;;  %v3794_v57 = vsel %vm11439_vm6, %v3762_v20, %v6464_v28  ;;  %v3825_v6 = vsel %vm11441_vm10, %v3793_v3, %v6668_v41  ;;  %v6473_v0 = vunpack.i.l.bf16 %v9993_v60  ;;  %vm11455_vm12 = vcmask 1045504   ;;  %vm11456_vm6 = vmmov %vm11453_vm0 }
 0x3a9   : > { %v6679_v12 = vunpack.i.h.bf16 %v6677_v17  ;;  %v6678_v10 = vunpack.i.l.bf16 %v6677_v17  ;;  %v3731_v59 = vsel %vm455_vm4, %v7285_v56, %v6583_v37  ;;  %6966 = vrot.lane.b32.xlu1 %v10172_v18, %s11446_s22  ;;  %v3764_v34 = vsel %vm11449_vm8, %v3732_v38, %v6664_v14  ;;  %vm11458_vm10 = vmmov %vm11455_vm12 }
 0x3aa   : > { %v6672_v43 = vpop.permute.xlu0 %6671  ;;  %v3763_v19 = vsel %vm11447_vm2, %v3731_v59, %v6663_v16  ;;  %v3826_v2 = vsel %vm11450_vm15, %v3794_v57, %v6669_v24  ;;  %v3796_v14 = vsel %vm11452_vm7, %v3764_v34, %v6469_v44  ;;  %vm11454_vm2 = vcmask 1046528   ;;  %v10323_v57 = vld [vmem:[#allocation3 + $0x1a0] sm:$0xff] }
 0x3ab   : > { %v6673_v46 = vunpack.i.l.bf16 %v6672_v43  ;;  %v6674_v37 = vunpack.i.h.bf16 %v6672_v43  ;;  %v3859_v17 = vsel %vm3853_vm5, %v3826_v2, %v6679_v12  ;;  %v3795_v20 = vsel %vm11451_vm1, %v3763_v19, %v6468_v61  ;;  %v4378_v43 = vld [vmem:[#allocation2 + $0x139] sm:$0xff]  ;;  %v4379_v12 = vld [vmem:[#allocation2 + $0x141] sm:$0xff]  ;;  %vm11460_vm1 = vmmov %vm11454_vm2 }
 0x3ac   : > { %6956 = vrot.lane.b32.xlu0 %v9818_v11, %s11446_s22  ;;  %v6687_v23 = vpop.permute.xlu1 %6686  ;;  %v3858_v11 = vsel %vm3853_vm5, %v3825_v6, %v6678_v10  ;;  %v3226_v41 = vsel %vm11454_vm2, %v3223_v63, %v3225_v49  ;;  %v3325_v60 = vsel %vm11455_vm12, %v3323_v32, %v3324_v15  ;;  %v3892_v38 = vsel %vm3886_vm11, %v3859_v17, %v6474_v40  ;;  %v10331_v40 = vld [vmem:[#allocation3 + $0x198] sm:$0xff]  ;;  %v4380_v17 = vld [vmem:[#allocation2 + $0x151] sm:$0xff]  ;;  %vm11461_vm7 = vmmov %vm11460_vm1 }
 0x3ad   : > { %v6689_v28 = vunpack.i.h.bf16 %v6687_v23  ;;  %v6688_v26 = vunpack.i.l.bf16 %v6687_v23  ;;  %6976 = vrot.lane.b32.xlu1 %v10178_v39, %s11219_s13  ;;  %v3827_v24 = vsel %vm11453_vm0, %v3795_v20, %v6673_v46  ;;  %v3828_v10 = vsel %vm11456_vm6, %v3796_v14, %v6674_v37 }
 0x3ae   : > { %v6682_v8 = vpop.permute.xlu0 %6681  ;;  %v3891_v61 = vsel %vm3886_vm11, %v3858_v11, %v6473_v0  ;;  %v4398_v59 = vpack.c.bf16 %v4379_v12, %v4378_v43  ;;  %v6479_v2 = vunpack.i.h.bf16 %v9991_v21  ;;  %v6478_v37 = vunpack.i.l.bf16 %v9991_v21  ;;  %v10337_v11 = vld [vmem:[#allocation3 + $0x1a8] sm:$0x3] }
 0x3af   : > { %v6684_v27 = vunpack.i.h.bf16 %v6682_v8  ;;  %v6683_v16 = vunpack.i.l.bf16 %v6682_v8  ;;  %v3924_v32 = vsel %vm3919_vm14, %v3891_v61, %v6688_v26  ;;  %v3925_v46 = vsel %vm3919_vm14, %v3892_v38, %v6689_v28 }
 0x3b0   : > { %6971 = vrot.lane.b32.xlu0 %v10174_v52, %s11219_s13  ;;  %v6697_v44 = vpop.permute.xlu1 %6696  ;;  %vm11457_vm8 = vcmask 31744   ;;  %v3524_v21 = vrot.slane %v10323_v57, 1  ;;  %v3523_v7 = vrot.slane %v10331_v40, 1  ;;  %v3526_v45 = vrot.slane %v10337_v11, 1 }
 0x3b1   : > { %v3860_v19 = vsel %vm3853_vm5, %v3827_v24, %v6683_v16  ;;  %v3861_v3 = vsel %vm3853_vm5, %v3828_v10, %v6684_v27  ;;  %v6699_v63 = vunpack.i.h.bf16 %v6697_v44  ;;  %v6698_v49 = vunpack.i.l.bf16 %v6697_v44  ;;  %6986 = vrot.lane.b32.xlu1 %v10174_v52, %s11223_s16  ;;  %5700 = vmatprep.mubr.msk.bf16.mxu0 %vm11457_vm8, %v4398_v59  ;;  %v4381_v27 = vld [vmem:[#allocation2 + $0x159] sm:$0xff]  ;;  %vm11459_vm15 = vmmov %vm11457_vm8 }
 0x3b2   : > { %v6692_v56 = vpop.permute.xlu0 %6691  ;;  %v3327_v52 = vsel %vm11458_vm10, %v3324_v15, %v3326_v62  ;;  %v4399_v28 = vpack.c.bf16 %v4381_v27, %v4380_v17  ;;  %v3893_v26 = vsel %vm3886_vm11, %v3860_v19, %v6478_v37  ;;  %v3894_v14 = vsel %vm3886_vm11, %v3861_v3, %v6479_v2  ;;  %v7287_v37 = vld [vmem:[#allocation3 + $0x60] sm:$0xff] }
 0x3b3   : > { %v6694_v34 = vunpack.i.h.bf16 %v6692_v56  ;;  %v6693_v6 = vunpack.i.l.bf16 %v6692_v56  ;;  %v3957_v8 = vsel %vm3952_vm13, %v3924_v32, %v6698_v49  ;;  %v3958_v23 = vsel %vm3952_vm13, %v3925_v46, %v6699_v63 }
 0x3b4   : > { %6981 = vrot.lane.b32.xlu0 %v10176_v1, %s11217_s12  ;;  %v6707_v0 = vpop.permute.xlu1 %6706  ;;  %v3987_v20 = vpack.c.bf16 %v3958_v23, %v3957_v8  ;;  %v6589_v15 = vunpack.i.h.bf16 %v10111_v29  ;;  %v6588_v62 = vunpack.i.l.bf16 %v10111_v29  ;;  %v10362_v63 = vpack.i.bf16 %v3226_v41, %v10269_v25  ;;  %5701 = vmatmul.mubr.msk.bf16.gmra.mxu0 %vm11459_vm15, %v4399_v28 }
 0x3b5   : > { %v3926_v12 = vsel %vm3919_vm14, %v3893_v26, %v6693_v6  ;;  %v3927_v10 = vsel %vm3919_vm14, %v3894_v14, %v6694_v34  ;;  %6996 = vrot.lane.b32.xlu1 %v10178_v39, %s11223_s16  ;;  %v6709_v56 = vunpack.i.h.bf16 %v6707_v0  ;;  %v6708_v44 = vunpack.i.l.bf16 %v6707_v0 }
 0x3b6   : > { %v6702_v16 = vpop.permute.xlu0 %6701  ;;  %5646 = vmatprep.mubr.msk.bf16.mxu1 %vm4044_vm9, %v3987_v20  ;;  %v10365_v49 = vpack.i.bf16 %v3327_v52, %v3325_v60  ;;  %v3625_v29 = vrot.slane %v10323_v57, 2  ;;  %v7045_v32 = vpack.i.bf16 %v10323_v57, %v10331_v40  ;;  %v3624_v46 = vrot.slane %v10331_v40, 2  ;;  %v7286_v60 = vld [vmem:[#allocation3 + $0x68] sm:$0xff] }
 0x3b7   : > { %v6704_v24 = vunpack.i.h.bf16 %v6702_v16  ;;  %v6703_v43 = vunpack.i.l.bf16 %v6702_v16  ;;  %v6594_v34 = vunpack.i.h.bf16 %v10137_v36  ;;  %v6593_v6 = vunpack.i.l.bf16 %v10137_v36 }
 0x3b8   : > { %6991 = vrot.lane.b32.xlu0 %v10246_v48, %s11217_s12  ;;  %v6717_v19 = vpop.permute.xlu1 %6716  ;;  %v10378_v25 = vsel %vm11460_vm1, %v3523_v7, %v3524_v21  ;;  %v10381_v41 = vsel %vm11461_vm7, %v3524_v21, %v3526_v45  ;;  %v3734_v2 = vsel %vm455_vm4, %v7286_v60, %v6589_v15  ;;  %v3733_v8 = vsel %vm455_vm4, %v7287_v37, %v6588_v62 }
 0x3b9   : > { %v3959_v61 = vsel %vm3952_vm13, %v3926_v12, %v6703_v43  ;;  %v3960_v38 = vsel %vm3952_vm13, %v3927_v10, %v6704_v24  ;;  %7006 = vrot.lane.b32.xlu1 %v10246_v48, %s11221_s30  ;;  %vm11462_vm0 = vcmask 130048   ;;  %v6719_v27 = vunpack.i.h.bf16 %v6717_v19  ;;  %v7288_v43 = vld [vmem:[#allocation3 + $0x80] sm:$0xff]  ;;  %v7289_v10 = vld [vmem:[#allocation3 + $0x78] sm:$0xff] }
 0x3ba   : > { %v6712_v59 = vpop.permute.xlu0 %6711  ;;  %v3988_v3 = vpack.c.bf16 %v3960_v38, %v3959_v61  ;;  %vm11463_vm2 = vmmov %vm11462_vm0  ;;  %v6718_v16 = vunpack.i.l.bf16 %v6717_v19  ;;  %v6484_v52 = vunpack.i.h.bf16 %v10003_v50  ;;  %v6483_v21 = vunpack.i.l.bf16 %v10003_v50 }
 0x3bb   : > { %v6714_v23 = vunpack.i.h.bf16 %v6712_v59  ;;  %v6713_v36 = vunpack.i.l.bf16 %v6712_v59  ;;  %v3765_v17 = vsel %vm11463_vm2, %v3733_v8, %v6708_v44  ;;  %v6489_v14 = vunpack.i.h.bf16 %v10001_v58  ;;  %vm11465_vm12 = vmmov %vm11462_vm0 }
 0x3bc   : > { %7001 = vrot.lane.b32.xlu0 %v10176_v1, %s11221_s30  ;;  %5647 = vmatmul.mubr.msk.bf16.gmra.mxu1 %vm4044_vm9, %v3988_v3  ;;  %v3766_v1 = vsel %vm11462_vm0, %v3734_v2, %v6709_v56  ;;  %v6727_v20 = vpop.permute.xlu1 %6726  ;;  %v6488_v24 = vunpack.i.l.bf16 %v10001_v58  ;;  %v3736_v12 = vsel %vm455_vm4, %v7288_v43, %v6594_v34  ;;  %v3735_v7 = vsel %vm455_vm4, %v7289_v10, %v6593_v6  ;;  %vm11466_vm6 = vmmov %vm11462_vm0 }
 0x3bd   : > { %v6729_v28 = vunpack.i.h.bf16 %v6727_v20  ;;  %v6728_v26 = vunpack.i.l.bf16 %v6727_v20  ;;  %7016 = vrot.lane.b32.xlu1 %v10226_v33, %s11464_s25  ;;  %v3767_v50 = vsel %vm11465_vm12, %v3735_v7, %v6713_v36  ;;  %v3768_v45 = vsel %vm11466_vm6, %v3736_v12, %v6714_v23 }
 0x3be   : > { %v6722_v0 = vpop.permute.xlu0 %6721  ;;  %vm11467_vm8 = vcmask 195584   ;;  %vm11469_vm15 = vcmask 261120   ;;  %v6493_v6 = vunpack.i.l.bf16 %v10014_v53  ;;  %v6498_v8 = vunpack.i.l.bf16 %v10012_v42 }
 0x3bf   : > { %v3797_v15 = vsel %vm11467_vm8, %v3765_v17, %v6483_v21  ;;  %vm11468_vm10 = vmmov %vm11467_vm8  ;;  %v6724_v38 = vunpack.i.h.bf16 %v6722_v0  ;;  %v6723_v56 = vunpack.i.l.bf16 %v6722_v0  ;;  %v6499_v43 = vunpack.i.h.bf16 %v10012_v42 }
 0x3c0   : > { %7011 = vrot.lane.b32.xlu0 %v10172_v18, %s11464_s25  ;;  %v3798_v58 = vsel %vm11468_vm10, %v3766_v1, %v6484_v52  ;;  %v3829_v62 = vsel %vm11469_vm15, %v3797_v15, %v6718_v16  ;;  %vm11470_vm1 = vmmov %vm11469_vm15  ;;  %v6737_v59 = vpop.permute.xlu1 %6736  ;;  %v6494_v18 = vunpack.i.h.bf16 %v10014_v53  ;;  %v3627_v1 = vrot.slane %v10337_v11, 2 }
 0x3c1   : > { %v3830_v61 = vsel %vm11470_vm1, %v3798_v58, %v6719_v27  ;;  %v3862_v19 = vsel %vm3853_vm5, %v3829_v62, %v6728_v26  ;;  %v6739_v2 = vunpack.i.h.bf16 %v6737_v59  ;;  %v6738_v37 = vunpack.i.l.bf16 %v6737_v59  ;;  %7026 = vrot.lane.b32.xlu1 %v10362_v63, %s11215_s24  ;;  %vm11471_vm7 = vmmov %vm11467_vm8  ;;  %v4382_v62 = vld [vmem:[#allocation2 + $0x169] sm:$0xff] }
 0x3c2   : > { %v6732_v44 = vpop.permute.xlu0 %6731  ;;  %v3863_v3 = vsel %vm3853_vm5, %v3830_v61, %v6729_v28  ;;  %v3799_v23 = vsel %vm11471_vm7, %v3767_v50, %v6488_v24  ;;  %vm11472_vm0 = vmmov %vm11471_vm7  ;;  %v3895_v27 = vsel %vm3886_vm11, %v3862_v19, %v6493_v6  ;;  %v7055_v7 = vpack.i.bf16 %v10381_v41, %v10378_v25  ;;  %v4383_v61 = vld [vmem:[#allocation2 + $0x171] sm:$0xff]  ;;  %v4385_v59 = vld [vmem:[#allocation2 + $0x189] sm:$0xff] }
 0x3c3   : > { %v6733_v34 = vunpack.i.l.bf16 %v6732_v44  ;;  %v6734_v60 = vunpack.i.h.bf16 %v6732_v44  ;;  %v3800_v36 = vsel %vm11472_vm0, %v3768_v45, %v6489_v14  ;;  %vm11473_vm2 = vmmov %vm11470_vm1  ;;  %v3896_v16 = vsel %vm3886_vm11, %v3863_v3, %v6494_v18 }
 0x3c4   : > { %7021 = vrot.lane.b32.xlu0 %v10178_v39, %s11215_s24  ;;  %v3831_v17 = vsel %vm11473_vm2, %v3799_v23, %v6723_v56  ;;  %vm11474_vm12 = vmmov %vm11470_vm1  ;;  %v6747_v0 = vpop.permute.xlu1 %6746  ;;  %v3928_v14 = vsel %vm3919_vm14, %v3895_v27, %v6738_v37  ;;  %v3929_v11 = vsel %vm3919_vm14, %v3896_v16, %v6739_v2  ;;  %vm11475_vm6 = vcmask 1045504  }
 0x3c5   : > { %v3832_v53 = vsel %vm11474_vm12, %v3800_v36, %v6724_v38  ;;  %v3864_v20 = vsel %vm3853_vm5, %v3831_v17, %v6733_v34  ;;  %v6749_v21 = vunpack.i.h.bf16 %v6747_v0  ;;  %v6748_v28 = vunpack.i.l.bf16 %v6747_v0  ;;  %7036 = vrot.lane.b32.xlu1 %v10365_v49, %s11213_s15  ;;  %vm11476_vm8 = vmmov %vm11475_vm6  ;;  %v4384_v38 = vld [vmem:[#allocation2 + $0x181] sm:$0xff] }
 0x3c6   : > { %v6742_v39 = vpop.permute.xlu0 %6741  ;;  %v3865_v26 = vsel %vm3853_vm5, %v3832_v53, %v6734_v60  ;;  %v3897_v50 = vsel %vm3886_vm11, %v3864_v20, %v6498_v8  ;;  %v3628_v42 = vsel %vm11476_vm8, %v3625_v29, %v3627_v1  ;;  %v6599_v19 = vunpack.i.h.bf16 %v10135_v51  ;;  %v7291_v36 = vld [vmem:[#allocation3 + $0x90] sm:$0xff] }
 0x3c7   : > { %v6743_v52 = vunpack.i.l.bf16 %v6742_v39  ;;  %v6744_v24 = vunpack.i.h.bf16 %v6742_v39  ;;  %v3961_v12 = vsel %vm3952_vm13, %v3928_v14, %v6748_v28  ;;  %v3962_v10 = vsel %vm3952_vm13, %v3929_v11, %v6749_v21  ;;  %v7292_v11 = vld [vmem:[#allocation3 + $0xb0] sm:$0xff] }
 0x3c8   : > { %7031 = vrot.lane.b32.xlu0 %v10246_v48, %s11213_s15  ;;  %v3989_v45 = vpack.c.bf16 %v3962_v10, %v3961_v12  ;;  %v6757_v58 = vpop.permute.xlu1 %6756  ;;  %v3626_v48 = vsel %vm11475_vm6, %v3624_v46, %v3625_v29  ;;  %v3898_v25 = vsel %vm3886_vm11, %v3865_v26, %v6499_v43  ;;  %v4400_v29 = vpack.c.bf16 %v4383_v61, %v4382_v62  ;;  %v7293_v43 = vld [vmem:[#allocation3 + $0xa8] sm:$0xff]  ;;  %s11538_s15 = smov 40  }
 0x3c9   : > { %v3930_v41 = vsel %vm3919_vm14, %v3897_v50, %v6743_v52  ;;  %v3931_v18 = vsel %vm3919_vm14, %v3898_v25, %v6744_v24  ;;  %7046 = vrot.lane.b32.xlu1 %v7045_v32, %s11446_s22  ;;  %v4401_v46 = vpack.c.bf16 %v4385_v59, %v4384_v38  ;;  %v6598_v3 = vunpack.i.l.bf16 %v10135_v51  ;;  %v7290_v32 = vld [vmem:[#allocation3 + $0x98] sm:$0xff] }
 0x3ca   : > { %v6752_v15 = vpop.permute.xlu0 %6751  ;;  %5650 = vmatprep.mubr.msk.bf16.mxu1 %vm4044_vm9, %v3989_v45  ;;  %v6759_v2 = vunpack.i.h.bf16 %v6757_v58  ;;  %vm11477_vm10 = vcmask 31744   ;;  %v6604_v57 = vunpack.i.h.bf16 %v10155_v47  ;;  %v6603_v40 = vunpack.i.l.bf16 %v10155_v47 }
 0x3cb   : > { %v6754_v56 = vunpack.i.h.bf16 %v6752_v15  ;;  %v6753_v44 = vunpack.i.l.bf16 %v6752_v15  ;;  %5704 = vmatprep.mubr.msk.bf16.mxu0 %vm11477_vm10, %v4400_v29  ;;  %vm11478_vm15 = vmmov %vm11477_vm10  ;;  %v7065_v51 = vpack.i.bf16 %v3628_v42, %v3626_v48  ;;  %v3738_v23 = vsel %vm455_vm4, %v7290_v32, %v6599_v19 }
 0x3cc   : > { %7041 = vrot.lane.b32.xlu0 %v10226_v33, %s11446_s22  ;;  %v6758_v33 = vunpack.i.l.bf16 %v6757_v58  ;;  %v6767_v8 = vpop.permute.xlu1 %6766  ;;  %5705 = vmatmul.mubr.msk.bf16.gmra.mxu0 %vm11478_vm15, %v4401_v46  ;;  %v3737_v1 = vsel %vm455_vm4, %v7291_v36, %v6598_v3  ;;  %vm11479_vm1 = vcmask 130048   ;;  %v6504_v20 = vunpack.i.h.bf16 %v10025_v54 }
 0x3cd   : > { %v3963_v34 = vsel %vm3952_vm13, %v3930_v41, %v6753_v44  ;;  %v3964_v6 = vsel %vm3952_vm13, %v3931_v18, %v6754_v56  ;;  %7056 = vrot.lane.b32.xlu1 %v7055_v7, %s11219_s13  ;;  %v3770_v27 = vsel %vm11479_vm1, %v3738_v23, %v6759_v2  ;;  %vm11480_vm7 = vmmov %vm11479_vm1  ;;  %v6769_v16 = vunpack.i.h.bf16 %v6767_v8 }
 0x3ce   : > { %v3990_v60 = vpack.c.bf16 %v3964_v6, %v3963_v34  ;;  %v6762_v37 = vpop.permute.xlu0 %6761  ;;  %v3769_v47 = vsel %vm11480_vm7, %v3737_v1, %v6758_v33  ;;  %v6768_v39 = vunpack.i.l.bf16 %v6767_v8  ;;  %v6503_v52 = vunpack.i.l.bf16 %v10025_v54  ;;  %vm11481_vm0 = vmmov %vm11479_vm1 }
 0x3cf   : > { %v6764_v17 = vunpack.i.h.bf16 %v6762_v37  ;;  %v6763_v53 = vunpack.i.l.bf16 %v6762_v37  ;;  %v6509_v26 = vunpack.i.h.bf16 %v10023_v30  ;;  %v6508_v14 = vunpack.i.l.bf16 %v10023_v30  ;;  %vm11482_vm2 = vmmov %vm11481_vm0 }
 0x3d0   : > { %7051 = vrot.lane.b32.xlu0 %v10362_v63, %s11219_s13  ;;  %5651 = vmatmul.mubr.msk.bf16.gmra.mxu1 %vm4044_vm9, %v3990_v60  ;;  %v6777_v0 = vpop.permute.xlu1 %6776  ;;  %v3740_v24 = vsel %vm455_vm4, %v7292_v11, %v6604_v57  ;;  %v3739_v12 = vsel %vm455_vm4, %v7293_v43, %v6603_v40  ;;  %vm11483_vm12 = vcmask 195584   ;;  %vm11485_vm8 = vcmask 261120   ;;  %s5447_s13 = sshll.u32 %s7607_s29, 8  ;;  %s11535_s29 = smov 56  }
 0x3d1   : > { %v6779_v21 = vunpack.i.h.bf16 %v6777_v0  ;;  %v6778_v28 = vunpack.i.l.bf16 %v6777_v0  ;;  %7066 = vrot.lane.b32.xlu1 %v7065_v51, %s11217_s12  ;;  %v3771_v10 = vsel %vm11481_vm0, %v3739_v12, %v6763_v53  ;;  %v3772_v54 = vsel %vm11482_vm2, %v3740_v24, %v6764_v17  ;;  %vm11484_vm6 = vmmov %vm11483_vm12  ;;  %s10693_s24 = scalar_lea.vmem %s11124_s10, %s5447_s13  ;;  %s11536_s13 = smov 64  }
 0x3d2   : > { %v6772_v63 = vpop.permute.xlu0 %6771  ;;  %v3801_v7 = vsel %vm11483_vm12, %v3769_v47, %v6503_v52  ;;  %v3802_v50 = vsel %vm11484_vm6, %v3770_v27, %v6504_v20  ;;  %vm11486_vm10 = vmmov %vm11485_vm8  ;;  %v6514_v25 = vunpack.i.h.bf16 %v10034_v31  ;;  %v6513_v41 = vunpack.i.l.bf16 %v10034_v31 }
 0x3d3   : > { %v3833_v30 = vsel %vm11485_vm8, %v3801_v7, %v6768_v39  ;;  %v3834_v45 = vsel %vm11486_vm10, %v3802_v50, %v6769_v16  ;;  %v6774_v15 = vunpack.i.h.bf16 %v6772_v63  ;;  %v6773_v58 = vunpack.i.l.bf16 %v6772_v63  ;;  %vm11487_vm15 = vmmov %vm11484_vm6 }
 0x3d4   : > { %7061 = vrot.lane.b32.xlu0 %v10365_v49, %s11217_s12  ;;  %v6787_v42 = vpop.permute.xlu1 %6786  ;;  %v3866_v49 = vsel %vm3853_vm5, %v3833_v30, %v6778_v28  ;;  %v3867_v62 = vsel %vm3853_vm5, %v3834_v45, %v6779_v21  ;;  %v3803_v59 = vsel %vm11487_vm15, %v3771_v10, %v6508_v14  ;;  %vm11488_vm1 = vmmov %vm11484_vm6  ;;  %v6519_v51 = vunpack.i.h.bf16 %v10032_v4  ;;  %s11537_s12 = smov 32  }
 0x3d5   : > { %v6789_v56 = vunpack.i.h.bf16 %v6787_v42  ;;  %v6788_v44 = vunpack.i.l.bf16 %v6787_v42  ;;  %v3804_v18 = vsel %vm11488_vm1, %v3772_v54, %v6509_v26  ;;  %vm11489_vm7 = vmmov %vm11485_vm8  ;;  %v3899_v19 = vsel %vm3886_vm11, %v3866_v49, %v6513_v41  ;;  %v7296_v49 = vld [vmem:[#allocation3 + $0xe0] sm:$0xff] }
 0x3d6   : > { %v6782_v48 = vpop.permute.xlu0 %6781  ;;  %v3835_v29 = vsel %vm11489_vm7, %v3803_v59, %v6773_v58  ;;  %vm11490_vm0 = vmmov %vm11489_vm7  ;;  %v3900_v3 = vsel %vm3886_vm11, %v3867_v62, %v6514_v25  ;;  %v6518_v32 = vunpack.i.l.bf16 %v10032_v4  ;;  %v6609_v26 = vunpack.i.h.bf16 %v10153_v22  ;;  %v7297_v62 = vld [vmem:[#allocation3 + $0xd8] sm:$0xff] }
 0x3d7   : > { %v6784_v61 = vunpack.i.h.bf16 %v6782_v48  ;;  %v6783_v38 = vunpack.i.l.bf16 %v6782_v48  ;;  %v3836_v46 = vsel %vm11490_vm0, %v3804_v18, %v6774_v15  ;;  %v3932_v37 = vsel %vm3919_vm14, %v3899_v19, %v6788_v44  ;;  %v7294_v15 = vld [vmem:[#allocation3 + $0xc8] sm:$0xff]  ;;  %v7295_v48 = vld [vmem:[#allocation3 + $0xc0] sm:$0xff]  ;;  %vm11491_vm12 = vmmov %vm11482_vm2 }
 0x3d8   : > { %v6797_v6 = vpop.permute.xlu1 %6796  ;;  %v3933_v8 = vsel %vm3919_vm14, %v3900_v3, %v6789_v56  ;;  %v6608_v14 = vunpack.i.l.bf16 %v10153_v22  ;;  %v6524_v30 = vunpack.i.h.bf16 %v10041_v55  ;;  %v6523_v45 = vunpack.i.l.bf16 %v10041_v55  ;;  %vm11492_vm6 = vmmov %vm11482_vm2 }
 0x3d9   : > { %v3868_v60 = vsel %vm3853_vm5, %v3835_v29, %v6783_v38  ;;  %v3869_v31 = vsel %vm3853_vm5, %v3836_v46, %v6784_v61  ;;  %v6799_v2 = vunpack.i.h.bf16 %v6797_v6  ;;  %v6798_v33 = vunpack.i.l.bf16 %v6797_v6  ;;  %vm11493_vm8 = vmmov %vm11482_vm2 }
 0x3da   : > { %v6792_v34 = vpop.permute.xlu0 %6791  ;;  %v3901_v27 = vsel %vm3886_vm11, %v3868_v60, %v6518_v32  ;;  %v3902_v47 = vsel %vm3886_vm11, %v3869_v31, %v6519_v51  ;;  %v3742_v58 = vsel %vm455_vm4, %v7294_v15, %v6609_v26  ;;  %v3741_v42 = vsel %vm455_vm4, %v7295_v48, %v6608_v14  ;;  %vm11494_vm10 = vmmov %vm11488_vm1 }
 0x3db   : > { %v6794_v57 = vunpack.i.h.bf16 %v6792_v34  ;;  %v6793_v40 = vunpack.i.l.bf16 %v6792_v34  ;;  %v3965_v23 = vsel %vm3952_vm13, %v3932_v37, %v6798_v33  ;;  %v3966_v36 = vsel %vm3952_vm13, %v3933_v8, %v6799_v2  ;;  %vm11495_vm15 = vmmov %vm11488_vm1 }
 0x3dc   : > { %v3991_v1 = vpack.c.bf16 %v3966_v36, %v3965_v23  ;;  %v6807_v53 = vpop.permute.xlu1 %6806  ;;  %v6529_v19 = vunpack.i.h.bf16 %v10043_v13  ;;  %v6528_v3 = vunpack.i.l.bf16 %v10043_v13  ;;  %vm11496_vm1 = vmmov %vm11490_vm0 }
 0x3dd   : > { %v3934_v63 = vsel %vm3919_vm14, %v3901_v27, %v6793_v40  ;;  %v3935_v0 = vsel %vm3919_vm14, %v3902_v47, %v6794_v57  ;;  %v6809_v11 = vunpack.i.h.bf16 %v6807_v53  ;;  %v6808_v24 = vunpack.i.l.bf16 %v6807_v53  ;;  %vm11497_vm7 = vmmov %vm11490_vm0 }
 0x3de   : > { %v6802_v17 = vpop.permute.xlu0 %6801  ;;  %5654 = vmatprep.mubr.msk.bf16.mxu1 %vm4044_vm9, %v3991_v1  ;;  %vm11498_vm0 = vmmov %vm11494_vm10  ;;  %v6533_v53 = vunpack.i.l.bf16 %v10051_v9 }
 0x3df   : > { %v6804_v16 = vunpack.i.h.bf16 %v6802_v17  ;;  %v6803_v39 = vunpack.i.l.bf16 %v6802_v17  ;;  %v3744_v22 = vsel %vm455_vm4, %v7296_v49, %v6809_v11  ;;  %v3743_v61 = vsel %vm455_vm4, %v7297_v62, %v6808_v24 }
 0x3e0   : > { %v6817_v28 = vpop.permute.xlu1 %6816  ;;  %v6534_v17 = vunpack.i.h.bf16 %v10051_v9  ;;  %v6539_v11 = vunpack.i.h.bf16 %v10053_v5  ;;  %v6538_v24 = vunpack.i.l.bf16 %v10053_v5 }
 0x3e1   : > { %v3967_v4 = vsel %vm3952_vm13, %v3934_v63, %v6803_v39  ;;  %v3968_v20 = vsel %vm3952_vm13, %v3935_v0, %v6804_v16  ;;  %v6819_v7 = vunpack.i.h.bf16 %v6817_v28  ;;  %v6818_v50 = vunpack.i.l.bf16 %v6817_v28 }
 0x3e2   : > { %v3992_v52 = vpack.c.bf16 %v3968_v20, %v3967_v4  ;;  %v6812_v21 = vpop.permute.xlu0 %6811 }
 0x3e3   : > { %v6814_v10 = vunpack.i.h.bf16 %v6812_v21  ;;  %v6813_v54 = vunpack.i.l.bf16 %v6812_v21  ;;  %v3775_v59 = vsel %vm11492_vm6, %v3743_v61, %v6818_v50  ;;  %v3776_v18 = vsel %vm11493_vm8, %v3744_v22, %v6819_v7  ;;  %vm11501_vm6 = vmmov %vm11496_vm1 }
 0x3e4   : > { %5655 = vmatmul.mubr.msk.bf16.gmra.mxu1 %vm4044_vm9, %v3992_v52  ;;  %v6827_v12 = vpop.permute.xlu1 %6826  ;;  %v3807_v51 = vsel %vm11498_vm0, %v3775_v59, %v6528_v3  ;;  %v7298_v3 = vld [vmem:[#allocation3 + $0xf8] sm:$0xff] }
 0x3e5   : > { %v3774_v41 = vsel %vm11482_vm2, %v3742_v58, %v6814_v10  ;;  %v3773_v56 = vsel %vm11491_vm12, %v3741_v42, %v6813_v54  ;;  %v6829_v34 = vunpack.i.h.bf16 %v6827_v12  ;;  %v6828_v6 = vunpack.i.l.bf16 %v6827_v12  ;;  %vm11499_vm2 = vmmov %vm11498_vm0 }
 0x3e6   : > { %v6822_v43 = vpop.permute.xlu0 %6821  ;;  %v3805_v60 = vsel %vm11494_vm10, %v3773_v56, %v6523_v45  ;;  %v3806_v31 = vsel %vm11495_vm15, %v3774_v41, %v6524_v30  ;;  %v3808_v32 = vsel %vm11499_vm2, %v3776_v18, %v6529_v19  ;;  %vm11500_vm12 = vmmov %vm11496_vm1  ;;  %v6543_v19 = vunpack.i.l.bf16 %v10061_v35 }
 0x3e7   : > { %v6824_v44 = vunpack.i.h.bf16 %v6822_v43  ;;  %v6823_v55 = vunpack.i.l.bf16 %v6822_v43  ;;  %v3839_v27 = vsel %vm11500_vm12, %v3807_v51, %v6828_v6  ;;  %v3840_v47 = vsel %vm11501_vm6, %v3808_v32, %v6829_v34  ;;  %v7299_v6 = vld [vmem:[#allocation3 + $0xf0] sm:$0xff]  ;;  %vm11502_vm10 = vmmov %vm11493_vm8 }
 0x3e8   : > { %v6837_v25 = vpop.permute.xlu1 %6836  ;;  %vm11503_vm15 = vmmov %vm11493_vm8 }
 0x3e9   : > { %v6839_v2 = vunpack.i.h.bf16 %v6837_v25  ;;  %v6838_v33 = vunpack.i.l.bf16 %v6837_v25  ;;  %v3837_v57 = vsel %vm11496_vm1, %v3805_v60, %v6823_v55  ;;  %v3838_v40 = vsel %vm11497_vm7, %v3806_v31, %v6824_v44  ;;  %v7300_v31 = vld [vmem:[#allocation3 + $0x110] sm:$0xff]  ;;  %vm11504_vm1 = vmmov %vm11493_vm8 }
 0x3ea   : > { %v6832_v38 = vpop.permute.xlu0 %6831  ;;  %vm11506_vm7 = vmmov %vm11498_vm0 }
 0x3eb   : > { %v6834_v29 = vunpack.i.h.bf16 %v6832_v38  ;;  %v6833_v46 = vunpack.i.l.bf16 %v6832_v38  ;;  %v3872_v16 = vsel %vm3853_vm5, %v3839_v27, %v6838_v33  ;;  %v3873_v39 = vsel %vm3853_vm5, %v3840_v47, %v6839_v2  ;;  %v7301_v33 = vld [vmem:[#allocation3 + $0x108] sm:$0xff]  ;;  %vm11507_vm2 = vmmov %vm11501_vm6 }
 0x3ec   : > { %v6847_v8 = vpop.permute.xlu1 %6846  ;;  %v3905_v50 = vsel %vm3886_vm11, %v3872_v16, %v6538_v24  ;;  %v3906_v30 = vsel %vm3886_vm11, %v3873_v39, %v6539_v11  ;;  %vm11508_vm12 = vmmov %vm11507_vm2 }
 0x3ed   : > { %v3870_v13 = vsel %vm3853_vm5, %v3837_v57, %v6833_v46  ;;  %v3871_v23 = vsel %vm3853_vm5, %v3838_v40, %v6834_v29  ;;  %v6849_v26 = vunpack.i.h.bf16 %v6847_v8  ;;  %v6848_v14 = vunpack.i.l.bf16 %v6847_v8  ;;  %vm11509_vm6 = vmmov %vm11498_vm0 }
 0x3ee   : > { %v6842_v37 = vpop.permute.xlu0 %6841  ;;  %v3903_v4 = vsel %vm3886_vm11, %v3870_v13, %v6533_v53  ;;  %v3904_v20 = vsel %vm3886_vm11, %v3871_v23, %v6534_v17  ;;  %v6544_v46 = vunpack.i.h.bf16 %v10061_v35  ;;  %v11505_v17 = vld [vmem:[#allocation20_spill] sm:$0xff] }
 0x3ef   : > { %v6844_v36 = vunpack.i.h.bf16 %v6842_v37  ;;  %v6843_v1 = vunpack.i.l.bf16 %v6842_v37  ;;  %v3938_v58 = vsel %vm3919_vm14, %v3905_v50, %v6848_v14  ;;  %v3939_v48 = vsel %vm3919_vm14, %v3906_v30, %v6849_v26 }
 0x3f0   : > { %v6857_v0 = vpop.permute.xlu1 %6856  ;;  %v6549_v53 = vunpack.i.h.bf16 %v11505_v17  ;;  %v6548_v27 = vunpack.i.l.bf16 %v11505_v17 }
 0x3f1   : > { %v3936_v28 = vsel %vm3919_vm14, %v3903_v4, %v6843_v1  ;;  %v3937_v9 = vsel %vm3919_vm14, %v3904_v20, %v6844_v36  ;;  %v6859_v61 = vunpack.i.h.bf16 %v6857_v0  ;;  %v6858_v38 = vunpack.i.l.bf16 %v6857_v0 }
 0x3f2   : > { %v6852_v63 = vpop.permute.xlu0 %6851 }
 0x3f3   : > { %v6854_v52 = vunpack.i.h.bf16 %v6852_v63  ;;  %v6853_v21 = vunpack.i.l.bf16 %v6852_v63  ;;  %v3746_v34 = vsel %vm455_vm4, %v7298_v3, %v6859_v61  ;;  %v3745_v60 = vsel %vm455_vm4, %v7299_v6, %v6858_v38 }
 0x3f4   : > { %v6867_v7 = vpop.permute.xlu1 %6866 }
 0x3f5   : > { %v3969_v43 = vsel %vm3952_vm13, %v3936_v28, %v6853_v21  ;;  %v3970_v12 = vsel %vm3952_vm13, %v3937_v9, %v6854_v52  ;;  %v6869_v25 = vunpack.i.h.bf16 %v6867_v7  ;;  %v6868_v41 = vunpack.i.l.bf16 %v6867_v7 }
 0x3f6   : > { %v3993_v10 = vpack.c.bf16 %v3970_v12, %v3969_v43  ;;  %v6862_v54 = vpop.permute.xlu0 %6861  ;;  %v11511_v12 = vld [vmem:[#allocation14_spill] sm:$0xff] }
 0x3f7   : > { %v6864_v45 = vunpack.i.h.bf16 %v6862_v54  ;;  %v6863_v15 = vunpack.i.l.bf16 %v6862_v54  ;;  %v3748_v2 = vsel %vm455_vm4, %v7300_v31, %v6869_v25  ;;  %v3747_v37 = vsel %vm455_vm4, %v7301_v33, %v6868_v41  ;;  %v11514_v25 = vld [vmem:[#allocation22_spill] sm:$0xff] }
 0x3f8   : > { %5658 = vmatprep.mubr.msk.bf16.mxu1 %vm4044_vm9, %v3993_v10  ;;  %v6877_v62 = vpop.permute.xlu1 %6876  ;;  %v6554_v10 = vunpack.i.h.bf16 %v11511_v12  ;;  %v6553_v54 = vunpack.i.l.bf16 %v11511_v12  ;;  %v6559_v41 = vunpack.i.h.bf16 %v11514_v25 }
 0x3f9   : > { %v3971_v5 = vsel %vm3952_vm13, %v3938_v58, %v6863_v15  ;;  %v3972_v42 = vsel %vm3952_vm13, %v3939_v48, %v6864_v45  ;;  %v6879_v18 = vunpack.i.h.bf16 %v6877_v62  ;;  %v6878_v29 = vunpack.i.l.bf16 %v6877_v62 }
 0x3fa   : > { %v3994_v49 = vpack.c.bf16 %v3972_v42, %v3971_v5  ;;  %v6872_v22 = vpop.permute.xlu0 %6871 }
 0x3fb   : > { %v6874_v55 = vunpack.i.h.bf16 %v6872_v22  ;;  %v6873_v59 = vunpack.i.l.bf16 %v6872_v22  ;;  %v3779_v13 = vsel %vm11503_vm15, %v3747_v37, %v6878_v29  ;;  %v3780_v23 = vsel %vm11504_vm1, %v3748_v2, %v6879_v18  ;;  %vm11513_vm15 = vmmov %vm11507_vm2 }
 0x3fc   : > { %5659 = vmatmul.mubr.msk.bf16.gmra.mxu1 %vm4044_vm9, %v3994_v49  ;;  %v6887_v44 = vpop.permute.xlu1 %6886  ;;  %v3811_v9 = vsel %vm11509_vm6, %v3779_v13, %v6548_v27 }
 0x3fd   : > { %v3777_v40 = vsel %vm11493_vm8, %v3745_v60, %v6873_v59  ;;  %v3778_v51 = vsel %vm11502_vm10, %v3746_v34, %v6874_v55  ;;  %v6889_v47 = vunpack.i.h.bf16 %v6887_v44  ;;  %v6888_v16 = vunpack.i.l.bf16 %v6887_v44  ;;  %vm11510_vm8 = vmmov %vm11498_vm0 }
 0x3fe   : > { %v6882_v56 = vpop.permute.xlu0 %6881  ;;  %v3809_v39 = vsel %vm11506_vm7, %v3777_v40, %v6543_v19  ;;  %v3810_v63 = vsel %vm11498_vm0, %v3778_v51, %v6544_v46  ;;  %v3812_v26 = vsel %vm11510_vm8, %v3780_v23, %v6549_v53  ;;  %vm11512_vm10 = vmmov %vm11507_vm2 }
 0x3ff   : > { %v6884_v32 = vunpack.i.h.bf16 %v6882_v56  ;;  %v6883_v35 = vunpack.i.l.bf16 %v6882_v56  ;;  %v3843_v7 = vsel %vm11512_vm10, %v3811_v9, %v6888_v16  ;;  %v3844_v50 = vsel %vm11513_vm15, %v3812_v26, %v6889_v47  ;;  %v7302_v47 = vld [vmem:[#allocation3 + $0x128] sm:$0xff]  ;;  %vm11515_vm7 = vmmov %vm11504_vm1 }
 0x400   : > { %v6897_v57 = vpop.permute.xlu1 %6896  ;;  %v6558_v56 = vunpack.i.l.bf16 %v11514_v25  ;;  %vm11517_vm0 = vmmov %vm11504_vm1 }
 0x401   : > { %v6899_v0 = vunpack.i.h.bf16 %v6897_v57  ;;  %v6898_v4 = vunpack.i.l.bf16 %v6897_v57  ;;  %v3841_v21 = vsel %vm11507_vm2, %v3809_v39, %v6883_v35  ;;  %v3842_v28 = vsel %vm11508_vm12, %v3810_v63, %v6884_v32  ;;  %v7303_v39 = vld [vmem:[#allocation3 + $0x120] sm:$0xff]  ;;  %vm11518_vm2 = vmmov %vm11517_vm0 }
 0x402   : > { %v6892_v8 = vpop.permute.xlu0 %6891  ;;  %vm11520_vm12 = vmmov %vm11509_vm6 }
 0x403   : > { %v6894_v36 = vunpack.i.h.bf16 %v6892_v8  ;;  %v6893_v1 = vunpack.i.l.bf16 %v6892_v8  ;;  %v3876_v30 = vsel %vm3853_vm5, %v3843_v7, %v6898_v4  ;;  %v3877_v45 = vsel %vm3853_vm5, %v3844_v50, %v6899_v0  ;;  %vm11521_vm8 = vmmov %vm11509_vm6 }
 0x404   : > { %v6907_v52 = vpop.permute.xlu1 %6906  ;;  %v3909_v46 = vsel %vm3886_vm11, %v3876_v30, %v6558_v56  ;;  %v3910_v19 = vsel %vm3886_vm11, %v3877_v45, %v6559_v41  ;;  %vm11522_vm10 = vmmov %vm11509_vm6 }
 0x405   : > { %v3874_v14 = vsel %vm3853_vm5, %v3841_v21, %v6893_v1  ;;  %v3875_v11 = vsel %vm3853_vm5, %v3842_v28, %v6894_v36  ;;  %v6909_v61 = vunpack.i.h.bf16 %v6907_v52  ;;  %v6908_v38 = vunpack.i.l.bf16 %v6907_v52  ;;  %v7305_v21 = vld [vmem:[#allocation3 + $0x138] sm:$0xff] }
 0x406   : > { %v6902_v20 = vpop.permute.xlu0 %6901  ;;  %v3907_v48 = vsel %vm3886_vm11, %v3874_v14, %v6553_v54  ;;  %v3908_v5 = vsel %vm3886_vm11, %v3875_v11, %v6554_v10  ;;  %v11516_v14 = vld [vmem:[#allocation23_spill] sm:$0xff]  ;;  %v11519_v10 = vld [vmem:[#allocation24_spill] sm:$0xff] }
 0x407   : > { %v6904_v24 = vunpack.i.h.bf16 %v6902_v20  ;;  %v6903_v43 = vunpack.i.l.bf16 %v6902_v20  ;;  %v3942_v6 = vsel %vm3919_vm14, %v3909_v46, %v6908_v38  ;;  %v3943_v60 = vsel %vm3919_vm14, %v3910_v19, %v6909_v61  ;;  %v7304_v20 = vld [vmem:[#allocation3 + $0x140] sm:$0xff] }
 0x408   : > { %v6917_v58 = vpop.permute.xlu1 %6916  ;;  %v6564_v11 = vunpack.i.h.bf16 %v11516_v14  ;;  %v6569_v54 = vunpack.i.h.bf16 %v11519_v10  ;;  %v6568_v7 = vunpack.i.l.bf16 %v11519_v10 }
 0x409   : > { %v3940_v22 = vsel %vm3919_vm14, %v3907_v48, %v6903_v43  ;;  %v3941_v62 = vsel %vm3919_vm14, %v3908_v5, %v6904_v24  ;;  %v6919_v51 = vunpack.i.h.bf16 %v6917_v58  ;;  %v6918_v32 = vunpack.i.l.bf16 %v6917_v58 }
 0x40a   : > { %v6912_v15 = vpop.permute.xlu0 %6911  ;;  %v6563_v24 = vunpack.i.l.bf16 %v11516_v14 }
 0x40b   : > { %v6914_v42 = vunpack.i.h.bf16 %v6912_v15  ;;  %v6913_v49 = vunpack.i.l.bf16 %v6912_v15  ;;  %v3750_v16 = vsel %vm455_vm4, %v7302_v47, %v6919_v51  ;;  %v3749_v63 = vsel %vm455_vm4, %v7303_v39, %v6918_v32 }
 0x40c   : > { %v6927_v29 = vpop.permute.xlu1 %6926 }
 0x40d   : > { %v3973_v44 = vsel %vm3952_vm13, %v3940_v22, %v6913_v49  ;;  %v3974_v55 = vsel %vm3952_vm13, %v3941_v62, %v6914_v42  ;;  %v6929_v23 = vunpack.i.h.bf16 %v6927_v29  ;;  %v6928_v36 = vunpack.i.l.bf16 %v6927_v29 }
 0x40e   : > { %v3995_v59 = vpack.c.bf16 %v3974_v55, %v3973_v44  ;;  %v6922_v18 = vpop.permute.xlu0 %6921 }
 0x40f   : > { %v6924_v3 = vunpack.i.h.bf16 %v6922_v18  ;;  %v6923_v34 = vunpack.i.l.bf16 %v6922_v18  ;;  %v3752_v52 = vsel %vm455_vm4, %v7304_v20, %v6929_v23  ;;  %v3751_v28 = vsel %vm455_vm4, %v7305_v21, %v6928_v36 }
 0x410   : > { %5662 = vmatprep.mubr.msk.bf16.mxu1 %vm4044_vm9, %v3995_v59  ;;  %v6937_v8 = vpop.permute.xlu1 %6936 }
 0x411   : > { %v3975_v31 = vsel %vm3952_vm13, %v3942_v6, %v6923_v34  ;;  %v3976_v2 = vsel %vm3952_vm13, %v3943_v60, %v6924_v3  ;;  %v6939_v53 = vunpack.i.h.bf16 %v6937_v8  ;;  %v6938_v27 = vunpack.i.l.bf16 %v6937_v8 }
 0x412   : > { %v3996_v33 = vpack.c.bf16 %v3976_v2, %v3975_v31  ;;  %v6932_v37 = vpop.permute.xlu0 %6931 }
 0x413   : > { %v6934_v1 = vunpack.i.h.bf16 %v6932_v37  ;;  %v6933_v17 = vunpack.i.l.bf16 %v6932_v37  ;;  %v3783_v43 = vsel %vm11517_vm0, %v3751_v28, %v6938_v27  ;;  %v3784_v12 = vsel %vm11518_vm2, %v3752_v52, %v6939_v53 }
 0x414   : > { %5663 = vmatmul.mubr.msk.bf16.gmra.mxu1 %vm4044_vm9, %v3996_v33  ;;  %v10595_v40 = vpop.permute.xlu1 %6946  ;;  %v3815_v49 = vsel %vm11521_vm8, %v3783_v43, %v6568_v7  ;;  %v3816_v22 = vsel %vm11522_vm10, %v3784_v12, %v6569_v54  ;;  %vm11528_vm8 = vmmov %vm11518_vm2 }
 0x415   : > { %v3781_v9 = vsel %vm11504_vm1, %v3749_v63, %v6933_v17  ;;  %v3782_v26 = vsel %vm11515_vm7, %v3750_v16, %v6934_v1  ;;  %v6949_v38 = vunpack.i.h.bf16 %v10595_v40  ;;  %v6948_v25 = vunpack.i.l.bf16 %v10595_v40  ;;  %vm11523_vm1 = vmmov %vm11513_vm15 }
 0x416   : > { %v6942_v57 = vpop.permute.xlu0 %6941  ;;  %v3813_v45 = vsel %vm11520_vm12, %v3781_v9, %v6563_v24  ;;  %v3814_v15 = vsel %vm11509_vm6, %v3782_v26, %v6564_v11  ;;  %vm11524_vm7 = vmmov %vm11523_vm1 }
 0x417   : > { %v6944_v50 = vunpack.i.h.bf16 %v6942_v57  ;;  %v6943_v30 = vunpack.i.l.bf16 %v6942_v57  ;;  %v3847_v51 = vsel %vm11524_vm7, %v3815_v49, %v6948_v25  ;;  %vm11525_vm0 = vmmov %vm11523_vm1  ;;  %v7306_v49 = vld [vmem:[#allocation3 + $0x158] sm:$0xff] }
 0x418   : > { %v10597_v13 = vpop.permute.xlu1 %6961  ;;  %v3848_v32 = vsel %vm11525_vm0, %v3816_v22, %v6949_v38  ;;  %v7308_v38 = vld [vmem:[#allocation3 + $0x170] sm:$0xff]  ;;  %vm11526_vm12 = vmmov %vm11518_vm2 }
 0x419   : > { %v3845_v44 = vsel %vm11513_vm15, %v3813_v45, %v6943_v30  ;;  %v3846_v55 = vsel %vm11523_vm1, %v3814_v15, %v6944_v50  ;;  %v6964_v59 = vunpack.i.h.bf16 %v10597_v13  ;;  %v6963_v18 = vunpack.i.l.bf16 %v10597_v13  ;;  %vm11527_vm6 = vmmov %vm11518_vm2 }
 0x41a   : > { %v6952_v35 = vpop.permute.xlu0 %6951  ;;  %vm11529_vm15 = vmmov %vm11522_vm10 }
 0x41b   : > { %v6954_v58 = vunpack.i.h.bf16 %v6952_v35  ;;  %v6953_v48 = vunpack.i.l.bf16 %v6952_v35  ;;  %v3880_v23 = vsel %vm3853_vm5, %v3847_v51, %v6963_v18  ;;  %v3881_v36 = vsel %vm3853_vm5, %v3848_v32, %v6964_v59  ;;  %vm11530_vm1 = vmmov %vm11522_vm10 }
 0x41c   : > { %v6967_v4 = vpop.permute.xlu1 %6966  ;;  %vm11531_vm7 = vmmov %vm11530_vm1 }
 0x41d   : > { %v3878_v29 = vsel %vm3853_vm5, %v3845_v44, %v6953_v48  ;;  %v3879_v46 = vsel %vm3853_vm5, %v3846_v55, %v6954_v58  ;;  %v6969_v19 = vunpack.i.h.bf16 %v6967_v4  ;;  %v6968_v3 = vunpack.i.l.bf16 %v6967_v4 }
 0x41e   : > { %v6957_v0 = vpop.permute.xlu0 %6956 }
 0x41f   : > { %v6959_v62 = vunpack.i.h.bf16 %v6957_v0  ;;  %v6958_v61 = vunpack.i.l.bf16 %v6957_v0  ;;  %v3913_v27 = vsel %vm3886_vm11, %v3880_v23, %v6968_v3  ;;  %v3914_v47 = vsel %vm3886_vm11, %v3881_v36, %v6969_v19 }
 0x420   : > { %v6977_v42 = vpop.permute.xlu1 %6976 }
 0x421   : > { %v3911_v60 = vsel %vm3886_vm11, %v3878_v29, %v6958_v61  ;;  %v3912_v31 = vsel %vm3886_vm11, %v3879_v46, %v6959_v62  ;;  %v6979_v57 = vunpack.i.h.bf16 %v6977_v42  ;;  %v6978_v40 = vunpack.i.l.bf16 %v6977_v42  ;;  %v7307_v62 = vld [vmem:[#allocation3 + $0x150] sm:$0xff] }
 0x422   : > { %v6972_v5 = vpop.permute.xlu0 %6971 }
 0x423   : > { %v6974_v41 = vunpack.i.h.bf16 %v6972_v5  ;;  %v6973_v56 = vunpack.i.l.bf16 %v6972_v5  ;;  %v3946_v63 = vsel %vm3919_vm14, %v3913_v27, %v6978_v40  ;;  %v3947_v0 = vsel %vm3919_vm14, %v3914_v47, %v6979_v57 }
 0x424   : > { %v6987_v6 = vpop.permute.xlu1 %6986 }
 0x425   : > { %v3944_v37 = vsel %vm3919_vm14, %v3911_v60, %v6973_v56  ;;  %v3945_v8 = vsel %vm3919_vm14, %v3912_v31, %v6974_v41  ;;  %v6989_v24 = vunpack.i.h.bf16 %v6987_v6  ;;  %v6988_v43 = vunpack.i.l.bf16 %v6987_v6  ;;  %v7309_v41 = vld [vmem:[#allocation3 + $0x168] sm:$0xff] }
 0x426   : > { %v6982_v34 = vpop.permute.xlu0 %6981 }
 0x427   : > { %v6984_v2 = vunpack.i.h.bf16 %v6982_v34  ;;  %v6983_v33 = vunpack.i.l.bf16 %v6982_v34  ;;  %v3754_v22 = vsel %vm455_vm4, %v7306_v49, %v6989_v24  ;;  %v3753_v61 = vsel %vm455_vm4, %v7307_v62, %v6988_v43  ;;  %v5678_v49 = vpop.f32.mrf.mxu0  ;;  %v10678_v62 = vld [vmem:[%s11120_s6] ss:$0 sm:$0xff] }
 0x428   : > { %v6997_v53 = vpop.permute.xlu1 %6996 }
 0x429   : > { %v3977_v35 = vsel %vm3952_vm13, %v3944_v37, %v6983_v33  ;;  %v3978_v13 = vsel %vm3952_vm13, %v3945_v8, %v6984_v2  ;;  %v6999_v12 = vunpack.i.h.bf16 %v6997_v53  ;;  %v6998_v10 = vunpack.i.l.bf16 %v6997_v53 }
 0x42a   : > { %v3997_v1 = vpack.c.bf16 %v3978_v13, %v3977_v35  ;;  %v6992_v17 = vpop.permute.xlu0 %6991 }
 0x42b   : > { %v6994_v16 = vunpack.i.h.bf16 %v6992_v17  ;;  %v6993_v39 = vunpack.i.l.bf16 %v6992_v17  ;;  %v3756_v25 = vsel %vm455_vm4, %v7308_v38, %v6999_v12  ;;  %v3755_v56 = vsel %vm455_vm4, %v7309_v41, %v6998_v10 }
 0x42c   : > { %5666 = vmatprep.mubr.msk.bf16.mxu1 %vm4044_vm9, %v3997_v1  ;;  %v7007_v28 = vpop.permute.xlu1 %7006 }
 0x42d   : > { %v3979_v4 = vsel %vm3952_vm13, %v3946_v63, %v6993_v39  ;;  %v3980_v20 = vsel %vm3952_vm13, %v3947_v0, %v6994_v16  ;;  %v7009_v50 = vunpack.i.h.bf16 %v7007_v28  ;;  %v7008_v30 = vunpack.i.l.bf16 %v7007_v28 }
 0x42e   : > { %v3998_v52 = vpack.c.bf16 %v3980_v20, %v3979_v4  ;;  %v7002_v21 = vpop.permute.xlu0 %7001 }
 0x42f   : > { %v7004_v54 = vunpack.i.h.bf16 %v7002_v21  ;;  %v7003_v7 = vunpack.i.l.bf16 %v7002_v21  ;;  %v3787_v59 = vsel %vm11527_vm6, %v3755_v56, %v7008_v30  ;;  %v3788_v18 = vsel %vm11528_vm8, %v3756_v25, %v7009_v50  ;;  %vm11534_vm6 = vmmov %vm11525_vm0 }
 0x430   : > { %5667 = vmatmul.mubr.msk.bf16.gmra.mxu1 %vm4044_vm9, %v3998_v52  ;;  %v7017_v26 = vpop.permute.xlu1 %7016 }
 0x431   : > { %v7019_v5 = vunpack.i.h.bf16 %v7017_v26  ;;  %v7018_v42 = vunpack.i.l.bf16 %v7017_v26  ;;  %v3785_v44 = vsel %vm11518_vm2, %v3753_v61, %v7003_v7  ;;  %v3786_v55 = vsel %vm11526_vm12, %v3754_v22, %v7004_v54  ;;  %vm11532_vm2 = vmmov %vm11525_vm0  ;;  %v4495_v22 = vpop.f32.mrf.mxu0  ;;  %v10683_v61 = vld [vmem:[%s11122_s8] ss:$0 sm:$0xff] }
 0x432   : > { %v7012_v9 = vpop.permute.xlu0 %7011  ;;  %vm11533_vm12 = vmmov %vm11525_vm0 }
 0x433   : > { %v7014_v58 = vunpack.i.h.bf16 %v7012_v9  ;;  %v7013_v48 = vunpack.i.l.bf16 %v7012_v9  ;;  %v3819_v2 = vsel %vm11530_vm1, %v3787_v59, %v7018_v42  ;;  %v3820_v33 = vsel %vm11531_vm7, %v3788_v18, %v7019_v5  ;;  %v5679_v41 = vpop.f32.mrf.mxu0 }
 0x434   : > { %v7027_v11 = vpop.permute.xlu1 %7026 }
 0x435   : > { %v7029_v34 = vunpack.i.h.bf16 %v7027_v11  ;;  %v7028_v6 = vunpack.i.l.bf16 %v7027_v11  ;;  %v3817_v60 = vsel %vm11522_vm10, %v3785_v44, %v7013_v48  ;;  %v3818_v31 = vsel %vm11529_vm15, %v3786_v55, %v7014_v58 }
 0x436   : > { %v7022_v14 = vpop.permute.xlu0 %7021  ;;  %v4504_v44 = vadd.f32 %v5678_v49, %v10683_v61 }
 0x437   : > { %v7024_v19 = vunpack.i.h.bf16 %v7022_v14  ;;  %v7023_v3 = vunpack.i.l.bf16 %v7022_v14  ;;  %v3851_v53 = vsel %vm11533_vm12, %v3819_v2, %v7028_v6  ;;  %v3852_v27 = vsel %vm11534_vm6, %v3820_v33, %v7029_v34  ;;  %v4498_v34 = vpop.f32.mrf.mxu0 }
 0x438   : > { %v7037_v15 = vpop.permute.xlu1 %7036 }
 0x439   : > { %v7039_v57 = vunpack.i.h.bf16 %v7037_v15  ;;  %v7038_v40 = vunpack.i.l.bf16 %v7037_v15  ;;  %v3849_v1 = vsel %vm11525_vm0, %v3817_v60, %v7023_v3  ;;  %v3850_v17 = vsel %vm11532_vm2, %v3818_v31, %v7024_v19 }
 0x43a   : > { %v7032_v45 = vpop.permute.xlu0 %7031  ;;  %v4507_v31 = vadd.f32 %v5679_v41, %v10683_v61 }
 0x43b   : > { %v7034_v37 = vunpack.i.h.bf16 %v7032_v45  ;;  %v7033_v8 = vunpack.i.l.bf16 %v7032_v45  ;;  %v3884_v20 = vsel %vm3853_vm5, %v3851_v53, %v7038_v40  ;;  %v3885_v52 = vsel %vm3853_vm5, %v3852_v27, %v7039_v57 }
 0x43c   : > { %v7047_v46 = vpop.permute.xlu1 %7046  ;;  %v4499_v57 = vadd.f32 %v10683_v61, %v4498_v34 }
 0x43d   : > { %v7049_v35 = vunpack.i.h.bf16 %v7047_v46  ;;  %v7048_v13 = vunpack.i.l.bf16 %v7047_v46  ;;  %v3882_v0 = vsel %vm3853_vm5, %v3849_v1, %v7033_v8  ;;  %v3883_v4 = vsel %vm3853_vm5, %v3850_v17, %v7034_v37 }
 0x43e   : > { %v7042_v29 = vpop.permute.xlu0 %7041 }
 0x43f   : > { %v7044_v51 = vunpack.i.h.bf16 %v7042_v29  ;;  %v7043_v32 = vunpack.i.l.bf16 %v7042_v29  ;;  %v3917_v9 = vsel %vm3886_vm11, %v3884_v20, %v7048_v13  ;;  %v3918_v26 = vsel %vm3886_vm11, %v3885_v52, %v7049_v35 }
 0x440   : > { %v7057_v36 = vpop.permute.xlu1 %7056  ;;  %v4496_v29 = vadd.f32 %v10683_v61, %v4495_v22 }
 0x441   : > { %v7059_v39 = vunpack.i.h.bf16 %v7057_v36  ;;  %v7058_v63 = vunpack.i.l.bf16 %v7057_v36  ;;  %v3915_v21 = vsel %vm3886_vm11, %v3882_v0, %v7043_v32  ;;  %v3916_v28 = vsel %vm3886_vm11, %v3883_v4, %v7044_v51  ;;  %v4752_v36 = vld [vmem:[#allocation3 + $0x1] ss:$2 sm:$0xff] }
 0x442   : > { %v7052_v23 = vpop.permute.xlu0 %7051 }
 0x443   : > { %v7054_v47 = vunpack.i.h.bf16 %v7052_v23  ;;  %v7053_v16 = vunpack.i.l.bf16 %v7052_v23  ;;  %v3950_v50 = vsel %vm3919_vm14, %v3917_v9, %v7058_v63  ;;  %v3951_v30 = vsel %vm3919_vm14, %v3918_v26, %v7059_v39  ;;  %v5682_v23 = vpop.f32.mrf.mxu0 }
 0x444   : > { %v7067_v11 = vpop.permute.xlu1 %7066  ;;  %v4520_v4 = vadd.f32 %v5682_v23, %v10683_v61 }
 0x445   : > { %v7069_v12 = vunpack.i.h.bf16 %v7067_v11  ;;  %v7068_v10 = vunpack.i.l.bf16 %v7067_v11  ;;  %v3948_v54 = vsel %vm3919_vm14, %v3915_v21, %v7053_v16  ;;  %v3949_v7 = vsel %vm3919_vm14, %v3916_v28, %v7054_v47  ;;  %v4511_v1 = vpop.f32.mrf.mxu0  ;;  %v4786_v16 = vld [vmem:[#allocation3 + $0x2] ss:$2 sm:$0xff] }
 0x446   : > { %v7062_v14 = vpop.permute.xlu0 %7061  ;;  %v4512_v28 = vadd.f32 %v10683_v61, %v4511_v1 }
 0x447   : > { %v7064_v24 = vunpack.i.h.bf16 %v7062_v14  ;;  %v7063_v43 = vunpack.i.l.bf16 %v7062_v14  ;;  %v3983_v58 = vsel %vm3952_vm13, %v3950_v50, %v7068_v10  ;;  %v3984_v48 = vsel %vm3952_vm13, %v3951_v30, %v7069_v12  ;;  %v5683_v63 = vpop.f32.mrf.mxu0 }
 0x448   : > { %v4000_v42 = vpack.c.bf16 %v3984_v48, %v3983_v58  ;;  %v4523_v10 = vadd.f32 %v5683_v63, %v10683_v61 }
 0x449   : > { %v3981_v45 = vsel %vm3952_vm13, %v3948_v54, %v7063_v43  ;;  %v3982_v15 = vsel %vm3952_vm13, %v3949_v7, %v7064_v24  ;;  %v4514_v24 = vpop.f32.mrf.mxu0 }
 0x44a   : > { %v3999_v5 = vpack.c.bf16 %v3982_v15, %v3981_v45  ;;  %v4515_v45 = vadd.f32 %v10683_v61, %v4514_v24 }
 0x44b   : > { %v5686_v49 = vpop.f32.mrf.mxu0 }
 0x44c   : > { %5670 = vmatprep.mubr.msk.bf16.mxu1 %vm4044_vm9, %v3999_v5 }
 0x44d   : > { %5671 = vmatmul.mubr.msk.bf16.gmra.mxu1 %vm4044_vm9, %v4000_v42  ;;  %v4527_v22 = vpop.f32.mrf.mxu0 }
 0x44e   : > { %v4528_v34 = vadd.f32 %v10683_v61, %v4527_v22 }
 0x468   : > { %v5644_v38 = vpop.f32.mrf.mxu1 }
 0x469   : > { %v4140_v25 = vadd.f32 %v5644_v38, %v10678_v62 }
 0x46a   : > { %v4131_v56 = vpop.f32.mrf.mxu1 }
 0x46b   : > { %vm4260_vm8 = vcmp.gt.f32.partialorder %v4140_v25, 0.0  ;;  %v4292_v55 = vmul.f32 0.2, %v4140_v25  ;;  %v4132_v59 = vadd.f32 %v10678_v62, %v4131_v56 }
 0x46c   : > { %v5645_v18 = vpop.f32.mrf.mxu1 }
 0x46d   : > { %vm4258_vm10 = vcmp.gt.f32.partialorder %v4132_v59, 0.0  ;;  %v4290_v46 = vmul.f32 0.2, %v4132_v59  ;;  %v4324_v19 = vsel %vm4260_vm8, %v4140_v25, %v4292_v55  ;;  %v4143_v3 = vadd.f32 %v5645_v18, %v10678_v62 }
 0x46e   : > { %v4624_v6 = vadd.f32 %v4504_v44, %v4324_v19  ;;  %v4134_v60 = vpop.f32.mrf.mxu1 }
 0x46f   : > { %vm4261_vm15 = vcmp.gt.f32.partialorder %v4143_v3, 0.0  ;;  %v4293_v2 = vmul.f32 0.2, %v4143_v3  ;;  %v4322_v33 = vsel %vm4258_vm10, %v4132_v59, %v4290_v46  ;;  %v4135_v37 = vadd.f32 %v10678_v62, %v4134_v60  ;;  %v5687_v59 = vpop.f32.mrf.mxu0 }
 0x470   : > { %4656 = vst.msk [vmem:[%s10693_s24 + $0x10] sm:$0xff] %vm455_vm4, %v4624_v6  ;;  %4688 = vst.msk [vmem:[#allocation3 + $0x31] sm:$0xff] %vm455_vm4, %v4624_v6  ;;  %v4622_v8 = vadd.f32 %v4496_v29, %v4322_v33  ;;  %v4536_v29 = vadd.f32 %v5686_v49, %v10683_v61 }
 0x471   : > { %vm4259_vm1 = vcmp.gt.f32.partialorder %v4135_v37, 0.0  ;;  %v4291_v40 = vmul.f32 0.2, %v4135_v37  ;;  %v4325_v51 = vsel %vm4261_vm15, %v4143_v3, %v4293_v2  ;;  %v4530_v33 = vpop.f32.mrf.mxu0 }
 0x472   : > { %4654 = vst.msk [vmem:[%s10693_s24] sm:$0xff] %vm455_vm4, %v4622_v8  ;;  %4686 = vst.msk [vmem:[#allocation3 + $0x19] sm:$0xff] %vm455_vm4, %v4622_v8  ;;  %v4625_v32 = vadd.f32 %v4507_v31, %v4325_v51  ;;  %v4531_v23 = vadd.f32 %v10683_v61, %v4530_v33 }
 0x473   : > { %v4323_v35 = vsel %vm4259_vm1, %v4135_v37, %v4291_v40  ;;  %v4539_v40 = vadd.f32 %v5687_v59, %v10683_v61 }
 0x474   : > { %4657 = vst.msk [vmem:[%s10693_s24 + $0x18] sm:$0xff] %vm455_vm4, %v4625_v32  ;;  %4689 = vst.msk [vmem:[#allocation3 + $0x39] sm:$0xff] %vm455_vm4, %v4625_v32  ;;  %v4623_v13 = vadd.f32 %v4499_v57, %v4323_v35 }
 0x476   : > { %4655 = vst.msk [vmem:[%s10693_s24 + $0x8] sm:$0xff] %vm455_vm4, %v4623_v13  ;;  %4687 = vst.msk [vmem:[#allocation3 + $0x21] sm:$0xff] %vm455_vm4, %v4623_v13 }
 0x47b   : > { %v10711_v17 = vld [vmem:[#allocation3 + $0x31] ss:$2 sm:$0xff]  ;;  %v10715_v39 = vld [vmem:[#allocation3 + $0x32] ss:$2 sm:$0xff] }
 0x47c   : > { %v5648_v53 = vpop.f32.mrf.mxu1  ;;  %v7070_v27 = vpack.i.bf16 %v10711_v17, %v4752_v36  ;;  %v7075_v9 = vpack.i.bf16 %v10715_v39, %v4786_v16  ;;  %v10739_v38 = vld [vmem:[#allocation3 + $0x30] ss:$2 sm:$0xff] }
 0x47d   : > { %v4156_v47 = vadd.f32 %v5648_v53, %v10678_v62  ;;  %v4720_v16 = vld [vmem:[#allocation3 + $0x18] ss:$2 sm:$0xff] }
 0x47e   : > { %7071 = vrot.lane.b32.xlu0 %v7070_v27, %s11223_s16  ;;  %v4147_v0 = vpop.f32.mrf.mxu1 }
 0x47f   : > { %vm4264_vm7 = vcmp.gt.f32.partialorder %v4156_v47, 0.0  ;;  %v4296_v20 = vmul.f32 0.2, %v4156_v47  ;;  %v4148_v52 = vadd.f32 %v10678_v62, %v4147_v0  ;;  %v5690_v0 = vpop.f32.mrf.mxu0 }
 0x480   : > { %v5649_v21 = vpop.f32.mrf.mxu1 }
 0x481   : > { %vm4262_vm0 = vcmp.gt.f32.partialorder %v4148_v52, 0.0  ;;  %v4294_v26 = vmul.f32 0.2, %v4148_v52  ;;  %v4328_v14 = vsel %vm4264_vm7, %v4156_v47, %v4296_v20  ;;  %v4159_v11 = vadd.f32 %v5649_v21, %v10678_v62  ;;  %v4754_v20 = vld [vmem:[#allocation3 + $0x19] ss:$2 sm:$0xff]  ;;  %v4543_v21 = vpop.f32.mrf.mxu0 }
 0x482   : > { %v4628_v43 = vadd.f32 %v4520_v4, %v4328_v14  ;;  %7076 = vrot.lane.b32.xlu0 %v7075_v9, %s11221_s30  ;;  %v4150_v12 = vpop.f32.mrf.mxu1  ;;  %v4788_v14 = vld [vmem:[#allocation3 + $0x1a] ss:$2 sm:$0xff] }
 0x483   : > { %vm4265_vm2 = vcmp.gt.f32.partialorder %v4159_v11, 0.0  ;;  %v4297_v54 = vmul.f32 0.2, %v4159_v11  ;;  %v4326_v7 = vsel %vm4262_vm0, %v4148_v52, %v4294_v26  ;;  %v4151_v50 = vadd.f32 %v10678_v62, %v4150_v12 }
 0x484   : > { %4660 = vst.msk [vmem:[%s10693_s24 + $0x30] sm:$0xff] %vm455_vm4, %v4628_v43  ;;  %4692 = vst.msk [vmem:[#allocation3 + $0x61] sm:$0xff] %vm455_vm4, %v4628_v43  ;;  %v4626_v30 = vadd.f32 %v4512_v28, %v4326_v7  ;;  %v4552_v7 = vadd.f32 %v5690_v0, %v10683_v61 }
 0x485   : > { %vm4263_vm12 = vcmp.gt.f32.partialorder %v4151_v50, 0.0  ;;  %v4295_v15 = vmul.f32 0.2, %v4151_v50  ;;  %v4329_v58 = vsel %vm4265_vm2, %v4159_v11, %v4297_v54 }
 0x486   : > { %4658 = vst.msk [vmem:[%s10693_s24 + $0x20] sm:$0xff] %vm455_vm4, %v4626_v30  ;;  %4690 = vst.msk [vmem:[#allocation3 + $0x49] sm:$0xff] %vm455_vm4, %v4626_v30  ;;  %v4629_v48 = vadd.f32 %v4523_v10, %v4329_v58  ;;  %v5691_v10 = vpop.f32.mrf.mxu0 }
 0x487   : > { %v4327_v5 = vsel %vm4263_vm12, %v4151_v50, %v4295_v15  ;;  %v4544_v15 = vadd.f32 %v10683_v61, %v4543_v21 }
 0x488   : > { %4661 = vst.msk [vmem:[%s10693_s24 + $0x38] sm:$0xff] %vm455_vm4, %v4629_v48  ;;  %4693 = vst.msk [vmem:[#allocation3 + $0x69] sm:$0xff] %vm455_vm4, %v4629_v48  ;;  %v4627_v42 = vadd.f32 %v4515_v45, %v4327_v5  ;;  %v4546_v49 = vpop.f32.mrf.mxu0 }
 0x48a   : > { %4659 = vst.msk [vmem:[%s10693_s24 + $0x28] sm:$0xff] %vm455_vm4, %v4627_v42  ;;  %4691 = vst.msk [vmem:[#allocation3 + $0x51] sm:$0xff] %vm455_vm4, %v4627_v42 }
 0x48f   : > { %v10741_v25 = vld [vmem:[#allocation3 + $0x60] ss:$2 sm:$0xff]  ;;  %v10746_v55 = vld [vmem:[#allocation3 + $0x61] ss:$2 sm:$0xff] }
 0x490   : > { %v5652_v41 = vpop.f32.mrf.mxu1  ;;  %v7080_v56 = vpack.i.bf16 %v10741_v25, %v10739_v38  ;;  %v7085_v6 = vpack.i.bf16 %v10746_v55, %v10711_v17  ;;  %v10755_v37 = vld [vmem:[#allocation3 + $0x62] ss:$2 sm:$0xff] }
 0x491   : > { %v4172_v44 = vadd.f32 %v5652_v41, %v10678_v62  ;;  %v7090_v36 = vpack.i.bf16 %v10755_v37, %v10715_v39  ;;  %v4724_v53 = vld [vmem:[#allocation3 + $0x48] ss:$2 sm:$0xff]  ;;  %v4758_v4 = vld [vmem:[#allocation3 + $0x49] ss:$2 sm:$0xff] }
 0x492   : > { %7081 = vrot.lane.b32.xlu0 %v7080_v56, %s11446_s22  ;;  %v4163_v18 = vpop.f32.mrf.mxu1  ;;  %v7095_v39 = vpack.i.bf16 %v4724_v53, %v4720_v16  ;;  %v7100_v52 = vpack.i.bf16 %v4758_v4, %v4754_v20  ;;  %v4792_v28 = vld [vmem:[#allocation3 + $0x4a] ss:$2 sm:$0xff]  ;;  %v4555_v56 = vadd.f32 %v5691_v10, %v10683_v61 }
 0x493   : > { %vm4268_vm6 = vcmp.gt.f32.partialorder %v4172_v44, 0.0  ;;  %v4300_v46 = vmul.f32 0.2, %v4172_v44  ;;  %v4164_v19 = vadd.f32 %v10678_v62, %v4163_v18  ;;  %v7105_v43 = vpack.i.bf16 %v4792_v28, %v4788_v14 }
 0x494   : > { %v5653_v3 = vpop.f32.mrf.mxu1 }
 0x495   : > { %vm4266_vm8 = vcmp.gt.f32.partialorder %v4164_v19, 0.0  ;;  %v4298_v60 = vmul.f32 0.2, %v4164_v19  ;;  %v4332_v31 = vsel %vm4268_vm6, %v4172_v44, %v4300_v46  ;;  %v4175_v2 = vadd.f32 %v5653_v3, %v10678_v62 }
 0x496   : > { %v4632_v8 = vadd.f32 %v4536_v29, %v4332_v31  ;;  %7086 = vrot.lane.b32.xlu0 %v7085_v6, %s11535_s29  ;;  %v4166_v57 = vpop.f32.mrf.mxu1  ;;  %v4547_v29 = vadd.f32 %v10683_v61, %v4546_v49 }
 0x497   : > { %vm4269_vm10 = vcmp.gt.f32.partialorder %v4175_v2, 0.0  ;;  %v4301_v51 = vmul.f32 0.2, %v4175_v2  ;;  %v4330_v32 = vsel %vm4266_vm8, %v4164_v19, %v4298_v60  ;;  %v4167_v35 = vadd.f32 %v10678_v62, %v4166_v57  ;;  %v7238_v60 = vld [vmem:[%s11123_s9 + $0x20] ss:$0 sps:$4 sm:$0xff]  }
 0x498   : > { %4664 = vst.msk [vmem:[%s10693_s24 + $0x50] sm:$0xff] %vm455_vm4, %v4632_v8  ;;  %4696 = vst.msk [vmem:[#allocation3 + $0x91] sm:$0xff] %vm455_vm4, %v4632_v8  ;;  %v4630_v13 = vadd.f32 %v4528_v34, %v4330_v32  ;;  %5736 = vmatprep.subr.msk.bf16.mxu1 %vm4093_vm3, %v7238_v60  ;;  %v5178_v31 = vsel %vm4093_vm3, %v7238_v60, 0 }
 0x499   : > { %vm4267_vm15 = vcmp.gt.f32.partialorder %v4167_v35, 0.0  ;;  %v4299_v1 = vmul.f32 0.2, %v4167_v35  ;;  %v4333_v17 = vsel %vm4269_vm10, %v4175_v2, %v4301_v51  ;;  %5709 = vmatpush3.bf16.msra.mxu1 %v5178_v31  ;;  %v5694_v2 = vpop.f32.mrf.mxu0  ;;  %v7239_v51 = vld [vmem:[%s11123_s9 + $0x18] sm:$0xff]  }
 0x49a   : > { %4662 = vst.msk [vmem:[%s10693_s24 + $0x40] sm:$0xff] %vm455_vm4, %v4630_v13  ;;  %4694 = vst.msk [vmem:[#allocation3 + $0x79] sm:$0xff] %vm455_vm4, %v4630_v13  ;;  %v4633_v27 = vadd.f32 %v4539_v40, %v4333_v17  ;;  %7091 = vrot.lane.b32.xlu0 %v7090_v36, %s11536_s13  ;;  %5710 = vmatprep.subr.bf16.mxu1 %v7239_v51  ;;  %v7240_v13 = vld [vmem:[%s11123_s9 + $0x10] sm:$0xff]  }
 0x49b   : > { %v4331_v47 = vsel %vm4267_vm15, %v4167_v35, %v4299_v1  ;;  %v4559_v35 = vpop.f32.mrf.mxu0 }
 0x49c   : > { %4665 = vst.msk [vmem:[%s10693_s24 + $0x58] sm:$0xff] %vm455_vm4, %v4633_v27  ;;  %4697 = vst.msk [vmem:[#allocation3 + $0x99] sm:$0xff] %vm455_vm4, %v4633_v27  ;;  %v4631_v63 = vadd.f32 %v4531_v23, %v4331_v47  ;;  %v4568_v47 = vadd.f32 %v5694_v2, %v10683_v61  ;;  %v4560_v4 = vadd.f32 %v10683_v61, %v4559_v35 }
 0x49d   : > { %5711 = vmatpush3.bf16.msra.mxu1 %v7239_v51  ;;  %v5695_v53 = vpop.f32.mrf.mxu0 }
 0x49e   : > { %4663 = vst.msk [vmem:[%s10693_s24 + $0x48] sm:$0xff] %vm455_vm4, %v4631_v63  ;;  %4695 = vst.msk [vmem:[#allocation3 + $0x81] sm:$0xff] %vm455_vm4, %v4631_v63  ;;  %7096 = vrot.lane.b32.xlu0 %v7095_v39, %s11464_s25  ;;  %5712 = vmatprep.subr.bf16.mxu1 %v7240_v13 }
 0x4a1   : > { %5713 = vmatpush3.bf16.msra.mxu1 %v7240_v13 }
 0x4a2   : > { %7101 = vrot.lane.b32.xlu0 %v7100_v52, %s11537_s12 }
 0x4a3   : > { %v10778_v26 = vld [vmem:[#allocation3 + $0x91] ss:$2 sm:$0xff]  ;;  %v4798_v12 = vld [vmem:[#allocation3 + $0x92] ss:$2 sm:$0xff] }
 0x4a4   : > { %v5656_v9 = vpop.f32.mrf.mxu1  ;;  %v7110_v24 = vpack.i.bf16 %v10778_v26, %v10746_v55  ;;  %v7115_v58 = vpack.i.bf16 %v4798_v12, %v10755_v37  ;;  %v10811_v33 = vld [vmem:[#allocation3 + $0x90] ss:$2 sm:$0xff] }
 0x4a5   : > { %v4188_v11 = vadd.f32 %v5656_v9, %v10678_v62  ;;  %v4728_v39 = vld [vmem:[#allocation3 + $0x78] ss:$2 sm:$0xff]  ;;  %v4562_v9 = vpop.f32.mrf.mxu0 }
 0x4a6   : > { %v4179_v54 = vpop.f32.mrf.mxu1  ;;  %7111 = vrot.lane.b32.xlu1 %v7110_v24, %s11223_s16  ;;  %7106 = vrot.lane.b32.xlu0 %v7105_v43, %s11538_s15  ;;  %v4571_v24 = vadd.f32 %v5695_v53, %v10683_v61  ;;  %v4762_v43 = vld [vmem:[#allocation3 + $0x79] ss:$2 sm:$0xff]  ;;  %s11540_s16 = smov 16  }
 0x4a7   : > { %vm4272_vm1 = vcmp.gt.f32.partialorder %v4188_v11, 0.0  ;;  %v4304_v50 = vmul.f32 0.2, %v4188_v11  ;;  %v4180_v30 = vadd.f32 %v10678_v62, %v4179_v54 }
 0x4a8   : > { %v5657_v45 = vpop.f32.mrf.mxu1 }
 0x4a9   : > { %vm4270_vm7 = vcmp.gt.f32.partialorder %v4180_v30, 0.0  ;;  %v4302_v48 = vmul.f32 0.2, %v4180_v30  ;;  %v4336_v5 = vsel %vm4272_vm1, %v4188_v11, %v4304_v50  ;;  %v4191_v42 = vadd.f32 %v5657_v45, %v10678_v62  ;;  %v7242_v50 = vld [vmem:[%s11123_s9] sm:$0xff]  }
 0x4aa   : > { %v4636_v22 = vadd.f32 %v4552_v7, %v4336_v5  ;;  %v4182_v41 = vpop.f32.mrf.mxu1  ;;  %7116 = vrot.lane.b32.xlu1 %v7115_v58, %s11221_s30  ;;  %v7241_v7 = vld [vmem:[%s11123_s9 + $0x8] sm:$0xff]   ;;  %v4563_v45 = vadd.f32 %v10683_v61, %v4562_v9 }
 0x4ab   : > { %vm4273_vm0 = vcmp.gt.f32.partialorder %v4191_v42, 0.0  ;;  %v4305_v44 = vmul.f32 0.2, %v4191_v42  ;;  %v4334_v55 = vsel %vm4270_vm7, %v4180_v30, %v4302_v48  ;;  %v4183_v59 = vadd.f32 %v10678_v62, %v4182_v41  ;;  %5714 = vmatprep.subr.bf16.mxu1 %v7241_v7 }
 0x4ac   : > { %4668 = vst.msk [vmem:[%s10693_s24 + $0x70] sm:$0xff] %vm455_vm4, %v4636_v22  ;;  %4700 = vst.msk [vmem:[#allocation3 + $0xc1] sm:$0xff] %vm455_vm4, %v4636_v22  ;;  %v4634_v18 = vadd.f32 %v4544_v15, %v4334_v55  ;;  %5715 = vmatpush3.bf16.msra.mxu1 %v7241_v7  ;;  %v4796_v22 = vld [vmem:[#allocation3 + $0x7a] ss:$2 sm:$0xff] }
 0x4ad   : > { %vm4271_vm2 = vcmp.gt.f32.partialorder %v4183_v59, 0.0  ;;  %v4303_v46 = vmul.f32 0.2, %v4183_v59  ;;  %v4337_v19 = vsel %vm4273_vm0, %v4191_v42, %v4305_v44  ;;  %5716 = vmatprep.subr.bf16.mxu1 %v7242_v50  ;;  %v5698_v44 = vpop.f32.mrf.mxu0 }
 0x4ae   : > { %4666 = vst.msk [vmem:[%s10693_s24 + $0x60] sm:$0xff] %vm455_vm4, %v4634_v18  ;;  %4698 = vst.msk [vmem:[#allocation3 + $0xa9] sm:$0xff] %vm455_vm4, %v4634_v18  ;;  %v4637_v3 = vadd.f32 %v4555_v56, %v4337_v19  ;;  %v4584_v60 = vadd.f32 %v5698_v44, %v10683_v61 }
 0x4af   : > { %v4335_v34 = vsel %vm4271_vm2, %v4183_v59, %v4303_v46  ;;  %v4575_v46 = vpop.f32.mrf.mxu0 }
 0x4b0   : > { %4669 = vst.msk [vmem:[%s10693_s24 + $0x78] sm:$0xff] %vm455_vm4, %v4637_v3  ;;  %4701 = vst.msk [vmem:[#allocation3 + $0xc9] sm:$0xff] %vm455_vm4, %v4637_v3  ;;  %v4635_v6 = vadd.f32 %v4547_v29, %v4335_v34  ;;  %5717 = vmatpush3.bf16.msra.mxu1 %v7242_v50 }
 0x4b1   : > { %v5699_v34 = vpop.f32.mrf.mxu0 }
 0x4b2   : > { %4667 = vst.msk [vmem:[%s10693_s24 + $0x68] sm:$0xff] %vm455_vm4, %v4635_v6  ;;  %4699 = vst.msk [vmem:[#allocation3 + $0xb1] sm:$0xff] %vm455_vm4, %v4635_v6 }
 0x4b3   : > { %v4578_v35 = vpop.f32.mrf.mxu0 }
 0x4b5   : > { %v5702_v9 = vpop.f32.mrf.mxu0 }
 0x4b7   : > { %v10813_v37 = vld [vmem:[#allocation3 + $0xc0] ss:$2 sm:$0xff]  ;;  %v10823_v32 = vld [vmem:[#allocation3 + $0xc1] ss:$2 sm:$0xff] }
 0x4b8   : > { %v10815_v8 = vld [vmem:[#allocation3 + $0xc2] ss:$2 sm:$0xff]  ;;  %v7120_v57 = vpack.i.bf16 %v10813_v37, %v10811_v33  ;;  %v7125_v36 = vpack.i.bf16 %v10823_v32, %v10778_v26 }
 0x4b9   : > { %v7130_v40 = vpack.i.bf16 %v10815_v8, %v4798_v12  ;;  %v4732_v17 = vld [vmem:[#allocation3 + $0xa8] ss:$2 sm:$0xff]  ;;  %v4766_v26 = vld [vmem:[#allocation3 + $0xa9] ss:$2 sm:$0xff] }
 0x4ba   : > { %7121 = vrot.lane.b32.xlu1 %v7120_v57, %s11446_s22  ;;  %v7135_v20 = vpack.i.bf16 %v4732_v17, %v4728_v39  ;;  %v7140_v15 = vpack.i.bf16 %v4766_v26, %v4762_v43  ;;  %v4800_v5 = vld [vmem:[#allocation3 + $0xaa] ss:$2 sm:$0xff] }
 0x4bb   : > { %7131 = vrot.lane.b32.xlu0 %v7130_v40, %s11536_s13  ;;  %v7145_v56 = vpack.i.bf16 %v4800_v5, %v4796_v22 }
 0x4bc   : > { %v5660_v23 = vpop.f32.mrf.mxu1 }
 0x4bd   : > { %v4204_v1 = vadd.f32 %v5660_v23, %v10678_v62 }
 0x4be   : > { %7126 = vrot.lane.b32.xlu1 %v7125_v36, %s11535_s29  ;;  %v4195_v27 = vpop.f32.mrf.mxu1  ;;  %v4587_v36 = vadd.f32 %v5699_v34, %v10683_v61 }
 0x4bf   : > { %vm4276_vm3 = vcmp.gt.f32.partialorder %v4204_v1, 0.0  ;;  %v4308_v16 = vmul.f32 0.2, %v4204_v1  ;;  %v4196_v63 = vadd.f32 %v10678_v62, %v4195_v27 }
 0x4c0   : > { %v5661_v0 = vpop.f32.mrf.mxu1 }
 0x4c1   : > { %vm4274_vm12 = vcmp.gt.f32.partialorder %v4196_v63, 0.0  ;;  %v4306_v52 = vmul.f32 0.2, %v4196_v63  ;;  %v4340_v21 = vsel %vm4276_vm3, %v4204_v1, %v4308_v16  ;;  %v4207_v28 = vadd.f32 %v5661_v0, %v10678_v62 }
 0x4c2   : > { %v4640_v14 = vadd.f32 %v4568_v47, %v4340_v21  ;;  %v4198_v11 = vpop.f32.mrf.mxu1  ;;  %7136 = vrot.lane.b32.xlu1 %v7135_v20, %s11464_s25  ;;  %v4579_v47 = vadd.f32 %v10683_v61, %v4578_v35 }
 0x4c3   : > { %vm4277_vm6 = vcmp.gt.f32.partialorder %v4207_v28, 0.0  ;;  %v4309_v12 = vmul.f32 0.2, %v4207_v28  ;;  %v4338_v10 = vsel %vm4274_vm12, %v4196_v63, %v4306_v52  ;;  %v4199_v54 = vadd.f32 %v10678_v62, %v4198_v11  ;;  %v4591_v11 = vpop.f32.mrf.mxu0 }
 0x4c4   : > { %4672 = vst.msk [vmem:[%s10693_s24 + $0x90] sm:$0xff] %vm455_vm4, %v4640_v14  ;;  %4704 = vst.msk [vmem:[#allocation3 + $0xf1] sm:$0xff] %vm455_vm4, %v4640_v14  ;;  %v4638_v30 = vadd.f32 %v4560_v4, %v4338_v10  ;;  %v4592_v5 = vadd.f32 %v10683_v61, %v4591_v11 }
 0x4c5   : > { %vm4275_vm8 = vcmp.gt.f32.partialorder %v4199_v54, 0.0  ;;  %v4307_v58 = vmul.f32 0.2, %v4199_v54  ;;  %v4341_v48 = vsel %vm4277_vm6, %v4207_v28, %v4309_v12  ;;  %v5703_v7 = vpop.f32.mrf.mxu0 }
 0x4c6   : > { %4670 = vst.msk [vmem:[%s10693_s24 + $0x80] sm:$0xff] %vm455_vm4, %v4638_v30  ;;  %4702 = vst.msk [vmem:[#allocation3 + $0xd9] sm:$0xff] %vm455_vm4, %v4638_v30  ;;  %v4641_v42 = vadd.f32 %v4571_v24, %v4341_v48  ;;  %7141 = vrot.lane.b32.xlu1 %v7140_v15, %s11537_s12  ;;  %v4600_v30 = vadd.f32 %v5702_v9, %v10683_v61 }
 0x4c7   : > { %v4339_v49 = vsel %vm4275_vm8, %v4199_v54, %v4307_v58 }
 0x4c8   : > { %4673 = vst.msk [vmem:[%s10693_s24 + $0x98] sm:$0xff] %vm455_vm4, %v4641_v42  ;;  %4705 = vst.msk [vmem:[#allocation3 + $0xf9] sm:$0xff] %vm455_vm4, %v4641_v42  ;;  %v4639_v41 = vadd.f32 %v4563_v45, %v4339_v49 }
 0x4ca   : > { %4671 = vst.msk [vmem:[%s10693_s24 + $0x88] sm:$0xff] %vm455_vm4, %v4639_v41  ;;  %4703 = vst.msk [vmem:[#allocation3 + $0xe1] sm:$0xff] %vm455_vm4, %v4639_v41  ;;  %7146 = vrot.lane.b32.xlu1 %v7145_v56, %s11538_s15  ;;  %v4594_v56 = vpop.f32.mrf.mxu0 }
 0x4cf   : > { %v4772_v55 = vld [vmem:[#allocation3 + $0xf1] ss:$2 sm:$0xff]  ;;  %v10862_v59 = vld [vmem:[#allocation3 + $0xf2] ss:$2 sm:$0xff] }
 0x4d0   : > { %v7150_v18 = vpack.i.bf16 %v4772_v55, %v10823_v32  ;;  %v7155_v29 = vpack.i.bf16 %v10862_v59, %v10815_v8  ;;  %v4576_v8 = vadd.f32 %v10683_v61, %v4575_v46  ;;  %v10889_v20 = vld [vmem:[#allocation3 + $0xf0] ss:$2 sm:$0xff] }
 0x4d1   : > { %v4736_v24 = vld [vmem:[#allocation3 + $0xd8] ss:$2 sm:$0xff]  ;;  %v4770_v58 = vld [vmem:[#allocation3 + $0xd9] ss:$2 sm:$0xff] }
 0x4d2   : > { %7151 = vrot.lane.b32.xlu1 %v7150_v18, %s11539_s0  ;;  %7156 = vrot.lane.b32.xlu0 %v7155_v29, %s11540_s16  ;;  %v4603_v29 = vadd.f32 %v5703_v7, %v10683_v61  ;;  %v4804_v34 = vld [vmem:[#allocation3 + $0xda] ss:$2 sm:$0xff] }
 0x4d4   : > { %v5664_v19 = vpop.f32.mrf.mxu1 }
 0x4d5   : > { %v4220_v3 = vadd.f32 %v5664_v19, %v10678_v62 }
 0x4d6   : > { %v4211_v6 = vpop.f32.mrf.mxu1 }
 0x4d7   : > { %vm4280_vm10 = vcmp.gt.f32.partialorder %v4220_v3, 0.0  ;;  %v4312_v31 = vmul.f32 0.2, %v4220_v3  ;;  %v4212_v2 = vadd.f32 %v10678_v62, %v4211_v6 }
 0x4d8   : > { %v5665_v57 = vpop.f32.mrf.mxu1 }
 0x4d9   : > { %vm4278_vm15 = vcmp.gt.f32.partialorder %v4212_v2, 0.0  ;;  %v4310_v40 = vmul.f32 0.2, %v4212_v2  ;;  %v4344_v51 = vsel %vm4280_vm10, %v4220_v3, %v4312_v31  ;;  %v4223_v32 = vadd.f32 %v5665_v57, %v10678_v62 }
 0x4da   : > { %v4644_v13 = vadd.f32 %v4584_v60, %v4344_v51  ;;  %v4214_v23 = vpop.f32.mrf.mxu1  ;;  %v4595_v60 = vadd.f32 %v10683_v61, %v4594_v56 }
 0x4db   : > { %vm4281_vm1 = vcmp.gt.f32.partialorder %v4223_v32, 0.0  ;;  %v4313_v1 = vmul.f32 0.2, %v4223_v32  ;;  %v4342_v17 = vsel %vm4278_vm15, %v4212_v2, %v4310_v40  ;;  %v4215_v53 = vadd.f32 %v10678_v62, %v4214_v23 }
 0x4dc   : > { %4676 = vst.msk [vmem:[%s10693_s24 + $0xb0] sm:$0xff] %vm455_vm4, %v4644_v13  ;;  %4708 = vst.msk [vmem:[#allocation3 + $0x121] sm:$0xff] %vm455_vm4, %v4644_v13  ;;  %v4642_v27 = vadd.f32 %v4576_v8, %v4342_v17 }
 0x4dd   : > { %vm4279_vm7 = vcmp.gt.f32.partialorder %v4215_v53, 0.0  ;;  %v4311_v16 = vmul.f32 0.2, %v4215_v53  ;;  %v4345_v63 = vsel %vm4281_vm1, %v4223_v32, %v4313_v1  ;;  %vm11541_vm1 = vcmask 130048  }
 0x4de   : > { %4674 = vst.msk [vmem:[%s10693_s24 + $0xa0] sm:$0xff] %vm455_vm4, %v4642_v27  ;;  %4706 = vst.msk [vmem:[#allocation3 + $0x109] sm:$0xff] %vm455_vm4, %v4642_v27  ;;  %v4645_v39 = vadd.f32 %v4587_v36, %v4345_v63  ;;  %v5706_v27 = vpop.f32.mrf.mxu0 }
 0x4df   : > { %v4343_v0 = vsel %vm4279_vm7, %v4215_v53, %v4311_v16  ;;  %vm11542_vm7 = vmmov %vm11541_vm1 }
 0x4e0   : > { %4677 = vst.msk [vmem:[%s10693_s24 + $0xb8] sm:$0xff] %vm455_vm4, %v4645_v39  ;;  %4709 = vst.msk [vmem:[#allocation3 + $0x129] sm:$0xff] %vm455_vm4, %v4645_v39  ;;  %v4643_v4 = vadd.f32 %v4579_v47, %v4343_v0  ;;  %v4607_v16 = vpop.f32.mrf.mxu0 }
 0x4e2   : > { %4675 = vst.msk [vmem:[%s10693_s24 + $0xa8] sm:$0xff] %vm455_vm4, %v4643_v4  ;;  %4707 = vst.msk [vmem:[#allocation3 + $0x111] sm:$0xff] %vm455_vm4, %v4643_v4  ;;  %v4616_v4 = vadd.f32 %v5706_v27, %v10683_v61  ;;  %v5707_v9 = vpop.f32.mrf.mxu0 }
 0x4e3   : > { %v4619_v7 = vadd.f32 %v5707_v9, %v10683_v61 }
 0x4e7   : > { %v10891_v52 = vld [vmem:[#allocation3 + $0x120] ss:$2 sm:$0xff]  ;;  %v10895_v28 = vld [vmem:[#allocation3 + $0x121] ss:$2 sm:$0xff] }
 0x4e8   : > { %v7160_v21 = vpack.i.bf16 %v10891_v52, %v10889_v20  ;;  %v7165_v26 = vpack.i.bf16 %v10895_v28, %v4772_v55  ;;  %v4810_v8 = vld [vmem:[#allocation3 + $0x122] ss:$2 sm:$0xff] }
 0x4e9   : > { %v4740_v14 = vld [vmem:[#allocation3 + $0x108] ss:$2 sm:$0xff]  ;;  %v4774_v54 = vld [vmem:[#allocation3 + $0x109] ss:$2 sm:$0xff]  ;;  %v7220_v13 = vpack.i.bf16 %v4810_v8, %v10862_v59 }
 0x4ea   : > { %7161 = vrot.lane.b32.xlu0 %v7160_v21, %s11446_s22  ;;  %v7170_v12 = vpack.i.bf16 %v4740_v14, %v4736_v24  ;;  %v7175_v42 = vpack.i.bf16 %v4774_v54, %v4770_v58  ;;  %v4808_v44 = vld [vmem:[#allocation3 + $0x10a] ss:$2 sm:$0xff]  ;;  %v4608_v24 = vadd.f32 %v10683_v61, %v4607_v16 }
 0x4eb   : > { %v7180_v31 = vpack.i.bf16 %v4808_v44, %v4804_v34 }
 0x4ee   : > { %7166 = vrot.lane.b32.xlu0 %v7165_v26, %s11535_s29 }
 0x4f0   : > { %v5668_v43 = vpop.f32.mrf.mxu1  ;;  %v10917_v51 = vpop.permute.xlu0 %7071 }
 0x4f1   : > { %v4236_v10 = vadd.f32 %v5668_v43, %v10678_v62 }
 0x4f2   : > { %v4227_v50 = vpop.f32.mrf.mxu1  ;;  %7171 = vrot.lane.b32.xlu0 %v7170_v12, %s11464_s25 }
 0x4f3   : > { %vm4284_vm0 = vcmp.gt.f32.partialorder %v4236_v10, 0.0  ;;  %v4316_v45 = vmul.f32 0.2, %v4236_v10  ;;  %v4228_v15 = vadd.f32 %v10678_v62, %v4227_v50 }
 0x4f4   : > { %v5669_v48 = vpop.f32.mrf.mxu1  ;;  %v7077_v23 = vpop.permute.xlu0 %7076 }
 0x4f5   : > { %vm4282_vm2 = vcmp.gt.f32.partialorder %v4228_v15, 0.0  ;;  %v4314_v49 = vmul.f32 0.2, %v4228_v15  ;;  %v4348_v22 = vsel %vm4284_vm0, %v4236_v10, %v4316_v45  ;;  %v4239_v41 = vadd.f32 %v5669_v48, %v10678_v62  ;;  %v4610_v48 = vpop.f32.mrf.mxu0 }
 0x4f6   : > { %v4648_v55 = vadd.f32 %v4600_v30, %v4348_v22  ;;  %v4230_v18 = vpop.f32.mrf.mxu1  ;;  %7176 = vrot.lane.b32.xlu0 %v7175_v42, %s11537_s12  ;;  %v7074_v10 = vunpack.i.h.bf16 %v10917_v51  ;;  %v7073_v45 = vunpack.i.l.bf16 %v10917_v51  ;;  %v4718_v42 = vld [vmem:[#allocation3] ss:$2 sm:$0xff]  ;;  %vm11543_vm0 = vcmask 195584  }
 0x4f7   : > { %vm4285_vm3 = vcmp.gt.f32.partialorder %v4239_v41, 0.0  ;;  %v4317_v46 = vmul.f32 0.2, %v4239_v41  ;;  %v4346_v19 = vsel %vm4282_vm2, %v4228_v15, %v4314_v49  ;;  %v4231_v3 = vadd.f32 %v10678_v62, %v4230_v18  ;;  %vm11544_vm2 = vmmov %vm11543_vm0 }
 0x4f8   : > { %4680 = vst.msk [vmem:[%s10693_s24 + $0xd0] sm:$0xff] %vm455_vm4, %v4648_v55  ;;  %4712 = vst.msk [vmem:[#allocation3 + $0x151] sm:$0xff] %vm455_vm4, %v4648_v55  ;;  %v4646_v6 = vadd.f32 %v4592_v5, %v4346_v19  ;;  %v7079_v15 = vunpack.i.h.bf16 %v7077_v23  ;;  %v7078_v49 = vunpack.i.l.bf16 %v7077_v23  ;;  %v5062_v34 = vsel %vm455_vm4, %v10739_v38, %v7074_v10 }
 0x4f9   : > { %vm4283_vm12 = vcmp.gt.f32.partialorder %v4231_v3, 0.0  ;;  %v4315_v2 = vmul.f32 0.2, %v4231_v3  ;;  %v4349_v57 = vsel %vm4285_vm3, %v4239_v41, %v4317_v46  ;;  %vm11545_vm3 = vcmask 261120  }
 0x4fa   : > { %4678 = vst.msk [vmem:[%s10693_s24 + $0xc0] sm:$0xff] %vm455_vm4, %v4646_v6  ;;  %4710 = vst.msk [vmem:[#allocation3 + $0x139] sm:$0xff] %vm455_vm4, %v4646_v6  ;;  %v4649_v40 = vadd.f32 %v4603_v29, %v4349_v57  ;;  %7181 = vrot.lane.b32.xlu0 %v7180_v31, %s11538_s15 }
 0x4fb   : > { %v4347_v32 = vsel %vm4283_vm12, %v4231_v3, %v4315_v2  ;;  %v5061_v3 = vsel %vm455_vm4, %v4718_v42, %v7073_v45  ;;  %v5070_v2 = vsel %vm11542_vm7, %v5062_v34, %v7079_v15  ;;  %vm11546_vm12 = vmmov %vm11545_vm3 }
 0x4fc   : > { %4681 = vst.msk [vmem:[%s10693_s24 + $0xd8] sm:$0xff] %vm455_vm4, %v4649_v40  ;;  %4713 = vst.msk [vmem:[#allocation3 + $0x159] sm:$0xff] %vm455_vm4, %v4649_v40  ;;  %v4647_v35 = vadd.f32 %v4595_v60, %v4347_v32  ;;  %v5069_v31 = vsel %vm11541_vm1, %v5061_v3, %v7078_v49 }
 0x4fe   : > { %4679 = vst.msk [vmem:[%s10693_s24 + $0xc8] sm:$0xff] %vm455_vm4, %v4647_v35  ;;  %4711 = vst.msk [vmem:[#allocation3 + $0x141] sm:$0xff] %vm455_vm4, %v4647_v35  ;;  %7221 = vrot.lane.b32.xlu0 %v7220_v13, %s11536_s13 }
 0x503   : > { %v10927_v36 = vld [vmem:[#allocation3 + $0x151] ss:$2 sm:$0xff]  ;;  %v10933_v53 = vld [vmem:[#allocation3 + $0x152] ss:$2 sm:$0xff] }
 0x504   : > { %v7185_v1 = vpack.i.bf16 %v10927_v36, %v10895_v28  ;;  %v10931_v17 = vpop.permute.xlu0 %7081  ;;  %v7190_v59 = vpack.i.bf16 %v10933_v53, %v4810_v8 }
 0x505   : > { %v7084_v38 = vunpack.i.h.bf16 %v10931_v17  ;;  %v7083_v35 = vunpack.i.l.bf16 %v10931_v17  ;;  %v4778_v15 = vld [vmem:[#allocation3 + $0x139] ss:$2 sm:$0xff]  ;;  %v4812_v42 = vld [vmem:[#allocation3 + $0x13a] ss:$2 sm:$0xff] }
 0x506   : > { %7186 = vrot.lane.b32.xlu1 %v7185_v1, %s11539_s0 }
 0x508   : > { %v10937_v47 = vpop.permute.xlu0 %7086 }
 0x509   : > { %v7089_v1 = vunpack.i.h.bf16 %v10937_v47  ;;  %v7088_v27 = vunpack.i.l.bf16 %v10937_v47 }
 0x50a   : > { %7191 = vrot.lane.b32.xlu1 %v7190_v59, %s11540_s16  ;;  %s7385_s16 = smov [#allocation4]  }
 0x50c   : > { %v10940_v63 = vpop.permute.xlu0 %7091 }
 0x50d   : > { %v5672_v39 = vpop.f32.mrf.mxu1  ;;  %v7093_v17 = vunpack.i.l.bf16 %v10940_v63 }
 0x50e   : > { %v4252_v0 = vadd.f32 %v5672_v39, %v10678_v62  ;;  %v7094_v39 = vunpack.i.h.bf16 %v10940_v63 }
 0x50f   : > { %v4243_v21 = vpop.f32.mrf.mxu1 }
 0x510   : > { %vm4288_vm6 = vcmp.gt.f32.partialorder %v4252_v0, 0.0  ;;  %v4320_v28 = vmul.f32 0.2, %v4252_v0  ;;  %v4244_v26 = vadd.f32 %v10678_v62, %v4243_v21  ;;  %v7097_v14 = vpop.permute.xlu0 %7096 }
 0x511   : > { %v5673_v11 = vpop.f32.mrf.mxu1  ;;  %v7099_v44 = vunpack.i.h.bf16 %v7097_v14  ;;  %v7098_v55 = vunpack.i.l.bf16 %v7097_v14  ;;  %v10987_v14 = vld [vmem:[#allocation3 + $0x150] ss:$2 sm:$0xff] }
 0x512   : > { %v4352_v43 = vsel %vm4288_vm6, %v4252_v0, %v4320_v28  ;;  %vm4286_vm8 = vcmp.gt.f32.partialorder %v4244_v26, 0.0  ;;  %v4318_v12 = vmul.f32 0.2, %v4244_v26  ;;  %v4255_v50 = vadd.f32 %v5673_v11, %v10678_v62  ;;  %vm11547_vm6 = vmmov %vm11541_vm1 }
 0x513   : > { %v4652_v54 = vadd.f32 %v4616_v4, %v4352_v43  ;;  %v4246_v30 = vpop.f32.mrf.mxu1  ;;  %v5078_v40 = vsel %vm11543_vm0, %v5070_v2, %v7099_v44 }
 0x514   : > { %v4350_v58 = vsel %vm4286_vm8, %v4244_v26, %v4318_v12  ;;  %v4247_v5 = vadd.f32 %v10678_v62, %v4246_v30  ;;  %vm4289_vm10 = vcmp.gt.f32.partialorder %v4255_v50, 0.0  ;;  %v4321_v41 = vmul.f32 0.2, %v4255_v50  ;;  %v7102_v56 = vpop.permute.xlu0 %7101  ;;  %vm11548_vm8 = vmmov %vm11541_vm1 }
 0x515   : > { %4684 = vst.msk [vmem:[%s10693_s24 + $0xf0] sm:$0xff] %vm455_vm4, %v4652_v54  ;;  %4716 = vst.msk [vmem:[#allocation3 + $0x181] sm:$0xff] %vm455_vm4, %v4652_v54  ;;  %v4650_v22 = vadd.f32 %v4608_v24, %v4350_v58  ;;  %v4611_v62 = vadd.f32 %v10683_v61, %v4610_v48  ;;  %v7104_v46 = vunpack.i.h.bf16 %v7102_v56  ;;  %v7103_v19 = vunpack.i.l.bf16 %v7102_v56 }
 0x516   : > { %vm4287_vm15 = vcmp.gt.f32.partialorder %v4247_v5, 0.0  ;;  %v4319_v18 = vmul.f32 0.2, %v4247_v5  ;;  %v4353_v29 = vsel %vm4289_vm10, %v4255_v50, %v4321_v41  ;;  %v5077_v61 = vsel %vm11544_vm2, %v5069_v31, %v7098_v55  ;;  %vm11549_vm10 = vmmov %vm11543_vm0 }
 0x517   : > { %4682 = vst.msk [vmem:[%s10693_s24 + $0xe0] sm:$0xff] %vm455_vm4, %v4650_v22  ;;  %4714 = vst.msk [vmem:[#allocation3 + $0x169] sm:$0xff] %vm455_vm4, %v4650_v22  ;;  %v4653_v6 = vadd.f32 %v4619_v7, %v4353_v29  ;;  %v5085_v13 = vsel %vm11545_vm3, %v5077_v61, %v7103_v19  ;;  %v5086_v23 = vsel %vm11546_vm12, %v5078_v40, %v7104_v46  ;;  %v4744_v7 = vld [vmem:[#allocation3 + $0x138] ss:$2 sm:$0xff] }
 0x518   : > { %v4351_v60 = vsel %vm4287_vm15, %v4247_v5, %v4319_v18  ;;  %v7107_v8 = vpop.permute.xlu0 %7106  ;;  %v7112_v24 = vpop.permute.xlu1 %7111  ;;  %vm11550_vm15 = vmmov %vm11543_vm0 }
 0x519   : > { %v4651_v57 = vadd.f32 %v4611_v62, %v4351_v60  ;;  %4685 = vst.msk [vmem:[%s10693_s24 + $0xf8] sm:$0xff] %vm455_vm4, %v4653_v6  ;;  %4717 = vst.msk [vmem:[#allocation3 + $0x189] sm:$0xff] %vm455_vm4, %v4653_v6  ;;  %v7109_v51 = vunpack.i.h.bf16 %v7107_v8  ;;  %v7108_v32 = vunpack.i.l.bf16 %v7107_v8  ;;  %v7114_v56 = vunpack.i.h.bf16 %v7112_v24 }
 0x51a   : > { %v7113_v44 = vunpack.i.l.bf16 %v7112_v24  ;;  %vm11551_vm1 = vmmov %vm11545_vm3 }
 0x51b   : > { %4683 = vst.msk [vmem:[%s10693_s24 + $0xe8] sm:$0xff] %vm455_vm4, %v4651_v57  ;;  %4715 = vst.msk [vmem:[#allocation3 + $0x171] sm:$0xff] %vm455_vm4, %v4651_v57  ;;  %v5093_v59 = vsel %vm3853_vm5, %v5085_v13, %v7108_v32  ;;  %v5094_v16 = vsel %vm3853_vm5, %v5086_v23, %v7109_v51  ;;  %v5064_v6 = vsel %vm455_vm4, %v10811_v33, %v7114_v56 }
 0x51c   : > { %v5101_v0 = vsel %vm3886_vm11, %v5093_v59, %v7083_v35  ;;  %v5102_v4 = vsel %vm3886_vm11, %v5094_v16, %v7084_v38  ;;  %v7117_v54 = vpop.permute.xlu1 %7116  ;;  %v5063_v34 = vsel %vm455_vm4, %v10741_v25, %v7113_v44  ;;  %vm11552_vm7 = vmmov %vm11551_vm1 }
 0x51d   : > { %v5109_v21 = vsel %vm3919_vm14, %v5101_v0, %v7088_v27  ;;  %v5110_v28 = vsel %vm3919_vm14, %v5102_v4, %v7089_v1  ;;  %v7119_v55 = vunpack.i.h.bf16 %v7117_v54  ;;  %v7118_v18 = vunpack.i.l.bf16 %v7117_v54  ;;  %vm11553_vm0 = vmmov %vm11547_vm6 }
 0x51e   : > { %v5117_v9 = vsel %vm3952_vm13, %v5109_v21, %v7093_v17  ;;  %v5118_v47 = vsel %vm3952_vm13, %v5110_v28, %v7094_v39  ;;  %vm11554_vm2 = vmmov %vm11553_vm0 }
 0x51f   : > { %v5125_v26 = vpack.c.bf16 %v5118_v47, %v5117_v9  ;;  %v5071_v60 = vsel %vm11547_vm6, %v5063_v34, %v7118_v18  ;;  %vm11555_vm3 = vmmov %vm11549_vm10 }
 0x520   : > { %v4750_v11 = vld [vmem:[#allocation3 + $0x180] ss:$2 sm:$0xff]  ;;  %v4784_v43 = vld [vmem:[#allocation3 + $0x181] ss:$2 sm:$0xff]  ;;  %vm11556_vm12 = vmmov %vm11555_vm3 }
 0x521   : > { %5718 = vmatprep.mubr.msk.bf16.mxu1 %vm4044_vm9, %v5125_v26  ;;  %v7195_v63 = vpack.i.bf16 %v4750_v11, %v10987_v14  ;;  %v7200_v12 = vpack.i.bf16 %v4784_v43, %v10927_v36  ;;  %v4818_v22 = vld [vmem:[#allocation3 + $0x182] ss:$2 sm:$0xff]  ;;  %vm11557_vm6 = vmmov %vm11551_vm1 }
 0x522   : > { %v4748_v10 = vld [vmem:[#allocation3 + $0x168] ss:$2 sm:$0xff]  ;;  %v4782_v30 = vld [vmem:[#allocation3 + $0x169] ss:$2 sm:$0xff]  ;;  %v7225_v41 = vpack.i.bf16 %v4818_v22, %v10933_v53  ;;  %v5072_v53 = vsel %vm11548_vm8, %v5064_v6, %v7119_v55  ;;  %vm11558_vm8 = vmmov %vm11551_vm1 }
 0x523   : > { %7196 = vrot.lane.b32.xlu1 %v7195_v63, %s11446_s22  ;;  %v7205_v50 = vpack.i.bf16 %v4748_v10, %v4744_v7  ;;  %v7210_v58 = vpack.i.bf16 %v4782_v30, %v4778_v15  ;;  %v4816_v48 = vld [vmem:[#allocation3 + $0x16a] ss:$2 sm:$0xff]  ;;  %s385_s22 = sand.u32 1, %s7362_s18  }
 0x524   : > { %v7215_v49 = vpack.i.bf16 %v4816_v48, %v4812_v42 }
 0x527   : > { %7201 = vrot.lane.b32.xlu1 %v7200_v12, %s11535_s29  ;;  %s5448_s29 = sshll.u32 %s7468_s21, 10  ;;  %s11073_s21 = scalar_lea.sflag [#allocation5], %s385_s22 }
 0x528   : > { %s11067_s30 = scalar_lea.hbm %s11125_s11, %s5448_s29 }
 0x52b   : > { %7206 = vrot.lane.b32.xlu1 %v7205_v50, %s11464_s25  ;;  %s5366_s25 = sshll.u32 %s385_s22, 6 }
 0x52c   : > { %v7122_v45 = vpop.permute.xlu1 %7121  ;;  %s387_s24 = scalar_lea.vmem [#allocation4], %s5366_s25  ;;  %s7314_s25 = sshll.u32 %s7385_s16, 4  ;;  %s7315_s25 = int_to_ptr.vmem [resolvable:$false] %s7314_s25 }
 0x52d   : > { %v7132_v2 = vpop.permute.xlu0 %7131  ;;  %v7124_v51 = vunpack.i.h.bf16 %v7122_v45  ;;  %v7123_v32 = vunpack.i.l.bf16 %v7122_v45  ;;  %s7316_s29 = scalar_lea.vmem %s7315_s25, 2048 }
 0x52e   : > { %v7134_v1 = vunpack.i.h.bf16 %v7132_v2  ;;  %v7133_v27 = vunpack.i.l.bf16 %v7132_v2 }
 0x52f   : > { %7211 = vrot.lane.b32.xlu1 %v7210_v58, %s11537_s12 }
 0x530   : > { %v7127_v5 = vpop.permute.xlu1 %7126 }
 0x531   : > { %v7129_v35 = vunpack.i.h.bf16 %v7127_v5  ;;  %v7128_v33 = vunpack.i.l.bf16 %v7127_v5 }
 0x533   : > { %7216 = vrot.lane.b32.xlu1 %v7215_v49, %s11538_s15 }
 0x534   : > { %v7137_v36 = vpop.permute.xlu1 %7136 }
 0x535   : > { %v7139_v29 = vunpack.i.h.bf16 %v7137_v36  ;;  %v7138_v46 = vunpack.i.l.bf16 %v7137_v36 }
 0x537   : > { %7226 = vrot.lane.b32.xlu1 %v7225_v41, %s11536_s13  ;;  %v5080_v57 = vsel %vm11549_vm10, %v5072_v53, %v7139_v29  ;;  %v5079_v8 = vsel %vm11550_vm15, %v5071_v60, %v7138_v46  ;;  %vm11559_vm10 = vmmov %vm11553_vm0  ;;  %s5275_s13 = sshll.u32 %s387_s24, 4  ;;  %s11070_s13 = int_to_ptr.vmem [resolvable:$true] %s5275_s13 }
 0x538   : > { %v7142_v62 = vpop.permute.xlu1 %7141  ;;  %vm11560_vm15 = vmmov %vm11553_vm0  ;;  %s7310_s14 = scalar_lea.vmem %s11070_s13, 1024  ;;  %p7317_p0 = scmp.lt.s32.totalorder %s11070_s13, %s7315_s25 }
 0x539   : > { %v7144_v19 = vunpack.i.h.bf16 %v7142_v62  ;;  %v7143_v3 = vunpack.i.l.bf16 %v7142_v62  ;;  %p7311_p11 = scmp.ne.s32.totalorder %s11070_s13, %s7310_s14  ;;  %p7318_p1 = scmp.lt.s32.totalorder %s7316_s29, %s7310_s14 }
 0x53b   : > { %v5087_v38 = vsel %vm11551_vm1, %v5079_v8, %v7143_v3  ;;  %v5088_v25 = vsel %vm11552_vm7, %v5080_v57, %v7144_v19  ;;  %vm11561_vm1 = vmmov %vm11555_vm3  ;;  %p7312_p12 = pnand %p7311_p11, %p7485_p5  ;;  %p7319_p2 = por %p7318_p1, %p7317_p0 }
 0x53c   : > { %v7147_v31 = vpop.permute.xlu1 %7146  ;;  %vm11562_vm7 = vmmov %vm11561_vm1 }
 0x53d   : > { %v7149_v40 = vunpack.i.h.bf16 %v7147_v31  ;;  %v7148_v61 = vunpack.i.l.bf16 %v7147_v31  ;;  %p7313_p13 = pneg %p7312_p12 }
 0x53f   : > { %v5095_v13 = vsel %vm3853_vm5, %v5087_v38, %v7148_v61  ;;  %v5096_v23 = vsel %vm3853_vm5, %v5088_v25, %v7149_v40  ;;  %p7320_p3 = pnand %p7319_p2, %p7313_p13 }
 0x540   : > { %v5103_v59 = vsel %vm3886_vm11, %v5095_v13, %v7123_v32  ;;  %v5104_v16 = vsel %vm3886_vm11, %v5096_v23, %v7124_v51 }
 0x541   : > { %v5111_v39 = vsel %vm3919_vm14, %v5103_v59, %v7128_v33  ;;  %v5112_v17 = vsel %vm3919_vm14, %v5104_v16, %v7129_v35 }
 0x542   : > { %v5119_v0 = vsel %vm3952_vm13, %v5111_v39, %v7133_v27  ;;  %v5120_v4 = vsel %vm3952_vm13, %v5112_v17, %v7134_v1 }
 0x543   : > { %v5126_v21 = vpack.c.bf16 %v5120_v4, %v5119_v0 }
 0x544   : > { %v7157_v28 = vpop.permute.xlu0 %7156  ;;  %v7152_v26 = vpop.permute.xlu1 %7151 }
 0x545   : > { %5719 = vmatmul.mubr.msk.bf16.vlgmr.msra.gmra.mxu1 %vm4044_vm9, %v5126_v21  ;;  %v7154_v24 = vunpack.i.h.bf16 %v7152_v26  ;;  %v7153_v63 = vunpack.i.l.bf16 %v7152_v26  ;;  %v7159_v43 = vunpack.i.h.bf16 %v7157_v28  ;;  %v7158_v12 = vunpack.i.l.bf16 %v7157_v28 }
 0x547   : > { %v5066_v54 = vsel %vm455_vm4, %v10889_v20, %v7154_v24  ;;  %v5065_v7 = vsel %vm455_vm4, %v10813_v37, %v7153_v63 }
 0x548   : > { %v5074_v58 = vsel %vm11553_vm0, %v5066_v54, %v7159_v43  ;;  %v5073_v48 = vsel %vm11554_vm2, %v5065_v7, %v7158_v12  ;;  %vm11563_vm0 = vmmov %vm11557_vm6 }
 0x549   : > { %vm11564_vm2 = vmmov %vm11563_vm0 }
 0x55c   : > { %v7162_v9 = vpop.permute.xlu0 %7161 }
 0x55d   : > { %v7164_v41 = vunpack.i.h.bf16 %v7162_v9  ;;  %v7163_v20 = vunpack.i.l.bf16 %v7162_v9 }
 0x560   : > { %v7167_v47 = vpop.permute.xlu0 %7166 }
 0x561   : > { %v7169_v44 = vunpack.i.h.bf16 %v7167_v47  ;;  %v7168_v55 = vunpack.i.l.bf16 %v7167_v47 }
 0x564   : > { %v7172_v11 = vpop.permute.xlu0 %7171 }
 0x565   : > { %v7174_v50 = vunpack.i.h.bf16 %v7172_v11  ;;  %v7173_v30 = vunpack.i.l.bf16 %v7172_v11 }
 0x567   : > { %v5081_v42 = vsel %vm11555_vm3, %v5073_v48, %v7173_v30  ;;  %v5082_v49 = vsel %vm11556_vm12, %v5074_v58, %v7174_v50 }
 0x568   : > { %v7177_v10 = vpop.permute.xlu0 %7176 }
 0x569   : > { %v7179_v45 = vunpack.i.h.bf16 %v7177_v10  ;;  %v7178_v15 = vunpack.i.l.bf16 %v7177_v10 }
 0x56b   : > { %v5089_v56 = vsel %vm11557_vm6, %v5081_v42, %v7178_v15  ;;  %v5090_v37 = vsel %vm11558_vm8, %v5082_v49, %v7179_v45 }
 0x56c   : > { %v7182_v5 = vpop.permute.xlu0 %7181 }
 0x56d   : > { %v7184_v22 = vunpack.i.h.bf16 %v7182_v5  ;;  %v7183_v36 = vunpack.i.l.bf16 %v7182_v5 }
 0x56f   : > { %v5097_v18 = vsel %vm3853_vm5, %v5089_v56, %v7183_v36  ;;  %v5098_v62 = vsel %vm3853_vm5, %v5090_v37, %v7184_v22 }
 0x570   : > { %v5105_v29 = vsel %vm3886_vm11, %v5097_v18, %v7163_v20  ;;  %v5106_v46 = vsel %vm3886_vm11, %v5098_v62, %v7164_v41  ;;  %v7222_v19 = vpop.permute.xlu0 %7221 }
 0x571   : > { %v7224_v3 = vunpack.i.h.bf16 %v7222_v19  ;;  %v7223_v34 = vunpack.i.l.bf16 %v7222_v19  ;;  %v5113_v6 = vsel %vm3919_vm14, %v5105_v29, %v7168_v55  ;;  %v5114_v60 = vsel %vm3919_vm14, %v5106_v46, %v7169_v44 }
 0x573   : > { %v5121_v53 = vsel %vm3952_vm13, %v5113_v6, %v7223_v34  ;;  %v5122_v31 = vsel %vm3952_vm13, %v5114_v60, %v7224_v3 }
 0x574   : > { %v5127_v2 = vpack.c.bf16 %v5122_v31, %v5121_v53 }
 0x576   : > { %5722 = vmatprep.mubr.msk.bf16.mxu1 %vm4044_vm9, %v5127_v2 }
 0x578   : > { %v7187_v57 = vpop.permute.xlu1 %7186 }
 0x579   : > { %v7189_v32 = vunpack.i.h.bf16 %v7187_v57  ;;  %v7188_v38 = vunpack.i.l.bf16 %v7187_v57 }
 0x57b   : > { %v5068_v59 = vsel %vm455_vm4, %v10987_v14, %v7189_v32  ;;  %v5067_v16 = vsel %vm455_vm4, %v10891_v52, %v7188_v38 }
 0x57c   : > { %v7192_v8 = vpop.permute.xlu1 %7191 }
 0x57d   : > { %v7194_v25 = vunpack.i.h.bf16 %v7192_v8  ;;  %v7193_v35 = vunpack.i.l.bf16 %v7192_v8 }
 0x57f   : > { %v5075_v39 = vsel %vm11559_vm10, %v5067_v16, %v7193_v35  ;;  %v5076_v17 = vsel %vm11560_vm15, %v5068_v59, %v7194_v25 }
 0x595   : > { %v7197_v40 = vpop.permute.xlu1 %7196 }
 0x596   : > { %v7199_v47 = vunpack.i.h.bf16 %v7197_v40  ;;  %v7198_v26 = vunpack.i.l.bf16 %v7197_v40 }
 0x599   : > { %v7202_v61 = vpop.permute.xlu1 %7201 }
 0x59a   : > { %v7204_v24 = vunpack.i.h.bf16 %v7202_v61  ;;  %v7203_v52 = vunpack.i.l.bf16 %v7202_v61 }
 0x59d   : > { %v7207_v51 = vpop.permute.xlu1 %7206 }
 0x59e   : > { %v7209_v13 = vunpack.i.h.bf16 %v7207_v51  ;;  %v7208_v23 = vunpack.i.l.bf16 %v7207_v51 }
 0x5a0   : > { %v5083_v4 = vsel %vm11561_vm1, %v5075_v39, %v7208_v23  ;;  %v5084_v21 = vsel %vm11562_vm7, %v5076_v17, %v7209_v13 }
 0x5a1   : > { %v7212_v33 = vpop.permute.xlu1 %7211 }
 0x5a2   : > { %v7214_v1 = vunpack.i.h.bf16 %v7212_v33  ;;  %v7213_v27 = vunpack.i.l.bf16 %v7212_v33 }
 0x5a4   : > { %v5091_v11 = vsel %vm11563_vm0, %v5083_v4, %v7213_v27  ;;  %v5092_v14 = vsel %vm11564_vm2, %v5084_v21, %v7214_v1 }
 0x5a5   : > { %v7217_v0 = vpop.permute.xlu1 %7216 }
 0x5a6   : > { %v7219_v28 = vunpack.i.h.bf16 %v7217_v0  ;;  %v7218_v9 = vunpack.i.l.bf16 %v7217_v0 }
 0x5a8   : > { %v5099_v63 = vsel %vm3853_vm5, %v5091_v11, %v7218_v9  ;;  %v5100_v43 = vsel %vm3853_vm5, %v5092_v14, %v7219_v28 }
 0x5a9   : > { %v5107_v12 = vsel %vm3886_vm11, %v5099_v63, %v7198_v26  ;;  %v5108_v10 = vsel %vm3886_vm11, %v5100_v43, %v7199_v47  ;;  %v7227_v54 = vpop.permute.xlu1 %7226 }
 0x5aa   : > { %v7229_v7 = vunpack.i.h.bf16 %v7227_v54  ;;  %v7228_v50 = vunpack.i.l.bf16 %v7227_v54  ;;  %v5115_v30 = vsel %vm3919_vm14, %v5107_v12, %v7203_v52  ;;  %v5116_v45 = vsel %vm3919_vm14, %v5108_v10, %v7204_v24 }
 0x5ac   : > { %v5123_v15 = vsel %vm3952_vm13, %v5115_v30, %v7228_v50  ;;  %v5124_v58 = vsel %vm3952_vm13, %v5116_v45, %v7229_v7 }
 0x5ad   : > { %v5128_v48 = vpack.c.bf16 %v5124_v58, %v5123_v15 }
 0x5af   : > { %5723 = vmatmul.mubr.msk.bf16.gmra.mxu1 %vm4044_vm9, %v5128_v48 }
 0x605   : > { %v5720_v5 = vpop.f32.mrf.mxu1 }
 0x606   : > { %5247 = vst.msk [vmem:[%s387_s24 + $0x10] sm:$0xff] %vm455_vm4, %v5720_v5 }
 0x607   : > { %v5214_v42 = vpop.f32.mrf.mxu1 }
 0x608   : > { %5245 = vst.msk [vmem:[%s387_s24] sm:$0xff] %vm455_vm4, %v5214_v42 }
 0x609   : > { %v5721_v49 = vpop.f32.mrf.mxu1 }
 0x60a   : > { %5248 = vst.msk [vmem:[%s387_s24 + $0x18] sm:$0xff] %vm455_vm4, %v5721_v49 }
 0x60b   : > { %v5217_v22 = vpop.f32.mrf.mxu1 }
 0x60c   : > { %5246 = vst.msk [vmem:[%s387_s24 + $0x8] sm:$0xff] %vm455_vm4, %v5217_v22 }
 0x66f   : > { %v5724_v36 = vpop.f32.mrf.mxu1 }
 0x670   : > { %5251 = vst.msk [vmem:[%s387_s24 + $0x30] sm:$0xff] %vm455_vm4, %v5724_v36 }
 0x671   : > { %v5230_v41 = vpop.f32.mrf.mxu1 }
 0x672   : > { %5249 = vst.msk [vmem:[%s387_s24 + $0x20] sm:$0xff] %vm455_vm4, %v5230_v41 }
 0x673   : > { %v5725_v20 = vpop.f32.mrf.mxu1 }
 0x674   : > { %5252 = vst.msk [vmem:[%s387_s24 + $0x38] sm:$0xff] %vm455_vm4, %v5725_v20 }
 0x675   : > { %v5233_v56 = vpop.f32.mrf.mxu1 }
 0x676   : > { %5250 = vst.msk [vmem:[%s387_s24 + $0x28] sm:$0xff] %vm455_vm4, %v5233_v56 }
 0x677   : > { %7323 = shalt.err (!%p7320_p3)
}
 0x678   : > { %s7324_s22 = scalar_lea.hbm %s11067_s30, 1024  ;;  %s7328_s15 = scalar_lea.hbm %s11125_s11, 2048 }
 0x679   : > { %p7325_p4 = scmp.ne.s32.totalorder %s11067_s30, %s7324_s22  ;;  %p7329_p9 = scmp.lt.s32.totalorder %s11067_s30, %s11125_s11 }
 0x67a   : > { %p7330_p10 = scmp.lt.s32.totalorder %s7328_s15, %s7324_s22 }
 0x67b   : > { %p7326_p7 = pnand %p7325_p4, %p7485_p5 }
 0x67c   : > { %p7331_p11 = por %p7330_p10, %p7329_p9 }
 0x67d   : > { %p7327_p8 = pneg %p7326_p7 }
 0x67f   : > { %p7332_p12 = pnand %p7331_p11, %p7327_p8 }
 0x681   : > { %7335 = shalt.err (!%p7332_p12)
}
 0x682   : > { %s7386_s14 = smov 128  }
 0x683   : > { %5737 = dma.vmem_to_hbm [thread:$0]  (%p7485_p5), %s11070_s13, 1024, %s11067_s30, %s11073_s21, %s7386_s14, %s7386_s14, %s11539_s0  }
 0x684 PF: > { %p5743_p13 = scmp.ge.s32.totalorder %s7370_s20, 2  ;;  %s5298_s25 = sand.u32 1, %s7358_s17  }
 0x685   : > { %s5299_s1 = scalar_lea.sflag [#allocation5], %s5298_s25 }
 0x686   : > { %p5740_p0 = pnand %p5743_p13, %p7489_p6 }
 0x688   : > { %p5741_p1 = pneg %p5740_p0 }
 0x68a   : > { %7353 = dma.done.wait (%p5741_p1), %s5299_s1, 1024  }
 0x68b   : > { %7355 = vsyncadd (%p5741_p1), %s5299_s1, 4294966272  ;;  %p22_p2 = scmp.ge.s32.totalorder %s7472_s23, 4   ;;  %s11565_s17 = smov %s7362_s18 }
 0x68c   : > { %s11566_s18 = smov %s7366_s19  ;;  %s11567_s19 = smov %s7483_s26 }
 0x68d   : > { %s11568_s20 = smov %s7472_s23  ;;  %24 = sbr.rel (!%p22_p2) target bundleno = 6 (0x6), region = 159 }
 0x692   :  { %5304 = vsyncpa [#allocation5], 1 }
 0x693   :  { %5306 = vsyncpa [#allocation5 + $0x1], 1 }

</bundles_post_ra>
